<compile_context>
chip_gen: v7x
topology: tpu7x:2x2x1
jax: 0.10.0
libtpu: 0.0.40
codegen_flags: <defaults>
</compile_context>

<pallas_src>
import functools

import jax
import jax.numpy as jnp
from jax.experimental import pallas as pl
from jax.experimental.pallas import tpu as pltpu


# ----------------------------------------------------------------------------
# Fused forward kernel: `n_img` images per grid step.
#
# Spatial layout: the (Hp, Wp) zero-padded grid is flattened to R = Hp*Wp
# rows.  A 3x3 tap (dy, dx) of the RPN conv is a contiguous length-R slice of
# the halo buffer at row offset pad + (dy-1)*Wp + (dx-1).  Outputs at the pad
# ring are garbage and are sliced off at the JAX level.
# ----------------------------------------------------------------------------
def _rcnn_fwd_kernel(x_ref, mask_ref, w27_ref, bbb_ref, wrpn_ref, brpn_ref,
                     whead_ref, bhead_ref, wroi_ref, broi_ref, prpn_ref,
                     rpn_ref, roi_ref, gext_ref, acc_ref, *,
                     Hp, Wp, pad, inv_hw, n_img):
    R = Hp * Wp
    C = wrpn_ref.shape[1]

    # Only the top/bottom halo bands need zeros (the interior is overwritten
    # for every image).  Rewriting them every step is tiny and stays correct
    # when the grid axis is sharded across TensorCores (megacore).
    zband = jnp.zeros((pad, C), gext_ref.dtype)
    gext_ref[pl.ds(0, pad), :] = zband
    gext_ref[pl.ds(pad + R, pad), :] = zband

    for b in range(n_img):
        # ---- backbone 'res4': one K=27 im2col matmul (pixel norm folded) ---
        feat = jnp.maximum(
            jnp.dot(x_ref[b], w27_ref[...],
                    preferred_element_type=jnp.float32) + bbb_ref[...], 0.0)

        # g = (feat - p) masked to the grid interior, p = -aff_rpn.b/aff_rpn.w,
        # so the zero-padded affine_rpn(feat) equals g * aff_rpn.w exactly
        # (scale folded into the RPN conv weights).  decouple_layer forward is
        # identity (it only rescales gradients).
        g = (feat - prpn_ref[...]) * mask_ref[...]               # (R, C) f32

        # ---- ROI branch: GAP first, then one tiny (1,C)x(C,Dr) matmul ------
        # (affine_rcnn and the "+p" un-shift are folded into wroi / broi).
        gsum = jnp.sum(g, axis=0, keepdims=True)                 # f32 reduce
        roi_ref[b, :, :] = (jnp.dot(gsum, wroi_ref[...],
                                    preferred_element_type=jnp.float32)
                            * inv_hw + broi_ref[...])

        # ---- RPN branch: 3x3 conv, 9 taps into an f32 VMEM accumulator -----
        gext_ref[pl.ds(pad, R), :] = g
        for t in range(9):
            dy, dx = divmod(t, 3)
            off = pad + (dy - 1) * Wp + (dx - 1)
            tap = jnp.dot(gext_ref[pl.ds(off, R), :], wrpn_ref[t],
                          preferred_element_type=jnp.float32)
            if t == 0:
                acc_ref[...] = tap
            else:
                acc_ref[...] += tap
        hid = jnp.maximum(acc_ref[...] + brpn_ref[...], 0.0)     # (R, C) f32

        # Fused, lane-dense (zero-padded to 128 cols) objectness|delta head.
        rpn_ref[b, :, :] = (jnp.dot(hid, whead_ref[...],
                                    preferred_element_type=jnp.float32)
                            + bhead_ref[...])


# ----------------------------------------------------------------------------
# GeneralizedRCNN (Pallas version)
# ----------------------------------------------------------------------------
class GeneralizedRCNNPallas:
    """Simplified but shape-faithful forward path of DeFRCN GeneralizedRCNN.

    backbone  : 3x3 conv (3 -> C_RES4) + ReLU producing the 'res4' feature map
    decouple  : decouple_layer forward is identity (it only scales gradients)
    affine    : per-channel AffineLayer x2, folded into adjacent weights
    RPN head  : 3x3 conv + ReLU, then fused 1x1 objectness / anchor-delta conv
    ROI heads : global average pool + fused cls / bbox linears
    """

    C_RES4 = 32
    NUM_ANCHORS = 3
    NUM_CLASSES = 8
    DH_PAD = 128                      # lane-dense padded RPN-head width

    # Detectron2 / DeFRCN default pixel normalization constants.
    PIXEL_MEAN = (103.530, 116.280, 123.675)
    PIXEL_STD = (1.0, 1.0, 1.0)

    def __init__(self, key):
        C = self.C_RES4
        A = self.NUM_ANCHORS
        K = self.NUM_CLASSES
        ks = jax.random.split(key, 12)

        def w_init(k, shape, scale=0.02):
            return scale * jax.random.normal(k, shape, dtype=jnp.float32)

        self.params = {
            # backbone stem -> res4
            "bb_w": w_init(ks[0], (C, 3, 3, 3)),
            "bb_b": w_init(ks[1], (C,)),
            # AffineLayer(num_channels=res4.channels, bias=True) x2
            "aff_rpn_w": 1.0 + w_init(ks[2], (C,), 0.1),
            "aff_rpn_b": w_init(ks[3], (C,), 0.1),
            "aff_rcnn_w": 1.0 + w_init(ks[4], (C,), 0.1),
            "aff_rcnn_b": w_init(ks[5], (C,), 0.1),
            # RPN head
            "rpn_w": w_init(ks[6], (C, C, 3, 3)),
            "rpn_b": w_init(ks[7], (C,)),
            "obj_w": w_init(ks[8], (A, C, 1, 1)),
            "obj_b": jnp.zeros((A,), jnp.float32),
            "dlt_w": w_init(ks[9], (4 * A, C, 1, 1)),
            "dlt_b": jnp.zeros((4 * A,), jnp.float32),
            # ROI box predictor
            "cls_w": w_init(ks[10], (K + 1, C)),
            "cls_b": jnp.zeros((K + 1,), jnp.float32),
            "box_w": w_init(ks[11], (4 * K, C)),
            "box_b": jnp.zeros((4 * K,), jnp.float32),
        }
        self._fold_params()
        self._fwd = jax.jit(self._forward_once_)

    # -- one-time algebraic folding of normalization / affine layers ---------
    def _fold_params(self):
        p = self.params
        C, A, K = self.C_RES4, self.NUM_ANCHORS, self.NUM_CLASSES
        Dhp = self.DH_PAD
        mean = jnp.asarray(self.PIXEL_MEAN, jnp.float32)
        std = jnp.asarray(self.PIXEL_STD, jnp.float32)

        def conv_to_taps(w):  # (Cout, Cin, 3, 3) -> (9, Cin, Cout)
            return jnp.transpose(w, (2, 3, 1, 0)).reshape(
                9, w.shape[1], w.shape[0])

        # Backbone: kernel input is im2col(x - mean) (zero padded), so folding
        # 1/std into the input-channel weights reproduces conv((x-mean)/std)
        # exactly.  Single K=27 matmul, kept f32 for numerical parity.
        self.pixel_mean = mean
        wbb = p["bb_w"] * (1.0 / std)[None, :, None, None]
        self.w27 = conv_to_taps(wbb).reshape(9 * wbb.shape[1], C)
        self.bbb = p["bb_b"].reshape(1, C)

        # RPN branch: affine_rpn(feat) = feat*s + t.  With p = -t/s the kernel
        # works on g = feat - p (zero at the pad ring), and s folds into the
        # RPN conv's input-channel weights -- exact, including borders.
        s_r, t_r = p["aff_rpn_w"], p["aff_rpn_b"]
        # TODO(synk): assumes affine_rpn.weight has no exactly-zero entries
        # (AffineLayer initializes weight=1).
        self.p_rpn = (-t_r / s_r).reshape(1, C)
        wrpn = p["rpn_w"] * s_r[None, :, None, None]
        self.wrpn9 = conv_to_taps(wrpn)
        self.brpn = p["rpn_b"].reshape(1, C)

        # Fused 1x1 objectness + anchor-delta head, zero-padded from 5A to 128
        # output columns so the per-row store in the kernel is a full-lane vst.
        whead = jnp.concatenate([p["obj_w"].reshape(A, C),
                                 p["dlt_w"].reshape(4 * A, C)], axis=0).T
        bhead = jnp.concatenate([p["obj_b"], p["dlt_b"]])
        self.whead = jnp.pad(whead, ((0, 0), (0, Dhp - 5 * A)))   # (C, 128)
        self.bhead = jnp.pad(bhead, (0, Dhp - 5 * A)).reshape(1, Dhp)

        # ROI head: GAP(feat) = GAP(g) + p; affine_rcnn folded into the
        # concatenated cls|bbox weights and bias.
        s_c, t_c = p["aff_rcnn_w"], p["aff_rcnn_b"]
        wcat = jnp.concatenate([p["cls_w"], p["box_w"]], axis=0).T   # (C, Dr)
        bcat = jnp.concatenate([p["cls_b"], p["box_b"]])             # (Dr,)
        self.wroi = wcat * s_c[:, None]
        shift = self.p_rpn.reshape(C) * s_c + t_c                    # (C,)
        self.broi = (bcat + shift @ wcat).reshape(1, -1)

    # -- batching helper ------------------------------------------------------
    @staticmethod
    def _images_per_step(n):
        # Block images per grid step to amortize per-step pipeline overhead,
        # while keeping >= 2 "parallel" grid steps whenever n >= 2 so that
        # both TensorCores on v7x get work (harmless on v5e/v6e).
        best = 1
        for d in range(2, min(4, n) + 1):
            if n % d == 0 and n // d >= 2:
                best = d
        return best

    # -- forward --------------------------------------------------------------
    def _forward_once_(self, images):
        A, K, C = self.NUM_ANCHORS, self.NUM_CLASSES, self.C_RES4
        N, Cin, H, W = images.shape
        Hp, Wp = H + 2, W + 2
        R = Hp * Wp
        pad = ((Wp + 1 + 7) // 8) * 8           # tap offsets span +-(Wp+1)
        RE = R + 2 * pad
        Dh = 5 * A                              # objectness (A) + deltas (4A)
        Dhp = self.DH_PAD                       # lane-dense padded head width
        Dr = (K + 1) + 4 * K                    # cls (K+1) + bbox (4K)
        B = self._images_per_step(N)

        # JAX-side prep on the tiny 3-channel image only: NCHW -> NHWC,
        # subtract pixel mean (1/std folded into conv weights), im2col of the
        # 3x3 patches over the (Hp, Wp) padded output grid -> (N, R, 27).
        # TODO(synk): ImageList.from_tensors size_divisibility padding skipped.
        x = (jnp.transpose(images, (0, 2, 3, 1)).astype(jnp.float32)
             - self.pixel_mean)
        xp = jnp.pad(x, ((0, 0), (2, 2), (2, 2), (0, 0)))
        taps = [xp[:, dy:dy + Hp, dx:dx + Wp, :]
                for dy in range(3) for dx in range(3)]
        x_im2col = jnp.concatenate(taps, axis=-1).reshape(N, R, 9 * Cin)

        # Interior mask of the padded (Hp, Wp) grid, flattened to (R, 1).
        yy = jnp.arange(Hp)
        xx = jnp.arange(Wp)
        m = ((yy[:, None] >= 1) & (yy[:, None] < Hp - 1)
             & (xx[None, :] >= 1) & (xx[None, :] < Wp - 1))
        mask = m.reshape(R, 1).astype(jnp.float32)

        kern = functools.partial(_rcnn_fwd_kernel, Hp=Hp, Wp=Wp, pad=pad,
                                 inv_hw=1.0 / (H * W), n_img=B)
        # TODO(synk): for real res4 sizes (C~1024) add row tiling with halo
        # handling; budget tiles against v7x's 64 MiB physical / 32 MiB scoped
        # VMEM (v5e/v6e have 128 MiB and can take ~2x larger row tiles).
        rpn_out, roi_out = pl.pallas_call(
            kern,
            out_shape=(jax.ShapeDtypeStruct((N, R, Dhp), jnp.float32),
                       jax.ShapeDtypeStruct((N, 1, Dr), jnp.float32)),
            grid=(N // B,),
            in_specs=[
                pl.BlockSpec((B, R, 9 * Cin), lambda i: (i, 0, 0)),  # im2col
                pl.BlockSpec((R, 1), lambda i: (0, 0)),              # mask
                pl.BlockSpec((9 * Cin, C), lambda i: (0, 0)),        # w27
                pl.BlockSpec((1, C), lambda i: (0, 0)),              # bbb
                pl.BlockSpec((9, C, C), lambda i: (0, 0, 0)),        # wrpn9
                pl.BlockSpec((1, C), lambda i: (0, 0)),              # brpn
                pl.BlockSpec((C, Dhp), lambda i: (0, 0)),            # whead
                pl.BlockSpec((1, Dhp), lambda i: (0, 0)),            # bhead
                pl.BlockSpec((C, Dr), lambda i: (0, 0)),             # wroi
                pl.BlockSpec((1, Dr), lambda i: (0, 0)),             # broi
                pl.BlockSpec((1, C), lambda i: (0, 0)),              # p_rpn
            ],
            out_specs=(
                pl.BlockSpec((B, R, Dhp), lambda i: (i, 0, 0)),
                pl.BlockSpec((B, 1, Dr), lambda i: (i, 0, 0)),
            ),
            scratch_shapes=[pltpu.VMEM((RE, C), jnp.float32),   # RPN halo buf
                            pltpu.VMEM((R, C), jnp.float32)],   # conv acc
            compiler_params=pltpu.CompilerParams(
                dimension_semantics=("parallel",),
                vmem_limit_bytes=32 * 1024 * 1024),
        )(x_im2col, mask, self.w27, self.bbb, self.wrpn9, self.brpn,
          self.whead, self.bhead, self.wroi, self.broi, self.p_rpn)

        # Un-pad / split / relayout the small head outputs.
        rpn_map = rpn_out[..., :Dh].reshape(N, Hp, Wp, Dh)[:, 1:-1, 1:-1, :]
        objectness = jnp.transpose(rpn_map[..., :A], (0, 3, 1, 2))
        anchor_deltas = jnp.transpose(rpn_map[..., A:], (0, 3, 1, 2))
        roi = roi_out.reshape(N, Dr)
        cls_scores = roi[:, :K + 1]
        bbox_pred = roi[:, K + 1:]
        # TODO(synk): anchor generation / proposal NMS / ROIAlign over
        # proposals / detector_postprocess have no clean Pallas equivalent;
        # raw per-anchor predictions and whole-image ROI heads are returned.
        return objectness, anchor_deltas, cls_scores, bbox_pred

    def forward(self, images):
        # inference path (self.training == False)
        return self._fwd(images)


# ----------------------------------------------------------------------------
if __name__ == "__main__":
    key = jax.random.PRNGKey(0)
    k_img, k_model = jax.random.split(key)

    N, C_IN, H, W = 2, 3, 16, 16
    images = jax.random.uniform(
        k_img, (N, C_IN, H, W), dtype=jnp.float32, minval=0.0, maxval=255.0)

    model = GeneralizedRCNNPallas(k_model)
    outs = jax.block_until_ready(model.forward(images))

    objectness, anchor_deltas, cls_scores, bbox_pred = outs
    assert objectness.shape == (N, model.NUM_ANCHORS, H, W)
    assert anchor_deltas.shape == (N, 4 * model.NUM_ANCHORS, H, W)
    assert cls_scores.shape == (N, model.NUM_CLASSES + 1)
    assert bbox_pred.shape == (N, 4 * model.NUM_CLASSES)
    assert all(bool(jnp.all(jnp.isfinite(o))) for o in outs)

    # Also exercise the multi-image-per-grid-step path (N=4 -> B=2, grid=(2,)).
    N2 = 4
    images2 = jax.random.uniform(
        jax.random.PRNGKey(1), (N2, C_IN, H, W), dtype=jnp.float32,
        minval=0.0, maxval=255.0)
    outs2 = jax.block_until_ready(model.forward(images2))
    assert outs2[0].shape == (N2, model.NUM_ANCHORS, H, W)
    assert outs2[1].shape == (N2, 4 * model.NUM_ANCHORS, H, W)
    assert outs2[2].shape == (N2, model.NUM_CLASSES + 1)
    assert outs2[3].shape == (N2, 4 * model.NUM_CLASSES)
    assert all(bool(jnp.all(jnp.isfinite(o))) for o in outs2)

    print("KERNEL_OK")
</pallas_src>

<mosaic_0001>
module attributes {stable_mosaic.version = 11 : i64} {
  func.func @_rcnn_fwd_kernel(%arg0: i32, %arg1: memref<1x324x27xf32, #tpu.memory_space<vmem>>, %arg2: memref<324x1xf32, #tpu.memory_space<vmem>>, %arg3: memref<27x32xf32, #tpu.memory_space<vmem>>, %arg4: memref<1x32xf32, #tpu.memory_space<vmem>>, %arg5: memref<9x32x32xf32, #tpu.memory_space<vmem>>, %arg6: memref<1x32xf32, #tpu.memory_space<vmem>>, %arg7: memref<32x128xf32, #tpu.memory_space<vmem>>, %arg8: memref<1x128xf32, #tpu.memory_space<vmem>>, %arg9: memref<32x41xf32, #tpu.memory_space<vmem>>, %arg10: memref<1x41xf32, #tpu.memory_space<vmem>>, %arg11: memref<1x32xf32, #tpu.memory_space<vmem>>, %arg12: memref<1x324x128xf32, #tpu.memory_space<vmem>>, %arg13: memref<1x1x41xf32, #tpu.memory_space<vmem>>, %arg14: memref<372x32xf32, #tpu.memory_space<vmem>>, %arg15: memref<324x32xf32, #tpu.memory_space<vmem>>) attributes {dimension_semantics = [#tpu.dimension_semantics<parallel>], iteration_bounds = array<i64: 2>, scalar_prefetch = 0 : i64, scratch_operands = 2 : i64, tpu.core_type = #tpu.core_type<tc>, window_params = [{transform_indices = @transform_0, window_bounds = array<i64: 1, 324, 27>}, {pipeline_mode = #tpu.pipeline_mode<synchronous>, transform_indices = @transform_1, window_bounds = array<i64: 324, 1>}, {pipeline_mode = #tpu.pipeline_mode<synchronous>, transform_indices = @transform_2, window_bounds = array<i64: 27, 32>}, {pipeline_mode = #tpu.pipeline_mode<synchronous>, transform_indices = @transform_3, window_bounds = array<i64: 1, 32>}, {pipeline_mode = #tpu.pipeline_mode<synchronous>, transform_indices = @transform_4, window_bounds = array<i64: 9, 32, 32>}, {pipeline_mode = #tpu.pipeline_mode<synchronous>, transform_indices = @transform_5, window_bounds = array<i64: 1, 32>}, {pipeline_mode = #tpu.pipeline_mode<synchronous>, transform_indices = @transform_6, window_bounds = array<i64: 32, 128>}, {pipeline_mode = #tpu.pipeline_mode<synchronous>, transform_indices = @transform_7, window_bounds = array<i64: 1, 128>}, {pipeline_mode = #tpu.pipeline_mode<synchronous>, transform_indices = @transform_8, window_bounds = array<i64: 32, 41>}, {pipeline_mode = #tpu.pipeline_mode<synchronous>, transform_indices = @transform_9, window_bounds = array<i64: 1, 41>}, {pipeline_mode = #tpu.pipeline_mode<synchronous>, transform_indices = @transform_10, window_bounds = array<i64: 1, 32>}, {transform_indices = @transform_11, window_bounds = array<i64: 1, 324, 128>}, {transform_indices = @transform_12, window_bounds = array<i64: 1, 1, 41>}]} {
    %cst = arith.constant 0.000000e+00 : f32
    %0 = vector.broadcast %cst : f32 to vector<24x32xf32>
    %c0 = arith.constant 0 : index
    %c0_0 = arith.constant 0 : index
    %1 = vector.load %arg14[%c0, %c0_0] : memref<372x32xf32, #tpu.memory_space<vmem>>, vector<24x32xf32>
    tpu.vector_store %arg14[%c0, %c0_0], %0 {strides = array<i32>} : memref<372x32xf32, #tpu.memory_space<vmem>>, vector<24x32xf32>,
    %c348 = arith.constant 348 : index
    %c0_1 = arith.constant 0 : index
    %2 = vector.load %arg14[%c348, %c0_1] : memref<372x32xf32, #tpu.memory_space<vmem>>, vector<24x32xf32>
    tpu.vector_store %arg14[%c348, %c0_1], %0 {strides = array<i32>} : memref<372x32xf32, #tpu.memory_space<vmem>>, vector<24x32xf32>,
    %c0_2 = arith.constant 0 : index
    %c0_3 = arith.constant 0 : index
    %c0_4 = arith.constant 0 : index
    %3 = vector.load %arg1[%c0_2, %c0_3, %c0_4] : memref<1x324x27xf32, #tpu.memory_space<vmem>>, vector<1x324x27xf32>
    %4 = vector.shape_cast %3 : vector<1x324x27xf32> to vector<324x27xf32>
    %c0_5 = arith.constant 0 : index
    %c0_6 = arith.constant 0 : index
    %5 = vector.load %arg3[%c0_5, %c0_6] : memref<27x32xf32, #tpu.memory_space<vmem>>, vector<27x32xf32>
    %cst_7 = arith.constant dense<0.000000e+00> : vector<324x32xf32>
    %6 = tpu.matmul %4, %5, %cst_7 {dimension_numbers = #tpu.dot_dimension_numbers<[1], [0], [0], [1], [0, 0, 1, 1], [], []>} : vector<324x27xf32>, vector<27x32xf32>, vector<324x32xf32> -> vector<324x32xf32>
    %c0_8 = arith.constant 0 : index
    %c0_9 = arith.constant 0 : index
    %7 = vector.load %arg4[%c0_8, %c0_9] : memref<1x32xf32, #tpu.memory_space<vmem>>, vector<1x32xf32>
    %8 = vector.broadcast %7 : vector<1x32xf32> to vector<324x32xf32>
    %9 = arith.addf %6, %8 : vector<324x32xf32>
    %cst_10 = arith.constant 0.000000e+00 : f32
    %10 = vector.broadcast %cst_10 : f32 to vector<324x32xf32>
    %11 = arith.maximumf %9, %10 : vector<324x32xf32>
    %c0_11 = arith.constant 0 : index
    %c0_12 = arith.constant 0 : index
    %12 = vector.load %arg11[%c0_11, %c0_12] : memref<1x32xf32, #tpu.memory_space<vmem>>, vector<1x32xf32>
    %13 = vector.broadcast %12 : vector<1x32xf32> to vector<324x32xf32>
    %14 = arith.subf %11, %13 : vector<324x32xf32>
    %c0_13 = arith.constant 0 : index
    %c0_14 = arith.constant 0 : index
    %15 = vector.load %arg2[%c0_13, %c0_14] : memref<324x1xf32, #tpu.memory_space<vmem>>, vector<324x1xf32>
    %16 = vector.broadcast %15 : vector<324x1xf32> to vector<324x32xf32>
    %17 = arith.mulf %14, %16 : vector<324x32xf32>
    %cst_15 = arith.constant dense<0.000000e+00> : vector<32xf32>
    %18 = vector.multi_reduction <add>, %17, %cst_15 [0] : vector<324x32xf32> to vector<32xf32>
    %19 = vector.shape_cast %18 : vector<32xf32> to vector<1x32xf32>
    %c0_16 = arith.constant 0 : index
    %c0_17 = arith.constant 0 : index
    %20 = vector.load %arg9[%c0_16, %c0_17] : memref<32x41xf32, #tpu.memory_space<vmem>>, vector<32x41xf32>
    %cst_18 = arith.constant dense<0.000000e+00> : vector<1x41xf32>
    %21 = tpu.matmul %19, %20, %cst_18 {dimension_numbers = #tpu.dot_dimension_numbers<[1], [0], [0], [1], [0, 0, 1, 1], [], []>} : vector<1x32xf32>, vector<32x41xf32>, vector<1x41xf32> -> vector<1x41xf32>
    %cst_19 = arith.constant 3.906250e-03 : f32
    %22 = vector.broadcast %cst_19 : f32 to vector<1x41xf32>
    %23 = arith.mulf %21, %22 : vector<1x41xf32>
    %c0_20 = arith.constant 0 : index
    %c0_21 = arith.constant 0 : index
    %24 = vector.load %arg10[%c0_20, %c0_21] : memref<1x41xf32, #tpu.memory_space<vmem>>, vector<1x41xf32>
    %25 = arith.addf %23, %24 : vector<1x41xf32>
    %c0_22 = arith.constant 0 : index
    %c0_23 = arith.constant 0 : index
    %c0_24 = arith.constant 0 : index
    %26 = vector.load %arg13[%c0_22, %c0_23, %c0_24] : memref<1x1x41xf32, #tpu.memory_space<vmem>>, vector<1x1x41xf32>
    %27 = vector.shape_cast %26 : vector<1x1x41xf32> to vector<1x41xf32>
    %28 = vector.shape_cast %25 : vector<1x41xf32> to vector<1x1x41xf32>
    tpu.vector_store %arg13[%c0_22, %c0_23, %c0_24], %28 {strides = array<i32>} : memref<1x1x41xf32, #tpu.memory_space<vmem>>, vector<1x1x41xf32>,
    %c24 = arith.constant 24 : index
    %c0_25 = arith.constant 0 : index
    %29 = vector.load %arg14[%c24, %c0_25] : memref<372x32xf32, #tpu.memory_space<vmem>>, vector<324x32xf32>
    tpu.vector_store %arg14[%c24, %c0_25], %17 {strides = array<i32>} : memref<372x32xf32, #tpu.memory_space<vmem>>, vector<324x32xf32>,
    %c5 = arith.constant 5 : index
    %c0_26 = arith.constant 0 : index
    %30 = vector.load %arg14[%c5, %c0_26] : memref<372x32xf32, #tpu.memory_space<vmem>>, vector<324x32xf32>
    %c0_27 = arith.constant 0 : index
    %c0_28 = arith.constant 0 : index
    %c0_29 = arith.constant 0 : index
    %31 = vector.load %arg5[%c0_27, %c0_28, %c0_29] : memref<9x32x32xf32, #tpu.memory_space<vmem>>, vector<1x32x32xf32>
    %32 = vector.shape_cast %31 : vector<1x32x32xf32> to vector<32x32xf32>
    %cst_30 = arith.constant dense<0.000000e+00> : vector<324x32xf32>
    %33 = tpu.matmul %30, %32, %cst_30 {dimension_numbers = #tpu.dot_dimension_numbers<[1], [0], [0], [1], [0, 0, 1, 1], [], []>} : vector<324x32xf32>, vector<32x32xf32>, vector<324x32xf32> -> vector<324x32xf32>
    %c0_31 = arith.constant 0 : index
    %c0_32 = arith.constant 0 : index
    %34 = vector.load %arg15[%c0_31, %c0_32] : memref<324x32xf32, #tpu.memory_space<vmem>>, vector<324x32xf32>
    tpu.vector_store %arg15[%c0_31, %c0_32], %33 {strides = array<i32>} : memref<324x32xf32, #tpu.memory_space<vmem>>, vector<324x32xf32>,
    %c6 = arith.constant 6 : index
    %c0_33 = arith.constant 0 : index
    %35 = vector.load %arg14[%c6, %c0_33] : memref<372x32xf32, #tpu.memory_space<vmem>>, vector<324x32xf32>
    %c1 = arith.constant 1 : index
    %c0_34 = arith.constant 0 : index
    %c0_35 = arith.constant 0 : index
    %36 = vector.load %arg5[%c1, %c0_34, %c0_35] : memref<9x32x32xf32, #tpu.memory_space<vmem>>, vector<1x32x32xf32>
    %37 = vector.shape_cast %36 : vector<1x32x32xf32> to vector<32x32xf32>
    %cst_36 = arith.constant dense<0.000000e+00> : vector<324x32xf32>
    %38 = tpu.matmul %35, %37, %cst_36 {dimension_numbers = #tpu.dot_dimension_numbers<[1], [0], [0], [1], [0, 0, 1, 1], [], []>} : vector<324x32xf32>, vector<32x32xf32>, vector<324x32xf32> -> vector<324x32xf32>
    %c0_37 = arith.constant 0 : index
    %c0_38 = arith.constant 0 : index
    %39 = vector.load %arg15[%c0_37, %c0_38] : memref<324x32xf32, #tpu.memory_space<vmem>>, vector<324x32xf32>
    %40 = arith.addf %39, %38 : vector<324x32xf32>
    %c0_39 = arith.constant 0 : index
    %c0_40 = arith.constant 0 : index
    %41 = vector.load %arg15[%c0_39, %c0_40] : memref<324x32xf32, #tpu.memory_space<vmem>>, vector<324x32xf32>
    tpu.vector_store %arg15[%c0_39, %c0_40], %40 {strides = array<i32>} : memref<324x32xf32, #tpu.memory_space<vmem>>, vector<324x32xf32>,
    %c7 = arith.constant 7 : index
    %c0_41 = arith.constant 0 : index
    %42 = vector.load %arg14[%c7, %c0_41] : memref<372x32xf32, #tpu.memory_space<vmem>>, vector<324x32xf32>
    %c2 = arith.constant 2 : index
    %c0_42 = arith.constant 0 : index
    %c0_43 = arith.constant 0 : index
    %43 = vector.load %arg5[%c2, %c0_42, %c0_43] : memref<9x32x32xf32, #tpu.memory_space<vmem>>, vector<1x32x32xf32>
    %44 = vector.shape_cast %43 : vector<1x32x32xf32> to vector<32x32xf32>
    %cst_44 = arith.constant dense<0.000000e+00> : vector<324x32xf32>
    %45 = tpu.matmul %42, %44, %cst_44 {dimension_numbers = #tpu.dot_dimension_numbers<[1], [0], [0], [1], [0, 0, 1, 1], [], []>} : vector<324x32xf32>, vector<32x32xf32>, vector<324x32xf32> -> vector<324x32xf32>
    %c0_45 = arith.constant 0 : index
    %c0_46 = arith.constant 0 : index
    %46 = vector.load %arg15[%c0_45, %c0_46] : memref<324x32xf32, #tpu.memory_space<vmem>>, vector<324x32xf32>
    %47 = arith.addf %46, %45 : vector<324x32xf32>
    %c0_47 = arith.constant 0 : index
    %c0_48 = arith.constant 0 : index
    %48 = vector.load %arg15[%c0_47, %c0_48] : memref<324x32xf32, #tpu.memory_space<vmem>>, vector<324x32xf32>
    tpu.vector_store %arg15[%c0_47, %c0_48], %47 {strides = array<i32>} : memref<324x32xf32, #tpu.memory_space<vmem>>, vector<324x32xf32>,
    %c23 = arith.constant 23 : index
    %c0_49 = arith.constant 0 : index
    %49 = vector.load %arg14[%c23, %c0_49] : memref<372x32xf32, #tpu.memory_space<vmem>>, vector<324x32xf32>
    %c3 = arith.constant 3 : index
    %c0_50 = arith.constant 0 : index
    %c0_51 = arith.constant 0 : index
    %50 = vector.load %arg5[%c3, %c0_50, %c0_51] : memref<9x32x32xf32, #tpu.memory_space<vmem>>, vector<1x32x32xf32>
    %51 = vector.shape_cast %50 : vector<1x32x32xf32> to vector<32x32xf32>
    %cst_52 = arith.constant dense<0.000000e+00> : vector<324x32xf32>
    %52 = tpu.matmul %49, %51, %cst_52 {dimension_numbers = #tpu.dot_dimension_numbers<[1], [0], [0], [1], [0, 0, 1, 1], [], []>} : vector<324x32xf32>, vector<32x32xf32>, vector<324x32xf32> -> vector<324x32xf32>
    %c0_53 = arith.constant 0 : index
    %c0_54 = arith.constant 0 : index
    %53 = vector.load %arg15[%c0_53, %c0_54] : memref<324x32xf32, #tpu.memory_space<vmem>>, vector<324x32xf32>
    %54 = arith.addf %53, %52 : vector<324x32xf32>
    %c0_55 = arith.constant 0 : index
    %c0_56 = arith.constant 0 : index
    %55 = vector.load %arg15[%c0_55, %c0_56] : memref<324x32xf32, #tpu.memory_space<vmem>>, vector<324x32xf32>
    tpu.vector_store %arg15[%c0_55, %c0_56], %54 {strides = array<i32>} : memref<324x32xf32, #tpu.memory_space<vmem>>, vector<324x32xf32>,
    %c24_57 = arith.constant 24 : index
    %c0_58 = arith.constant 0 : index
    %56 = vector.load %arg14[%c24_57, %c0_58] : memref<372x32xf32, #tpu.memory_space<vmem>>, vector<324x32xf32>
    %c4 = arith.constant 4 : index
    %c0_59 = arith.constant 0 : index
    %c0_60 = arith.constant 0 : index
    %57 = vector.load %arg5[%c4, %c0_59, %c0_60] : memref<9x32x32xf32, #tpu.memory_space<vmem>>, vector<1x32x32xf32>
    %58 = vector.shape_cast %57 : vector<1x32x32xf32> to vector<32x32xf32>
    %cst_61 = arith.constant dense<0.000000e+00> : vector<324x32xf32>
    %59 = tpu.matmul %56, %58, %cst_61 {dimension_numbers = #tpu.dot_dimension_numbers<[1], [0], [0], [1], [0, 0, 1, 1], [], []>} : vector<324x32xf32>, vector<32x32xf32>, vector<324x32xf32> -> vector<324x32xf32>
    %c0_62 = arith.constant 0 : index
    %c0_63 = arith.constant 0 : index
    %60 = vector.load %arg15[%c0_62, %c0_63] : memref<324x32xf32, #tpu.memory_space<vmem>>, vector<324x32xf32>
    %61 = arith.addf %60, %59 : vector<324x32xf32>
    %c0_64 = arith.constant 0 : index
    %c0_65 = arith.constant 0 : index
    %62 = vector.load %arg15[%c0_64, %c0_65] : memref<324x32xf32, #tpu.memory_space<vmem>>, vector<324x32xf32>
    tpu.vector_store %arg15[%c0_64, %c0_65], %61 {strides = array<i32>} : memref<324x32xf32, #tpu.memory_space<vmem>>, vector<324x32xf32>,
    %c25 = arith.constant 25 : index
    %c0_66 = arith.constant 0 : index
    %63 = vector.load %arg14[%c25, %c0_66] : memref<372x32xf32, #tpu.memory_space<vmem>>, vector<324x32xf32>
    %c5_67 = arith.constant 5 : index
    %c0_68 = arith.constant 0 : index
    %c0_69 = arith.constant 0 : index
    %64 = vector.load %arg5[%c5_67, %c0_68, %c0_69] : memref<9x32x32xf32, #tpu.memory_space<vmem>>, vector<1x32x32xf32>
    %65 = vector.shape_cast %64 : vector<1x32x32xf32> to vector<32x32xf32>
    %cst_70 = arith.constant dense<0.000000e+00> : vector<324x32xf32>
    %66 = tpu.matmul %63, %65, %cst_70 {dimension_numbers = #tpu.dot_dimension_numbers<[1], [0], [0], [1], [0, 0, 1, 1], [], []>} : vector<324x32xf32>, vector<32x32xf32>, vector<324x32xf32> -> vector<324x32xf32>
    %c0_71 = arith.constant 0 : index
    %c0_72 = arith.constant 0 : index
    %67 = vector.load %arg15[%c0_71, %c0_72] : memref<324x32xf32, #tpu.memory_space<vmem>>, vector<324x32xf32>
    %68 = arith.addf %67, %66 : vector<324x32xf32>
    %c0_73 = arith.constant 0 : index
    %c0_74 = arith.constant 0 : index
    %69 = vector.load %arg15[%c0_73, %c0_74] : memref<324x32xf32, #tpu.memory_space<vmem>>, vector<324x32xf32>
    tpu.vector_store %arg15[%c0_73, %c0_74], %68 {strides = array<i32>} : memref<324x32xf32, #tpu.memory_space<vmem>>, vector<324x32xf32>,
    %c41 = arith.constant 41 : index
    %c0_75 = arith.constant 0 : index
    %70 = vector.load %arg14[%c41, %c0_75] : memref<372x32xf32, #tpu.memory_space<vmem>>, vector<324x32xf32>
    %c6_76 = arith.constant 6 : index
    %c0_77 = arith.constant 0 : index
    %c0_78 = arith.constant 0 : index
    %71 = vector.load %arg5[%c6_76, %c0_77, %c0_78] : memref<9x32x32xf32, #tpu.memory_space<vmem>>, vector<1x32x32xf32>
    %72 = vector.shape_cast %71 : vector<1x32x32xf32> to vector<32x32xf32>
    %cst_79 = arith.constant dense<0.000000e+00> : vector<324x32xf32>
    %73 = tpu.matmul %70, %72, %cst_79 {dimension_numbers = #tpu.dot_dimension_numbers<[1], [0], [0], [1], [0, 0, 1, 1], [], []>} : vector<324x32xf32>, vector<32x32xf32>, vector<324x32xf32> -> vector<324x32xf32>
    %c0_80 = arith.constant 0 : index
    %c0_81 = arith.constant 0 : index
    %74 = vector.load %arg15[%c0_80, %c0_81] : memref<324x32xf32, #tpu.memory_space<vmem>>, vector<324x32xf32>
    %75 = arith.addf %74, %73 : vector<324x32xf32>
    %c0_82 = arith.constant 0 : index
    %c0_83 = arith.constant 0 : index
    %76 = vector.load %arg15[%c0_82, %c0_83] : memref<324x32xf32, #tpu.memory_space<vmem>>, vector<324x32xf32>
    tpu.vector_store %arg15[%c0_82, %c0_83], %75 {strides = array<i32>} : memref<324x32xf32, #tpu.memory_space<vmem>>, vector<324x32xf32>,
    %c42 = arith.constant 42 : index
    %c0_84 = arith.constant 0 : index
    %77 = vector.load %arg14[%c42, %c0_84] : memref<372x32xf32, #tpu.memory_space<vmem>>, vector<324x32xf32>
    %c7_85 = arith.constant 7 : index
    %c0_86 = arith.constant 0 : index
    %c0_87 = arith.constant 0 : index
    %78 = vector.load %arg5[%c7_85, %c0_86, %c0_87] : memref<9x32x32xf32, #tpu.memory_space<vmem>>, vector<1x32x32xf32>
    %79 = vector.shape_cast %78 : vector<1x32x32xf32> to vector<32x32xf32>
    %cst_88 = arith.constant dense<0.000000e+00> : vector<324x32xf32>
    %80 = tpu.matmul %77, %79, %cst_88 {dimension_numbers = #tpu.dot_dimension_numbers<[1], [0], [0], [1], [0, 0, 1, 1], [], []>} : vector<324x32xf32>, vector<32x32xf32>, vector<324x32xf32> -> vector<324x32xf32>
    %c0_89 = arith.constant 0 : index
    %c0_90 = arith.constant 0 : index
    %81 = vector.load %arg15[%c0_89, %c0_90] : memref<324x32xf32, #tpu.memory_space<vmem>>, vector<324x32xf32>
    %82 = arith.addf %81, %80 : vector<324x32xf32>
    %c0_91 = arith.constant 0 : index
    %c0_92 = arith.constant 0 : index
    %83 = vector.load %arg15[%c0_91, %c0_92] : memref<324x32xf32, #tpu.memory_space<vmem>>, vector<324x32xf32>
    tpu.vector_store %arg15[%c0_91, %c0_92], %82 {strides = array<i32>} : memref<324x32xf32, #tpu.memory_space<vmem>>, vector<324x32xf32>,
    %c43 = arith.constant 43 : index
    %c0_93 = arith.constant 0 : index
    %84 = vector.load %arg14[%c43, %c0_93] : memref<372x32xf32, #tpu.memory_space<vmem>>, vector<324x32xf32>
    %c8 = arith.constant 8 : index
    %c0_94 = arith.constant 0 : index
    %c0_95 = arith.constant 0 : index
    %85 = vector.load %arg5[%c8, %c0_94, %c0_95] : memref<9x32x32xf32, #tpu.memory_space<vmem>>, vector<1x32x32xf32>
    %86 = vector.shape_cast %85 : vector<1x32x32xf32> to vector<32x32xf32>
    %cst_96 = arith.constant dense<0.000000e+00> : vector<324x32xf32>
    %87 = tpu.matmul %84, %86, %cst_96 {dimension_numbers = #tpu.dot_dimension_numbers<[1], [0], [0], [1], [0, 0, 1, 1], [], []>} : vector<324x32xf32>, vector<32x32xf32>, vector<324x32xf32> -> vector<324x32xf32>
    %c0_97 = arith.constant 0 : index
    %c0_98 = arith.constant 0 : index
    %88 = vector.load %arg15[%c0_97, %c0_98] : memref<324x32xf32, #tpu.memory_space<vmem>>, vector<324x32xf32>
    %89 = arith.addf %88, %87 : vector<324x32xf32>
    %c0_99 = arith.constant 0 : index
    %c0_100 = arith.constant 0 : index
    %90 = vector.load %arg15[%c0_99, %c0_100] : memref<324x32xf32, #tpu.memory_space<vmem>>, vector<324x32xf32>
    tpu.vector_store %arg15[%c0_99, %c0_100], %89 {strides = array<i32>} : memref<324x32xf32, #tpu.memory_space<vmem>>, vector<324x32xf32>,
    %c0_101 = arith.constant 0 : index
    %c0_102 = arith.constant 0 : index
    %91 = vector.load %arg15[%c0_101, %c0_102] : memref<324x32xf32, #tpu.memory_space<vmem>>, vector<324x32xf32>
    %c0_103 = arith.constant 0 : index
    %c0_104 = arith.constant 0 : index
    %92 = vector.load %arg6[%c0_103, %c0_104] : memref<1x32xf32, #tpu.memory_space<vmem>>, vector<1x32xf32>
    %93 = vector.broadcast %92 : vector<1x32xf32> to vector<324x32xf32>
    %94 = arith.addf %91, %93 : vector<324x32xf32>
    %cst_105 = arith.constant 0.000000e+00 : f32
    %95 = vector.broadcast %cst_105 : f32 to vector<324x32xf32>
    %96 = arith.maximumf %94, %95 : vector<324x32xf32>
    %c0_106 = arith.constant 0 : index
    %c0_107 = arith.constant 0 : index
    %97 = vector.load %arg7[%c0_106, %c0_107] : memref<32x128xf32, #tpu.memory_space<vmem>>, vector<32x128xf32>
    %cst_108 = arith.constant dense<0.000000e+00> : vector<324x128xf32>
    %98 = tpu.matmul %96, %97, %cst_108 {dimension_numbers = #tpu.dot_dimension_numbers<[1], [0], [0], [1], [0, 0, 1, 1], [], []>} : vector<324x32xf32>, vector<32x128xf32>, vector<324x128xf32> -> vector<324x128xf32>
    %c0_109 = arith.constant 0 : index
    %c0_110 = arith.constant 0 : index
    %99 = vector.load %arg8[%c0_109, %c0_110] : memref<1x128xf32, #tpu.memory_space<vmem>>, vector<1x128xf32>
    %100 = vector.broadcast %99 : vector<1x128xf32> to vector<324x128xf32>
    %101 = arith.addf %98, %100 : vector<324x128xf32>
    %c0_111 = arith.constant 0 : index
    %c0_112 = arith.constant 0 : index
    %c0_113 = arith.constant 0 : index
    %102 = vector.load %arg12[%c0_111, %c0_112, %c0_113] : memref<1x324x128xf32, #tpu.memory_space<vmem>>, vector<1x324x128xf32>
    %103 = vector.shape_cast %102 : vector<1x324x128xf32> to vector<324x128xf32>
    %104 = vector.shape_cast %101 : vector<324x128xf32> to vector<1x324x128xf32>
    tpu.vector_store %arg12[%c0_111, %c0_112, %c0_113], %104 {strides = array<i32>} : memref<1x324x128xf32, #tpu.memory_space<vmem>>, vector<1x324x128xf32>,
    return
  }
  func.func @transform_0(%arg0: i32) -> (i32, i32, i32) {
    %c0_i32 = arith.constant 0 : i32
    %c0_i32_0 = arith.constant 0 : i32
    %c0_i32_1 = arith.constant 0 : i32
    return %arg0, %c0_i32, %c0_i32_0 : i32, i32, i32
  }
  func.func @transform_1(%arg0: i32) -> (i32, i32) {
    %c0_i32 = arith.constant 0 : i32
    %c0_i32_0 = arith.constant 0 : i32
    %c0_i32_1 = arith.constant 0 : i32
    return %c0_i32, %c0_i32_0 : i32, i32
  }
  func.func @transform_2(%arg0: i32) -> (i32, i32) {
    %c0_i32 = arith.constant 0 : i32
    %c0_i32_0 = arith.constant 0 : i32
    %c0_i32_1 = arith.constant 0 : i32
    return %c0_i32, %c0_i32_0 : i32, i32
  }
  func.func @transform_3(%arg0: i32) -> (i32, i32) {
    %c0_i32 = arith.constant 0 : i32
    %c0_i32_0 = arith.constant 0 : i32
    %c0_i32_1 = arith.constant 0 : i32
    return %c0_i32, %c0_i32_0 : i32, i32
  }
  func.func @transform_4(%arg0: i32) -> (i32, i32, i32) {
    %c0_i32 = arith.constant 0 : i32
    %c0_i32_0 = arith.constant 0 : i32
    %c0_i32_1 = arith.constant 0 : i32
    %c0_i32_2 = arith.constant 0 : i32
    return %c0_i32, %c0_i32_0, %c0_i32_1 : i32, i32, i32
  }
  func.func @transform_5(%arg0: i32) -> (i32, i32) {
    %c0_i32 = arith.constant 0 : i32
    %c0_i32_0 = arith.constant 0 : i32
    %c0_i32_1 = arith.constant 0 : i32
    return %c0_i32, %c0_i32_0 : i32, i32
  }
  func.func @transform_6(%arg0: i32) -> (i32, i32) {
    %c0_i32 = arith.constant 0 : i32
    %c0_i32_0 = arith.constant 0 : i32
    %c0_i32_1 = arith.constant 0 : i32
    return %c0_i32, %c0_i32_0 : i32, i32
  }
  func.func @transform_7(%arg0: i32) -> (i32, i32) {
    %c0_i32 = arith.constant 0 : i32
    %c0_i32_0 = arith.constant 0 : i32
    %c0_i32_1 = arith.constant 0 : i32
    return %c0_i32, %c0_i32_0 : i32, i32
  }
  func.func @transform_8(%arg0: i32) -> (i32, i32) {
    %c0_i32 = arith.constant 0 : i32
    %c0_i32_0 = arith.constant 0 : i32
    %c0_i32_1 = arith.constant 0 : i32
    return %c0_i32, %c0_i32_0 : i32, i32
  }
  func.func @transform_9(%arg0: i32) -> (i32, i32) {
    %c0_i32 = arith.constant 0 : i32
    %c0_i32_0 = arith.constant 0 : i32
    %c0_i32_1 = arith.constant 0 : i32
    return %c0_i32, %c0_i32_0 : i32, i32
  }
  func.func @transform_10(%arg0: i32) -> (i32, i32) {
    %c0_i32 = arith.constant 0 : i32
    %c0_i32_0 = arith.constant 0 : i32
    %c0_i32_1 = arith.constant 0 : i32
    return %c0_i32, %c0_i32_0 : i32, i32
  }
  func.func @transform_11(%arg0: i32) -> (i32, i32, i32) {
    %c0_i32 = arith.constant 0 : i32
    %c0_i32_0 = arith.constant 0 : i32
    %c0_i32_1 = arith.constant 0 : i32
    return %arg0, %c0_i32, %c0_i32_0 : i32, i32, i32
  }
  func.func @transform_12(%arg0: i32) -> (i32, i32, i32) {
    %c0_i32 = arith.constant 0 : i32
    %c0_i32_0 = arith.constant 0 : i32
    %c0_i32_1 = arith.constant 0 : i32
    return %arg0, %c0_i32, %c0_i32_0 : i32, i32, i32
  }
}

</mosaic_0001>

<bundles_post_ra>
// kernel: _forward_once_.1
= control target key start
LH: loop header
LB: loop body
LE: loop exit
PB: predicated region body
PF: predicated region fallthrough
CT: control target
= control target key end

     0   :  { %s9718_s21 = smov 0   ;;  %s12915_s0 = inlined_call_operand.vmem [shape: f32[2,324,27], index: 0, kind: input, shape index: {}]   ;;  %s12916_s1 = inlined_call_operand.vmem [shape: f32[324,1], index: 1, kind: input, shape index: {}]   ;;  %s12917_s2 = inlined_call_operand.vmem [shape: f32[27,32], index: 2, kind: input, shape index: {}]   ;;  %s12918_s3 = inlined_call_operand.vmem [shape: f32[1,32], index: 3, kind: input, shape index: {}]   ;;  %s12919_s4 = inlined_call_operand.vmem [shape: f32[9,32,32], index: 4, kind: input, shape index: {}]   ;;  %s12920_s5 = inlined_call_operand.vmem [shape: f32[1,32], index: 5, kind: input, shape index: {}]   ;;  %s12921_s6 = inlined_call_operand.vmem [shape: f32[32,128], index: 6, kind: input, shape index: {}]   ;;  %s12922_s7 = inlined_call_operand.vmem [shape: f32[1,128], index: 7, kind: input, shape index: {}]   ;;  %s12923_s8 = inlined_call_operand.vmem [shape: f32[32,41], index: 8, kind: input, shape index: {}]   ;;  %s12924_s9 = inlined_call_operand.vmem [shape: f32[1,41], index: 9, kind: input, shape index: {}]   ;;  %s12925_s10 = inlined_call_operand.vmem [shape: f32[1,32], index: 10, kind: input, shape index: {}]   ;;  %s12926_s11 = inlined_call_operand.vmem [shape: f32[2,324,128], index: 11, kind: output, shape index: {0}]   ;;  %s12927_s12 = inlined_call_operand.vmem [shape: f32[2,1,41], index: 12, kind: output, shape index: {1}]  }
   0x1 LB: > { %s7097_s22 = sadd.s32 4294967295, %s9646_s21   ;;  %p7101_p0 = scmp.ge.s32.totalorder %s9646_s21, 1  ;;  %s9646_s21 = sphi %s9718_s21, %s23_s21  }
   0x2   : > { %p365_p1 = scmp.lt.s32.totalorder %s9646_s21, 3 }
   0x4   : > { %p366_p2 = pnand %p7101_p0, %p365_p1 }
   0x6   : > { %369 = sbr.rel (%p366_p2) target bundleno = 1645 (0x66d), region = 64 }
   0xd   : > { %v471_v0 = vld [vmem:[%s12917_s2] sm:$0xff]  ;;  %v472_v1 = vld [vmem:[%s12917_s2 + $0x8] sm:$0xff]  ;;  %v473_v2 = vld [vmem:[%s12917_s2 + $0x10] sm:$0xff]  ;;  %vm606_vm0 = vcmask 1042432   ;;  %v12928_v3 = vmov 0.0|0.0   ;;  %p410_p3 = scmp.lt.s32.totalorder %s7097_s22, 1 }
   0xe   : > { %9547 = vmatprep.subr.bf16.mxu0 %v12928_v3  ;;  %9620 = vmatprep.subr.bf16.mxu1 %v12928_v3  ;;  %v9548_v4 = vpack.c.bf16 %v472_v1, %v471_v0  ;;  %v474_v5 = vld [vmem:[%s12917_s2 + $0x18] sm:$0x7]  ;;  %vm9649_vm1 = vmmov 0   ;;  %v9650_v6 = vmov 0.0   ;;  %v969_v8 = vld [vmem:[%s12916_s1] sm:$0xff]  ;;  %v971_v9 = vld [vmem:[%s12916_s1 + $0x10] sm:$0xff] }
   0xf   : > { %8103 = vmatprep.mubr.msk.f32.mxu0 %vm9649_vm1, %v9650_v6  ;;  %8169 = vmatprep.mubr.msk.f32.mxu1 %vm9649_vm1, %v9650_v6  ;;  %v9551_v7 = vpack.c.bf16 %v474_v5, %v473_v2  ;;  %s12962_s22 = smov (!%p410_p3, %s7097_s22), 1  ;;  %vm9651_vm2 = vmmov 1   ;;  %v9652_v10 = vmov 0   ;;  %vm482_vm4 = vcmask 220160   ;;  %v970_v13 = vld [vmem:[%s12916_s1 + $0x8] sm:$0xff]  ;;  %v972_v14 = vld [vmem:[%s12916_s1 + $0x18] sm:$0xff] }
  0x10   : > { %9549 = vmatpush3.bf16.msra.mxu0 %v9548_v4  ;;  %9622 = vmatpush3.bf16.msra.mxu1 %v9548_v4  ;;  %vm9552_vm3 = vmpackc.low %vm606_vm0, %vm9651_vm2  ;;  %s9624_s17 = smul.u32 328, %s12962_s22  ;;  %v973_v17 = vld [vmem:[%s12916_s1 + $0x20] sm:$0xff]  ;;  %v974_v18 = vld [vmem:[%s12916_s1 + $0x28] sm:$0xff]  ;;  %vm423_vm5 = vcmask 261120   ;;  %vm1335_vm6 = vcmask 257024   ;;  %s422_s18 = scalar_lea.vmem %s12927_s12, %s12962_s22  ;;  %vm1424_vm7 = vcmask 327680  }
  0x11   : > { %9550 = vmatprep.subr.bf16.mxu0 %v12928_v3  ;;  %9621 = vmatprep.subr.bf16.mxu1 %v12928_v3  ;;  %v975_v21 = vld [vmem:[%s12916_s1 + $0x30] sm:$0xff]  ;;  %v976_v22 = vld [vmem:[%s12916_s1 + $0x38] sm:$0xff]  ;;  %v977_v25 = vld [vmem:[%s12916_s1 + $0x40] sm:$0xff]  ;;  %424 = vst.msk [vmem:[#allocation2] sm:$0xff] %vm423_vm5, %v9650_v6 }
  0x12   : > { %9638 = vset.pattern.permute.xlu0 %v9652_v10  ;;  %9639 = vset.pattern.permute.xlu1 %v9652_v10  ;;  %s9761_s20 = scalar_lea.vmem %s12915_s0, %s9624_s17  ;;  %v978_v26 = vld [vmem:[%s12916_s1 + $0x48] sm:$0xff]  ;;  %v979_v29 = vld [vmem:[%s12916_s1 + $0x50] sm:$0xff]  ;;  %v980_v30 = vld [vmem:[%s12916_s1 + $0x58] sm:$0xff]  ;;  %425 = vst.msk [vmem:[#allocation2 + $0x8] sm:$0xff] %vm423_vm5, %v9650_v6  ;;  %s12828_s29 = scalar_lea.vmem %s12926_s11, %s9624_s17 }
  0x13   : > { %1012 = vperm.xlu0 %9638, %v969_v8   ;;  %1022 = vperm.xlu1 %9639, %v971_v9   ;;  %v430_v11 = vld [vmem:[%s9761_s20] sm:$0xff]  ;;  %v452_v12 = vld [vmem:[%s9761_s20 + $0xb0] sm:$0xff]  ;;  %v431_v15 = vld [vmem:[%s9761_s20 + $0x8] sm:$0xff]  ;;  %426 = vst.msk [vmem:[#allocation2 + $0x10] sm:$0xff] %vm423_vm5, %v9650_v6 }
  0x14   : > { %9553 = vmatpush3.bf16.msk.msra.mxu0 %vm9552_vm3, %v9551_v7  ;;  %9623 = vmatpush3.bf16.msk.msra.mxu1 %vm9552_vm3, %v9551_v7  ;;  %v453_v16 = vld [vmem:[%s9761_s20 + $0xb8] sm:$0xff]  ;;  %v432_v19 = vld [vmem:[%s9761_s20 + $0x10] sm:$0xff]  ;;  %v454_v20 = vld [vmem:[%s9761_s20 + $0xc0] sm:$0xff]  ;;  %427 = vst.msk [vmem:[#allocation2 + $0x15c] sm:$0xff] %vm423_vm5, %v9650_v6 }
  0x15   : > { %9566 = vmatprep.subr.bf16.mxu0 %v12928_v3  ;;  %9554 = vmatprep.subr.bf16.mxu1 %v12928_v3  ;;  %v433_v23 = vld [vmem:[%s9761_s20 + $0x18] sm:$0xff]  ;;  %v455_v24 = vld [vmem:[%s9761_s20 + $0xc8] sm:$0xff]  ;;  %v434_v27 = vld [vmem:[%s9761_s20 + $0x20] sm:$0xff]  ;;  %428 = vst.msk [vmem:[#allocation2 + $0x164] sm:$0xff] %vm423_vm5, %v9650_v6 }
  0x16   : > { %v456_v28 = vld [vmem:[%s9761_s20 + $0xd0] sm:$0xff]  ;;  %v435_v31 = vld [vmem:[%s9761_s20 + $0x28] sm:$0xff]  ;;  %v457_v32 = vld [vmem:[%s9761_s20 + $0xd8] sm:$0xff]  ;;  %429 = vst.msk [vmem:[#allocation2 + $0x16c] sm:$0xff] %vm423_vm5, %v9650_v6 }
  0x17   : > { %8104 = vmatmul.mubr.msk.f32.vlgmr.msra.gmra.mrb[0].mxu0 %vm482_vm4, %v430_v11  ;;  %8170 = vmatmul.mubr.msk.f32.vlgmr.msra.gmra.mrb[0].mxu1 %vm482_vm4, %v452_v12  ;;  %v981_v33 = vld [vmem:[%s12916_s1 + $0x60] sm:$0xff]  ;;  %v982_v34 = vld [vmem:[%s12916_s1 + $0x68] sm:$0xff]  ;;  %v436_v35 = vld [vmem:[%s9761_s20 + $0x30] sm:$0xff] }
  0x18   : > { %8106 = vmatprep.mubr.msk.f32.mxu0 %vm9649_vm1, %v9650_v6  ;;  %8172 = vmatprep.mubr.msk.f32.mxu1 %vm9649_vm1, %v9650_v6  ;;  %v458_v36 = vld [vmem:[%s9761_s20 + $0xe0] sm:$0xff]  ;;  %v983_v37 = vld [vmem:[%s12916_s1 + $0x70] sm:$0xff]  ;;  %v984_v38 = vld [vmem:[%s12916_s1 + $0x78] sm:$0xff] }
  0x19   : > { %1017 = vperm.xlu0 %9638, %v970_v13   ;;  %1027 = vperm.xlu1 %9639, %v972_v14   ;;  %v437_v39 = vld [vmem:[%s9761_s20 + $0x38] sm:$0xff]  ;;  %v459_v40 = vld [vmem:[%s9761_s20 + $0xe8] sm:$0xff]  ;;  %v985_v41 = vld [vmem:[%s12916_s1 + $0x80] sm:$0xff] }
  0x1a   : > { %v986_v42 = vld [vmem:[%s12916_s1 + $0x88] sm:$0xff]  ;;  %v438_v43 = vld [vmem:[%s9761_s20 + $0x40] sm:$0xff]  ;;  %v460_v44 = vld [vmem:[%s9761_s20 + $0xf0] sm:$0xff] }
  0x1b   : > { %8107 = vmatmul.mubr.msk.f32.gmra.mrb[2].mxu0 %vm482_vm4, %v431_v15  ;;  %8173 = vmatmul.mubr.msk.f32.gmra.mrb[2].mxu1 %vm482_vm4, %v453_v16  ;;  %v987_v45 = vld [vmem:[%s12916_s1 + $0x90] sm:$0xff]  ;;  %v988_v46 = vld [vmem:[%s12916_s1 + $0x98] sm:$0xff]  ;;  %v439_v47 = vld [vmem:[%s9761_s20 + $0x48] sm:$0xff] }
  0x1c   : > { %8109 = vmatprep.mubr.msk.f32.mxu0 %vm9649_vm1, %v9650_v6  ;;  %8175 = vmatprep.mubr.msk.f32.mxu1 %vm9649_vm1, %v9650_v6  ;;  %v461_v48 = vld [vmem:[%s9761_s20 + $0xf8] sm:$0xff]  ;;  %v989_v49 = vld [vmem:[%s12916_s1 + $0xa0] sm:$0xff]  ;;  %v990_v50 = vld [vmem:[%s12916_s1 + $0xa8] sm:$0xff] }
  0x1d   : > { %1032 = vperm.xlu0 %9638, %v973_v17   ;;  %1037 = vperm.xlu1 %9639, %v974_v18   ;;  %v440_v51 = vld [vmem:[%s9761_s20 + $0x50] sm:$0xff]  ;;  %v462_v52 = vld [vmem:[%s9761_s20 + $0x100] sm:$0xff]  ;;  %v992_v54 = vld [vmem:[%s12916_s1 + $0xb8] sm:$0xff] }
  0x1e   : > { %v991_v53 = vld [vmem:[%s12916_s1 + $0xb0] sm:$0xff]  ;;  %v441_v55 = vld [vmem:[%s9761_s20 + $0x58] sm:$0xff]  ;;  %v463_v56 = vld [vmem:[%s9761_s20 + $0x108] sm:$0xff] }
  0x1f   : > { %8110 = vmatmul.mubr.msk.f32.gmra.mrb[4].mxu0 %vm482_vm4, %v432_v19  ;;  %8176 = vmatmul.mubr.msk.f32.gmra.mrb[4].mxu1 %vm482_vm4, %v454_v20  ;;  %v993_v57 = vld [vmem:[%s12916_s1 + $0xc0] sm:$0xff]  ;;  %v994_v58 = vld [vmem:[%s12916_s1 + $0xc8] sm:$0xff]  ;;  %v464_v60 = vld [vmem:[%s9761_s20 + $0x110] sm:$0xff] }
  0x20   : > { %8112 = vmatprep.mubr.msk.f32.mxu0 %vm9649_vm1, %v9650_v6  ;;  %8178 = vmatprep.mubr.msk.f32.mxu1 %vm9649_vm1, %v9650_v6  ;;  %v442_v59 = vld [vmem:[%s9761_s20 + $0x60] sm:$0xff]  ;;  %v995_v61 = vld [vmem:[%s12916_s1 + $0xd0] sm:$0xff]  ;;  %v996_v62 = vld [vmem:[%s12916_s1 + $0xd8] sm:$0xff] }
  0x21   : > { %1042 = vperm.xlu0 %9638, %v975_v21   ;;  %1047 = vperm.xlu1 %9639, %v976_v22   ;;  %v443_v63 = vld [vmem:[%s9761_s20 + $0x68] sm:$0xff]  ;;  %v465_v0 = vld [vmem:[%s9761_s20 + $0x118] sm:$0xff]  ;;  %v997_v1 = vld [vmem:[%s12916_s1 + $0xe0] sm:$0xff] }
  0x22   : > { %v998_v2 = vld [vmem:[%s12916_s1 + $0xe8] sm:$0xff]  ;;  %v444_v4 = vld [vmem:[%s9761_s20 + $0x70] sm:$0xff]  ;;  %v466_v5 = vld [vmem:[%s9761_s20 + $0x120] sm:$0xff] }
  0x23   : > { %8113 = vmatmul.mubr.msk.f32.gmra.mrb[6].mxu0 %vm482_vm4, %v433_v23  ;;  %8179 = vmatmul.mubr.msk.f32.gmra.mrb[6].mxu1 %vm482_vm4, %v455_v24  ;;  %v999_v7 = vld [vmem:[%s12916_s1 + $0xf0] sm:$0xff]  ;;  %v1000_v8 = vld [vmem:[%s12916_s1 + $0xf8] sm:$0xff]  ;;  %v467_v10 = vld [vmem:[%s9761_s20 + $0x128] sm:$0xff] }
  0x24   : > { %8115 = vmatprep.mubr.msk.f32.mxu0 %vm9649_vm1, %v9650_v6  ;;  %8181 = vmatprep.mubr.msk.f32.mxu1 %vm9649_vm1, %v9650_v6  ;;  %v445_v9 = vld [vmem:[%s9761_s20 + $0x78] sm:$0xff]  ;;  %v1001_v11 = vld [vmem:[%s12916_s1 + $0x100] sm:$0xff]  ;;  %v1002_v12 = vld [vmem:[%s12916_s1 + $0x108] sm:$0xff] }
  0x25   : > { %1052 = vperm.xlu0 %9638, %v977_v25   ;;  %1057 = vperm.xlu1 %9639, %v978_v26   ;;  %v446_v13 = vld [vmem:[%s9761_s20 + $0x80] sm:$0xff]  ;;  %v468_v14 = vld [vmem:[%s9761_s20 + $0x130] sm:$0xff]  ;;  %v1004_v16 = vld [vmem:[%s12916_s1 + $0x118] sm:$0xff] }
  0x26   : > { %v1003_v15 = vld [vmem:[%s12916_s1 + $0x110] sm:$0xff]  ;;  %v447_v17 = vld [vmem:[%s9761_s20 + $0x88] sm:$0xff]  ;;  %v469_v18 = vld [vmem:[%s9761_s20 + $0x138] sm:$0xff] }
  0x27   : > { %8116 = vmatmul.mubr.msk.f32.gmra.mrb[8].mxu0 %vm482_vm4, %v434_v27  ;;  %8182 = vmatmul.mubr.msk.f32.gmra.mrb[8].mxu1 %vm482_vm4, %v456_v28  ;;  %v1005_v19 = vld [vmem:[%s12916_s1 + $0x120] sm:$0xff]  ;;  %v1006_v20 = vld [vmem:[%s12916_s1 + $0x128] sm:$0xff]  ;;  %v448_v21 = vld [vmem:[%s9761_s20 + $0x90] sm:$0xff] }
  0x28   : > { %8118 = vmatprep.mubr.msk.f32.mxu0 %vm9649_vm1, %v9650_v6  ;;  %8184 = vmatprep.mubr.msk.f32.mxu1 %vm9649_vm1, %v9650_v6  ;;  %v470_v22 = vld [vmem:[%s9761_s20 + $0x140] sm:$0xf]  ;;  %v1007_v23 = vld [vmem:[%s12916_s1 + $0x130] sm:$0xff]  ;;  %v1008_v24 = vld [vmem:[%s12916_s1 + $0x138] sm:$0xff] }
  0x29   : > { %1062 = vperm.xlu0 %9638, %v979_v29   ;;  %1067 = vperm.xlu1 %9639, %v980_v30   ;;  %v449_v25 = vld [vmem:[%s9761_s20 + $0x98] sm:$0xff]  ;;  %v1009_v26 = vld [vmem:[%s12916_s1 + $0x140] sm:$0xf]  ;;  %v451_v28 = vld [vmem:[%s9761_s20 + $0xa8] sm:$0xff] }
  0x2a   : > { %v450_v27 = vld [vmem:[%s9761_s20 + $0xa0] sm:$0xff]  ;;  %v7191_v30 = vld [vmem:[%s12919_s4 + $0x28] sm:$0xff] }
  0x2b   : > { %8119 = vmatmul.mubr.msk.f32.gmra.mrb[10].mxu0 %vm482_vm4, %v435_v31  ;;  %8185 = vmatmul.mubr.msk.f32.gmra.mrb[10].mxu1 %vm482_vm4, %v457_v32  ;;  %v7190_v29 = vld [vmem:[%s12919_s4 + $0x20] sm:$0xff]  ;;  %v7192_v32 = vld [vmem:[%s12919_s4 + $0x30] sm:$0xff] }
  0x2c   : > { %8121 = vmatprep.mubr.msk.f32.mxu0 %vm9649_vm1, %v9650_v6  ;;  %8187 = vmatprep.mubr.msk.f32.mxu1 %vm9649_vm1, %v9650_v6  ;;  %v9567_v31 = vpack.c.bf16 %v7191_v30, %v7190_v29 }
  0x2d   : > { %1072 = vperm.xlu0 %9638, %v981_v33   ;;  %1077 = vperm.xlu1 %9639, %v982_v34   ;;  %v7193_v33 = vld [vmem:[%s12919_s4 + $0x38] sm:$0xff] }
  0x2e   : > { %9568 = vmatpush3.bf16.msra.mxu0 %v9567_v31  ;;  %v9570_v34 = vpack.c.bf16 %v7193_v33, %v7192_v32 }
  0x2f   : > { %8122 = vmatmul.mubr.msk.f32.gmra.mrb[12].mxu0 %vm482_vm4, %v436_v35  ;;  %8188 = vmatmul.mubr.msk.f32.gmra.mrb[12].mxu1 %vm482_vm4, %v458_v36  ;;  %v1946_v35 = vld [vmem:[#allocation2 + $0x6] sm:$0xff]  ;;  %v1947_v36 = vld [vmem:[#allocation2 + $0xe] sm:$0xff] }
  0x30   : > { %8124 = vmatprep.mubr.msk.f32.mxu0 %vm9649_vm1, %v9650_v6  ;;  %8190 = vmatprep.mubr.msk.f32.mxu1 %vm9649_vm1, %v9650_v6 }
  0x31   : > { %1082 = vperm.xlu0 %9638, %v983_v37   ;;  %1087 = vperm.xlu1 %9639, %v984_v38  }
  0x32   : > { %9569 = vmatprep.subr.bf16.mxu0 %v12928_v3 }
  0x33   : > { %8125 = vmatmul.mubr.msk.f32.gmra.mrb[14].mxu0 %vm482_vm4, %v437_v39  ;;  %8191 = vmatmul.mubr.msk.f32.gmra.mrb[14].mxu1 %vm482_vm4, %v459_v40 }
  0x34   : > { %8127 = vmatprep.mubr.msk.f32.mxu0 %vm9649_vm1, %v9650_v6  ;;  %8193 = vmatprep.mubr.msk.f32.mxu1 %vm9649_vm1, %v9650_v6 }
  0x35   : > { %1092 = vperm.xlu0 %9638, %v985_v41   ;;  %1097 = vperm.xlu1 %9639, %v986_v42   ;;  %v1344_v41 = vld [vmem:[%s12923_s8] sm:$0xff]  ;;  %v1345_v42 = vld [vmem:[%s12923_s8 + $0x8] sm:$0xff] }
  0x36   : > { %9571 = vmatpush3.bf16.msra.mxu0 %v9570_v34 }
  0x37   : > { %8128 = vmatmul.mubr.msk.f32.gmra.mrb[16].mxu0 %vm482_vm4, %v438_v43  ;;  %8194 = vmatmul.mubr.msk.f32.gmra.mrb[16].mxu1 %vm482_vm4, %v460_v44  ;;  %v9555_v44 = vpack.c.bf16 %v1345_v42, %v1344_v41 }
  0x38   : > { %8130 = vmatprep.mubr.msk.f32.mxu0 %vm9649_vm1, %v9650_v6  ;;  %8196 = vmatprep.mubr.msk.f32.mxu1 %vm9649_vm1, %v9650_v6 }
  0x39   : > { %1102 = vperm.xlu0 %9638, %v987_v45   ;;  %1107 = vperm.xlu1 %9639, %v988_v46  }
  0x3a   : > { %9578 = vmatprep.subr.bf16.mxu0 %v12928_v3  ;;  %9556 = vmatpush3.bf16.msra.mxu1 %v9555_v44 }
  0x3b   : > { %8131 = vmatmul.mubr.msk.f32.gmra.mrb[18].mxu0 %vm482_vm4, %v439_v47  ;;  %8197 = vmatmul.mubr.msk.f32.gmra.mrb[18].mxu1 %vm482_vm4, %v461_v48 }
  0x3c   : > { %8133 = vmatprep.mubr.msk.f32.mxu0 %vm9649_vm1, %v9650_v6  ;;  %8199 = vmatprep.mubr.msk.f32.mxu1 %vm9649_vm1, %v9650_v6 }
  0x3d   : > { %1112 = vperm.xlu0 %9638, %v989_v49   ;;  %1117 = vperm.xlu1 %9639, %v990_v50  }
  0x3e   : > { %9557 = vmatprep.subr.bf16.mxu1 %v12928_v3 }
  0x3f   : > { %8134 = vmatmul.mubr.msk.f32.gmra.mrb[20].mxu0 %vm482_vm4, %v440_v51  ;;  %8200 = vmatmul.mubr.msk.f32.gmra.mrb[20].mxu1 %vm482_vm4, %v462_v52 }
  0x40   : > { %8136 = vmatprep.mubr.msk.f32.mxu0 %vm9649_vm1, %v9650_v6  ;;  %8202 = vmatprep.mubr.msk.f32.mxu1 %vm9649_vm1, %v9650_v6 }
  0x41   : > { %1122 = vperm.xlu0 %9638, %v991_v53   ;;  %1127 = vperm.xlu1 %9639, %v992_v54  }
  0x43   : > { %8137 = vmatmul.mubr.msk.f32.gmra.mrb[22].mxu0 %vm482_vm4, %v441_v55  ;;  %8203 = vmatmul.mubr.msk.f32.gmra.mrb[22].mxu1 %vm482_vm4, %v463_v56 }
  0x44   : > { %8139 = vmatprep.mubr.msk.f32.mxu0 %vm9649_vm1, %v9650_v6  ;;  %8205 = vmatprep.mubr.msk.f32.mxu1 %vm9649_vm1, %v9650_v6 }
  0x45   : > { %1132 = vperm.xlu0 %9638, %v993_v57   ;;  %1137 = vperm.xlu1 %9639, %v994_v58   ;;  %v1346_v57 = vld [vmem:[%s12923_s8 + $0x10] sm:$0xff]  ;;  %v1347_v58 = vld [vmem:[%s12923_s8 + $0x18] sm:$0xff] }
  0x47   : > { %8140 = vmatmul.mubr.msk.f32.gmra.mrb[24].mxu0 %vm482_vm4, %v442_v59  ;;  %8206 = vmatmul.mubr.msk.f32.gmra.mrb[24].mxu1 %vm482_vm4, %v464_v60  ;;  %v9558_v60 = vpack.c.bf16 %v1347_v58, %v1346_v57 }
  0x48   : > { %8142 = vmatprep.mubr.msk.f32.mxu0 %vm9649_vm1, %v9650_v6  ;;  %8208 = vmatprep.mubr.msk.f32.mxu1 %vm9649_vm1, %v9650_v6 }
  0x49   : > { %1142 = vperm.xlu0 %9638, %v995_v61   ;;  %1147 = vperm.xlu1 %9639, %v996_v62  }
  0x4a   : > { %9559 = vmatpush3.bf16.msra.mxu1 %v9558_v60 }
  0x4b   : > { %8143 = vmatmul.mubr.msk.f32.gmra.mrb[26].mxu0 %vm482_vm4, %v443_v63  ;;  %8209 = vmatmul.mubr.msk.f32.gmra.mrb[26].mxu1 %vm482_vm4, %v465_v0  ;;  %v10133_v63 = vld [vmem:[%s12918_s3] ss:$0 sm:$0xff] }
  0x4c   : > { %8145 = vmatprep.mubr.msk.f32.mxu0 %vm9649_vm1, %v9650_v6  ;;  %8211 = vmatprep.mubr.msk.f32.mxu1 %vm9649_vm1, %v9650_v6 }
  0x4d   : > { %1152 = vperm.xlu0 %9638, %v997_v1   ;;  %1157 = vperm.xlu1 %9639, %v998_v2  }
  0x4e   : > { %9560 = vmatprep.subr.bf16.mxu1 %v12928_v3 }
  0x4f   : > { %8146 = vmatmul.mubr.msk.f32.gmra.mrb[28].mxu0 %vm482_vm4, %v444_v4  ;;  %8212 = vmatmul.mubr.msk.f32.gmra.mrb[28].mxu1 %vm482_vm4, %v466_v5 }
  0x50   : > { %8148 = vmatprep.mubr.msk.f32.mxu0 %vm9649_vm1, %v9650_v6  ;;  %8214 = vmatprep.mubr.msk.f32.mxu1 %vm9649_vm1, %v9650_v6 }
  0x51   : > { %1162 = vperm.xlu0 %9638, %v999_v7   ;;  %1167 = vperm.xlu1 %9639, %v1000_v8  }
  0x53   : > { %8149 = vmatmul.mubr.msk.f32.gmra.mrb[30].mxu0 %vm482_vm4, %v445_v9  ;;  %8215 = vmatmul.mubr.msk.f32.gmra.mrb[30].mxu1 %vm482_vm4, %v467_v10  ;;  %v10142_v9 = vld [vmem:[%s12925_s10] ss:$0 sm:$0xff] }
  0x54   : > { %8151 = vmatprep.mubr.msk.f32.mxu0 %vm9649_vm1, %v9650_v6  ;;  %8217 = vmatprep.mubr.msk.f32.mxu1 %vm9649_vm1, %v9650_v6 }
  0x55   : > { %1172 = vperm.xlu0 %9638, %v1001_v11   ;;  %1177 = vperm.xlu1 %9639, %v1002_v12  }
  0x57   : > { %8152 = vmatmul.mubr.msk.f32.gmra.mrb[32].mxu0 %vm482_vm4, %v446_v13  ;;  %8218 = vmatmul.mubr.msk.f32.gmra.mrb[32].mxu1 %vm482_vm4, %v468_v14 }
  0x58   : > { %8154 = vmatprep.mubr.msk.f32.mxu0 %vm9649_vm1, %v9650_v6  ;;  %8220 = vmatprep.mubr.msk.f32.mxu1 %vm9649_vm1, %v9650_v6 }
  0x59   : > { %1182 = vperm.xlu0 %9638, %v1003_v15   ;;  %1187 = vperm.xlu1 %9639, %v1004_v16  }
  0x5b   : > { %8155 = vmatmul.mubr.msk.f32.gmra.mrb[34].mxu0 %vm482_vm4, %v447_v17  ;;  %8221 = vmatmul.mubr.msk.f32.gmra.mrb[34].mxu1 %vm482_vm4, %v469_v18 }
  0x5c   : > { %8157 = vmatprep.mubr.msk.f32.mxu0 %vm9649_vm1, %v9650_v6  ;;  %8223 = vmatprep.mubr.msk.f32.mxu1 %vm9649_vm1, %v9650_v6 }
  0x5d   : > { %1192 = vperm.xlu0 %9638, %v1005_v19   ;;  %1197 = vperm.xlu1 %9639, %v1006_v20  }
  0x5f   : > { %8158 = vmatmul.mubr.msk.f32.gmra.mrb[36].mxu0 %vm482_vm4, %v448_v21  ;;  %8224 = vmatmul.mubr.msk.f32.gmra.mrb[36].mxu1 %vm482_vm4, %v470_v22 }
  0x60   : > { %8160 = vmatprep.mubr.msk.f32.mxu0 %vm9649_vm1, %v9650_v6  ;;  %8234 = vmatprep.mubr.msk.f32.mxu1 %vm9649_vm1, %v9650_v6 }
  0x61   : > { %1202 = vperm.xlu0 %9638, %v1007_v23   ;;  %1207 = vperm.xlu1 %9639, %v1008_v24  }
  0x63   : > { %8161 = vmatmul.mubr.msk.f32.gmra.mrb[38].mxu0 %vm482_vm4, %v449_v25 }
  0x64   : > { %8163 = vmatprep.mubr.msk.f32.mxu0 %vm9649_vm1, %v9650_v6 }
  0x65   : > { %1212 = vperm.xlu0 %9638, %v1009_v26  }
  0x67   : > { %8164 = vmatmul.mubr.msk.f32.gmra.mrb[40].mxu0 %vm482_vm4, %v450_v27 }
  0x68   : > { %8166 = vmatprep.mubr.msk.f32.mxu0 %vm9649_vm1, %v9650_v6 }
  0x6b   : > { %8167 = vmatmul.mubr.msk.f32.gmra.mrb[42].mxu0 %vm482_vm4, %v451_v28 }
  0x6c   : > { %8376 = vmatprep.mubr.msk.f32.mxu0 %vm9649_vm1, %v9650_v6 }
  0x6f   : > { %8377 = vmatmul.mubr.msk.f32.vlgmr.msra.gmra.mrb[44].mxu0 %vm423_vm5, %v1946_v35 }
  0x70   : > { %8379 = vmatprep.mubr.msk.f32.mxu0 %vm9649_vm1, %v9650_v6 }
  0x73   : > { %8380 = vmatmul.mubr.msk.f32.gmra.mrb[46].mxu0 %vm423_vm5, %v1947_v36 }
  0x74   : > { %8382 = vmatprep.mubr.msk.f32.mxu0 %vm9649_vm1, %v9650_v6 }
  0x92   : > { %v1013_v37 = vpop.permute.xlu0 %1012  ;;  %v10078_v38 = vpop.permute.xlu1 %1022 }
  0x98   : > { %v10080_v39 = vpop.permute.xlu0 %1017  ;;  %v10082_v40 = vpop.permute.xlu1 %1027 }
  0x9c   : > { %v10090_v43 = vpop.permute.xlu0 %1032  ;;  %v10093_v45 = vpop.permute.xlu1 %1037 }
  0xa0   : > { %v10095_v46 = vpop.permute.xlu0 %1042  ;;  %v10097_v47 = vpop.permute.xlu1 %1047 }
  0xa4   : > { %v10099_v48 = vpop.permute.xlu0 %1052  ;;  %v10101_v49 = vpop.permute.xlu1 %1057 }
  0xa8   : > { %v10103_v50 = vpop.permute.xlu0 %1062  ;;  %v10105_v51 = vpop.permute.xlu1 %1067 }
  0xac   : > { %v10107_v52 = vpop.permute.xlu0 %1072  ;;  %v10109_v53 = vpop.permute.xlu1 %1077 }
  0xb0   : > { %v10111_v54 = vpop.permute.xlu0 %1082  ;;  %v10113_v55 = vpop.permute.xlu1 %1087 }
  0xb4   : > { %v10115_v56 = vpop.permute.xlu0 %1092  ;;  %v10123_v59 = vpop.permute.xlu1 %1097 }
  0xb8   : > { %v10125_v61 = vpop.permute.xlu0 %1102  ;;  %v10128_v62 = vpop.permute.xlu1 %1107 }
  0xbc   : > { %v10135_v0 = vpop.permute.xlu0 %1112  ;;  %v10144_v11 = vpop.permute.xlu1 %1117 }
  0xc0   : > { %v1123_v21 = vpop.permute.xlu0 %1122  ;;  %v1128_v36 = vpop.permute.xlu1 %1127 }
  0xea   : > { %v676_v1 = vpop.f32.mrb[0].mxu0  ;;  %v786_v2 = vpop.f32.mrb[0].mxu1 }
  0xeb   : > { %v677_v4 = vadd.f32 %v10133_v63, %v676_v1  ;;  %v8105_v5 = vpop.f32.mrb[1].mxu0  ;;  %v787_v7 = vadd.f32 %v10133_v63, %v786_v2  ;;  %v8171_v8 = vpop.f32.mrb[1].mxu1 }
  0xed   : > { %v880_v10 = vmax.f32 %v677_v4, 0.0  ;;  %v902_v12 = vmax.f32 %v787_v7, 0.0 }
  0xee   : > { %v681_v13 = vpop.f32.mrb[2].mxu0  ;;  %v791_v14 = vpop.f32.mrb[2].mxu1 }
  0xef   : > { %v928_v15 = vsub.f32 %v880_v10, %v10142_v9  ;;  %v682_v16 = vadd.f32 %v10133_v63, %v681_v13  ;;  %v8108_v17 = vpop.f32.mrb[3].mxu0  ;;  %v950_v18 = vsub.f32 %v902_v12, %v10142_v9  ;;  %v792_v19 = vadd.f32 %v10133_v63, %v791_v14  ;;  %v8174_v20 = vpop.f32.mrb[3].mxu1 }
  0xf0   : > { %v1133_v12 = vpop.permute.xlu0 %1132 }
  0xf1   : > { %v1215_v22 = vmul.f32 %v1013_v37, %v928_v15  ;;  %v881_v23 = vmax.f32 %v682_v16, 0.0  ;;  %v10150_v24 = vmul.f32 %v1123_v21, %v950_v18  ;;  %v903_v25 = vmax.f32 %v792_v19, 0.0 }
  0xf2   : > { %v686_v26 = vpop.f32.mrb[4].mxu0  ;;  %v796_v27 = vpop.f32.mrb[4].mxu1 }
  0xf3   : > { %1426 = vst.msk [vmem:[#allocation2 + $0x18] sm:$0xff] %vm423_vm5, %v1215_v22  ;;  %v929_v28 = vsub.f32 %v881_v23, %v10142_v9  ;;  %v687_v29 = vadd.f32 %v10133_v63, %v686_v26  ;;  %v8111_v30 = vpop.f32.mrb[5].mxu0  ;;  %1448 = vst.msk [vmem:[#allocation2 + $0xc8] sm:$0xff] %vm423_vm5, %v10150_v24  ;;  %v8177_v31 = vpop.f32.mrb[5].mxu1  ;;  %v951_v32 = vsub.f32 %v903_v25, %v10142_v9  ;;  %v1256_v37 = vsel %vm423_vm5, %v1215_v22, 0.0 }
  0xf4   : > { %v797_v33 = vadd.f32 %v10133_v63, %v796_v27  ;;  %v1138_v25 = vpop.permute.xlu1 %1137 }
  0xf5   : > { %v1216_v34 = vmul.f32 %v10080_v39, %v929_v28  ;;  %v882_v35 = vmax.f32 %v687_v29, 0.0  ;;  %v10161_v42 = vmul.f32 %v1128_v36, %v951_v32 }
  0xf6   : > { %v691_v41 = vpop.f32.mrb[6].mxu0  ;;  %v904_v44 = vmax.f32 %v797_v33, 0.0  ;;  %v801_v57 = vpop.f32.mrb[6].mxu1 }
  0xf7   : > { %v1257_v58 = vsel %vm423_vm5, %v1216_v34, 0.0  ;;  %1427 = vst.msk [vmem:[#allocation2 + $0x20] sm:$0xff] %vm423_vm5, %v1216_v34  ;;  %v930_v60 = vsub.f32 %v882_v35, %v10142_v9  ;;  %v692_v1 = vadd.f32 %v10133_v63, %v691_v41  ;;  %v8114_v2 = vpop.f32.mrb[7].mxu0  ;;  %v802_v39 = vadd.f32 %v10133_v63, %v801_v57  ;;  %v8180_v4 = vpop.f32.mrb[7].mxu1  ;;  %1449 = vst.msk [vmem:[#allocation2 + $0xd0] sm:$0xff] %vm423_vm5, %v10161_v42 }
  0xf8   : > { %v1258_v5 = vadd.f32 %v1257_v58, %v1256_v37  ;;  %v952_v7 = vsub.f32 %v904_v44, %v10142_v9 }
  0xf9   : > { %v1217_v8 = vmul.f32 %v10078_v38, %v930_v60  ;;  %v883_v10 = vmax.f32 %v692_v1, 0.0  ;;  %v905_v13 = vmax.f32 %v802_v39, 0.0  ;;  %v1143_v60 = vpop.permute.xlu0 %1142 }
  0xfa   : > { %v696_v14 = vpop.f32.mrb[8].mxu0  ;;  %v1948_v15 = vld [vmem:[#allocation2 + $0x16] sm:$0xff]  ;;  %v10172_v16 = vmul.f32 %v1133_v12, %v952_v7  ;;  %v806_v17 = vpop.f32.mrb[8].mxu1 }
  0xfb   : > { %v1259_v18 = vsel %vm423_vm5, %v1217_v8, 0.0  ;;  %1428 = vst.msk [vmem:[#allocation2 + $0x28] sm:$0xff] %vm423_vm5, %v1217_v8  ;;  %v931_v19 = vsub.f32 %v883_v10, %v10142_v9  ;;  %v697_v20 = vadd.f32 %v10133_v63, %v696_v14  ;;  %v8117_v21 = vpop.f32.mrb[9].mxu0  ;;  %8383 = vmatmul.mubr.msk.f32.gmra.mrb[48].mxu0 %vm423_vm5, %v1948_v15  ;;  %v953_v38 = vsub.f32 %v905_v13, %v10142_v9  ;;  %v8183_v22 = vpop.f32.mrb[9].mxu1 }
  0xfc   : > { %v1260_v23 = vadd.f32 %v1259_v18, %v1258_v5  ;;  %8385 = vmatprep.mubr.msk.f32.mxu0 %vm9649_vm1, %v9650_v6  ;;  %1450 = vst.msk [vmem:[#allocation2 + $0xd8] sm:$0xff] %vm423_vm5, %v10172_v16  ;;  %v807_v26 = vadd.f32 %v10133_v63, %v806_v17 }
  0xfd   : > { %v1218_v27 = vmul.f32 %v10082_v40, %v931_v19  ;;  %v884_v28 = vmax.f32 %v697_v20, 0.0  ;;  %v10186_v29 = vmul.f32 %v1138_v25, %v953_v38  ;;  %v1148_v20 = vpop.permute.xlu1 %1147 }
  0xfe   : > { %v701_v30 = vpop.f32.mrb[10].mxu0  ;;  %v1949_v31 = vld [vmem:[#allocation2 + $0x1e] sm:$0xff]  ;;  %v906_v32 = vmax.f32 %v807_v26, 0.0  ;;  %v811_v33 = vpop.f32.mrb[10].mxu1 }
  0xff   : > { %v1261_v34 = vsel %vm423_vm5, %v1218_v27, 0.0  ;;  %1429 = vst.msk [vmem:[#allocation2 + $0x30] sm:$0xff] %vm423_vm5, %v1218_v27  ;;  %v932_v35 = vsub.f32 %v884_v28, %v10142_v9  ;;  %v702_v36 = vadd.f32 %v10133_v63, %v701_v30  ;;  %v8120_v37 = vpop.f32.mrb[11].mxu0  ;;  %8386 = vmatmul.mubr.msk.f32.gmra.mrb[50].mxu0 %vm423_vm5, %v1949_v31  ;;  %1451 = vst.msk [vmem:[#allocation2 + $0xe0] sm:$0xff] %vm423_vm5, %v10186_v29  ;;  %v8186_v40 = vpop.f32.mrb[11].mxu1 }
 0x100   : > { %v1262_v41 = vadd.f32 %v1261_v34, %v1260_v23  ;;  %8388 = vmatprep.mubr.msk.f32.mxu0 %vm9649_vm1, %v9650_v6  ;;  %v954_v44 = vsub.f32 %v906_v32, %v10142_v9  ;;  %v812_v57 = vadd.f32 %v10133_v63, %v811_v33  ;;  %v1153_v33 = vpop.permute.xlu0 %1152 }
 0x101   : > { %v1219_v58 = vmul.f32 %v10090_v43, %v932_v35  ;;  %v885_v1 = vmax.f32 %v702_v36, 0.0 }
 0x102   : > { %v706_v2 = vpop.f32.mrb[12].mxu0  ;;  %v1950_v39 = vld [vmem:[#allocation2 + $0x26] sm:$0xff]  ;;  %v10200_v4 = vmul.f32 %v1143_v60, %v954_v44  ;;  %v907_v5 = vmax.f32 %v812_v57, 0.0  ;;  %v816_v7 = vpop.f32.mrb[12].mxu1 }
 0x103   : > { %v1263_v8 = vsel %vm423_vm5, %v1219_v58, 0.0  ;;  %1430 = vst.msk [vmem:[#allocation2 + $0x38] sm:$0xff] %vm423_vm5, %v1219_v58  ;;  %v933_v10 = vsub.f32 %v885_v1, %v10142_v9  ;;  %v707_v12 = vadd.f32 %v10133_v63, %v706_v2  ;;  %v8123_v13 = vpop.f32.mrb[13].mxu0  ;;  %8389 = vmatmul.mubr.msk.f32.gmra.mrb[52].mxu0 %vm423_vm5, %v1950_v39  ;;  %v817_v43 = vadd.f32 %v10133_v63, %v816_v7  ;;  %v8189_v14 = vpop.f32.mrb[13].mxu1 }
 0x104   : > { %v1264_v15 = vadd.f32 %v1263_v8, %v1262_v41  ;;  %1452 = vst.msk [vmem:[#allocation2 + $0xe8] sm:$0xff] %vm423_vm5, %v10200_v4  ;;  %8391 = vmatprep.mubr.msk.f32.mxu0 %vm9649_vm1, %v9650_v6  ;;  %v955_v17 = vsub.f32 %v907_v5, %v10142_v9 }
 0x105   : > { %v1220_v18 = vmul.f32 %v10093_v45, %v933_v10  ;;  %v886_v19 = vmax.f32 %v707_v12, 0.0  ;;  %v908_v21 = vmax.f32 %v817_v43, 0.0  ;;  %v1158_v10 = vpop.permute.xlu1 %1157 }
 0x106   : > { %v711_v38 = vpop.f32.mrb[14].mxu0  ;;  %v1951_v22 = vld [vmem:[#allocation2 + $0x2e] sm:$0xff]  ;;  %v10214_v23 = vmul.f32 %v1148_v20, %v955_v17  ;;  %v821_v25 = vpop.f32.mrb[14].mxu1 }
 0x107   : > { %v1265_v26 = vsel %vm423_vm5, %v1220_v18, 0.0  ;;  %1431 = vst.msk [vmem:[#allocation2 + $0x40] sm:$0xff] %vm423_vm5, %v1220_v18  ;;  %v934_v27 = vsub.f32 %v886_v19, %v10142_v9  ;;  %v712_v28 = vadd.f32 %v10133_v63, %v711_v38  ;;  %v8126_v30 = vpop.f32.mrb[15].mxu0  ;;  %8392 = vmatmul.mubr.msk.f32.gmra.mrb[54].mxu0 %vm423_vm5, %v1951_v22  ;;  %v956_v45 = vsub.f32 %v908_v21, %v10142_v9  ;;  %v8192_v31 = vpop.f32.mrb[15].mxu1  ;;  %v7280_v18 = vld [vmem:[%s12919_s4 + $0x60] sm:$0xff]  ;;  %v7281_v19 = vld [vmem:[%s12919_s4 + $0x68] sm:$0xff] }
 0x108   : > { %v1266_v32 = vadd.f32 %v1265_v26, %v1264_v15  ;;  %1453 = vst.msk [vmem:[#allocation2 + $0xf0] sm:$0xff] %vm423_vm5, %v10214_v23  ;;  %8394 = vmatprep.mubr.msk.f32.mxu0 %vm9649_vm1, %v9650_v6  ;;  %v822_v34 = vadd.f32 %v10133_v63, %v821_v25  ;;  %v1163_v30 = vpop.permute.xlu0 %1162 }
 0x109   : > { %v1221_v35 = vmul.f32 %v10095_v46, %v934_v27  ;;  %v887_v36 = vmax.f32 %v712_v28, 0.0  ;;  %v10228_v37 = vmul.f32 %v1153_v33, %v956_v45  ;;  %v9579_v28 = vpack.c.bf16 %v7281_v19, %v7280_v18 }
 0x10a   : > { %v716_v40 = vpop.f32.mrb[16].mxu0  ;;  %v1952_v41 = vld [vmem:[#allocation2 + $0x36] sm:$0xff]  ;;  %v909_v44 = vmax.f32 %v822_v34, 0.0  ;;  %v826_v57 = vpop.f32.mrb[16].mxu1 }
 0x10b   : > { %v1267_v58 = vsel %vm423_vm5, %v1221_v35, 0.0  ;;  %1432 = vst.msk [vmem:[#allocation2 + $0x48] sm:$0xff] %vm423_vm5, %v1221_v35  ;;  %v935_v60 = vsub.f32 %v887_v36, %v10142_v9  ;;  %v717_v1 = vadd.f32 %v10133_v63, %v716_v40  ;;  %1454 = vst.msk [vmem:[#allocation2 + $0xf8] sm:$0xff] %vm423_vm5, %v10228_v37  ;;  %v8129_v2 = vpop.f32.mrb[17].mxu0  ;;  %8395 = vmatmul.mubr.msk.f32.gmra.mrb[56].mxu0 %vm423_vm5, %v1952_v41  ;;  %v8195_v46 = vpop.f32.mrb[17].mxu1  ;;  %v7282_v40 = vld [vmem:[%s12919_s4 + $0x70] sm:$0xff] }
 0x10c   : > { %v1268_v39 = vadd.f32 %v1267_v58, %v1266_v32  ;;  %v957_v5 = vsub.f32 %v909_v44, %v10142_v9  ;;  %v827_v7 = vadd.f32 %v10133_v63, %v826_v57  ;;  %8397 = vmatprep.mubr.msk.f32.mxu0 %vm9649_vm1, %v9650_v6  ;;  %9580 = vmatpush3.bf16.msra.mxu0 %v9579_v28  ;;  %v1168_v46 = vpop.permute.xlu1 %1167 }
 0x10d   : > { %v1222_v8 = vmul.f32 %v10097_v47, %v935_v60  ;;  %v888_v12 = vmax.f32 %v717_v1, 0.0  ;;  %9581 = vmatprep.subr.bf16.mxu0 %v12928_v3  ;;  %v7283_v1 = vld [vmem:[%s12919_s4 + $0x78] sm:$0xff] }
 0x10e   : > { %v10242_v13 = vmul.f32 %v1158_v10, %v957_v5  ;;  %v721_v43 = vpop.f32.mrb[18].mxu0  ;;  %v910_v14 = vmax.f32 %v827_v7, 0.0  ;;  %v1953_v15 = vld [vmem:[#allocation2 + $0x3e] sm:$0xff]  ;;  %v831_v17 = vpop.f32.mrb[18].mxu1  ;;  %v9582_v5 = vpack.c.bf16 %v7283_v1, %v7282_v40 }
 0x10f   : > { %v1269_v20 = vsel %vm423_vm5, %v1222_v8, 0.0  ;;  %1433 = vst.msk [vmem:[#allocation2 + $0x50] sm:$0xff] %vm423_vm5, %v1222_v8  ;;  %v936_v47 = vsub.f32 %v888_v12, %v10142_v9  ;;  %v722_v21 = vadd.f32 %v10133_v63, %v721_v43  ;;  %v8132_v38 = vpop.f32.mrb[19].mxu0  ;;  %8398 = vmatmul.mubr.msk.f32.gmra.mrb[58].mxu0 %vm423_vm5, %v1953_v15  ;;  %v832_v22 = vadd.f32 %v10133_v63, %v831_v17  ;;  %v8198_v25 = vpop.f32.mrb[19].mxu1 }
 0x110   : > { %v1270_v26 = vadd.f32 %v1269_v20, %v1268_v39  ;;  %1455 = vst.msk [vmem:[#allocation2 + $0x100] sm:$0xff] %vm423_vm5, %v10242_v13  ;;  %v958_v27 = vsub.f32 %v910_v14, %v10142_v9  ;;  %8400 = vmatprep.mubr.msk.f32.mxu0 %vm9649_vm1, %v9650_v6  ;;  %9583 = vmatpush3.bf16.msra.mxu0 %v9582_v5 }
 0x111   : > { %v1223_v45 = vmul.f32 %v10099_v48, %v936_v47  ;;  %v889_v31 = vmax.f32 %v722_v21, 0.0  ;;  %v911_v32 = vmax.f32 %v832_v22, 0.0  ;;  %9590 = vmatprep.subr.bf16.mxu0 %v12928_v3  ;;  %v1173_v22 = vpop.permute.xlu0 %1172 }
 0x112   : > { %v10262_v33 = vmul.f32 %v1163_v30, %v958_v27  ;;  %v726_v34 = vpop.f32.mrb[20].mxu0  ;;  %v836_v35 = vpop.f32.mrb[20].mxu1  ;;  %v1954_v36 = vld [vmem:[#allocation2 + $0x46] sm:$0xff] }
 0x113   : > { %v1271_v41 = vsel %vm423_vm5, %v1223_v45, 0.0  ;;  %1434 = vst.msk [vmem:[#allocation2 + $0x58] sm:$0xff] %vm423_vm5, %v1223_v45  ;;  %v937_v44 = vsub.f32 %v889_v31, %v10142_v9  ;;  %v959_v48 = vsub.f32 %v911_v32, %v10142_v9  ;;  %v727_v57 = vadd.f32 %v10133_v63, %v726_v34  ;;  %v8135_v58 = vpop.f32.mrb[21].mxu0  ;;  %8401 = vmatmul.mubr.msk.f32.gmra.mrb[60].mxu0 %vm423_vm5, %v1954_v36  ;;  %v8201_v60 = vpop.f32.mrb[21].mxu1 }
 0x114   : > { %v1272_v2 = vadd.f32 %v1271_v41, %v1270_v26  ;;  %1456 = vst.msk [vmem:[#allocation2 + $0x108] sm:$0xff] %vm423_vm5, %v10262_v33  ;;  %v837_v39 = vadd.f32 %v10133_v63, %v836_v35  ;;  %8403 = vmatprep.mubr.msk.f32.mxu0 %vm9649_vm1, %v9650_v6 }
 0x115   : > { %v1224_v7 = vmul.f32 %v10101_v49, %v937_v44  ;;  %v10283_v8 = vmul.f32 %v1168_v46, %v959_v48  ;;  %v890_v10 = vmax.f32 %v727_v57, 0.0  ;;  %v1178_v48 = vpop.permute.xlu1 %1177 }
 0x116   : > { %v912_v12 = vmax.f32 %v837_v39, 0.0  ;;  %v731_v43 = vpop.f32.mrb[22].mxu0  ;;  %v841_v14 = vpop.f32.mrb[22].mxu1  ;;  %v1955_v15 = vld [vmem:[#allocation2 + $0x4e] sm:$0xff] }
 0x117   : > { %v1273_v17 = vsel %vm423_vm5, %v1224_v7, 0.0  ;;  %1435 = vst.msk [vmem:[#allocation2 + $0x60] sm:$0xff] %vm423_vm5, %v1224_v7  ;;  %1457 = vst.msk [vmem:[#allocation2 + $0x110] sm:$0xff] %vm423_vm5, %v10283_v8  ;;  %v938_v18 = vsub.f32 %v890_v10, %v10142_v9  ;;  %v732_v19 = vadd.f32 %v10133_v63, %v731_v43  ;;  %v8138_v49 = vpop.f32.mrb[23].mxu0  ;;  %8404 = vmatmul.mubr.msk.f32.gmra.mrb[62].mxu0 %vm423_vm5, %v1955_v15  ;;  %v8204_v20 = vpop.f32.mrb[23].mxu1 }
 0x118   : > { %v1274_v47 = vadd.f32 %v1273_v17, %v1272_v2  ;;  %v960_v21 = vsub.f32 %v912_v12, %v10142_v9  ;;  %v842_v38 = vadd.f32 %v10133_v63, %v841_v14  ;;  %8406 = vmatprep.mubr.msk.f32.mxu0 %vm9649_vm1, %v9650_v6  ;;  %v1183_v14 = vpop.permute.xlu0 %1182 }
 0x119   : > { %v1225_v25 = vmul.f32 %v10103_v50, %v938_v18  ;;  %v891_v26 = vmax.f32 %v732_v19, 0.0 }
 0x11a   : > { %v10298_v27 = vmul.f32 %v1173_v22, %v960_v21  ;;  %v913_v28 = vmax.f32 %v842_v38, 0.0  ;;  %v736_v30 = vpop.f32.mrb[24].mxu0  ;;  %v846_v45 = vpop.f32.mrb[24].mxu1  ;;  %v1956_v31 = vld [vmem:[#allocation2 + $0x56] sm:$0xff] }
 0x11b   : > { %v1275_v32 = vsel %vm423_vm5, %v1225_v25, 0.0  ;;  %1436 = vst.msk [vmem:[#allocation2 + $0x68] sm:$0xff] %vm423_vm5, %v1225_v25  ;;  %v939_v34 = vsub.f32 %v891_v26, %v10142_v9  ;;  %v737_v35 = vadd.f32 %v10133_v63, %v736_v30  ;;  %v847_v36 = vadd.f32 %v10133_v63, %v846_v45  ;;  %v8141_v40 = vpop.f32.mrb[25].mxu0  ;;  %8407 = vmatmul.mubr.msk.f32.gmra.mrb[64].mxu0 %vm423_vm5, %v1956_v31  ;;  %v8207_v50 = vpop.f32.mrb[25].mxu1 }
 0x11c   : > { %v1276_v41 = vadd.f32 %v1275_v32, %v1274_v47  ;;  %1458 = vst.msk [vmem:[#allocation2 + $0x118] sm:$0xff] %vm423_vm5, %v10298_v27  ;;  %v961_v44 = vsub.f32 %v913_v28, %v10142_v9  ;;  %8409 = vmatprep.mubr.msk.f32.mxu0 %vm9649_vm1, %v9650_v6  ;;  %v1188_v32 = vpop.permute.xlu1 %1187 }
 0x11d   : > { %v1226_v57 = vmul.f32 %v10105_v51, %v939_v34  ;;  %v892_v58 = vmax.f32 %v737_v35, 0.0  ;;  %v914_v60 = vmax.f32 %v847_v36, 0.0 }
 0x11e   : > { %v10312_v1 = vmul.f32 %v1178_v48, %v961_v44  ;;  %v741_v2 = vpop.f32.mrb[26].mxu0  ;;  %v851_v46 = vpop.f32.mrb[26].mxu1  ;;  %v1957_v39 = vld [vmem:[#allocation2 + $0x5e] sm:$0xff] }
 0x11f   : > { %v1277_v5 = vsel %vm423_vm5, %v1226_v57, 0.0  ;;  %1437 = vst.msk [vmem:[#allocation2 + $0x70] sm:$0xff] %vm423_vm5, %v1226_v57  ;;  %v940_v7 = vsub.f32 %v892_v58, %v10142_v9  ;;  %v962_v10 = vsub.f32 %v914_v60, %v10142_v9  ;;  %v742_v12 = vadd.f32 %v10133_v63, %v741_v2  ;;  %v8144_v43 = vpop.f32.mrb[27].mxu0  ;;  %8410 = vmatmul.mubr.msk.f32.gmra.mrb[66].mxu0 %vm423_vm5, %v1957_v39  ;;  %v8210_v51 = vpop.f32.mrb[27].mxu1 }
 0x120   : > { %v1278_v15 = vadd.f32 %v1277_v5, %v1276_v41  ;;  %1459 = vst.msk [vmem:[#allocation2 + $0x120] sm:$0xff] %vm423_vm5, %v10312_v1  ;;  %v852_v17 = vadd.f32 %v10133_v63, %v851_v46  ;;  %8412 = vmatprep.mubr.msk.f32.mxu0 %vm9649_vm1, %v9650_v6  ;;  %v1193_v5 = vpop.permute.xlu0 %1192 }
 0x121   : > { %v1227_v18 = vmul.f32 %v10107_v52, %v940_v7  ;;  %v10326_v19 = vmul.f32 %v1183_v14, %v962_v10  ;;  %v893_v49 = vmax.f32 %v742_v12, 0.0 }
 0x122   : > { %v915_v20 = vmax.f32 %v852_v17, 0.0  ;;  %v746_v47 = vpop.f32.mrb[28].mxu0  ;;  %v856_v21 = vpop.f32.mrb[28].mxu1  ;;  %v1958_v38 = vld [vmem:[#allocation2 + $0x66] sm:$0xff] }
 0x123   : > { %v1279_v22 = vsel %vm423_vm5, %v1227_v18, 0.0  ;;  %1438 = vst.msk [vmem:[#allocation2 + $0x78] sm:$0xff] %vm423_vm5, %v1227_v18  ;;  %1460 = vst.msk [vmem:[#allocation2 + $0x128] sm:$0xff] %vm423_vm5, %v10326_v19  ;;  %v941_v25 = vsub.f32 %v893_v49, %v10142_v9  ;;  %v747_v26 = vadd.f32 %v10133_v63, %v746_v47  ;;  %v8147_v28 = vpop.f32.mrb[29].mxu0  ;;  %8413 = vmatmul.mubr.msk.f32.gmra.mrb[68].mxu0 %vm423_vm5, %v1958_v38  ;;  %v8213_v52 = vpop.f32.mrb[29].mxu1 }
 0x124   : > { %v1280_v30 = vadd.f32 %v1279_v22, %v1278_v15  ;;  %v963_v45 = vsub.f32 %v915_v20, %v10142_v9  ;;  %v857_v31 = vadd.f32 %v10133_v63, %v856_v21  ;;  %8415 = vmatprep.mubr.msk.f32.mxu0 %vm9649_vm1, %v9650_v6  ;;  %v1198_v21 = vpop.permute.xlu1 %1197 }
 0x125   : > { %v1228_v34 = vmul.f32 %v10109_v53, %v941_v25  ;;  %v894_v35 = vmax.f32 %v747_v26, 0.0 }
 0x126   : > { %v10340_v36 = vmul.f32 %v1188_v32, %v963_v45  ;;  %v916_v40 = vmax.f32 %v857_v31, 0.0  ;;  %v751_v50 = vpop.f32.mrb[30].mxu0  ;;  %v861_v41 = vpop.f32.mrb[30].mxu1  ;;  %v1959_v44 = vld [vmem:[#allocation2 + $0x6e] sm:$0xff] }
 0x127   : > { %v1281_v48 = vsel %vm423_vm5, %v1228_v34, 0.0  ;;  %1439 = vst.msk [vmem:[#allocation2 + $0x80] sm:$0xff] %vm423_vm5, %v1228_v34  ;;  %v942_v57 = vsub.f32 %v894_v35, %v10142_v9  ;;  %v752_v58 = vadd.f32 %v10133_v63, %v751_v50  ;;  %v862_v60 = vadd.f32 %v10133_v63, %v861_v41  ;;  %v8150_v2 = vpop.f32.mrb[31].mxu0  ;;  %8416 = vmatmul.mubr.msk.f32.gmra.mrb[70].mxu0 %vm423_vm5, %v1959_v44  ;;  %v8216_v53 = vpop.f32.mrb[31].mxu1 }
 0x128   : > { %v1282_v46 = vadd.f32 %v1281_v48, %v1280_v30  ;;  %1461 = vst.msk [vmem:[#allocation2 + $0x130] sm:$0xff] %vm423_vm5, %v10340_v36  ;;  %v964_v39 = vsub.f32 %v916_v40, %v10142_v9  ;;  %8418 = vmatprep.mubr.msk.f32.mxu0 %vm9649_vm1, %v9650_v6  ;;  %v1203_v48 = vpop.permute.xlu0 %1202 }
 0x129   : > { %v1229_v7 = vmul.f32 %v10111_v54, %v942_v57  ;;  %v895_v10 = vmax.f32 %v752_v58, 0.0  ;;  %v917_v12 = vmax.f32 %v862_v60, 0.0 }
 0x12a   : > { %v10354_v43 = vmul.f32 %v1193_v5, %v964_v39  ;;  %v756_v51 = vpop.f32.mrb[32].mxu0  ;;  %v866_v14 = vpop.f32.mrb[32].mxu1  ;;  %v1960_v15 = vld [vmem:[#allocation2 + $0x76] sm:$0xff] }
 0x12b   : > { %v1283_v17 = vsel %vm423_vm5, %v1229_v7, 0.0  ;;  %1440 = vst.msk [vmem:[#allocation2 + $0x88] sm:$0xff] %vm423_vm5, %v1229_v7  ;;  %v943_v18 = vsub.f32 %v895_v10, %v10142_v9  ;;  %v965_v49 = vsub.f32 %v917_v12, %v10142_v9  ;;  %v757_v20 = vadd.f32 %v10133_v63, %v756_v51  ;;  %v8153_v47 = vpop.f32.mrb[33].mxu0  ;;  %8419 = vmatmul.mubr.msk.f32.gmra.mrb[72].mxu0 %vm423_vm5, %v1960_v15  ;;  %v8219_v54 = vpop.f32.mrb[33].mxu1 }
 0x12c   : > { %v1284_v38 = vadd.f32 %v1283_v17, %v1282_v46  ;;  %1462 = vst.msk [vmem:[#allocation2 + $0x138] sm:$0xff] %vm423_vm5, %v10354_v43  ;;  %v867_v22 = vadd.f32 %v10133_v63, %v866_v14  ;;  %8421 = vmatprep.mubr.msk.f32.mxu0 %vm9649_vm1, %v9650_v6  ;;  %v1208_v17 = vpop.permute.xlu1 %1207 }
 0x12d   : > { %v1230_v25 = vmul.f32 %v10113_v55, %v943_v18  ;;  %v10368_v26 = vmul.f32 %v1198_v21, %v965_v49  ;;  %v896_v28 = vmax.f32 %v757_v20, 0.0 }
 0x12e   : > { %v918_v52 = vmax.f32 %v867_v22, 0.0  ;;  %v761_v30 = vpop.f32.mrb[34].mxu0  ;;  %v871_v45 = vpop.f32.mrb[34].mxu1  ;;  %v1961_v31 = vld [vmem:[#allocation2 + $0x7e] sm:$0xff] }
 0x12f   : > { %v1285_v32 = vsel %vm423_vm5, %v1230_v25, 0.0  ;;  %1441 = vst.msk [vmem:[#allocation2 + $0x90] sm:$0xff] %vm423_vm5, %v1230_v25  ;;  %1463 = vst.msk [vmem:[#allocation2 + $0x140] sm:$0xff] %vm423_vm5, %v10368_v26  ;;  %v944_v34 = vsub.f32 %v896_v28, %v10142_v9  ;;  %v762_v35 = vadd.f32 %v10133_v63, %v761_v30  ;;  %v8156_v40 = vpop.f32.mrb[35].mxu0  ;;  %8422 = vmatmul.mubr.msk.f32.gmra.mrb[74].mxu0 %vm423_vm5, %v1961_v31  ;;  %v8222_v55 = vpop.f32.mrb[35].mxu1 }
 0x130   : > { %v1286_v50 = vadd.f32 %v1285_v32, %v1284_v38  ;;  %v966_v41 = vsub.f32 %v918_v52, %v10142_v9  ;;  %v872_v44 = vadd.f32 %v10133_v63, %v871_v45  ;;  %8424 = vmatprep.mubr.msk.f32.mxu0 %vm9649_vm1, %v9650_v6 }
 0x131   : > { %v1231_v57 = vmul.f32 %v10115_v56, %v944_v34  ;;  %v897_v58 = vmax.f32 %v762_v35, 0.0 }
 0x132   : > { %v10382_v60 = vmul.f32 %v1203_v48, %v966_v41  ;;  %v919_v2 = vmax.f32 %v872_v44, 0.0  ;;  %v766_v53 = vpop.f32.mrb[36].mxu0  ;;  %v876_v46 = vpop.f32.mrb[36].mxu1  ;;  %v1962_v39 = vld [vmem:[#allocation2 + $0x86] sm:$0xff] }
 0x133   : > { %v1287_v5 = vsel %vm423_vm5, %v1231_v57, 0.0  ;;  %1442 = vst.msk [vmem:[#allocation2 + $0x98] sm:$0xff] %vm423_vm5, %v1231_v57  ;;  %v945_v7 = vsub.f32 %v897_v58, %v10142_v9  ;;  %v767_v10 = vadd.f32 %v10133_v63, %v766_v53  ;;  %v877_v12 = vadd.f32 %v10133_v63, %v876_v46  ;;  %v8159_v51 = vpop.f32.mrb[37].mxu0  ;;  %8425 = vmatmul.mubr.msk.f32.gmra.mrb[76].mxu0 %vm423_vm5, %v1962_v39  ;;  %v8225_v56 = vpop.f32.mrb[37].mxu1 }
 0x134   : > { %v1288_v14 = vadd.f32 %v1287_v5, %v1286_v50  ;;  %1464 = vst.msk [vmem:[#allocation2 + $0x148] sm:$0xff] %vm423_vm5, %v10382_v60  ;;  %v967_v15 = vsub.f32 %v919_v2, %v10142_v9  ;;  %8427 = vmatprep.mubr.msk.f32.mxu0 %vm9649_vm1, %v9650_v6 }
 0x135   : > { %v1232_v18 = vmul.f32 %v10123_v59, %v945_v7  ;;  %v898_v49 = vmax.f32 %v767_v10, 0.0  ;;  %v920_v20 = vmax.f32 %v877_v12, 0.0  ;;  %v1213_v59 = vpop.permute.xlu0 %1212 }
 0x136   : > { %v10396_v47 = vmul.f32 %v1208_v17, %v967_v15  ;;  %v771_v54 = vpop.f32.mrb[38].mxu0  ;;  %v1963_v21 = vld [vmem:[#allocation2 + $0x8e] sm:$0xff] }
 0x137   : > { %v1289_v38 = vsel %vm423_vm5, %v1232_v18, 0.0  ;;  %1443 = vst.msk [vmem:[#allocation2 + $0xa0] sm:$0xff] %vm423_vm5, %v1232_v18  ;;  %v946_v22 = vsub.f32 %v898_v49, %v10142_v9  ;;  %v968_v25 = vsub.f32 %v920_v20, %v10142_v9  ;;  %v772_v28 = vadd.f32 %v10133_v63, %v771_v54  ;;  %v8162_v52 = vpop.f32.mrb[39].mxu0  ;;  %8428 = vmatmul.mubr.msk.f32.gmra.mrb[78].mxu0 %vm423_vm5, %v1963_v21 }
 0x138   : > { %v1290_v30 = vadd.f32 %v1289_v38, %v1288_v14  ;;  %1465 = vst.msk [vmem:[#allocation2 + $0x150] sm:$0xff] %vm423_vm5, %v10396_v47  ;;  %8430 = vmatprep.mubr.msk.f32.mxu0 %vm9649_vm1, %v9650_v6  ;;  %v1303_v38 = vsel %vm423_vm5, %v10172_v16, 0.0  ;;  %v1307_v52 = vsel %vm423_vm5, %v10200_v4, 0.0  ;;  %v1309_v16 = vsel %vm423_vm5, %v10214_v23, 0.0 }
 0x139   : > { %v1233_v45 = vmul.f32 %v10125_v61, %v946_v22  ;;  %v10409_v31 = vmul.f32 %v1213_v59, %v968_v25  ;;  %v899_v32 = vmax.f32 %v772_v28, 0.0  ;;  %v1305_v28 = vsel %vm423_vm5, %v10186_v29, 0.0 }
 0x13a   : > { %v776_v34 = vpop.f32.mrb[40].mxu0  ;;  %v1964_v35 = vld [vmem:[#allocation2 + $0x96] sm:$0xff]  ;;  %v1311_v29 = vsel %vm423_vm5, %v10228_v37, 0.0  ;;  %v1315_v23 = vsel %vm423_vm5, %v10262_v33, 0.0 }
 0x13b   : > { %v1291_v40 = vsel %vm423_vm5, %v1233_v45, 0.0  ;;  %1444 = vst.msk [vmem:[#allocation2 + $0xa8] sm:$0xff] %vm423_vm5, %v1233_v45  ;;  %v947_v55 = vsub.f32 %v899_v32, %v10142_v9  ;;  %v777_v50 = vadd.f32 %v10133_v63, %v776_v34  ;;  %v8165_v41 = vpop.f32.mrb[41].mxu0  ;;  %8431 = vmatmul.mubr.msk.f32.gmra.mrb[80].mxu0 %vm423_vm5, %v1964_v35  ;;  %v1971_v34 = vld [vmem:[#allocation2 + $0xce] sm:$0xff]  ;;  %v1313_v35 = vsel %vm423_vm5, %v10242_v13, 0.0 }
 0x13c   : > { %1466 = vst.msk [vmem:[#allocation2 + $0x158] sm:$0xf] %vm1335_vm6, %v10409_v31  ;;  %v1292_v61 = vadd.f32 %v1291_v40, %v1290_v30  ;;  %8433 = vmatprep.mubr.msk.f32.mxu0 %vm9649_vm1, %v9650_v6  ;;  %v1319_v13 = vsel %vm423_vm5, %v10298_v27, 0.0 }
 0x13d   : > { %v1234_v44 = vmul.f32 %v10128_v62, %v947_v55  ;;  %v900_v48 = vmax.f32 %v777_v50, 0.0  ;;  %v1972_v55 = vld [vmem:[#allocation2 + $0xd6] sm:$0xff]  ;;  %v1317_v50 = vsel %vm423_vm5, %v10283_v8, 0.0  ;;  %v1323_v8 = vsel %vm423_vm5, %v10326_v19, 0.0 }
 0x13e   : > { %v781_v57 = vpop.f32.mrb[42].mxu0  ;;  %v1965_v58 = vld [vmem:[#allocation2 + $0x9e] sm:$0xff] }
 0x13f   : > { %v1293_v2 = vsel %vm423_vm5, %v1234_v44, 0.0  ;;  %1445 = vst.msk [vmem:[#allocation2 + $0xb0] sm:$0xff] %vm423_vm5, %v1234_v44  ;;  %v948_v53 = vsub.f32 %v900_v48, %v10142_v9  ;;  %v782_v46 = vadd.f32 %v10133_v63, %v781_v57  ;;  %v8168_v39 = vpop.f32.mrb[43].mxu0  ;;  %8434 = vmatmul.mubr.msk.f32.gmra.mrb[82].mxu0 %vm423_vm5, %v1965_v58  ;;  %v1321_v44 = vsel %vm423_vm5, %v10312_v1, 0.0  ;;  %v1974_v48 = vld [vmem:[#allocation2 + $0xe6] sm:$0xff] }
 0x140   : > { %v1294_v5 = vadd.f32 %v1293_v2, %v1292_v61  ;;  %8436 = vmatprep.mubr.msk.f32.mxu0 %vm9649_vm1, %v9650_v6  ;;  %v1973_v61 = vld [vmem:[#allocation2 + $0xde] sm:$0xff]  ;;  %v1325_v58 = vsel %vm423_vm5, %v10340_v36, 0.0  ;;  %v1327_v1 = vsel %vm423_vm5, %v10354_v43, 0.0  ;;  %v1975_v2 = vld [vmem:[#allocation2 + $0xee] sm:$0xff]  ;;  %v1331_v36 = vsel %vm423_vm5, %v10382_v60, 0.0  ;;  %v1976_v39 = vld [vmem:[#allocation2 + $0xf6] sm:$0xff] }
 0x141   : > { %v1235_v62 = vmul.f32 %v10135_v0, %v948_v53  ;;  %v901_v7 = vmax.f32 %v782_v46, 0.0  ;;  %v1329_v46 = vsel %vm423_vm5, %v10368_v26, 0.0  ;;  %v1336_v26 = vsel %vm1335_vm6, %v10409_v31, 0.0  ;;  %v1508_v31 = vld [vmem:[%s12919_s4] sm:$0xff] }
 0x142   : > { %v1966_v10 = vld [vmem:[#allocation2 + $0xa6] sm:$0xff]  ;;  %v10443_v17 = vpop.f32.mrb[44].mxu0 }
 0x143   : > { %v1295_v12 = vsel %vm423_vm5, %v1235_v62, 0.0  ;;  %1446 = vst.msk [vmem:[#allocation2 + $0xb8] sm:$0xff] %vm423_vm5, %v1235_v62  ;;  %v949_v51 = vsub.f32 %v901_v7, %v10142_v9  ;;  %8437 = vmatmul.mubr.msk.f32.gmra.mrb[84].mxu0 %vm423_vm5, %v1966_v10  ;;  %v1299_v9 = vsel %vm423_vm5, %v10150_v24, 0.0  ;;  %v8378_v20 = vpop.f32.mrb[45].mxu0  ;;  %v1333_v62 = vsel %vm423_vm5, %v10396_v47, 0.0  ;;  %v1977_v7 = vld [vmem:[#allocation2 + $0xfe] sm:$0xff] }
 0x144   : > { %v1296_v63 = vadd.f32 %v1295_v12, %v1294_v5  ;;  %8439 = vmatprep.mubr.msk.f32.mxu0 %vm9649_vm1, %v9650_v6  ;;  %v1978_v12 = vld [vmem:[#allocation2 + $0x106] sm:$0xff]  ;;  %v1511_v20 = vld [vmem:[%s12919_s4 + $0x18] sm:$0xff] }
 0x145   : > { %v1236_v56 = vmul.f32 %v10144_v11, %v949_v51  ;;  %v1301_v11 = vsel %vm423_vm5, %v10161_v42, 0.0 }
 0x146   : > { %v1967_v14 = vld [vmem:[#allocation2 + $0xae] sm:$0xff]  ;;  %v10450_v21 = vpop.f32.mrb[46].mxu0 }
 0x147   : > { %v1297_v15 = vsel %vm423_vm5, %v1236_v56, 0.0  ;;  %1447 = vst.msk [vmem:[#allocation2 + $0xc0] sm:$0xff] %vm423_vm5, %v1236_v56  ;;  %8440 = vmatmul.mubr.msk.f32.gmra.mrb[86].mxu0 %vm423_vm5, %v1967_v14  ;;  %v8381_v24 = vpop.f32.mrb[47].mxu0  ;;  %v1509_v14 = vld [vmem:[%s12919_s4 + $0x8] sm:$0xff] }
 0x148   : > { %v1298_v0 = vadd.f32 %v1297_v15, %v1296_v63  ;;  %8442 = vmatprep.mubr.msk.f32.mxu0 %vm9649_vm1, %v9650_v6  ;;  %v1979_v63 = vld [vmem:[#allocation2 + $0x10e] sm:$0xff] }
 0x149   : > { %v7236_v24 = vld [vmem:[%s12919_s4 + $0x48] sm:$0xff] }
 0x14a   : > { %v1300_v18 = vadd.f32 %v1299_v9, %v1298_v0  ;;  %v1968_v49 = vld [vmem:[#allocation2 + $0xb6] sm:$0xff]  ;;  %v9561_v0 = vpack.c.bf16 %v1509_v14, %v1508_v31  ;;  %v10728_v14 = vld [vmem:[#allocation2 + $0x87] sm:$0xff] }
 0x14b   : > { %8443 = vmatmul.mubr.msk.f32.gmra.mrb[88].mxu0 %vm423_vm5, %v1968_v49  ;;  %v1980_v9 = vld [vmem:[#allocation2 + $0x116] sm:$0xff] }
 0x14c   : > { %v1302_v54 = vadd.f32 %v1301_v11, %v1300_v18  ;;  %8445 = vmatprep.mubr.msk.f32.mxu0 %vm9649_vm1, %v9650_v6  ;;  %v1510_v49 = vld [vmem:[%s12919_s4 + $0x10] sm:$0xff] }
 0x14d   : > { %v9564_v11 = vpack.c.bf16 %v1511_v20, %v1510_v49  ;;  %v1487_v49 = vld [vmem:[#allocation2 + $0xa5] sm:$0xff] }
 0x14e   : > { %v1304_v22 = vadd.f32 %v1303_v38, %v1302_v54  ;;  %v1969_v25 = vld [vmem:[#allocation2 + $0xbe] sm:$0xff]  ;;  %v1970_v30 = vld [vmem:[#allocation2 + $0xc6] sm:$0xff] }
 0x14f   : > { %8446 = vmatmul.mubr.msk.f32.gmra.mrb[90].mxu0 %vm423_vm5, %v1969_v25  ;;  %v1981_v54 = vld [vmem:[#allocation2 + $0x11e] sm:$0xff] }
 0x150   : > { %v1306_v42 = vadd.f32 %v1305_v28, %v1304_v22  ;;  %8448 = vmatprep.mubr.msk.f32.mxu0 %vm9649_vm1, %v9650_v6  ;;  %v7235_v38 = vld [vmem:[%s12919_s4 + $0x40] sm:$0xff] }
 0x151   : > { %v1467_v22 = vld [vmem:[#allocation2 + $0x5] sm:$0xff]  ;;  %v9573_v25 = vpack.c.bf16 %v7236_v24, %v7235_v38  ;;  %v1488_v38 = vld [vmem:[#allocation2 + $0xad] sm:$0xff] }
 0x152   : > { %v1308_v59 = vadd.f32 %v1307_v52, %v1306_v42  ;;  %v1982_v28 = vld [vmem:[#allocation2 + $0x126] sm:$0xff]  ;;  %v7237_v42 = vld [vmem:[%s12919_s4 + $0x50] sm:$0xff]  ;;  %v7238_v52 = vld [vmem:[%s12919_s4 + $0x58] sm:$0xff] }
 0x153   : > { %8449 = vmatmul.mubr.msk.f32.gmra.mrb[92].mxu0 %vm423_vm5, %v1970_v30  ;;  %v9576_v30 = vpack.c.bf16 %v7238_v52, %v7237_v42 }
 0x154   : > { %v1310_v45 = vadd.f32 %v1309_v16, %v1308_v59  ;;  %8451 = vmatprep.mubr.msk.f32.mxu0 %vm9649_vm1, %v9650_v6  ;;  %v1468_v59 = vld [vmem:[#allocation2 + $0xd] sm:$0xff] }
 0x155   : > { %v1983_v16 = vld [vmem:[#allocation2 + $0x12e] sm:$0xff] }
 0x156   : > { %v1312_v32 = vadd.f32 %v1311_v29, %v1310_v45  ;;  %v1984_v45 = vld [vmem:[#allocation2 + $0x136] sm:$0xff] }
 0x157   : > { %8452 = vmatmul.mubr.msk.f32.gmra.mrb[94].mxu0 %vm423_vm5, %v1971_v34  ;;  %v1469_v29 = vld [vmem:[#allocation2 + $0x15] sm:$0xff]  ;;  %v1470_v34 = vld [vmem:[#allocation2 + $0x1d] sm:$0xff] }
 0x158   : > { %v1314_v4 = vadd.f32 %v1313_v35, %v1312_v32  ;;  %8454 = vmatprep.mubr.msk.f32.mxu0 %vm9649_vm1, %v9650_v6  ;;  %v1985_v32 = vld [vmem:[#allocation2 + $0x13e] sm:$0xff]  ;;  %v1986_v35 = vld [vmem:[#allocation2 + $0x146] sm:$0xf] }
 0x15a   : > { %v1316_v40 = vadd.f32 %v1315_v23, %v1314_v4  ;;  %v1471_v4 = vld [vmem:[#allocation2 + $0x25] sm:$0xff]  ;;  %v10586_v23 = vld [vmem:[#allocation2 + $0x17] sm:$0xff] }
 0x15b   : > { %8455 = vmatmul.mubr.msk.f32.gmra.mrb[96].mxu0 %vm423_vm5, %v1972_v55  ;;  %v10595_v55 = vld [vmem:[#allocation2 + $0x1f] sm:$0xff] }
 0x15c   : > { %v1318_v37 = vadd.f32 %v1317_v50, %v1316_v40  ;;  %8457 = vmatprep.mubr.msk.f32.mxu0 %vm9649_vm1, %v9650_v6  ;;  %v1472_v40 = vld [vmem:[#allocation2 + $0x2d] sm:$0xff]  ;;  %v1473_v50 = vld [vmem:[#allocation2 + $0x35] sm:$0xff] }
 0x15e   : > { %v1320_v41 = vadd.f32 %v1319_v13, %v1318_v37  ;;  %v10604_v37 = vld [vmem:[#allocation2 + $0x27] sm:$0xff]  ;;  %v1474_v13 = vld [vmem:[#allocation2 + $0x3d] sm:$0xff] }
 0x15f   : > { %8458 = vmatmul.mubr.msk.f32.gmra.mrb[98].mxu0 %vm423_vm5, %v1973_v61  ;;  %v1475_v61 = vld [vmem:[#allocation2 + $0x45] sm:$0xff] }
 0x160   : > { %v1322_v33 = vadd.f32 %v1321_v44, %v1320_v41  ;;  %8460 = vmatprep.mubr.msk.f32.mxu0 %vm9649_vm1, %v9650_v6  ;;  %v10613_v41 = vld [vmem:[#allocation2 + $0x2f] sm:$0xff]  ;;  %v10622_v44 = vld [vmem:[#allocation2 + $0x37] sm:$0xff] }
 0x162   : > { %v1324_v57 = vadd.f32 %v1323_v8, %v1322_v33  ;;  %v1476_v33 = vld [vmem:[#allocation2 + $0x4d] sm:$0xff]  ;;  %v10631_v8 = vld [vmem:[#allocation2 + $0x3f] sm:$0xff] }
 0x163   : > { %8461 = vmatmul.mubr.msk.f32.gmra.mrb[100].mxu0 %vm423_vm5, %v1974_v48  ;;  %v1477_v48 = vld [vmem:[#allocation2 + $0x55] sm:$0xff] }
 0x164   : > { %8463 = vmatprep.mubr.msk.f32.mxu0 %vm9649_vm1, %v9650_v6  ;;  %v1326_v27 = vadd.f32 %v1325_v58, %v1324_v57  ;;  %v10640_v57 = vld [vmem:[#allocation2 + $0x47] sm:$0xff]  ;;  %v1478_v58 = vld [vmem:[#allocation2 + $0x5d] sm:$0xff] }
 0x166   : > { %v1328_v53 = vadd.f32 %v1327_v1, %v1326_v27  ;;  %v10649_v27 = vld [vmem:[#allocation2 + $0x4f] sm:$0xff]  ;;  %v1479_v1 = vld [vmem:[#allocation2 + $0x65] sm:$0xff] }
 0x167   : > { %8464 = vmatmul.mubr.msk.f32.gmra.mrb[102].mxu0 %vm423_vm5, %v1975_v2  ;;  %v7370_v2 = vld [vmem:[%s12919_s4 + $0xa0] sm:$0xff] }
 0x168   : > { %8466 = vmatprep.mubr.msk.f32.mxu0 %vm9649_vm1, %v9650_v6  ;;  %v1330_v19 = vadd.f32 %v1329_v46, %v1328_v53  ;;  %v7371_v53 = vld [vmem:[%s12919_s4 + $0xa8] sm:$0xff] }
 0x169   : > { %v9591_v46 = vpack.c.bf16 %v7371_v53, %v7370_v2  ;;  %v1494_v2 = vld [vmem:[#allocation2 + $0xdd] sm:$0xff] }
 0x16a   : > { %v1332_v5 = vadd.f32 %v1331_v36, %v1330_v19  ;;  %v10664_v19 = vld [vmem:[#allocation2 + $0x57] sm:$0xff]  ;;  %v1480_v36 = vld [vmem:[#allocation2 + $0x6d] sm:$0xff] }
 0x16b   : > { %8467 = vmatmul.mubr.msk.f32.gmra.mrb[104].mxu0 %vm423_vm5, %v1976_v39  ;;  %v7372_v39 = vld [vmem:[%s12919_s4 + $0xb0] sm:$0xff] }
 0x16c   : > { %8469 = vmatprep.mubr.msk.f32.mxu0 %vm9649_vm1, %v9650_v6  ;;  %v1334_v43 = vadd.f32 %v1333_v62, %v1332_v5  ;;  %v7373_v5 = vld [vmem:[%s12919_s4 + $0xb8] sm:$0xff] }
 0x16d   : > { %v9594_v62 = vpack.c.bf16 %v7373_v5, %v7372_v39  ;;  %v1495_v39 = vld [vmem:[#allocation2 + $0xe5] sm:$0xff] }
 0x16e   : > { %v1337_v10 = vadd.f32 %v1336_v26, %v1334_v43  ;;  %v10680_v43 = vld [vmem:[#allocation2 + $0x5f] sm:$0xff]  ;;  %v1481_v26 = vld [vmem:[#allocation2 + $0x75] sm:$0xff] }
 0x16f   : > { %8470 = vmatmul.mubr.msk.f32.gmra.mrb[106].mxu0 %vm423_vm5, %v1977_v7  ;;  %v10690_v7 = vld [vmem:[#allocation2 + $0x67] sm:$0xff] }
 0x170   : > { %8472 = vmatprep.mubr.msk.f32.mxu0 %vm9649_vm1, %v9650_v6  ;;  %v1338_v60 = vrot.slane %v1337_v10, 4 }
 0x172   : > { %v1339_v51 = vadd.f32 %v1338_v60, %v1337_v10  ;;  %v1482_v10 = vld [vmem:[#allocation2 + $0x7d] sm:$0xff]  ;;  %v10699_v60 = vld [vmem:[#allocation2 + $0x6f] sm:$0xff] }
 0x173   : > { %8473 = vmatmul.mubr.msk.f32.gmra.mrb[108].mxu0 %vm423_vm5, %v1978_v12  ;;  %v1483_v12 = vld [vmem:[#allocation2 + $0x85] sm:$0xff] }
 0x174   : > { %8475 = vmatprep.mubr.msk.f32.mxu0 %vm9649_vm1, %v9650_v6  ;;  %v1340_v47 = vrot.slane %v1339_v51, 2 }
 0x176   : > { %v1341_v56 = vadd.f32 %v1340_v47, %v1339_v51  ;;  %v10708_v51 = vld [vmem:[#allocation2 + $0x77] sm:$0xff]  ;;  %v1484_v47 = vld [vmem:[#allocation2 + $0x8d] sm:$0xff] }
 0x177   : > { %8476 = vmatmul.mubr.msk.f32.gmra.mrb[110].mxu0 %vm423_vm5, %v1979_v63  ;;  %v10717_v63 = vld [vmem:[#allocation2 + $0x7f] sm:$0xff] }
 0x178   : > { %8478 = vmatprep.mubr.msk.f32.mxu0 %vm9649_vm1, %v9650_v6  ;;  %v1342_v15 = vrot.slane %v1341_v56, 1 }
 0x17a   : > { %v1343_v18 = vadd.f32 %v1342_v15, %v1341_v56  ;;  %v1485_v56 = vld [vmem:[#allocation2 + $0x95] sm:$0xff]  ;;  %v1486_v15 = vld [vmem:[#allocation2 + $0x9d] sm:$0xff] }
 0x17b   : > { %8479 = vmatmul.mubr.msk.f32.gmra.mrb[112].mxu0 %vm423_vm5, %v1980_v9 }
 0x17c   : > { %8235 = vmatmul.mubr.msk.f32.vlgmr.msra.gmra.mrb[38].mxu1 %vm423_vm5, %v1343_v18  ;;  %8481 = vmatprep.mubr.msk.f32.mxu0 %vm9649_vm1, %v9650_v6  ;;  %v10739_v18 = vld [vmem:[#allocation2 + $0x8f] sm:$0xff] }
 0x17d   : > { %9562 = vmatpush3.bf16.msra.mxu1 %v9561_v0  ;;  %8245 = vmatprep.mubr.msk.f32.mxu1 %vm9649_vm1, %v9650_v6 }
 0x17e   : > { %9563 = vmatprep.subr.bf16.mxu1 %v12928_v3 }
 0x17f   : > { %8482 = vmatmul.mubr.msk.f32.gmra.mrb[114].mxu0 %vm423_vm5, %v1981_v54  ;;  %v10750_v54 = vld [vmem:[#allocation2 + $0x97] sm:$0xff] }
 0x180   : > { %8484 = vmatprep.mubr.msk.f32.mxu0 %vm9649_vm1, %v9650_v6 }
 0x181   : > { %9565 = vmatpush3.bf16.msra.mxu1 %v9564_v11 }
 0x182   : > { %9572 = vmatprep.subr.bf16.mxu1 %v12928_v3 }
 0x183   : > { %8485 = vmatmul.mubr.msk.f32.gmra.mrb[116].mxu0 %vm423_vm5, %v1982_v28  ;;  %v1489_v28 = vld [vmem:[#allocation2 + $0xb5] sm:$0xff] }
 0x184   : > { %8246 = vmatmul.mubr.msk.f32.vlgmr.msra.gmra.mrb[40].mxu1 %vm423_vm5, %v1467_v22  ;;  %8487 = vmatprep.mubr.msk.f32.mxu0 %vm9649_vm1, %v9650_v6 }
 0x185   : > { %9574 = vmatpush3.bf16.msra.mxu1 %v9573_v25  ;;  %8248 = vmatprep.mubr.msk.f32.mxu1 %vm9649_vm1, %v9650_v6  ;;  %v10761_v25 = vld [vmem:[#allocation2 + $0x9f] sm:$0xff] }
 0x186   : > { %9575 = vmatprep.subr.bf16.mxu1 %v12928_v3 }
 0x187   : > { %8488 = vmatmul.mubr.msk.f32.gmra.mrb[118].mxu0 %vm423_vm5, %v1983_v16 }
 0x188   : > { %8249 = vmatmul.mubr.msk.f32.gmra.mrb[42].mxu1 %vm423_vm5, %v1468_v59  ;;  %8490 = vmatprep.mubr.msk.f32.mxu0 %vm9649_vm1, %v9650_v6  ;;  %v10772_v59 = vld [vmem:[#allocation2 + $0xa7] sm:$0xff] }
 0x189   : > { %8251 = vmatprep.mubr.msk.f32.mxu1 %vm9649_vm1, %v9650_v6  ;;  %9577 = vmatpush3.bf16.msra.mxu1 %v9576_v30  ;;  %v1490_v30 = vld [vmem:[#allocation2 + $0xbd] sm:$0xff] }
 0x18a   : > { %9584 = vmatprep.subr.bf16.mxu1 %v12928_v3 }
 0x18b   : > { %8491 = vmatmul.mubr.msk.f32.gmra.mrb[120].mxu0 %vm423_vm5, %v1984_v45 }
 0x18c   : > { %8252 = vmatmul.mubr.msk.f32.gmra.mrb[44].mxu1 %vm423_vm5, %v1469_v29  ;;  %8493 = vmatprep.mubr.msk.f32.mxu0 %vm9649_vm1, %v9650_v6  ;;  %v10783_v29 = vld [vmem:[#allocation2 + $0xaf] sm:$0xff] }
 0x18d   : > { %8254 = vmatprep.mubr.msk.f32.mxu1 %vm9649_vm1, %v9650_v6 }
 0x18f   : > { %8494 = vmatmul.mubr.msk.f32.gmra.mrb[122].mxu0 %vm423_vm5, %v1985_v32  ;;  %v1491_v32 = vld [vmem:[#allocation2 + $0xc5] sm:$0xff] }
 0x190   : > { %8255 = vmatmul.mubr.msk.f32.gmra.mrb[46].mxu1 %vm423_vm5, %v1470_v34  ;;  %8496 = vmatprep.mubr.msk.f32.mxu0 %vm9649_vm1, %v9650_v6 }
 0x191   : > { %8257 = vmatprep.mubr.msk.f32.mxu1 %vm9649_vm1, %v9650_v6 }
 0x193   : > { %8497 = vmatmul.mubr.msk.f32.gmra.mrb[124].mxu0 %vm423_vm5, %v1986_v35 }
 0x194   : > { %8258 = vmatmul.mubr.msk.f32.gmra.mrb[48].mxu1 %vm423_vm5, %v1471_v4  ;;  %8638 = vmatprep.mubr.msk.f32.mxu0 %vm9649_vm1, %v9650_v6  ;;  %v10794_v4 = vld [vmem:[#allocation2 + $0xb7] sm:$0xff] }
 0x195   : > { %8260 = vmatprep.mubr.msk.f32.mxu1 %vm9649_vm1, %v9650_v6 }
 0x197   : > { %8639 = vmatmul.mubr.msk.f32.vlgmr.msra.gmra.mrb[126].mxu0 %vm423_vm5, %v10586_v23 }
 0x198   : > { %8261 = vmatmul.mubr.msk.f32.gmra.mrb[50].mxu1 %vm423_vm5, %v1472_v40  ;;  %8641 = vmatprep.mubr.msk.f32.mxu0 %vm9649_vm1, %v9650_v6  ;;  %v1492_v40 = vld [vmem:[#allocation2 + $0xcd] sm:$0xff] }
 0x199   : > { %8263 = vmatprep.mubr.msk.f32.mxu1 %vm9649_vm1, %v9650_v6  ;;  %9592 = vmatpush3.bf16.msra.mxu0 %v9591_v46 }
 0x19a   : > { %9593 = vmatprep.subr.bf16.mxu0 %v12928_v3 }
 0x19b   : > { %8642 = vmatmul.mubr.msk.f32.gmra.mrb[128].mxu0 %vm423_vm5, %v10595_v55 }
 0x19c   : > { %8264 = vmatmul.mubr.msk.f32.gmra.mrb[52].mxu1 %vm423_vm5, %v1473_v50  ;;  %8644 = vmatprep.mubr.msk.f32.mxu0 %vm9649_vm1, %v9650_v6 }
 0x19d   : > { %8266 = vmatprep.mubr.msk.f32.mxu1 %vm9649_vm1, %v9650_v6  ;;  %9595 = vmatpush3.bf16.msra.mxu0 %v9594_v62 }
 0x19e   : > { %9602 = vmatprep.subr.bf16.mxu0 %v12928_v3  ;;  %v7325_v3 = vld [vmem:[%s12919_s4 + $0x80] sm:$0xff] }
 0x19f   : > { %8645 = vmatmul.mubr.msk.f32.gmra.mrb[130].mxu0 %vm423_vm5, %v10604_v37 }
 0x1a0   : > { %8267 = vmatmul.mubr.msk.f32.gmra.mrb[54].mxu1 %vm423_vm5, %v1474_v13  ;;  %8647 = vmatprep.mubr.msk.f32.mxu0 %vm9649_vm1, %v9650_v6 }
 0x1a1   : > { %8269 = vmatprep.mubr.msk.f32.mxu1 %vm9649_vm1, %v9650_v6 }
 0x1a3   : > { %8648 = vmatmul.mubr.msk.f32.gmra.mrb[132].mxu0 %vm423_vm5, %v10613_v41 }
 0x1a4   : > { %8270 = vmatmul.mubr.msk.f32.gmra.mrb[56].mxu1 %vm423_vm5, %v1475_v61  ;;  %8650 = vmatprep.mubr.msk.f32.mxu0 %vm9649_vm1, %v9650_v6  ;;  %v10805_v61 = vld [vmem:[#allocation2 + $0xbf] sm:$0xff] }
 0x1a5   : > { %8272 = vmatprep.mubr.msk.f32.mxu1 %vm9649_vm1, %v9650_v6 }
 0x1a7   : > { %8651 = vmatmul.mubr.msk.f32.gmra.mrb[134].mxu0 %vm423_vm5, %v10622_v44 }
 0x1a8   : > { %8273 = vmatmul.mubr.msk.f32.gmra.mrb[58].mxu1 %vm423_vm5, %v1476_v33  ;;  %8653 = vmatprep.mubr.msk.f32.mxu0 %vm9649_vm1, %v9650_v6  ;;  %v1493_v33 = vld [vmem:[#allocation2 + $0xd5] sm:$0xff] }
 0x1a9   : > { %8275 = vmatprep.mubr.msk.f32.mxu1 %vm9649_vm1, %v9650_v6 }
 0x1ab   : > { %8654 = vmatmul.mubr.msk.f32.gmra.mrb[136].mxu0 %vm423_vm5, %v10631_v8 }
 0x1ac   : > { %8276 = vmatmul.mubr.msk.f32.gmra.mrb[60].mxu1 %vm423_vm5, %v1477_v48  ;;  %8656 = vmatprep.mubr.msk.f32.mxu0 %vm9649_vm1, %v9650_v6 }
 0x1ad   : > { %8278 = vmatprep.mubr.msk.f32.mxu1 %vm9649_vm1, %v9650_v6 }
 0x1af   : > { %8657 = vmatmul.mubr.msk.f32.gmra.mrb[138].mxu0 %vm423_vm5, %v10640_v57 }
 0x1b0   : > { %8279 = vmatmul.mubr.msk.f32.gmra.mrb[62].mxu1 %vm423_vm5, %v1478_v58  ;;  %8659 = vmatprep.mubr.msk.f32.mxu0 %vm9649_vm1, %v9650_v6 }
 0x1b1   : > { %8281 = vmatprep.mubr.msk.f32.mxu1 %vm9649_vm1, %v9650_v6 }
 0x1b3   : > { %8660 = vmatmul.mubr.msk.f32.gmra.mrb[140].mxu0 %vm423_vm5, %v10649_v27 }
 0x1b4   : > { %8282 = vmatmul.mubr.msk.f32.gmra.mrb[64].mxu1 %vm423_vm5, %v1479_v1  ;;  %8662 = vmatprep.mubr.msk.f32.mxu0 %vm9649_vm1, %v9650_v6  ;;  %v10816_v1 = vld [vmem:[#allocation2 + $0xc7] sm:$0xff] }
 0x1b5   : > { %8284 = vmatprep.mubr.msk.f32.mxu1 %vm9649_vm1, %v9650_v6 }
 0x1b7   : > { %8663 = vmatmul.mubr.msk.f32.gmra.mrb[142].mxu0 %vm423_vm5, %v10664_v19 }
 0x1b8   : > { %8285 = vmatmul.mubr.msk.f32.gmra.mrb[66].mxu1 %vm423_vm5, %v1480_v36  ;;  %8665 = vmatprep.mubr.msk.f32.mxu0 %vm9649_vm1, %v9650_v6  ;;  %v10827_v36 = vld [vmem:[#allocation2 + $0xcf] sm:$0xff] }
 0x1b9   : > { %8287 = vmatprep.mubr.msk.f32.mxu1 %vm9649_vm1, %v9650_v6 }
 0x1bb   : > { %8666 = vmatmul.mubr.msk.f32.gmra.mrb[144].mxu0 %vm423_vm5, %v10680_v43 }
 0x1bc   : > { %8288 = vmatmul.mubr.msk.f32.gmra.mrb[68].mxu1 %vm423_vm5, %v1481_v26  ;;  %8668 = vmatprep.mubr.msk.f32.mxu0 %vm9649_vm1, %v9650_v6  ;;  %v10838_v26 = vld [vmem:[#allocation2 + $0xd7] sm:$0xff] }
 0x1bd   : > { %8290 = vmatprep.mubr.msk.f32.mxu1 %vm9649_vm1, %v9650_v6 }
 0x1bf   : > { %8669 = vmatmul.mubr.msk.f32.gmra.mrb[146].mxu0 %vm423_vm5, %v10690_v7 }
 0x1c0   : > { %8291 = vmatmul.mubr.msk.f32.gmra.mrb[70].mxu1 %vm423_vm5, %v1482_v10  ;;  %8671 = vmatprep.mubr.msk.f32.mxu0 %vm9649_vm1, %v9650_v6  ;;  %v1496_v10 = vld [vmem:[#allocation2 + $0xed] sm:$0xff] }
 0x1c1   : > { %8293 = vmatprep.mubr.msk.f32.mxu1 %vm9649_vm1, %v9650_v6 }
 0x1c3   : > { %8672 = vmatmul.mubr.msk.f32.gmra.mrb[148].mxu0 %vm423_vm5, %v10699_v60 }
 0x1c4   : > { %8294 = vmatmul.mubr.msk.f32.gmra.mrb[72].mxu1 %vm423_vm5, %v1483_v12  ;;  %8674 = vmatprep.mubr.msk.f32.mxu0 %vm9649_vm1, %v9650_v6 }
 0x1c5   : > { %8296 = vmatprep.mubr.msk.f32.mxu1 %vm9649_vm1, %v9650_v6 }
 0x1c7   : > { %8675 = vmatmul.mubr.msk.f32.gmra.mrb[150].mxu0 %vm423_vm5, %v10708_v51 }
 0x1c8   : > { %8297 = vmatmul.mubr.msk.f32.gmra.mrb[74].mxu1 %vm423_vm5, %v1484_v47  ;;  %8677 = vmatprep.mubr.msk.f32.mxu0 %vm9649_vm1, %v9650_v6 }
 0x1c9   : > { %8299 = vmatprep.mubr.msk.f32.mxu1 %vm9649_vm1, %v9650_v6 }
 0x1cb   : > { %8678 = vmatmul.mubr.msk.f32.gmra.mrb[152].mxu0 %vm423_vm5, %v10717_v63 }
 0x1cc   : > { %8300 = vmatmul.mubr.msk.f32.gmra.mrb[76].mxu1 %vm423_vm5, %v1485_v56  ;;  %8680 = vmatprep.mubr.msk.f32.mxu0 %vm9649_vm1, %v9650_v6  ;;  %v10849_v56 = vld [vmem:[#allocation2 + $0xdf] sm:$0xff] }
 0x1cd   : > { %8302 = vmatprep.mubr.msk.f32.mxu1 %vm9649_vm1, %v9650_v6 }
 0x1ce   : > { %v10726_v31 = vpop.f32.mrb[48].mxu0 }
 0x1cf   : > { %v8384_v0 = vpop.f32.mrb[49].mxu0  ;;  %8681 = vmatmul.mubr.msk.f32.gmra.mrb[154].mxu0 %vm423_vm5, %v10728_v14 }
 0x1d0   : > { %8303 = vmatmul.mubr.msk.f32.gmra.mrb[78].mxu1 %vm423_vm5, %v1486_v15  ;;  %8683 = vmatprep.mubr.msk.f32.mxu0 %vm9649_vm1, %v9650_v6  ;;  %v1497_v15 = vld [vmem:[#allocation2 + $0xf5] sm:$0xff] }
 0x1d1   : > { %8305 = vmatprep.mubr.msk.f32.mxu1 %vm9649_vm1, %v9650_v6 }
 0x1d2   : > { %v10737_v9 = vpop.f32.mrb[50].mxu0 }
 0x1d3   : > { %v8387_v20 = vpop.f32.mrb[51].mxu0  ;;  %8684 = vmatmul.mubr.msk.f32.gmra.mrb[156].mxu0 %vm423_vm5, %v10739_v18 }
 0x1d4   : > { %8306 = vmatmul.mubr.msk.f32.gmra.mrb[80].mxu1 %vm423_vm5, %v1487_v49  ;;  %8686 = vmatprep.mubr.msk.f32.mxu0 %vm9649_vm1, %v9650_v6  ;;  %v10860_v20 = vld [vmem:[#allocation2 + $0xe7] sm:$0xff] }
 0x1d5   : > { %8308 = vmatprep.mubr.msk.f32.mxu1 %vm9649_vm1, %v9650_v6 }
 0x1d6   : > { %v10748_v11 = vpop.f32.mrb[52].mxu0 }
 0x1d7   : > { %v8390_v24 = vpop.f32.mrb[53].mxu0  ;;  %8687 = vmatmul.mubr.msk.f32.gmra.mrb[158].mxu0 %vm423_vm5, %v10750_v54 }
 0x1d8   : > { %8309 = vmatmul.mubr.msk.f32.gmra.mrb[82].mxu1 %vm423_vm5, %v1488_v38  ;;  %8689 = vmatprep.mubr.msk.f32.mxu0 %vm9649_vm1, %v9650_v6  ;;  %v1498_v38 = vld [vmem:[#allocation2 + $0xfd] sm:$0xff] }
 0x1d9   : > { %8311 = vmatprep.mubr.msk.f32.mxu1 %vm9649_vm1, %v9650_v6 }
 0x1da   : > { %v10759_v22 = vpop.f32.mrb[54].mxu0 }
 0x1db   : > { %v8393_v42 = vpop.f32.mrb[55].mxu0  ;;  %8690 = vmatmul.mubr.msk.f32.gmra.mrb[160].mxu0 %vm423_vm5, %v10761_v25 }
 0x1dc   : > { %8312 = vmatmul.mubr.msk.f32.gmra.mrb[84].mxu1 %vm423_vm5, %v1489_v28  ;;  %8692 = vmatprep.mubr.msk.f32.mxu0 %vm9649_vm1, %v9650_v6  ;;  %v10871_v42 = vld [vmem:[#allocation2 + $0xef] sm:$0xff] }
 0x1dd   : > { %8314 = vmatprep.mubr.msk.f32.mxu1 %vm9649_vm1, %v9650_v6 }
 0x1de   : > { %v10770_v52 = vpop.f32.mrb[56].mxu0 }
 0x1df   : > { %v8396_v16 = vpop.f32.mrb[57].mxu0  ;;  %8693 = vmatmul.mubr.msk.f32.gmra.mrb[162].mxu0 %vm423_vm5, %v10772_v59 }
 0x1e0   : > { %8315 = vmatmul.mubr.msk.f32.gmra.mrb[86].mxu1 %vm423_vm5, %v1490_v30  ;;  %8695 = vmatprep.mubr.msk.f32.mxu0 %vm9649_vm1, %v9650_v6  ;;  %v1499_v30 = vld [vmem:[#allocation2 + $0x105] sm:$0xff] }
 0x1e1   : > { %8317 = vmatprep.mubr.msk.f32.mxu1 %vm9649_vm1, %v9650_v6 }
 0x1e2   : > { %v10781_v45 = vpop.f32.mrb[58].mxu0 }
 0x1e3   : > { %v8399_v34 = vpop.f32.mrb[59].mxu0  ;;  %8696 = vmatmul.mubr.msk.f32.gmra.mrb[164].mxu0 %vm423_vm5, %v10783_v29 }
 0x1e4   : > { %8318 = vmatmul.mubr.msk.f32.gmra.mrb[88].mxu1 %vm423_vm5, %v1491_v32  ;;  %8698 = vmatprep.mubr.msk.f32.mxu0 %vm9649_vm1, %v9650_v6  ;;  %v10882_v34 = vld [vmem:[#allocation2 + $0xf7] sm:$0xff] }
 0x1e5   : > { %8320 = vmatprep.mubr.msk.f32.mxu1 %vm9649_vm1, %v9650_v6 }
 0x1e6   : > { %v10792_v35 = vpop.f32.mrb[60].mxu0 }
 0x1e7   : > { %v8402_v50 = vpop.f32.mrb[61].mxu0  ;;  %8699 = vmatmul.mubr.msk.f32.gmra.mrb[166].mxu0 %vm423_vm5, %v10794_v4 }
 0x1e8   : > { %8321 = vmatmul.mubr.msk.f32.gmra.mrb[90].mxu1 %vm423_vm5, %v1492_v40  ;;  %8701 = vmatprep.mubr.msk.f32.mxu0 %vm9649_vm1, %v9650_v6  ;;  %v1500_v40 = vld [vmem:[#allocation2 + $0x10d] sm:$0xff] }
 0x1e9   : > { %8323 = vmatprep.mubr.msk.f32.mxu1 %vm9649_vm1, %v9650_v6 }
 0x1ea   : > { %v10803_v13 = vpop.f32.mrb[62].mxu0 }
 0x1eb   : > { %v8405_v48 = vpop.f32.mrb[63].mxu0  ;;  %8702 = vmatmul.mubr.msk.f32.gmra.mrb[168].mxu0 %vm423_vm5, %v10805_v61 }
 0x1ec   : > { %8324 = vmatmul.mubr.msk.f32.gmra.mrb[92].mxu1 %vm423_vm5, %v1493_v33  ;;  %8704 = vmatprep.mubr.msk.f32.mxu0 %vm9649_vm1, %v9650_v6  ;;  %v10893_v48 = vld [vmem:[#allocation2 + $0xff] sm:$0xff] }
 0x1ed   : > { %8326 = vmatprep.mubr.msk.f32.mxu1 %vm9649_vm1, %v9650_v6 }
 0x1ee   : > { %v10814_v58 = vpop.f32.mrb[64].mxu0 }
 0x1ef   : > { %v8408_v53 = vpop.f32.mrb[65].mxu0  ;;  %8705 = vmatmul.mubr.msk.f32.gmra.mrb[170].mxu0 %vm423_vm5, %v10816_v1 }
 0x1f0   : > { %8327 = vmatmul.mubr.msk.f32.gmra.mrb[94].mxu1 %vm423_vm5, %v1494_v2  ;;  %8707 = vmatprep.mubr.msk.f32.mxu0 %vm9649_vm1, %v9650_v6  ;;  %v1501_v2 = vld [vmem:[#allocation2 + $0x115] sm:$0xff] }
 0x1f1   : > { %8329 = vmatprep.mubr.msk.f32.mxu1 %vm9649_vm1, %v9650_v6 }
 0x1f2   : > { %v10825_v46 = vpop.f32.mrb[66].mxu0 }
 0x1f3   : > { %v8411_v5 = vpop.f32.mrb[67].mxu0  ;;  %8708 = vmatmul.mubr.msk.f32.gmra.mrb[172].mxu0 %vm423_vm5, %v10827_v36 }
 0x1f4   : > { %8330 = vmatmul.mubr.msk.f32.gmra.mrb[96].mxu1 %vm423_vm5, %v1495_v39  ;;  %8710 = vmatprep.mubr.msk.f32.mxu0 %vm9649_vm1, %v9650_v6  ;;  %v10904_v5 = vld [vmem:[#allocation2 + $0x107] sm:$0xff] }
 0x1f5   : > { %8332 = vmatprep.mubr.msk.f32.mxu1 %vm9649_vm1, %v9650_v6 }
 0x1f6   : > { %v10836_v62 = vpop.f32.mrb[68].mxu0 }
 0x1f7   : > { %v8414_v12 = vpop.f32.mrb[69].mxu0  ;;  %8711 = vmatmul.mubr.msk.f32.gmra.mrb[174].mxu0 %vm423_vm5, %v10838_v26 }
 0x1f8   : > { %8333 = vmatmul.mubr.msk.f32.gmra.mrb[98].mxu1 %vm423_vm5, %v1496_v10  ;;  %8713 = vmatprep.mubr.msk.f32.mxu0 %vm9649_vm1, %v9650_v6  ;;  %v1502_v10 = vld [vmem:[#allocation2 + $0x11d] sm:$0xff] }
 0x1f9   : > { %8335 = vmatprep.mubr.msk.f32.mxu1 %vm9649_vm1, %v9650_v6 }
 0x1fa   : > { %v10847_v47 = vpop.f32.mrb[70].mxu0 }
 0x1fb   : > { %v8417_v0 = vpop.f32.mrb[71].mxu0  ;;  %8714 = vmatmul.mubr.msk.f32.gmra.mrb[176].mxu0 %vm423_vm5, %v10849_v56 }
 0x1fc   : > { %8336 = vmatmul.mubr.msk.f32.gmra.mrb[100].mxu1 %vm423_vm5, %v1497_v15  ;;  %8716 = vmatprep.mubr.msk.f32.mxu0 %vm9649_vm1, %v9650_v6  ;;  %v10915_v0 = vld [vmem:[#allocation2 + $0x10f] sm:$0xff] }
 0x1fd   : > { %8338 = vmatprep.mubr.msk.f32.mxu1 %vm9649_vm1, %v9650_v6 }
 0x1fe   : > { %v10858_v49 = vpop.f32.mrb[72].mxu0 }
 0x1ff   : > { %v8420_v24 = vpop.f32.mrb[73].mxu0  ;;  %8717 = vmatmul.mubr.msk.f32.gmra.mrb[178].mxu0 %vm423_vm5, %v10860_v20 }
 0x200   : > { %8339 = vmatmul.mubr.msk.f32.gmra.mrb[102].mxu1 %vm423_vm5, %v1498_v38  ;;  %8719 = vmatprep.mubr.msk.f32.mxu0 %vm9649_vm1, %v9650_v6  ;;  %v1503_v38 = vld [vmem:[#allocation2 + $0x125] sm:$0xff] }
 0x201   : > { %8341 = vmatprep.mubr.msk.f32.mxu1 %vm9649_vm1, %v9650_v6 }
 0x202   : > { %v10869_v28 = vpop.f32.mrb[74].mxu0 }
 0x203   : > { %v8423_v16 = vpop.f32.mrb[75].mxu0  ;;  %8720 = vmatmul.mubr.msk.f32.gmra.mrb[180].mxu0 %vm423_vm5, %v10871_v42 }
 0x204   : > { %8342 = vmatmul.mubr.msk.f32.gmra.mrb[104].mxu1 %vm423_vm5, %v1499_v30  ;;  %8722 = vmatprep.mubr.msk.f32.mxu0 %vm9649_vm1, %v9650_v6  ;;  %v10926_v16 = vld [vmem:[#allocation2 + $0x117] sm:$0xff] }
 0x205   : > { %8344 = vmatprep.mubr.msk.f32.mxu1 %vm9649_vm1, %v9650_v6  ;;  %12935 = vst [vmem:[#allocation5_spill] sm:$0xff] %v10926_v16 }
 0x206   : > { %v10880_v32 = vpop.f32.mrb[76].mxu0 }
 0x207   : > { %v8426_v50 = vpop.f32.mrb[77].mxu0  ;;  %8723 = vmatmul.mubr.msk.f32.gmra.mrb[182].mxu0 %vm423_vm5, %v10882_v34 }
 0x208   : > { %8345 = vmatmul.mubr.msk.f32.gmra.mrb[106].mxu1 %vm423_vm5, %v1500_v40  ;;  %8725 = vmatprep.mubr.msk.f32.mxu0 %vm9649_vm1, %v9650_v6  ;;  %v1504_v40 = vld [vmem:[#allocation2 + $0x12d] sm:$0xff] }
 0x209   : > { %8347 = vmatprep.mubr.msk.f32.mxu1 %vm9649_vm1, %v9650_v6 }
 0x20a   : > { %v10891_v33 = vpop.f32.mrb[78].mxu0 }
 0x20b   : > { %v8429_v53 = vpop.f32.mrb[79].mxu0  ;;  %8726 = vmatmul.mubr.msk.f32.gmra.mrb[184].mxu0 %vm423_vm5, %v10893_v48 }
 0x20c   : > { %8348 = vmatmul.mubr.msk.f32.gmra.mrb[108].mxu1 %vm423_vm5, %v1501_v2  ;;  %8728 = vmatprep.mubr.msk.f32.mxu0 %vm9649_vm1, %v9650_v6  ;;  %v10937_v53 = vld [vmem:[#allocation2 + $0x11f] sm:$0xff] }
 0x20d   : > { %8350 = vmatprep.mubr.msk.f32.mxu1 %vm9649_vm1, %v9650_v6  ;;  %12937 = vst [vmem:[#allocation7_spill] sm:$0xff] %v10937_v53 }
 0x20e   : > { %v10902_v39 = vpop.f32.mrb[80].mxu0 }
 0x20f   : > { %v8432_v12 = vpop.f32.mrb[81].mxu0  ;;  %8729 = vmatmul.mubr.msk.f32.gmra.mrb[186].mxu0 %vm423_vm5, %v10904_v5 }
 0x210   : > { %8351 = vmatmul.mubr.msk.f32.gmra.mrb[110].mxu1 %vm423_vm5, %v1502_v10  ;;  %8731 = vmatprep.mubr.msk.f32.mxu0 %vm9649_vm1, %v9650_v6  ;;  %v1505_v10 = vld [vmem:[#allocation2 + $0x135] sm:$0xff] }
 0x211   : > { %8353 = vmatprep.mubr.msk.f32.mxu1 %vm9649_vm1, %v9650_v6 }
 0x212   : > { %v10913_v15 = vpop.f32.mrb[82].mxu0 }
 0x213   : > { %v8435_v24 = vpop.f32.mrb[83].mxu0  ;;  %8732 = vmatmul.mubr.msk.f32.gmra.mrb[188].mxu0 %vm423_vm5, %v10915_v0 }
 0x214   : > { %8354 = vmatmul.mubr.msk.f32.gmra.mrb[112].mxu1 %vm423_vm5, %v1503_v38  ;;  %8734 = vmatprep.mubr.msk.f32.mxu0 %vm9649_vm1, %v9650_v6  ;;  %v10948_v24 = vld [vmem:[#allocation2 + $0x127] sm:$0xff] }
 0x215   : > { %8356 = vmatprep.mubr.msk.f32.mxu1 %vm9649_vm1, %v9650_v6  ;;  %12939 = vst [vmem:[#allocation9_spill] sm:$0xff] %v10948_v24 }
 0x216   : > { %v10924_v30 = vpop.f32.mrb[84].mxu0 }
 0x217   : > { %12934 = vst [vmem:[#allocation4_spill] sm:$0xff] %v10924_v30  ;;  %v8438_v50 = vpop.f32.mrb[85].mxu0  ;;  %8735 = vmatmul.mubr.msk.f32.gmra.mrb[190].mxu0 %vm423_vm5, %v10926_v16  ;;  %v10993_v16 = vld [vmem:[#allocation2 + $0x13f] sm:$0xff]  ;;  %v12943_v30 = vmov 0.0|0.0  }
 0x218   : > { %8357 = vmatmul.mubr.msk.f32.gmra.mrb[114].mxu1 %vm423_vm5, %v1504_v40  ;;  %8737 = vmatprep.mubr.msk.f32.mxu0 %vm9649_vm1, %v9650_v6  ;;  %v1506_v40 = vld [vmem:[#allocation2 + $0x13d] sm:$0xff] }
 0x219   : > { %8359 = vmatprep.mubr.msk.f32.mxu1 %vm9649_vm1, %v9650_v6 }
 0x21a   : > { %v10935_v2 = vpop.f32.mrb[86].mxu0 }
 0x21b   : > { %12936 = vst [vmem:[#allocation6_spill] sm:$0xff] %v10935_v2  ;;  %v8441_v12 = vpop.f32.mrb[87].mxu0  ;;  %8738 = vmatmul.mubr.msk.f32.gmra.mrb[192].mxu0 %vm423_vm5, %v10937_v53  ;;  %v10976_v2 = vld [vmem:[#allocation2 + $0x137] sm:$0xff] }
 0x21c   : > { %8360 = vmatmul.mubr.msk.f32.gmra.mrb[116].mxu1 %vm423_vm5, %v1505_v10  ;;  %8740 = vmatprep.mubr.msk.f32.mxu0 %vm9649_vm1, %v9650_v6  ;;  %v10959_v12 = vld [vmem:[#allocation2 + $0x12f] sm:$0xff] }
 0x21d   : > { %8362 = vmatprep.mubr.msk.f32.mxu1 %vm9649_vm1, %v9650_v6  ;;  %12941 = vst [vmem:[#allocation11_spill] sm:$0xff] %v10959_v12 }
 0x21e   : > { %v10946_v38 = vpop.f32.mrb[88].mxu0 }
 0x21f   : > { %12938 = vst [vmem:[#allocation8_spill] sm:$0xff] %v10946_v38  ;;  %v8444_v50 = vpop.f32.mrb[89].mxu0  ;;  %8741 = vmatmul.mubr.msk.f32.gmra.mrb[194].mxu0 %vm423_vm5, %v10948_v24  ;;  %v1507_v24 = vld [vmem:[#allocation2 + $0x145] sm:$0xf] }
 0x220   : > { %8363 = vmatmul.mubr.msk.f32.gmra.mrb[118].mxu1 %vm423_vm5, %v1506_v40  ;;  %8743 = vmatprep.mubr.msk.f32.mxu0 %vm9649_vm1, %v9650_v6  ;;  %v7326_v50 = vld [vmem:[%s12919_s4 + $0x88] sm:$0xff] }
 0x221   : > { %8365 = vmatprep.mubr.msk.f32.mxu1 %vm9649_vm1, %v9650_v6  ;;  %v9585_v38 = vpack.c.bf16 %v7326_v50, %v7325_v3  ;;  %v2509_v3 = vld [vmem:[#allocation2 + $0xf] sm:$0xff] }
 0x222   : > { %v10957_v10 = vpop.f32.mrb[90].mxu0 }
 0x223   : > { %12940 = vst [vmem:[#allocation10_spill] sm:$0xff] %v10957_v10  ;;  %v8447_v40 = vpop.f32.mrb[91].mxu0  ;;  %8744 = vmatmul.mubr.msk.f32.gmra.mrb[196].mxu0 %vm423_vm5, %v10959_v12  ;;  %v2508_v10 = vld [vmem:[#allocation2 + $0x7] sm:$0xff] }
 0x224   : > { %8366 = vmatmul.mubr.msk.f32.gmra.mrb[120].mxu1 %vm423_vm5, %v1507_v24  ;;  %8746 = vmatprep.mubr.msk.f32.mxu0 %vm9649_vm1, %v9650_v6  ;;  %v7327_v40 = vld [vmem:[%s12919_s4 + $0x90] sm:$0xff]  ;;  %v7328_v24 = vld [vmem:[%s12919_s4 + $0x98] sm:$0xff] }
 0x225   : > { %8507 = vmatprep.mubr.msk.f32.mxu1 %vm9649_vm1, %v9650_v6  ;;  %v9588_v50 = vpack.c.bf16 %v7328_v24, %v7327_v40 }
 0x226   : > { %v10974_v53 = vpop.f32.mrb[92].mxu0 }
 0x227   : > { %12942 = vst [vmem:[#allocation12_spill] sm:$0xff] %v10974_v53  ;;  %v8450_v12 = vpop.f32.mrb[93].mxu0  ;;  %8747 = vmatmul.mubr.msk.f32.gmra.mrb[198].mxu0 %vm423_vm5, %v10976_v2 }
 0x228   : > { %8508 = vmatmul.mubr.msk.f32.vlgmr.msra.gmra.mrb[122].mxu1 %vm423_vm5, %v2508_v10  ;;  %8749 = vmatprep.mubr.msk.f32.mxu0 %vm9649_vm1, %v9650_v6  ;;  %v3108_v10 = vld [vmem:[#allocation2 + $0x147] sm:$0xff] }
 0x229   : > { %9586 = vmatpush3.bf16.msra.mxu1 %v9585_v38  ;;  %8510 = vmatprep.mubr.msk.f32.mxu1 %vm9649_vm1, %v9650_v6 }
 0x22a   : > { %v10991_v53 = vpop.f32.mrb[94].mxu0  ;;  %9587 = vmatprep.subr.bf16.mxu1 %v12943_v30 }
 0x22b   : > { %v8453_v12 = vpop.f32.mrb[95].mxu0  ;;  %8750 = vmatmul.mubr.msk.f32.gmra.mrb[200].mxu0 %vm423_vm5, %v10993_v16 }
 0x22c   : > { %8511 = vmatmul.mubr.msk.f32.gmra.mrb[124].mxu1 %vm423_vm5, %v2509_v3  ;;  %8752 = vmatprep.mubr.msk.f32.mxu0 %vm9649_vm1, %v9650_v6  ;;  %v3109_v3 = vld [vmem:[#allocation2 + $0x14f] sm:$0xff]  ;;  %v3110_v12 = vld [vmem:[#allocation2 + $0x157] sm:$0xf] }
 0x22d   : > { %8513 = vmatprep.mubr.msk.f32.mxu1 %vm9649_vm1, %v9650_v6  ;;  %9589 = vmatpush3.bf16.msra.mxu1 %v9588_v50 }
 0x22e   : > { %v11003_v38 = vpop.f32.mrb[96].mxu0  ;;  %9596 = vmatprep.subr.bf16.mxu1 %v12943_v30 }
 0x22f   : > { %v8456_v40 = vpop.f32.mrb[97].mxu0  ;;  %8753 = vmatmul.mubr.msk.f32.gmra.mrb[202].mxu0 %vm423_vm5, %v3108_v10 }
 0x230   : > { %8514 = vmatmul.mubr.msk.f32.gmra.mrb[126].mxu1 %vm423_vm5, %v10586_v23  ;;  %8755 = vmatprep.mubr.msk.f32.mxu0 %vm9649_vm1, %v9650_v6  ;;  %v4194_v40 = vld [vmem:[#allocation2 + $0x19] sm:$0xff] }
 0x231   : > { %8516 = vmatprep.mubr.msk.f32.mxu1 %vm9649_vm1, %v9650_v6 }
 0x232   : > { %v11013_v24 = vpop.f32.mrb[98].mxu0 }
 0x233   : > { %v8459_v50 = vpop.f32.mrb[99].mxu0  ;;  %8756 = vmatmul.mubr.msk.f32.gmra.mrb[204].mxu0 %vm423_vm5, %v3109_v3 }
 0x234   : > { %8517 = vmatmul.mubr.msk.f32.gmra.mrb[128].mxu1 %vm423_vm5, %v10595_v55  ;;  %8758 = vmatprep.mubr.msk.f32.mxu0 %vm9649_vm1, %v9650_v6  ;;  %v4195_v50 = vld [vmem:[#allocation2 + $0x21] sm:$0xff] }
 0x235   : > { %8519 = vmatprep.mubr.msk.f32.mxu1 %vm9649_vm1, %v9650_v6 }
 0x236   : > { %v11022_v23 = vpop.f32.mrb[100].mxu0 }
 0x237   : > { %v8462_v10 = vpop.f32.mrb[101].mxu0  ;;  %8759 = vmatmul.mubr.msk.f32.gmra.mrb[206].mxu0 %vm423_vm5, %v3110_v12 }
 0x238   : > { %8520 = vmatmul.mubr.msk.f32.gmra.mrb[130].mxu1 %vm423_vm5, %v10604_v37  ;;  %8900 = vmatprep.mubr.msk.f32.mxu0 %vm9649_vm1, %v9650_v6  ;;  %v4196_v10 = vld [vmem:[#allocation2 + $0x29] sm:$0xff] }
 0x239   : > { %8522 = vmatprep.mubr.msk.f32.mxu1 %vm9649_vm1, %v9650_v6 }
 0x23a   : > { %v11031_v55 = vpop.f32.mrb[102].mxu0 }
 0x23b   : > { %v8465_v3 = vpop.f32.mrb[103].mxu0  ;;  %8901 = vmatmul.mubr.msk.f32.vlgmr.msra.gmra.mrb[208].mxu0 %vm423_vm5, %v4194_v40 }
 0x23c   : > { %8523 = vmatmul.mubr.msk.f32.gmra.mrb[132].mxu1 %vm423_vm5, %v10613_v41  ;;  %8903 = vmatprep.mubr.msk.f32.mxu0 %vm9649_vm1, %v9650_v6  ;;  %v4197_v3 = vld [vmem:[#allocation2 + $0x31] sm:$0xff] }
 0x23d   : > { %8525 = vmatprep.mubr.msk.f32.mxu1 %vm9649_vm1, %v9650_v6 }
 0x23e   : > { %v11040_v37 = vpop.f32.mrb[104].mxu0 }
 0x23f   : > { %v8468_v12 = vpop.f32.mrb[105].mxu0  ;;  %8904 = vmatmul.mubr.msk.f32.gmra.mrb[210].mxu0 %vm423_vm5, %v4195_v50 }
 0x240   : > { %8526 = vmatmul.mubr.msk.f32.gmra.mrb[134].mxu1 %vm423_vm5, %v10622_v44  ;;  %8906 = vmatprep.mubr.msk.f32.mxu0 %vm9649_vm1, %v9650_v6  ;;  %v4198_v12 = vld [vmem:[#allocation2 + $0x39] sm:$0xff] }
 0x241   : > { %8528 = vmatprep.mubr.msk.f32.mxu1 %vm9649_vm1, %v9650_v6 }
 0x242   : > { %v11049_v41 = vpop.f32.mrb[106].mxu0 }
 0x243   : > { %v8471_v40 = vpop.f32.mrb[107].mxu0  ;;  %8907 = vmatmul.mubr.msk.f32.gmra.mrb[212].mxu0 %vm423_vm5, %v4196_v10 }
 0x244   : > { %8529 = vmatmul.mubr.msk.f32.gmra.mrb[136].mxu1 %vm423_vm5, %v10631_v8  ;;  %8909 = vmatprep.mubr.msk.f32.mxu0 %vm9649_vm1, %v9650_v6  ;;  %v4199_v40 = vld [vmem:[#allocation2 + $0x41] sm:$0xff] }
 0x245   : > { %8531 = vmatprep.mubr.msk.f32.mxu1 %vm9649_vm1, %v9650_v6 }
 0x246   : > { %v11058_v44 = vpop.f32.mrb[108].mxu0 }
 0x247   : > { %v8474_v50 = vpop.f32.mrb[109].mxu0  ;;  %8910 = vmatmul.mubr.msk.f32.gmra.mrb[214].mxu0 %vm423_vm5, %v4197_v3 }
 0x248   : > { %8532 = vmatmul.mubr.msk.f32.gmra.mrb[138].mxu1 %vm423_vm5, %v10640_v57  ;;  %8912 = vmatprep.mubr.msk.f32.mxu0 %vm9649_vm1, %v9650_v6  ;;  %v1422_v50 = vld [vmem:[%s12924_s9] sm:$0x1] }
 0x249   : > { %8534 = vmatprep.mubr.msk.f32.mxu1 %vm9649_vm1, %v9650_v6 }
 0x24a   : > { %v11067_v8 = vpop.f32.mrb[110].mxu0 }
 0x24b   : > { %v8477_v10 = vpop.f32.mrb[111].mxu0  ;;  %8913 = vmatmul.mubr.msk.f32.gmra.mrb[216].mxu0 %vm423_vm5, %v4198_v12 }
 0x24c   : > { %8535 = vmatmul.mubr.msk.f32.gmra.mrb[140].mxu1 %vm423_vm5, %v10649_v27  ;;  %8915 = vmatprep.mubr.msk.f32.mxu0 %vm9649_vm1, %v9650_v6 }
 0x24d   : > { %8537 = vmatprep.mubr.msk.f32.mxu1 %vm9649_vm1, %v9650_v6 }
 0x24e   : > { %v11076_v57 = vpop.f32.mrb[112].mxu0 }
 0x24f   : > { %12944 = vst [vmem:[#allocation13_spill] sm:$0xff] %v11076_v57  ;;  %v1417_v3 = vpop.f32.mrb[38].mxu1  ;;  %v8480_v10 = vpop.f32.mrb[113].mxu0  ;;  %8916 = vmatmul.mubr.msk.f32.gmra.mrb[218].mxu0 %vm423_vm5, %v4199_v40  ;;  %v4200_v40 = vld [vmem:[#allocation2 + $0x49] sm:$0xff] }
 0x250   : > { %v1421_v12 = vmul.f32 0.00390625, %v1417_v3  ;;  %8538 = vmatmul.mubr.msk.f32.gmra.mrb[142].mxu1 %vm423_vm5, %v10664_v19  ;;  %v8236_v27 = vpop.f32.mrb[39].mxu1  ;;  %8918 = vmatprep.mubr.msk.f32.mxu0 %vm9649_vm1, %v9650_v6 }
 0x251   : > { %8540 = vmatprep.mubr.msk.f32.mxu1 %vm9649_vm1, %v9650_v6  ;;  %v4201_v27 = vld [vmem:[#allocation2 + $0x51] sm:$0xff] }
 0x252   : > { %v1423_v57 = vadd.f32 %v1422_v50, %v1421_v12  ;;  %v11092_v10 = vpop.f32.mrb[114].mxu0 }
 0x253   : > { %v8483_v3 = vpop.f32.mrb[115].mxu0  ;;  %8919 = vmatmul.mubr.msk.f32.gmra.mrb[220].mxu0 %vm423_vm5, %v4200_v40 }
 0x254   : > { %1425 = vst.msk [vmem:[%s422_s18] sm:$0x1] %vm1424_vm7, %v1423_v57  ;;  %8541 = vmatmul.mubr.msk.f32.gmra.mrb[144].mxu1 %vm423_vm5, %v10680_v43  ;;  %8921 = vmatprep.mubr.msk.f32.mxu0 %vm9649_vm1, %v9650_v6  ;;  %v4202_v57 = vld [vmem:[#allocation2 + $0x59] sm:$0xff] }
 0x255   : > { %8543 = vmatprep.mubr.msk.f32.mxu1 %vm9649_vm1, %v9650_v6 }
 0x256   : > { %v11101_v19 = vpop.f32.mrb[116].mxu0 }
 0x257   : > { %12945 = vst [vmem:[#allocation14_spill] sm:$0xff] %v11101_v19  ;;  %v1701_v50 = vpop.f32.mrb[40].mxu1  ;;  %v8486_v12 = vpop.f32.mrb[117].mxu0  ;;  %8922 = vmatmul.mubr.msk.f32.gmra.mrb[222].mxu0 %vm423_vm5, %v4201_v27 }
 0x258   : > { %1905 = vst.msk [vmem:[#allocation3] sm:$0xff] %vm423_vm5, %v1701_v50  ;;  %v8247_v40 = vpop.f32.mrb[41].mxu1  ;;  %8544 = vmatmul.mubr.msk.f32.gmra.mrb[146].mxu1 %vm423_vm5, %v10690_v7  ;;  %8924 = vmatprep.mubr.msk.f32.mxu0 %vm9649_vm1, %v9650_v6  ;;  %v7460_v7 = vld [vmem:[%s12919_s4 + $0xe0] sm:$0xff]  ;;  %v7461_v50 = vld [vmem:[%s12919_s4 + $0xe8] sm:$0xff] }
 0x259   : > { %8546 = vmatprep.mubr.msk.f32.mxu1 %vm9649_vm1, %v9650_v6  ;;  %v4203_v40 = vld [vmem:[#allocation2 + $0x61] sm:$0xff] }
 0x25a   : > { %v11111_v43 = vpop.f32.mrb[118].mxu0 }
 0x25b   : > { %12946 = vst [vmem:[#allocation15_spill] sm:$0xff] %v11111_v43  ;;  %v1706_v3 = vpop.f32.mrb[42].mxu1  ;;  %v8489_v19 = vpop.f32.mrb[119].mxu0  ;;  %8925 = vmatmul.mubr.msk.f32.gmra.mrb[224].mxu0 %vm423_vm5, %v4202_v57 }
 0x25c   : > { %1906 = vst.msk [vmem:[#allocation3 + $0x8] sm:$0xff] %vm423_vm5, %v1706_v3  ;;  %v8250_v27 = vpop.f32.mrb[43].mxu1  ;;  %8547 = vmatmul.mubr.msk.f32.gmra.mrb[148].mxu1 %vm423_vm5, %v10699_v60  ;;  %8927 = vmatprep.mubr.msk.f32.mxu0 %vm9649_vm1, %v9650_v6  ;;  %v9603_v19 = vpack.c.bf16 %v7461_v50, %v7460_v7  ;;  %v7462_v7 = vld [vmem:[%s12919_s4 + $0xf0] sm:$0xff]  ;;  %v7463_v50 = vld [vmem:[%s12919_s4 + $0xf8] sm:$0xff] }
 0x25d   : > { %8549 = vmatprep.mubr.msk.f32.mxu1 %vm9649_vm1, %v9650_v6 }
 0x25e   : > { %v11127_v12 = vpop.f32.mrb[120].mxu0  ;;  %9604 = vmatpush3.bf16.msra.mxu0 %v9603_v19 }
 0x25f   : > { %12947 = vst [vmem:[#allocation16_spill] sm:$0xff] %v11127_v12  ;;  %v2385_v57 = vld [vmem:[#allocation3] sm:$0xff]  ;;  %v1711_v60 = vpop.f32.mrb[44].mxu1  ;;  %v8492_v3 = vpop.f32.mrb[121].mxu0  ;;  %8928 = vmatmul.mubr.msk.f32.gmra.mrb[226].mxu0 %vm423_vm5, %v4203_v40  ;;  %9605 = vmatprep.subr.bf16.mxu0 %v12943_v30 }
 0x260   : > { %v2426_v27 = vadd.f32 %v2385_v57, %v10443_v17  ;;  %1907 = vst.msk [vmem:[#allocation3 + $0x10] sm:$0xff] %vm423_vm5, %v1711_v60  ;;  %v8253_v43 = vpop.f32.mrb[45].mxu1  ;;  %8550 = vmatmul.mubr.msk.f32.gmra.mrb[150].mxu1 %vm423_vm5, %v10708_v51  ;;  %8930 = vmatprep.mubr.msk.f32.mxu0 %vm9649_vm1, %v9650_v6  ;;  %v9606_v17 = vpack.c.bf16 %v7463_v50, %v7462_v7  ;;  %v4204_v51 = vld [vmem:[#allocation2 + $0x69] sm:$0xff] }
 0x261   : > { %8552 = vmatprep.mubr.msk.f32.mxu1 %vm9649_vm1, %v9650_v6 }
 0x262   : > { %2467 = vst.msk [vmem:[#allocation3] sm:$0xff] %vm423_vm5, %v2426_v27  ;;  %v11145_v43 = vpop.f32.mrb[122].mxu0  ;;  %9607 = vmatpush3.bf16.msra.mxu0 %v9606_v17  ;;  %v4205_v27 = vld [vmem:[#allocation2 + $0x71] sm:$0xff] }
 0x263   : > { %v2386_v40 = vld [vmem:[#allocation3 + $0x8] sm:$0xff]  ;;  %v1716_v57 = vpop.f32.mrb[46].mxu1  ;;  %v8495_v60 = vpop.f32.mrb[123].mxu0  ;;  %8931 = vmatmul.mubr.msk.f32.gmra.mrb[228].mxu0 %vm423_vm5, %v4204_v51  ;;  %9614 = vmatprep.subr.bf16.mxu0 %v12943_v30 }
 0x264   : > { %v2427_v3 = vadd.f32 %v2386_v40, %v10450_v21  ;;  %1908 = vst.msk [vmem:[#allocation3 + $0x18] sm:$0xff] %vm423_vm5, %v1716_v57  ;;  %v8256_v12 = vpop.f32.mrb[47].mxu1  ;;  %8553 = vmatmul.mubr.msk.f32.gmra.mrb[152].mxu1 %vm423_vm5, %v10717_v63  ;;  %8933 = vmatprep.mubr.msk.f32.mxu0 %vm9649_vm1, %v9650_v6  ;;  %v4206_v51 = vld [vmem:[#allocation2 + $0x79] sm:$0xff] }
 0x265   : > { %8555 = vmatprep.mubr.msk.f32.mxu1 %vm9649_vm1, %v9650_v6 }
 0x266   : > { %2468 = vst.msk [vmem:[#allocation3 + $0x8] sm:$0xff] %vm423_vm5, %v2427_v3  ;;  %v11158_v19 = vpop.f32.mrb[124].mxu0 }
 0x267   : > { %v2387_v21 = vld [vmem:[#allocation3 + $0x10] sm:$0xff]  ;;  %v1721_v7 = vpop.f32.mrb[48].mxu1  ;;  %v8498_v12 = vpop.f32.mrb[125].mxu0  ;;  %8934 = vmatmul.mubr.msk.f32.gmra.mrb[230].mxu0 %vm423_vm5, %v4205_v27 }
 0x268   : > { %v2428_v63 = vadd.f32 %v2387_v21, %v10726_v31  ;;  %1909 = vst.msk [vmem:[#allocation3 + $0x20] sm:$0xff] %vm423_vm5, %v1721_v7  ;;  %v8259_v50 = vpop.f32.mrb[49].mxu1  ;;  %8556 = vmatmul.mubr.msk.f32.gmra.mrb[154].mxu1 %vm423_vm5, %v10728_v14  ;;  %8936 = vmatprep.mubr.msk.f32.mxu0 %vm9649_vm1, %v9650_v6  ;;  %v4207_v27 = vld [vmem:[#allocation2 + $0x81] sm:$0xff] }
 0x269   : > { %8558 = vmatprep.mubr.msk.f32.mxu1 %vm9649_vm1, %v9650_v6  ;;  %v4208_v50 = vld [vmem:[#allocation2 + $0x89] sm:$0xff] }
 0x26a   : > { %2469 = vst.msk [vmem:[#allocation3 + $0x10] sm:$0xff] %vm423_vm5, %v2428_v63  ;;  %v11171_v17 = vpop.f32.mrb[126].mxu0 }
 0x26b   : > { %v2388_v40 = vld [vmem:[#allocation3 + $0x18] sm:$0xff]  ;;  %v1726_v57 = vpop.f32.mrb[50].mxu1  ;;  %v8640_v31 = vpop.f32.mrb[127].mxu0  ;;  %8937 = vmatmul.mubr.msk.f32.gmra.mrb[232].mxu0 %vm423_vm5, %v4206_v51 }
 0x26c   : > { %v2429_v60 = vadd.f32 %v2388_v40, %v10737_v9  ;;  %1910 = vst.msk [vmem:[#allocation3 + $0x28] sm:$0xff] %vm423_vm5, %v1726_v57  ;;  %v8262_v14 = vpop.f32.mrb[51].mxu1  ;;  %8559 = vmatmul.mubr.msk.f32.gmra.mrb[156].mxu1 %vm423_vm5, %v10739_v18  ;;  %8939 = vmatprep.mubr.msk.f32.mxu0 %vm9649_vm1, %v9650_v6 }
 0x26d   : > { %8561 = vmatprep.mubr.msk.f32.mxu1 %vm9649_vm1, %v9650_v6 }
 0x26e   : > { %2470 = vst.msk [vmem:[#allocation3 + $0x18] sm:$0xff] %vm423_vm5, %v2429_v60  ;;  %v11183_v3 = vpop.f32.mrb[128].mxu0  ;;  %v4209_v60 = vld [vmem:[#allocation2 + $0x91] sm:$0xff] }
 0x26f   : > { %v2389_v21 = vld [vmem:[#allocation3 + $0x20] sm:$0xff]  ;;  %v1731_v7 = vpop.f32.mrb[52].mxu1  ;;  %v8643_v9 = vpop.f32.mrb[129].mxu0  ;;  %8940 = vmatmul.mubr.msk.f32.gmra.mrb[234].mxu0 %vm423_vm5, %v4207_v27 }
 0x270   : > { %v2430_v12 = vadd.f32 %v2389_v21, %v10748_v11  ;;  %1911 = vst.msk [vmem:[#allocation3 + $0x30] sm:$0xff] %vm423_vm5, %v1731_v7  ;;  %v8265_v18 = vpop.f32.mrb[53].mxu1  ;;  %8562 = vmatmul.mubr.msk.f32.gmra.mrb[158].mxu1 %vm423_vm5, %v10750_v54  ;;  %8942 = vmatprep.mubr.msk.f32.mxu0 %vm9649_vm1, %v9650_v6  ;;  %v4210_v9 = vld [vmem:[#allocation2 + $0x99] sm:$0xff] }
 0x271   : > { %8564 = vmatprep.mubr.msk.f32.mxu1 %vm9649_vm1, %v9650_v6 }
 0x272   : > { %2471 = vst.msk [vmem:[#allocation3 + $0x20] sm:$0xff] %vm423_vm5, %v2430_v12  ;;  %v11195_v63 = vpop.f32.mrb[130].mxu0 }
 0x273   : > { %v2390_v51 = vld [vmem:[#allocation3 + $0x28] sm:$0xff]  ;;  %v1736_v40 = vpop.f32.mrb[54].mxu1  ;;  %v8646_v11 = vpop.f32.mrb[131].mxu0  ;;  %8943 = vmatmul.mubr.msk.f32.gmra.mrb[236].mxu0 %vm423_vm5, %v4208_v50 }
 0x274   : > { %v2431_v57 = vadd.f32 %v2390_v51, %v10759_v22  ;;  %1912 = vst.msk [vmem:[#allocation3 + $0x38] sm:$0xff] %vm423_vm5, %v1736_v40  ;;  %v8268_v54 = vpop.f32.mrb[55].mxu1  ;;  %8565 = vmatmul.mubr.msk.f32.gmra.mrb[160].mxu1 %vm423_vm5, %v10761_v25  ;;  %8945 = vmatprep.mubr.msk.f32.mxu0 %vm9649_vm1, %v9650_v6  ;;  %v4211_v40 = vld [vmem:[#allocation2 + $0xa1] sm:$0xff] }
 0x275   : > { %8567 = vmatprep.mubr.msk.f32.mxu1 %vm9649_vm1, %v9650_v6 }
 0x276   : > { %2472 = vst.msk [vmem:[#allocation3 + $0x28] sm:$0xff] %vm423_vm5, %v2431_v57  ;;  %v11207_v31 = vpop.f32.mrb[132].mxu0 }
 0x277   : > { %v2391_v14 = vld [vmem:[#allocation3 + $0x30] sm:$0xff]  ;;  %v1741_v27 = vpop.f32.mrb[56].mxu1  ;;  %v8649_v22 = vpop.f32.mrb[133].mxu0  ;;  %8946 = vmatmul.mubr.msk.f32.gmra.mrb[238].mxu0 %vm423_vm5, %v4209_v60 }
 0x278   : > { %v2432_v21 = vadd.f32 %v2391_v14, %v10770_v52  ;;  %1913 = vst.msk [vmem:[#allocation3 + $0x40] sm:$0xff] %vm423_vm5, %v1741_v27  ;;  %v8271_v25 = vpop.f32.mrb[57].mxu1  ;;  %8568 = vmatmul.mubr.msk.f32.gmra.mrb[162].mxu1 %vm423_vm5, %v10772_v59  ;;  %8948 = vmatprep.mubr.msk.f32.mxu0 %vm9649_vm1, %v9650_v6  ;;  %v4212_v14 = vld [vmem:[#allocation2 + $0xa9] sm:$0xff] }
 0x279   : > { %8570 = vmatprep.mubr.msk.f32.mxu1 %vm9649_vm1, %v9650_v6 }
 0x27a   : > { %2473 = vst.msk [vmem:[#allocation3 + $0x30] sm:$0xff] %vm423_vm5, %v2432_v21  ;;  %v11219_v7 = vpop.f32.mrb[134].mxu0 }
 0x27b   : > { %v2392_v12 = vld [vmem:[#allocation3 + $0x38] sm:$0xff]  ;;  %v1746_v18 = vpop.f32.mrb[58].mxu1  ;;  %v8652_v52 = vpop.f32.mrb[135].mxu0  ;;  %8949 = vmatmul.mubr.msk.f32.gmra.mrb[240].mxu0 %vm423_vm5, %v4210_v9 }
 0x27c   : > { %v2433_v50 = vadd.f32 %v2392_v12, %v10781_v45  ;;  %1914 = vst.msk [vmem:[#allocation3 + $0x48] sm:$0xff] %vm423_vm5, %v1746_v18  ;;  %v8274_v59 = vpop.f32.mrb[59].mxu1  ;;  %8571 = vmatmul.mubr.msk.f32.gmra.mrb[164].mxu1 %vm423_vm5, %v10783_v29  ;;  %8951 = vmatprep.mubr.msk.f32.mxu0 %vm9649_vm1, %v9650_v6  ;;  %v4213_v9 = vld [vmem:[#allocation2 + $0xb1] sm:$0xff] }
 0x27d   : > { %8573 = vmatprep.mubr.msk.f32.mxu1 %vm9649_vm1, %v9650_v6  ;;  %v4214_v59 = vld [vmem:[#allocation2 + $0xb9] sm:$0xff] }
 0x27e   : > { %2474 = vst.msk [vmem:[#allocation3 + $0x38] sm:$0xff] %vm423_vm5, %v2433_v50  ;;  %v11231_v51 = vpop.f32.mrb[136].mxu0 }
 0x27f   : > { %v2393_v11 = vld [vmem:[#allocation3 + $0x40] sm:$0xff]  ;;  %v1751_v57 = vpop.f32.mrb[60].mxu1  ;;  %v8655_v45 = vpop.f32.mrb[137].mxu0  ;;  %8952 = vmatmul.mubr.msk.f32.gmra.mrb[242].mxu0 %vm423_vm5, %v4211_v40 }
 0x280   : > { %v2434_v54 = vadd.f32 %v2393_v11, %v10792_v35  ;;  %1915 = vst.msk [vmem:[#allocation3 + $0x50] sm:$0xff] %vm423_vm5, %v1751_v57  ;;  %v8277_v29 = vpop.f32.mrb[61].mxu1  ;;  %8574 = vmatmul.mubr.msk.f32.gmra.mrb[166].mxu1 %vm423_vm5, %v10794_v4  ;;  %8954 = vmatprep.mubr.msk.f32.mxu0 %vm9649_vm1, %v9650_v6 }
 0x281   : > { %8576 = vmatprep.mubr.msk.f32.mxu1 %vm9649_vm1, %v9650_v6 }
 0x282   : > { %2475 = vst.msk [vmem:[#allocation3 + $0x40] sm:$0xff] %vm423_vm5, %v2434_v54  ;;  %v11243_v60 = vpop.f32.mrb[138].mxu0  ;;  %v4215_v54 = vld [vmem:[#allocation2 + $0xc1] sm:$0xff] }
 0x283   : > { %v2394_v27 = vld [vmem:[#allocation3 + $0x48] sm:$0xff]  ;;  %v1756_v22 = vpop.f32.mrb[62].mxu1  ;;  %v8658_v35 = vpop.f32.mrb[139].mxu0  ;;  %8955 = vmatmul.mubr.msk.f32.gmra.mrb[244].mxu0 %vm423_vm5, %v4212_v14 }
 0x284   : > { %v2435_v21 = vadd.f32 %v2394_v27, %v10803_v13  ;;  %1916 = vst.msk [vmem:[#allocation3 + $0x58] sm:$0xff] %vm423_vm5, %v1756_v22  ;;  %v8280_v4 = vpop.f32.mrb[63].mxu1  ;;  %8577 = vmatmul.mubr.msk.f32.gmra.mrb[168].mxu1 %vm423_vm5, %v10805_v61  ;;  %8957 = vmatprep.mubr.msk.f32.mxu0 %vm9649_vm1, %v9650_v6  ;;  %v4216_v35 = vld [vmem:[#allocation2 + $0xc9] sm:$0xff] }
 0x285   : > { %8579 = vmatprep.mubr.msk.f32.mxu1 %vm9649_vm1, %v9650_v6 }
 0x286   : > { %2476 = vst.msk [vmem:[#allocation3 + $0x48] sm:$0xff] %vm423_vm5, %v2435_v21  ;;  %v11255_v25 = vpop.f32.mrb[140].mxu0 }
 0x287   : > { %v2395_v12 = vld [vmem:[#allocation3 + $0x50] sm:$0xff]  ;;  %v1761_v18 = vpop.f32.mrb[64].mxu1  ;;  %v8661_v13 = vpop.f32.mrb[141].mxu0  ;;  %8958 = vmatmul.mubr.msk.f32.gmra.mrb[246].mxu0 %vm423_vm5, %v4213_v9 }
 0x288   : > { %v2436_v52 = vadd.f32 %v2395_v12, %v10814_v58  ;;  %1917 = vst.msk [vmem:[#allocation3 + $0x60] sm:$0xff] %vm423_vm5, %v1761_v18  ;;  %v8283_v61 = vpop.f32.mrb[65].mxu1  ;;  %8580 = vmatmul.mubr.msk.f32.gmra.mrb[170].mxu1 %vm423_vm5, %v10816_v1  ;;  %8960 = vmatprep.mubr.msk.f32.mxu0 %vm9649_vm1, %v9650_v6  ;;  %v4217_v18 = vld [vmem:[#allocation2 + $0xd1] sm:$0xff] }
 0x289   : > { %8582 = vmatprep.mubr.msk.f32.mxu1 %vm9649_vm1, %v9650_v6 }
 0x28a   : > { %2477 = vst.msk [vmem:[#allocation3 + $0x50] sm:$0xff] %vm423_vm5, %v2436_v52  ;;  %v11267_v50 = vpop.f32.mrb[142].mxu0 }
 0x28b   : > { %v2396_v40 = vld [vmem:[#allocation3 + $0x58] sm:$0xff]  ;;  %v1766_v11 = vpop.f32.mrb[66].mxu1  ;;  %v8664_v58 = vpop.f32.mrb[143].mxu0  ;;  %8961 = vmatmul.mubr.msk.f32.gmra.mrb[248].mxu0 %vm423_vm5, %v4214_v59 }
 0x28c   : > { %v2437_v57 = vadd.f32 %v2396_v40, %v10825_v46  ;;  %1918 = vst.msk [vmem:[#allocation3 + $0x68] sm:$0xff] %vm423_vm5, %v1766_v11  ;;  %v8286_v1 = vpop.f32.mrb[67].mxu1  ;;  %8583 = vmatmul.mubr.msk.f32.gmra.mrb[172].mxu1 %vm423_vm5, %v10827_v36  ;;  %8963 = vmatprep.mubr.msk.f32.mxu0 %vm9649_vm1, %v9650_v6  ;;  %v4218_v40 = vld [vmem:[#allocation2 + $0xd9] sm:$0xff] }
 0x28d   : > { %8585 = vmatprep.mubr.msk.f32.mxu1 %vm9649_vm1, %v9650_v6 }
 0x28e   : > { %2478 = vst.msk [vmem:[#allocation3 + $0x58] sm:$0xff] %vm423_vm5, %v2437_v57  ;;  %v11279_v45 = vpop.f32.mrb[144].mxu0 }
 0x28f   : > { %v2397_v29 = vld [vmem:[#allocation3 + $0x60] sm:$0xff]  ;;  %v1771_v14 = vpop.f32.mrb[68].mxu1  ;;  %v8667_v46 = vpop.f32.mrb[145].mxu0  ;;  %8964 = vmatmul.mubr.msk.f32.gmra.mrb[250].mxu0 %vm423_vm5, %v4215_v54  ;;  %v4219_v54 = vld [vmem:[#allocation2 + $0xe1] sm:$0xff] }
 0x290   : > { %v2438_v27 = vadd.f32 %v2397_v29, %v10836_v62  ;;  %1919 = vst.msk [vmem:[#allocation3 + $0x70] sm:$0xff] %vm423_vm5, %v1771_v14  ;;  %v8289_v36 = vpop.f32.mrb[69].mxu1  ;;  %8586 = vmatmul.mubr.msk.f32.gmra.mrb[174].mxu1 %vm423_vm5, %v10838_v26  ;;  %8966 = vmatprep.mubr.msk.f32.mxu0 %vm9649_vm1, %v9650_v6 }
 0x291   : > { %8588 = vmatprep.mubr.msk.f32.mxu1 %vm9649_vm1, %v9650_v6  ;;  %v4220_v36 = vld [vmem:[#allocation2 + $0xe9] sm:$0xff] }
 0x292   : > { %2479 = vst.msk [vmem:[#allocation3 + $0x60] sm:$0xff] %vm423_vm5, %v2438_v27  ;;  %v11291_v22 = vpop.f32.mrb[146].mxu0 }
 0x293   : > { %v2398_v21 = vld [vmem:[#allocation3 + $0x68] sm:$0xff]  ;;  %v1776_v4 = vpop.f32.mrb[70].mxu1  ;;  %v8670_v62 = vpop.f32.mrb[147].mxu0  ;;  %8967 = vmatmul.mubr.msk.f32.gmra.mrb[252].mxu0 %vm423_vm5, %v4216_v35 }
 0x294   : > { %v2439_v9 = vadd.f32 %v2398_v21, %v10847_v47  ;;  %1920 = vst.msk [vmem:[#allocation3 + $0x78] sm:$0xff] %vm423_vm5, %v1776_v4  ;;  %v8292_v26 = vpop.f32.mrb[71].mxu1  ;;  %8589 = vmatmul.mubr.msk.f32.gmra.mrb[176].mxu1 %vm423_vm5, %v10849_v56  ;;  %8969 = vmatprep.mubr.msk.f32.mxu0 %vm9649_vm1, %v9650_v6 }
 0x295   : > { %8591 = vmatprep.mubr.msk.f32.mxu1 %vm9649_vm1, %v9650_v6 }
 0x296   : > { %2480 = vst.msk [vmem:[#allocation3 + $0x68] sm:$0xff] %vm423_vm5, %v2439_v9  ;;  %v11303_v12 = vpop.f32.mrb[148].mxu0  ;;  %v4221_v9 = vld [vmem:[#allocation2 + $0xf1] sm:$0xff] }
 0x297   : > { %v2399_v13 = vld [vmem:[#allocation3 + $0x70] sm:$0xff]  ;;  %v1781_v52 = vpop.f32.mrb[72].mxu1  ;;  %v8673_v47 = vpop.f32.mrb[149].mxu0  ;;  %8970 = vmatmul.mubr.msk.f32.gmra.mrb[254].mxu0 %vm423_vm5, %v4217_v18 }
 0x298   : > { %v2440_v61 = vadd.f32 %v2399_v13, %v10858_v49  ;;  %1921 = vst.msk [vmem:[#allocation3 + $0x80] sm:$0xff] %vm423_vm5, %v1781_v52  ;;  %v8295_v56 = vpop.f32.mrb[73].mxu1  ;;  %8592 = vmatmul.mubr.msk.f32.gmra.mrb[178].mxu1 %vm423_vm5, %v10860_v20  ;;  %8972 = vmatprep.mubr.msk.f32.mxu0 %vm9649_vm1, %v9650_v6  ;;  %v4222_v47 = vld [vmem:[#allocation2 + $0xf9] sm:$0xff] }
 0x299   : > { %8594 = vmatprep.mubr.msk.f32.mxu1 %vm9649_vm1, %v9650_v6 }
 0x29a   : > { %2481 = vst.msk [vmem:[#allocation3 + $0x70] sm:$0xff] %vm423_vm5, %v2440_v61  ;;  %v11315_v59 = vpop.f32.mrb[150].mxu0 }
 0x29b   : > { %v2400_v11 = vld [vmem:[#allocation3 + $0x78] sm:$0xff]  ;;  %v1786_v58 = vpop.f32.mrb[74].mxu1  ;;  %v8676_v49 = vpop.f32.mrb[151].mxu0  ;;  %8973 = vmatmul.mubr.msk.f32.gmra.mrb[0].mxu0 %vm423_vm5, %v4218_v40 }
 0x29c   : > { %v2441_v57 = vadd.f32 %v2400_v11, %v10869_v28  ;;  %1922 = vst.msk [vmem:[#allocation3 + $0x88] sm:$0xff] %vm423_vm5, %v1786_v58  ;;  %v8298_v20 = vpop.f32.mrb[75].mxu1  ;;  %8595 = vmatmul.mubr.msk.f32.gmra.mrb[180].mxu1 %vm423_vm5, %v10871_v42  ;;  %8975 = vmatprep.mubr.msk.f32.mxu0 %vm9649_vm1, %v9650_v6  ;;  %v4223_v58 = vld [vmem:[#allocation2 + $0x101] sm:$0xff] }
 0x29d   : > { %8597 = vmatprep.mubr.msk.f32.mxu1 %vm9649_vm1, %v9650_v6  ;;  %v12948_v20 = vld [vmem:[#allocation4_spill] sm:$0xff] }
 0x29e   : > { %2482 = vst.msk [vmem:[#allocation3 + $0x78] sm:$0xff] %vm423_vm5, %v2441_v57  ;;  %v11327_v1 = vpop.f32.mrb[152].mxu0 }
 0x29f   : > { %v2401_v29 = vld [vmem:[#allocation3 + $0x80] sm:$0xff]  ;;  %v1791_v14 = vpop.f32.mrb[76].mxu1  ;;  %v8679_v28 = vpop.f32.mrb[153].mxu0  ;;  %8976 = vmatmul.mubr.msk.f32.gmra.mrb[2].mxu0 %vm423_vm5, %v4219_v54 }
 0x2a0   : > { %v2442_v46 = vadd.f32 %v2401_v29, %v10880_v32  ;;  %1923 = vst.msk [vmem:[#allocation3 + $0x90] sm:$0xff] %vm423_vm5, %v1791_v14  ;;  %v8301_v42 = vpop.f32.mrb[77].mxu1  ;;  %8598 = vmatmul.mubr.msk.f32.gmra.mrb[182].mxu1 %vm423_vm5, %v10882_v34  ;;  %8978 = vmatprep.mubr.msk.f32.mxu0 %vm9649_vm1, %v9650_v6  ;;  %v12949_v29 = vld [vmem:[#allocation5_spill] sm:$0xff] }
 0x2a1   : > { %8600 = vmatprep.mubr.msk.f32.mxu1 %vm9649_vm1, %v9650_v6  ;;  %v4224_v28 = vld [vmem:[#allocation2 + $0x109] sm:$0xff] }
 0x2a2   : > { %2483 = vst.msk [vmem:[#allocation3 + $0x80] sm:$0xff] %vm423_vm5, %v2442_v46  ;;  %v11339_v27 = vpop.f32.mrb[154].mxu0 }
 0x2a3   : > { %v2402_v35 = vld [vmem:[#allocation3 + $0x88] sm:$0xff]  ;;  %v1796_v21 = vpop.f32.mrb[78].mxu1  ;;  %v8682_v32 = vpop.f32.mrb[155].mxu0  ;;  %8979 = vmatmul.mubr.msk.f32.gmra.mrb[4].mxu0 %vm423_vm5, %v4220_v36 }
 0x2a4   : > { %v2443_v4 = vadd.f32 %v2402_v35, %v10891_v33  ;;  %1924 = vst.msk [vmem:[#allocation3 + $0x98] sm:$0xff] %vm423_vm5, %v1796_v21  ;;  %v8304_v34 = vpop.f32.mrb[79].mxu1  ;;  %8601 = vmatmul.mubr.msk.f32.gmra.mrb[184].mxu1 %vm423_vm5, %v10893_v48  ;;  %8981 = vmatprep.mubr.msk.f32.mxu0 %vm9649_vm1, %v9650_v6  ;;  %v12950_v35 = vld [vmem:[#allocation6_spill] sm:$0xff] }
 0x2a5   : > { %8603 = vmatprep.mubr.msk.f32.mxu1 %vm9649_vm1, %v9650_v6 }
 0x2a6   : > { %2484 = vst.msk [vmem:[#allocation3 + $0x88] sm:$0xff] %vm423_vm5, %v2443_v4  ;;  %v11351_v62 = vpop.f32.mrb[156].mxu0  ;;  %v12951_v4 = vld [vmem:[#allocation7_spill] sm:$0xff] }
 0x2a7   : > { %v2403_v26 = vld [vmem:[#allocation3 + $0x90] sm:$0xff]  ;;  %v1801_v18 = vpop.f32.mrb[80].mxu1  ;;  %v8685_v33 = vpop.f32.mrb[157].mxu0  ;;  %8982 = vmatmul.mubr.msk.f32.gmra.mrb[6].mxu0 %vm423_vm5, %v4221_v9  ;;  %v4225_v9 = vld [vmem:[#allocation2 + $0x111] sm:$0xff] }
 0x2a8   : > { %v2444_v13 = vadd.f32 %v2403_v26, %v10902_v39  ;;  %1925 = vst.msk [vmem:[#allocation3 + $0xa0] sm:$0xff] %vm423_vm5, %v1801_v18  ;;  %v8307_v48 = vpop.f32.mrb[81].mxu1  ;;  %8604 = vmatmul.mubr.msk.f32.gmra.mrb[186].mxu1 %vm423_vm5, %v10904_v5  ;;  %8984 = vmatprep.mubr.msk.f32.mxu0 %vm9649_vm1, %v9650_v6 }
 0x2a9   : > { %8606 = vmatprep.mubr.msk.f32.mxu1 %vm9649_vm1, %v9650_v6 }
 0x2aa   : > { %2485 = vst.msk [vmem:[#allocation3 + $0x90] sm:$0xff] %vm423_vm5, %v2444_v13  ;;  %v11363_v52 = vpop.f32.mrb[158].mxu0  ;;  %v12952_v13 = vld [vmem:[#allocation8_spill] sm:$0xff] }
 0x2ab   : > { %v2404_v61 = vld [vmem:[#allocation3 + $0x98] sm:$0xff]  ;;  %v1806_v56 = vpop.f32.mrb[82].mxu1  ;;  %v8688_v39 = vpop.f32.mrb[159].mxu0  ;;  %8985 = vmatmul.mubr.msk.f32.gmra.mrb[8].mxu0 %vm423_vm5, %v4222_v47 }
 0x2ac   : > { %v2445_v40 = vadd.f32 %v2404_v61, %v10913_v15  ;;  %1926 = vst.msk [vmem:[#allocation3 + $0xa8] sm:$0xff] %vm423_vm5, %v1806_v56  ;;  %v8310_v5 = vpop.f32.mrb[83].mxu1  ;;  %8607 = vmatmul.mubr.msk.f32.gmra.mrb[188].mxu1 %vm423_vm5, %v10915_v0  ;;  %8987 = vmatprep.mubr.msk.f32.mxu0 %vm9649_vm1, %v9650_v6  ;;  %v12953_v61 = vld [vmem:[#allocation9_spill] sm:$0xff]  ;;  %v4226_v39 = vld [vmem:[#allocation2 + $0x119] sm:$0xff] }
 0x2ad   : > { %8609 = vmatprep.mubr.msk.f32.mxu1 %vm9649_vm1, %v9650_v6 }
 0x2ae   : > { %2486 = vst.msk [vmem:[#allocation3 + $0x98] sm:$0xff] %vm423_vm5, %v2445_v40  ;;  %v11375_v11 = vpop.f32.mrb[160].mxu0 }
 0x2af   : > { %v2405_v49 = vld [vmem:[#allocation3 + $0xa0] sm:$0xff]  ;;  %v1811_v57 = vpop.f32.mrb[84].mxu1  ;;  %v8691_v15 = vpop.f32.mrb[161].mxu0  ;;  %8988 = vmatmul.mubr.msk.f32.gmra.mrb[10].mxu0 %vm423_vm5, %v4223_v58 }
 0x2b0   : > { %v2446_v54 = vadd.f32 %v2405_v49, %v12948_v20  ;;  %1927 = vst.msk [vmem:[#allocation3 + $0xb0] sm:$0xff] %vm423_vm5, %v1811_v57  ;;  %v8313_v0 = vpop.f32.mrb[85].mxu1  ;;  %8610 = vmatmul.mubr.msk.f32.gmra.mrb[190].mxu1 %vm423_vm5, %v12949_v29  ;;  %8990 = vmatprep.mubr.msk.f32.mxu0 %vm9649_vm1, %v9650_v6  ;;  %v12954_v49 = vld [vmem:[#allocation10_spill] sm:$0xff]  ;;  %v12955_v20 = vld [vmem:[#allocation11_spill] sm:$0xff] }
 0x2b1   : > { %8612 = vmatprep.mubr.msk.f32.mxu1 %vm9649_vm1, %v9650_v6  ;;  %v4227_v0 = vld [vmem:[#allocation2 + $0x121] sm:$0xff] }
 0x2b2   : > { %2487 = vst.msk [vmem:[#allocation3 + $0xa0] sm:$0xff] %vm423_vm5, %v2446_v54  ;;  %v11387_v14 = vpop.f32.mrb[162].mxu0 }
 0x2b3   : > { %v2406_v46 = vld [vmem:[#allocation3 + $0xa8] sm:$0xff]  ;;  %v1816_v42 = vpop.f32.mrb[86].mxu1  ;;  %v8694_v36 = vpop.f32.mrb[163].mxu0  ;;  %8991 = vmatmul.mubr.msk.f32.gmra.mrb[12].mxu0 %vm423_vm5, %v4224_v28 }
 0x2b4   : > { %v2447_v21 = vadd.f32 %v2406_v46, %v12950_v35  ;;  %1928 = vst.msk [vmem:[#allocation3 + $0xb8] sm:$0xff] %vm423_vm5, %v1816_v42  ;;  %v8316_v32 = vpop.f32.mrb[87].mxu1  ;;  %8613 = vmatmul.mubr.msk.f32.gmra.mrb[192].mxu1 %vm423_vm5, %v12951_v4  ;;  %8993 = vmatprep.mubr.msk.f32.mxu0 %vm9649_vm1, %v9650_v6  ;;  %v12956_v42 = vld [vmem:[#allocation12_spill] sm:$0xff] }
 0x2b5   : > { %8615 = vmatprep.mubr.msk.f32.mxu1 %vm9649_vm1, %v9650_v6  ;;  %v4228_v32 = vld [vmem:[#allocation2 + $0x129] sm:$0xff] }
 0x2b6   : > { %2488 = vst.msk [vmem:[#allocation3 + $0xa8] sm:$0xff] %vm423_vm5, %v2447_v21  ;;  %v11399_v34 = vpop.f32.mrb[164].mxu0 }
 0x2b7   : > { %v2407_v26 = vld [vmem:[#allocation3 + $0xb0] sm:$0xff]  ;;  %v1821_v18 = vpop.f32.mrb[88].mxu1  ;;  %v8697_v33 = vpop.f32.mrb[165].mxu0  ;;  %8994 = vmatmul.mubr.msk.f32.gmra.mrb[14].mxu0 %vm423_vm5, %v4225_v9 }
 0x2b8   : > { %v2448_v48 = vadd.f32 %v2407_v26, %v12952_v13  ;;  %1929 = vst.msk [vmem:[#allocation3 + $0xc0] sm:$0xff] %vm423_vm5, %v1821_v18  ;;  %v8319_v47 = vpop.f32.mrb[89].mxu1  ;;  %8616 = vmatmul.mubr.msk.f32.gmra.mrb[194].mxu1 %vm423_vm5, %v12953_v61  ;;  %8996 = vmatprep.mubr.msk.f32.mxu0 %vm9649_vm1, %v9650_v6  ;;  %v4229_v13 = vld [vmem:[#allocation2 + $0x131] sm:$0xff]  ;;  %v2548_v61 = vld [vmem:[#allocation2 + $0x147] sm:$0xf] }
 0x2b9   : > { %8618 = vmatprep.mubr.msk.f32.mxu1 %vm9649_vm1, %v9650_v6 }
 0x2ba   : > { %2489 = vst.msk [vmem:[#allocation3 + $0xb0] sm:$0xff] %vm423_vm5, %v2448_v48  ;;  %v11411_v56 = vpop.f32.mrb[166].mxu0  ;;  %v7416_v48 = vld [vmem:[%s12919_s4 + $0xc8] sm:$0xff] }
 0x2bb   : > { %v2408_v40 = vld [vmem:[#allocation3 + $0xb8] sm:$0xff]  ;;  %v1826_v5 = vpop.f32.mrb[90].mxu1  ;;  %v8700_v58 = vpop.f32.mrb[167].mxu0  ;;  %8997 = vmatmul.mubr.msk.f32.gmra.mrb[16].mxu0 %vm423_vm5, %v4226_v39 }
 0x2bc   : > { %v2449_v57 = vadd.f32 %v2408_v40, %v12954_v49  ;;  %1930 = vst.msk [vmem:[#allocation3 + $0xc8] sm:$0xff] %vm423_vm5, %v1826_v5  ;;  %v8322_v15 = vpop.f32.mrb[91].mxu1  ;;  %8619 = vmatmul.mubr.msk.f32.gmra.mrb[196].mxu1 %vm423_vm5, %v12955_v20  ;;  %8999 = vmatprep.mubr.msk.f32.mxu0 %vm9649_vm1, %v9650_v6 }
 0x2bd   : > { %8621 = vmatprep.mubr.msk.f32.mxu1 %vm9649_vm1, %v9650_v6  ;;  %v7418_v15 = vld [vmem:[%s12919_s4 + $0xd8] sm:$0xff] }
 0x2be   : > { %2490 = vst.msk [vmem:[#allocation3 + $0xb8] sm:$0xff] %vm423_vm5, %v2449_v57  ;;  %v11423_v54 = vpop.f32.mrb[168].mxu0  ;;  %v4230_v57 = vld [vmem:[#allocation2 + $0x139] sm:$0xff] }
 0x2bf   : > { %v2409_v29 = vld [vmem:[#allocation3 + $0xc0] sm:$0xff]  ;;  %v1831_v28 = vpop.f32.mrb[92].mxu1  ;;  %v8703_v46 = vpop.f32.mrb[169].mxu0  ;;  %9000 = vmatmul.mubr.msk.f32.gmra.mrb[18].mxu0 %vm423_vm5, %v4227_v0 }
 0x2c0   : > { %v2450_v36 = vadd.f32 %v2409_v29, %v12956_v42  ;;  %1931 = vst.msk [vmem:[#allocation3 + $0xd0] sm:$0xff] %vm423_vm5, %v1831_v28  ;;  %v8325_v35 = vpop.f32.mrb[93].mxu1  ;;  %8622 = vmatmul.mubr.msk.f32.gmra.mrb[198].mxu1 %vm423_vm5, %v10976_v2  ;;  %9002 = vmatprep.mubr.msk.f32.mxu0 %vm9649_vm1, %v9650_v6  ;;  %v3632_v28 = vld [vmem:[#allocation2 + $0x18] sm:$0xff] }
 0x2c1   : > { %8624 = vmatprep.mubr.msk.f32.mxu1 %vm9649_vm1, %v9650_v6 }
 0x2c2   : > { %2491 = vst.msk [vmem:[#allocation3 + $0xc0] sm:$0xff] %vm423_vm5, %v2450_v36  ;;  %v11435_v21 = vpop.f32.mrb[170].mxu0 }
 0x2c3   : > { %v2410_v4 = vld [vmem:[#allocation3 + $0xc8] sm:$0xff]  ;;  %v1836_v9 = vpop.f32.mrb[94].mxu1  ;;  %v8706_v26 = vpop.f32.mrb[171].mxu0  ;;  %9003 = vmatmul.mubr.msk.f32.gmra.mrb[20].mxu0 %vm423_vm5, %v4228_v32 }
 0x2c4   : > { %v2451_v18 = vadd.f32 %v2410_v4, %v10991_v53  ;;  %1932 = vst.msk [vmem:[#allocation3 + $0xd8] sm:$0xff] %vm423_vm5, %v1836_v9  ;;  %v8328_v2 = vpop.f32.mrb[95].mxu1  ;;  %8625 = vmatmul.mubr.msk.f32.gmra.mrb[200].mxu1 %vm423_vm5, %v10993_v16  ;;  %9005 = vmatprep.mubr.msk.f32.mxu0 %vm9649_vm1, %v9650_v6  ;;  %v7415_v53 = vld [vmem:[%s12919_s4 + $0xc0] sm:$0xff] }
 0x2c5   : > { %8627 = vmatprep.mubr.msk.f32.mxu1 %vm9649_vm1, %v9650_v6  ;;  %v9597_v58 = vpack.c.bf16 %v7416_v48, %v7415_v53  ;;  %v4231_v32 = vld [vmem:[#allocation2 + $0x141] sm:$0xff]  ;;  %v4232_v53 = vld [vmem:[#allocation2 + $0x149] sm:$0xff] }
 0x2c6   : > { %2492 = vst.msk [vmem:[#allocation3 + $0xc8] sm:$0xff] %vm423_vm5, %v2451_v18  ;;  %v11447_v33 = vpop.f32.mrb[172].mxu0  ;;  %v3633_v26 = vld [vmem:[#allocation2 + $0x20] sm:$0xff] }
 0x2c7   : > { %v2411_v16 = vld [vmem:[#allocation3 + $0xd0] sm:$0xff]  ;;  %v1841_v47 = vpop.f32.mrb[96].mxu1  ;;  %v8709_v39 = vpop.f32.mrb[173].mxu0  ;;  %9006 = vmatmul.mubr.msk.f32.gmra.mrb[22].mxu0 %vm423_vm5, %v4229_v13 }
 0x2c8   : > { %v2452_v40 = vadd.f32 %v2411_v16, %v11003_v38  ;;  %1933 = vst.msk [vmem:[#allocation3 + $0xe0] sm:$0xff] %vm423_vm5, %v1841_v47  ;;  %v8331_v5 = vpop.f32.mrb[97].mxu1  ;;  %8628 = vmatmul.mubr.msk.f32.gmra.mrb[202].mxu1 %vm423_vm5, %v2548_v61  ;;  %9008 = vmatprep.mubr.msk.f32.mxu0 %vm9649_vm1, %v9650_v6  ;;  %v7417_v38 = vld [vmem:[%s12919_s4 + $0xd0] sm:$0xff]  ;;  %v3634_v47 = vld [vmem:[#allocation2 + $0x28] sm:$0xff] }
 0x2c9   : > { %8769 = vmatprep.mubr.msk.f32.mxu1 %vm9649_vm1, %v9650_v6  ;;  %v9600_v36 = vpack.c.bf16 %v7418_v15, %v7417_v38  ;;  %v4233_v5 = vld [vmem:[#allocation2 + $0x151] sm:$0xff] }
 0x2ca   : > { %2493 = vst.msk [vmem:[#allocation3 + $0xd0] sm:$0xff] %vm423_vm5, %v2452_v40  ;;  %v11464_v49 = vpop.f32.mrb[174].mxu0 }
 0x2cb   : > { %v2412_v20 = vld [vmem:[#allocation3 + $0xd8] sm:$0xff]  ;;  %v1846_v0 = vpop.f32.mrb[98].mxu1  ;;  %v8712_v29 = vpop.f32.mrb[175].mxu0  ;;  %9009 = vmatmul.mubr.msk.f32.gmra.mrb[24].mxu0 %vm423_vm5, %v4230_v57 }
 0x2cc   : > { %v2453_v46 = vadd.f32 %v2412_v20, %v11013_v24  ;;  %1934 = vst.msk [vmem:[#allocation3 + $0xe8] sm:$0xff] %vm423_vm5, %v1846_v0  ;;  %v8334_v42 = vpop.f32.mrb[99].mxu1  ;;  %8770 = vmatmul.mubr.msk.f32.vlgmr.msra.gmra.mrb[204].mxu1 %vm423_vm5, %v3632_v28  ;;  %9011 = vmatprep.mubr.msk.f32.mxu0 %vm9649_vm1, %v9650_v6  ;;  %v4234_v29 = vld [vmem:[#allocation2 + $0x159] sm:$0xf] }
 0x2cd   : > { %9598 = vmatpush3.bf16.msra.mxu1 %v9597_v58  ;;  %8772 = vmatprep.mubr.msk.f32.mxu1 %vm9649_vm1, %v9650_v6 }
 0x2ce   : > { %2494 = vst.msk [vmem:[#allocation3 + $0xd8] sm:$0xff] %vm423_vm5, %v2453_v46  ;;  %v11481_v35 = vpop.f32.mrb[176].mxu0  ;;  %9599 = vmatprep.subr.bf16.mxu1 %v12943_v30 }
 0x2cf   : > { %v2413_v24 = vld [vmem:[#allocation3 + $0xe0] sm:$0xff]  ;;  %v1851_v4 = vpop.f32.mrb[100].mxu1  ;;  %v8715_v9 = vpop.f32.mrb[177].mxu0  ;;  %9012 = vmatmul.mubr.msk.f32.gmra.mrb[26].mxu0 %vm423_vm5, %v4231_v32 }
 0x2d0   : > { %v2454_v18 = vadd.f32 %v2413_v24, %v11022_v23  ;;  %1935 = vst.msk [vmem:[#allocation3 + $0xf0] sm:$0xff] %vm423_vm5, %v1851_v4  ;;  %v8337_v2 = vpop.f32.mrb[101].mxu1  ;;  %8773 = vmatmul.mubr.msk.f32.gmra.mrb[206].mxu1 %vm423_vm5, %v3633_v26  ;;  %9014 = vmatprep.mubr.msk.f32.mxu0 %vm9649_vm1, %v9650_v6  ;;  %v5318_v4 = vld [vmem:[#allocation2 + $0x2a] sm:$0xff] }
 0x2d1   : > { %8775 = vmatprep.mubr.msk.f32.mxu1 %vm9649_vm1, %v9650_v6  ;;  %9601 = vmatpush3.bf16.msra.mxu1 %v9600_v36 }
 0x2d2   : > { %2495 = vst.msk [vmem:[#allocation3 + $0xe0] sm:$0xff] %vm423_vm5, %v2454_v18  ;;  %v11493_v13 = vpop.f32.mrb[178].mxu0  ;;  %9608 = vmatprep.subr.bf16.mxu1 %v12943_v30 }
 0x2d3   : > { %v2414_v23 = vld [vmem:[#allocation3 + $0xe8] sm:$0xff]  ;;  %v1856_v48 = vpop.f32.mrb[102].mxu1  ;;  %v8718_v16 = vpop.f32.mrb[179].mxu0  ;;  %9015 = vmatmul.mubr.msk.f32.gmra.mrb[28].mxu0 %vm423_vm5, %v4232_v53 }
 0x2d4   : > { %v2455_v61 = vadd.f32 %v2414_v23, %v11031_v55  ;;  %1936 = vst.msk [vmem:[#allocation3 + $0xf8] sm:$0xff] %vm423_vm5, %v1856_v48  ;;  %v8340_v39 = vpop.f32.mrb[103].mxu1  ;;  %8776 = vmatmul.mubr.msk.f32.gmra.mrb[208].mxu1 %vm423_vm5, %v3634_v47  ;;  %9017 = vmatprep.mubr.msk.f32.mxu0 %vm9649_vm1, %v9650_v6  ;;  %v3635_v55 = vld [vmem:[#allocation2 + $0x30] sm:$0xff] }
 0x2d5   : > { %8778 = vmatprep.mubr.msk.f32.mxu1 %vm9649_vm1, %v9650_v6  ;;  %v5319_v48 = vld [vmem:[#allocation2 + $0x32] sm:$0xff] }
 0x2d6   : > { %2496 = vst.msk [vmem:[#allocation3 + $0xe8] sm:$0xff] %vm423_vm5, %v2455_v61  ;;  %v11505_v40 = vpop.f32.mrb[180].mxu0 }
 0x2d7   : > { %v2415_v58 = vld [vmem:[#allocation3 + $0xf0] sm:$0xff]  ;;  %v1861_v57 = vpop.f32.mrb[104].mxu1  ;;  %v8721_v38 = vpop.f32.mrb[181].mxu0  ;;  %9018 = vmatmul.mubr.msk.f32.gmra.mrb[30].mxu0 %vm423_vm5, %v4233_v5 }
 0x2d8   : > { %v2456_v15 = vadd.f32 %v2415_v58, %v11040_v37  ;;  %1937 = vst.msk [vmem:[#allocation3 + $0x100] sm:$0xff] %vm423_vm5, %v1861_v57  ;;  %v8343_v20 = vpop.f32.mrb[105].mxu1  ;;  %8779 = vmatmul.mubr.msk.f32.gmra.mrb[210].mxu1 %vm423_vm5, %v3635_v55  ;;  %9020 = vmatprep.mubr.msk.f32.mxu0 %vm9649_vm1, %v9650_v6  ;;  %v3636_v37 = vld [vmem:[#allocation2 + $0x38] sm:$0xff] }
 0x2d9   : > { %8781 = vmatprep.mubr.msk.f32.mxu1 %vm9649_vm1, %v9650_v6  ;;  %v5320_v57 = vld [vmem:[#allocation2 + $0x3a] sm:$0xff]  ;;  %v12957_v20 = vld [vmem:[#allocation13_spill] sm:$0xff] }
 0x2da   : > { %2497 = vst.msk [vmem:[#allocation3 + $0xf0] sm:$0xff] %vm423_vm5, %v2456_v15  ;;  %v11516_v0 = vpop.f32.mrb[182].mxu0 }
 0x2db   : > { %v2416_v28 = vld [vmem:[#allocation3 + $0xf8] sm:$0xff]  ;;  %v1866_v46 = vpop.f32.mrb[106].mxu1  ;;  %v8724_v42 = vpop.f32.mrb[183].mxu0  ;;  %9021 = vmatmul.mubr.msk.f32.gmra.mrb[32].mxu0 %vm423_vm5, %v4234_v29 }
 0x2dc   : > { %v2457_v36 = vadd.f32 %v2416_v28, %v11049_v41  ;;  %1938 = vst.msk [vmem:[#allocation3 + $0x108] sm:$0xff] %vm423_vm5, %v1866_v46  ;;  %v8346_v32 = vpop.f32.mrb[107].mxu1  ;;  %8782 = vmatmul.mubr.msk.f32.gmra.mrb[212].mxu1 %vm423_vm5, %v3636_v37  ;;  %9162 = vmatprep.mubr.msk.f32.mxu0 %vm9649_vm1, %v9650_v6  ;;  %v3637_v41 = vld [vmem:[#allocation2 + $0x40] sm:$0xff] }
 0x2dd   : > { %8784 = vmatprep.mubr.msk.f32.mxu1 %vm9649_vm1, %v9650_v6  ;;  %v5321_v42 = vld [vmem:[#allocation2 + $0x42] sm:$0xff] }
 0x2de   : > { %2498 = vst.msk [vmem:[#allocation3 + $0xf8] sm:$0xff] %vm423_vm5, %v2457_v36  ;;  %v11527_v24 = vpop.f32.mrb[184].mxu0 }
 0x2df   : > { %v2417_v9 = vld [vmem:[#allocation3 + $0x100] sm:$0xff]  ;;  %v1871_v26 = vpop.f32.mrb[108].mxu1  ;;  %v8727_v18 = vpop.f32.mrb[185].mxu0  ;;  %9163 = vmatmul.mubr.msk.f32.vlgmr.msra.gmra.mrb[34].mxu0 %vm423_vm5, %v5318_v4 }
 0x2e0   : > { %v2458_v2 = vadd.f32 %v2417_v9, %v11058_v44  ;;  %1939 = vst.msk [vmem:[#allocation3 + $0x110] sm:$0xff] %vm423_vm5, %v1871_v26  ;;  %v8349_v53 = vpop.f32.mrb[109].mxu1  ;;  %8785 = vmatmul.mubr.msk.f32.gmra.mrb[214].mxu1 %vm423_vm5, %v3637_v41  ;;  %9165 = vmatprep.mubr.msk.f32.mxu0 %vm9649_vm1, %v9650_v6  ;;  %v3638_v44 = vld [vmem:[#allocation2 + $0x48] sm:$0xff]  ;;  %v3640_v4 = vld [vmem:[#allocation2 + $0x58] sm:$0xff] }
 0x2e1   : > { %8787 = vmatprep.mubr.msk.f32.mxu1 %vm9649_vm1, %v9650_v6  ;;  %v5322_v41 = vld [vmem:[#allocation2 + $0x4a] sm:$0xff] }
 0x2e2   : > { %2499 = vst.msk [vmem:[#allocation3 + $0x100] sm:$0xff] %vm423_vm5, %v2458_v2  ;;  %v11538_v23 = vpop.f32.mrb[186].mxu0 }
 0x2e3   : > { %v2418_v16 = vld [vmem:[#allocation3 + $0x108] sm:$0xff]  ;;  %v1876_v47 = vpop.f32.mrb[110].mxu1  ;;  %v8730_v61 = vpop.f32.mrb[187].mxu0  ;;  %9166 = vmatmul.mubr.msk.f32.gmra.mrb[36].mxu0 %vm423_vm5, %v5319_v48 }
 0x2e4   : > { %v2459_v39 = vadd.f32 %v2418_v16, %v11067_v8  ;;  %1940 = vst.msk [vmem:[#allocation3 + $0x118] sm:$0xff] %vm423_vm5, %v1876_v47  ;;  %v8352_v5 = vpop.f32.mrb[111].mxu1  ;;  %8788 = vmatmul.mubr.msk.f32.gmra.mrb[216].mxu1 %vm423_vm5, %v3638_v44  ;;  %9168 = vmatprep.mubr.msk.f32.mxu0 %vm9649_vm1, %v9650_v6  ;;  %v3639_v8 = vld [vmem:[#allocation2 + $0x50] sm:$0xff] }
 0x2e5   : > { %8790 = vmatprep.mubr.msk.f32.mxu1 %vm9649_vm1, %v9650_v6  ;;  %v12958_v16 = vld [vmem:[#allocation14_spill] sm:$0xff] }
 0x2e6   : > { %2500 = vst.msk [vmem:[#allocation3 + $0x108] sm:$0xff] %vm423_vm5, %v2459_v39  ;;  %v11549_v58 = vpop.f32.mrb[188].mxu0  ;;  %v5323_v39 = vld [vmem:[#allocation2 + $0x52] sm:$0xff] }
 0x2e7   : > { %v2419_v38 = vld [vmem:[#allocation3 + $0x110] sm:$0xff]  ;;  %v1881_v55 = vpop.f32.mrb[112].mxu1  ;;  %v8733_v15 = vpop.f32.mrb[189].mxu0  ;;  %9169 = vmatmul.mubr.msk.f32.gmra.mrb[38].mxu0 %vm423_vm5, %v5320_v57 }
 0x2e8   : > { %v2460_v29 = vadd.f32 %v2419_v38, %v12957_v20  ;;  %1941 = vst.msk [vmem:[#allocation3 + $0x120] sm:$0xff] %vm423_vm5, %v1881_v55  ;;  %v8355_v28 = vpop.f32.mrb[113].mxu1  ;;  %8791 = vmatmul.mubr.msk.f32.gmra.mrb[218].mxu1 %vm423_vm5, %v3639_v8  ;;  %9171 = vmatprep.mubr.msk.f32.mxu0 %vm9649_vm1, %v9650_v6  ;;  %v3642_v55 = vld [vmem:[#allocation2 + $0x68] sm:$0xff]  ;;  %v12959_v15 = vld [vmem:[#allocation15_spill] sm:$0xff] }
 0x2e9   : > { %8793 = vmatprep.mubr.msk.f32.mxu1 %vm9649_vm1, %v9650_v6  ;;  %v5324_v28 = vld [vmem:[#allocation2 + $0x5a] sm:$0xff] }
 0x2ea   : > { %2501 = vst.msk [vmem:[#allocation3 + $0x110] sm:$0xff] %vm423_vm5, %v2460_v29  ;;  %v11560_v46 = vpop.f32.mrb[190].mxu0 }
 0x2eb   : > { %v2420_v37 = vld [vmem:[#allocation3 + $0x118] sm:$0xff]  ;;  %v1886_v36 = vpop.f32.mrb[114].mxu1  ;;  %v8736_v32 = vpop.f32.mrb[191].mxu0  ;;  %9172 = vmatmul.mubr.msk.f32.gmra.mrb[40].mxu0 %vm423_vm5, %v5321_v42 }
 0x2ec   : > { %v2461_v9 = vadd.f32 %v2420_v37, %v11092_v10  ;;  %1942 = vst.msk [vmem:[#allocation3 + $0x128] sm:$0xff] %vm423_vm5, %v1886_v36  ;;  %v8358_v26 = vpop.f32.mrb[115].mxu1  ;;  %8794 = vmatmul.mubr.msk.f32.gmra.mrb[220].mxu1 %vm423_vm5, %v3640_v4  ;;  %9174 = vmatprep.mubr.msk.f32.mxu0 %vm9649_vm1, %v9650_v6  ;;  %v3641_v10 = vld [vmem:[#allocation2 + $0x60] sm:$0xff]  ;;  %v3643_v32 = vld [vmem:[#allocation2 + $0x70] sm:$0xff] }
 0x2ed   : > { %8796 = vmatprep.mubr.msk.f32.mxu1 %vm9649_vm1, %v9650_v6  ;;  %v12960_v4 = vld [vmem:[#allocation16_spill] sm:$0xff] }
 0x2ee   : > { %2502 = vst.msk [vmem:[#allocation3 + $0x118] sm:$0xff] %vm423_vm5, %v2461_v9  ;;  %v11571_v18 = vpop.f32.mrb[192].mxu0 }
 0x2ef   : > { %v2421_v2 = vld [vmem:[#allocation3 + $0x120] sm:$0xff]  ;;  %v1891_v53 = vpop.f32.mrb[116].mxu1  ;;  %v8739_v48 = vpop.f32.mrb[193].mxu0  ;;  %9175 = vmatmul.mubr.msk.f32.gmra.mrb[42].mxu0 %vm423_vm5, %v5322_v41 }
 0x2f0   : > { %v2462_v47 = vadd.f32 %v2421_v2, %v12958_v16  ;;  %1943 = vst.msk [vmem:[#allocation3 + $0x130] sm:$0xff] %vm423_vm5, %v1891_v53  ;;  %v8361_v61 = vpop.f32.mrb[117].mxu1  ;;  %8797 = vmatmul.mubr.msk.f32.gmra.mrb[222].mxu1 %vm423_vm5, %v3641_v10  ;;  %9177 = vmatprep.mubr.msk.f32.mxu0 %vm9649_vm1, %v9650_v6  ;;  %v5325_v2 = vld [vmem:[#allocation2 + $0x62] sm:$0xff]  ;;  %v2947_v10 = vld [vmem:[#allocation3] sm:$0xff] }
 0x2f1   : > { %8799 = vmatprep.mubr.msk.f32.mxu1 %vm9649_vm1, %v9650_v6 }
 0x2f2   : > { %2503 = vst.msk [vmem:[#allocation3 + $0x120] sm:$0xff] %vm423_vm5, %v2462_v47  ;;  %v11582_v44 = vpop.f32.mrb[194].mxu0  ;;  %v3644_v47 = vld [vmem:[#allocation2 + $0x78] sm:$0xff] }
 0x2f3   : > { %v2422_v5 = vld [vmem:[#allocation3 + $0x128] sm:$0xff]  ;;  %v1896_v57 = vpop.f32.mrb[118].mxu1  ;;  %v8742_v38 = vpop.f32.mrb[195].mxu0  ;;  %9178 = vmatmul.mubr.msk.f32.gmra.mrb[44].mxu0 %vm423_vm5, %v5323_v39 }
 0x2f4   : > { %v2463_v8 = vadd.f32 %v2422_v5, %v12959_v15  ;;  %1944 = vst.msk [vmem:[#allocation3 + $0x138] sm:$0xff] %vm423_vm5, %v1896_v57  ;;  %v8364_v20 = vpop.f32.mrb[119].mxu1  ;;  %8800 = vmatmul.mubr.msk.f32.gmra.mrb[224].mxu1 %vm423_vm5, %v3642_v55  ;;  %9180 = vmatprep.mubr.msk.f32.mxu0 %vm9649_vm1, %v9650_v6  ;;  %v5326_v38 = vld [vmem:[#allocation2 + $0x6a] sm:$0xff] }
 0x2f5   : > { %8802 = vmatprep.mubr.msk.f32.mxu1 %vm9649_vm1, %v9650_v6  ;;  %v3645_v20 = vld [vmem:[#allocation2 + $0x80] sm:$0xff] }
 0x2f6   : > { %2504 = vst.msk [vmem:[#allocation3 + $0x128] sm:$0xff] %vm423_vm5, %v2463_v8  ;;  %v11593_v29 = vpop.f32.mrb[196].mxu0 }
 0x2f7   : > { %v2423_v42 = vld [vmem:[#allocation3 + $0x130] sm:$0xff]  ;;  %v1901_v37 = vpop.f32.mrb[120].mxu1  ;;  %v8745_v36 = vpop.f32.mrb[197].mxu0  ;;  %9181 = vmatmul.mubr.msk.f32.gmra.mrb[46].mxu0 %vm423_vm5, %v5324_v28 }
 0x2f8   : > { %v2464_v9 = vadd.f32 %v2423_v42, %v12960_v4  ;;  %1945 = vst.msk [vmem:[#allocation3 + $0x140] sm:$0xf] %vm1335_vm6, %v1901_v37  ;;  %v8367_v26 = vpop.f32.mrb[121].mxu1  ;;  %8803 = vmatmul.mubr.msk.f32.gmra.mrb[226].mxu1 %vm423_vm5, %v3643_v32  ;;  %9183 = vmatprep.mubr.msk.f32.mxu0 %vm9649_vm1, %v9650_v6  ;;  %v5327_v32 = vld [vmem:[#allocation2 + $0x72] sm:$0xff] }
 0x2f9   : > { %8805 = vmatprep.mubr.msk.f32.mxu1 %vm9649_vm1, %v9650_v6  ;;  %v3646_v26 = vld [vmem:[#allocation2 + $0x88] sm:$0xff] }
 0x2fa   : > { %2505 = vst.msk [vmem:[#allocation3 + $0x130] sm:$0xff] %vm423_vm5, %v2464_v9  ;;  %v11604_v41 = vpop.f32.mrb[198].mxu0  ;;  %v2949_v9 = vld [vmem:[#allocation3 + $0x10] sm:$0xff] }
 0x2fb   : > { %v2424_v53 = vld [vmem:[#allocation3 + $0x138] sm:$0xff]  ;;  %v2743_v48 = vpop.f32.mrb[122].mxu1  ;;  %v8748_v16 = vpop.f32.mrb[199].mxu0  ;;  %9184 = vmatmul.mubr.msk.f32.gmra.mrb[48].mxu0 %vm423_vm5, %v5325_v2 }
 0x2fc   : > { %v2465_v61 = vadd.f32 %v2424_v53, %v11145_v43  ;;  %v2988_v39 = vadd.f32 %v2947_v10, %v2743_v48  ;;  %v8509_v5 = vpop.f32.mrb[123].mxu1  ;;  %8806 = vmatmul.mubr.msk.f32.gmra.mrb[228].mxu1 %vm423_vm5, %v3644_v47  ;;  %9186 = vmatprep.mubr.msk.f32.mxu0 %vm9649_vm1, %v9650_v6  ;;  %v2948_v43 = vld [vmem:[#allocation3 + $0x8] sm:$0xff] }
 0x2fd   : > { %8808 = vmatprep.mubr.msk.f32.mxu1 %vm9649_vm1, %v9650_v6  ;;  %v5328_v16 = vld [vmem:[#allocation2 + $0x7a] sm:$0xff] }
 0x2fe   : > { %2506 = vst.msk [vmem:[#allocation3 + $0x138] sm:$0xff] %vm423_vm5, %v2465_v61  ;;  %3029 = vst.msk [vmem:[#allocation3] sm:$0xff] %vm423_vm5, %v2988_v39  ;;  %v11615_v57 = vpop.f32.mrb[200].mxu0  ;;  %v2950_v39 = vld [vmem:[#allocation3 + $0x18] sm:$0xff] }
 0x2ff   : > { %v2425_v55 = vld [vmem:[#allocation3 + $0x140] sm:$0xf]  ;;  %v2748_v15 = vpop.f32.mrb[124].mxu1  ;;  %v8751_v8 = vpop.f32.mrb[201].mxu0  ;;  %9187 = vmatmul.mubr.msk.f32.gmra.mrb[50].mxu0 %vm423_vm5, %v5326_v38  ;;  %v3647_v38 = vld [vmem:[#allocation2 + $0x90] sm:$0xff] }
 0x300   : > { %v2466_v28 = vadd.f32 %v2425_v55, %v11158_v19  ;;  %v2989_v42 = vadd.f32 %v2948_v43, %v2748_v15  ;;  %v8512_v37 = vpop.f32.mrb[125].mxu1  ;;  %8809 = vmatmul.mubr.msk.f32.gmra.mrb[230].mxu1 %vm423_vm5, %v3645_v20  ;;  %9189 = vmatprep.mubr.msk.f32.mxu0 %vm9649_vm1, %v9650_v6  ;;  %v5329_v8 = vld [vmem:[#allocation2 + $0x82] sm:$0xff] }
 0x301   : > { %8811 = vmatprep.mubr.msk.f32.mxu1 %vm9649_vm1, %v9650_v6 }
 0x302   : > { %2507 = vst.msk [vmem:[#allocation3 + $0x140] sm:$0xf] %vm1335_vm6, %v2466_v28  ;;  %v11626_v36 = vpop.f32.mrb[202].mxu0 }
 0x303   : > { %3030 = vst.msk [vmem:[#allocation3 + $0x8] sm:$0xff] %vm423_vm5, %v2989_v42  ;;  %v2753_v4 = vpop.f32.mrb[126].mxu1  ;;  %v8754_v19 = vpop.f32.mrb[203].mxu0  ;;  %9190 = vmatmul.mubr.msk.f32.gmra.mrb[52].mxu0 %vm423_vm5, %v5327_v32  ;;  %v2951_v42 = vld [vmem:[#allocation3 + $0x20] sm:$0xff] }
 0x304   : > { %v2990_v2 = vadd.f32 %v2949_v9, %v2753_v4  ;;  %v8515_v53 = vpop.f32.mrb[127].mxu1  ;;  %8812 = vmatmul.mubr.msk.f32.gmra.mrb[232].mxu1 %vm423_vm5, %v3646_v26  ;;  %9192 = vmatprep.mubr.msk.f32.mxu0 %vm9649_vm1, %v9650_v6  ;;  %v3648_v32 = vld [vmem:[#allocation2 + $0x98] sm:$0xff]  ;;  %v5330_v26 = vld [vmem:[#allocation2 + $0x8a] sm:$0xff] }
 0x305   : > { %8814 = vmatprep.mubr.msk.f32.mxu1 %vm9649_vm1, %v9650_v6  ;;  %v3509_v48 = vld [vmem:[#allocation3] sm:$0xff] }
 0x306   : > { %3031 = vst.msk [vmem:[#allocation3 + $0x10] sm:$0xff] %vm423_vm5, %v2990_v2  ;;  %v11635_v10 = vpop.f32.mrb[204].mxu0  ;;  %v3550_v47 = vadd.f32 %v3509_v48, %v11171_v17  ;;  %v2952_v48 = vld [vmem:[#allocation3 + $0x28] sm:$0xff] }
 0x307   : > { %v2758_v61 = vpop.f32.mrb[128].mxu1  ;;  %v8757_v5 = vpop.f32.mrb[205].mxu0  ;;  %9193 = vmatmul.mubr.msk.f32.gmra.mrb[54].mxu0 %vm423_vm5, %v5328_v16  ;;  %v3649_v16 = vld [vmem:[#allocation2 + $0xa0] sm:$0xff] }
 0x308   : > { %v2991_v55 = vadd.f32 %v2950_v39, %v2758_v61  ;;  %v8518_v15 = vpop.f32.mrb[129].mxu1  ;;  %8815 = vmatmul.mubr.msk.f32.gmra.mrb[234].mxu1 %vm423_vm5, %v3647_v38  ;;  %9195 = vmatprep.mubr.msk.f32.mxu0 %vm9649_vm1, %v9650_v6  ;;  %3591 = vst.msk [vmem:[#allocation3] sm:$0xff] %vm423_vm5, %v3550_v47  ;;  %v5331_v38 = vld [vmem:[#allocation2 + $0x92] sm:$0xff] }
 0x309   : > { %8817 = vmatprep.mubr.msk.f32.mxu1 %vm9649_vm1, %v9650_v6 }
 0x30a   : > { %v3510_v43 = vld [vmem:[#allocation3 + $0x8] sm:$0xff]  ;;  %3032 = vst.msk [vmem:[#allocation3 + $0x18] sm:$0xff] %vm423_vm5, %v2991_v55  ;;  %v11646_v17 = vpop.f32.mrb[206].mxu0 }
 0x30b   : > { %v3551_v20 = vadd.f32 %v3510_v43, %v11183_v3  ;;  %v2763_v28 = vpop.f32.mrb[130].mxu1  ;;  %v8760_v37 = vpop.f32.mrb[207].mxu0  ;;  %9196 = vmatmul.mubr.msk.f32.gmra.mrb[56].mxu0 %vm423_vm5, %v5329_v8  ;;  %v2953_v43 = vld [vmem:[#allocation3 + $0x30] sm:$0xff] }
 0x30c   : > { %v2992_v4 = vadd.f32 %v2951_v42, %v2763_v28  ;;  %v8521_v9 = vpop.f32.mrb[131].mxu1  ;;  %8818 = vmatmul.mubr.msk.f32.gmra.mrb[236].mxu1 %vm423_vm5, %v3648_v32  ;;  %9198 = vmatprep.mubr.msk.f32.mxu0 %vm9649_vm1, %v9650_v6  ;;  %v3650_v8 = vld [vmem:[#allocation2 + $0xa8] sm:$0xff]  ;;  %v5332_v32 = vld [vmem:[#allocation2 + $0x9a] sm:$0xff] }
 0x30d   : > { %3592 = vst.msk [vmem:[#allocation3 + $0x8] sm:$0xff] %vm423_vm5, %v3551_v20  ;;  %8820 = vmatprep.mubr.msk.f32.mxu1 %vm9649_vm1, %v9650_v6  ;;  %v3511_v19 = vld [vmem:[#allocation3 + $0x10] sm:$0xff] }
 0x30e   : > { %3033 = vst.msk [vmem:[#allocation3 + $0x20] sm:$0xff] %vm423_vm5, %v2992_v4  ;;  %v11657_v3 = vpop.f32.mrb[208].mxu0  ;;  %v3552_v2 = vadd.f32 %v3511_v19, %v11195_v63  ;;  %v2954_v19 = vld [vmem:[#allocation3 + $0x38] sm:$0xff] }
 0x30f   : > { %v2768_v53 = vpop.f32.mrb[132].mxu1  ;;  %v8902_v47 = vpop.f32.mrb[209].mxu0  ;;  %9199 = vmatmul.mubr.msk.f32.gmra.mrb[58].mxu0 %vm423_vm5, %v5330_v26  ;;  %v3651_v26 = vld [vmem:[#allocation2 + $0xb0] sm:$0xff] }
 0x310   : > { %v2993_v61 = vadd.f32 %v2952_v48, %v2768_v53  ;;  %v8524_v39 = vpop.f32.mrb[133].mxu1  ;;  %8821 = vmatmul.mubr.msk.f32.gmra.mrb[238].mxu1 %vm423_vm5, %v3649_v16  ;;  %9201 = vmatprep.mubr.msk.f32.mxu0 %vm9649_vm1, %v9650_v6  ;;  %3593 = vst.msk [vmem:[#allocation3 + $0x10] sm:$0xff] %vm423_vm5, %v3552_v2  ;;  %v5333_v47 = vld [vmem:[#allocation2 + $0xa2] sm:$0xff] }
 0x311   : > { %8823 = vmatprep.mubr.msk.f32.mxu1 %vm9649_vm1, %v9650_v6  ;;  %v3512_v5 = vld [vmem:[#allocation3 + $0x18] sm:$0xff] }
 0x312   : > { %3034 = vst.msk [vmem:[#allocation3 + $0x28] sm:$0xff] %vm423_vm5, %v2993_v61  ;;  %v11668_v63 = vpop.f32.mrb[210].mxu0  ;;  %v3553_v55 = vadd.f32 %v3512_v5, %v11207_v31  ;;  %v2955_v5 = vld [vmem:[#allocation3 + $0x40] sm:$0xff] }
 0x313   : > { %v2773_v15 = vpop.f32.mrb[134].mxu1  ;;  %v8905_v20 = vpop.f32.mrb[211].mxu0  ;;  %9202 = vmatmul.mubr.msk.f32.gmra.mrb[60].mxu0 %vm423_vm5, %v5331_v38  ;;  %v3652_v38 = vld [vmem:[#allocation2 + $0xb8] sm:$0xff] }
 0x314   : > { %v2994_v28 = vadd.f32 %v2953_v43, %v2773_v15  ;;  %v8527_v42 = vpop.f32.mrb[135].mxu1  ;;  %8824 = vmatmul.mubr.msk.f32.gmra.mrb[240].mxu1 %vm423_vm5, %v3650_v8  ;;  %9204 = vmatprep.mubr.msk.f32.mxu0 %vm9649_vm1, %v9650_v6  ;;  %3594 = vst.msk [vmem:[#allocation3 + $0x18] sm:$0xff] %vm423_vm5, %v3553_v55  ;;  %v5334_v20 = vld [vmem:[#allocation2 + $0xaa] sm:$0xff] }
 0x315   : > { %8826 = vmatprep.mubr.msk.f32.mxu1 %vm9649_vm1, %v9650_v6  ;;  %v3513_v37 = vld [vmem:[#allocation3 + $0x20] sm:$0xff] }
 0x316   : > { %3035 = vst.msk [vmem:[#allocation3 + $0x30] sm:$0xff] %vm423_vm5, %v2994_v28  ;;  %v11679_v31 = vpop.f32.mrb[212].mxu0  ;;  %v3554_v4 = vadd.f32 %v3513_v37, %v11219_v7  ;;  %v2956_v37 = vld [vmem:[#allocation3 + $0x48] sm:$0xff] }
 0x317   : > { %v2778_v9 = vpop.f32.mrb[136].mxu1  ;;  %v8908_v2 = vpop.f32.mrb[213].mxu0  ;;  %9205 = vmatmul.mubr.msk.f32.gmra.mrb[62].mxu0 %vm423_vm5, %v5332_v32  ;;  %v3653_v32 = vld [vmem:[#allocation2 + $0xc0] sm:$0xff] }
 0x318   : > { %v2995_v53 = vadd.f32 %v2954_v19, %v2778_v9  ;;  %v8530_v48 = vpop.f32.mrb[137].mxu1  ;;  %8827 = vmatmul.mubr.msk.f32.gmra.mrb[242].mxu1 %vm423_vm5, %v3651_v26  ;;  %9207 = vmatprep.mubr.msk.f32.mxu0 %vm9649_vm1, %v9650_v6  ;;  %3595 = vst.msk [vmem:[#allocation3 + $0x20] sm:$0xff] %vm423_vm5, %v3554_v4  ;;  %v5335_v2 = vld [vmem:[#allocation2 + $0xb2] sm:$0xff] }
 0x319   : > { %8829 = vmatprep.mubr.msk.f32.mxu1 %vm9649_vm1, %v9650_v6  ;;  %v3514_v16 = vld [vmem:[#allocation3 + $0x28] sm:$0xff] }
 0x31a   : > { %3036 = vst.msk [vmem:[#allocation3 + $0x38] sm:$0xff] %vm423_vm5, %v2995_v53  ;;  %v11690_v7 = vpop.f32.mrb[214].mxu0  ;;  %v3555_v61 = vadd.f32 %v3514_v16, %v11231_v51  ;;  %v2957_v16 = vld [vmem:[#allocation3 + $0x50] sm:$0xff] }
 0x31b   : > { %v2783_v39 = vpop.f32.mrb[138].mxu1  ;;  %v8911_v55 = vpop.f32.mrb[215].mxu0  ;;  %9208 = vmatmul.mubr.msk.f32.gmra.mrb[64].mxu0 %vm423_vm5, %v5333_v47  ;;  %v3654_v47 = vld [vmem:[#allocation2 + $0xc8] sm:$0xff] }
 0x31c   : > { %v2996_v15 = vadd.f32 %v2955_v5, %v2783_v39  ;;  %v8533_v43 = vpop.f32.mrb[139].mxu1  ;;  %8830 = vmatmul.mubr.msk.f32.gmra.mrb[244].mxu1 %vm423_vm5, %v3652_v38  ;;  %9210 = vmatprep.mubr.msk.f32.mxu0 %vm9649_vm1, %v9650_v6  ;;  %3596 = vst.msk [vmem:[#allocation3 + $0x28] sm:$0xff] %vm423_vm5, %v3555_v61  ;;  %v5336_v55 = vld [vmem:[#allocation2 + $0xba] sm:$0xff] }
 0x31d   : > { %8832 = vmatprep.mubr.msk.f32.mxu1 %vm9649_vm1, %v9650_v6  ;;  %v3515_v8 = vld [vmem:[#allocation3 + $0x30] sm:$0xff] }
 0x31e   : > { %3037 = vst.msk [vmem:[#allocation3 + $0x40] sm:$0xff] %vm423_vm5, %v2996_v15  ;;  %v11701_v51 = vpop.f32.mrb[216].mxu0  ;;  %v3556_v28 = vadd.f32 %v3515_v8, %v11243_v60  ;;  %v2958_v8 = vld [vmem:[#allocation3 + $0x58] sm:$0xff] }
 0x31f   : > { %v2788_v42 = vpop.f32.mrb[140].mxu1  ;;  %v8914_v4 = vpop.f32.mrb[217].mxu0  ;;  %9211 = vmatmul.mubr.msk.f32.gmra.mrb[66].mxu0 %vm423_vm5, %v5334_v20  ;;  %v3655_v20 = vld [vmem:[#allocation2 + $0xd0] sm:$0xff] }
 0x320   : > { %v2997_v9 = vadd.f32 %v2956_v37, %v2788_v42  ;;  %v8536_v19 = vpop.f32.mrb[141].mxu1  ;;  %8833 = vmatmul.mubr.msk.f32.gmra.mrb[246].mxu1 %vm423_vm5, %v3653_v32  ;;  %9213 = vmatprep.mubr.msk.f32.mxu0 %vm9649_vm1, %v9650_v6  ;;  %3597 = vst.msk [vmem:[#allocation3 + $0x30] sm:$0xff] %vm423_vm5, %v3556_v28  ;;  %v5337_v4 = vld [vmem:[#allocation2 + $0xc2] sm:$0xff] }
 0x321   : > { %8835 = vmatprep.mubr.msk.f32.mxu1 %vm9649_vm1, %v9650_v6  ;;  %v3516_v26 = vld [vmem:[#allocation3 + $0x38] sm:$0xff] }
 0x322   : > { %3038 = vst.msk [vmem:[#allocation3 + $0x48] sm:$0xff] %vm423_vm5, %v2997_v9  ;;  %v11712_v60 = vpop.f32.mrb[218].mxu0  ;;  %v3557_v53 = vadd.f32 %v3516_v26, %v11255_v25  ;;  %v2959_v26 = vld [vmem:[#allocation3 + $0x60] sm:$0xff] }
 0x323   : > { %v2793_v48 = vpop.f32.mrb[142].mxu1  ;;  %v8917_v61 = vpop.f32.mrb[219].mxu0  ;;  %9214 = vmatmul.mubr.msk.f32.gmra.mrb[68].mxu0 %vm423_vm5, %v5335_v2  ;;  %v3656_v2 = vld [vmem:[#allocation2 + $0xd8] sm:$0xff] }
 0x324   : > { %v2998_v39 = vadd.f32 %v2957_v16, %v2793_v48  ;;  %v8539_v5 = vpop.f32.mrb[143].mxu1  ;;  %8836 = vmatmul.mubr.msk.f32.gmra.mrb[248].mxu1 %vm423_vm5, %v3654_v47  ;;  %9216 = vmatprep.mubr.msk.f32.mxu0 %vm9649_vm1, %v9650_v6  ;;  %3598 = vst.msk [vmem:[#allocation3 + $0x38] sm:$0xff] %vm423_vm5, %v3557_v53  ;;  %v5338_v61 = vld [vmem:[#allocation2 + $0xca] sm:$0xff] }
 0x325   : > { %8838 = vmatprep.mubr.msk.f32.mxu1 %vm9649_vm1, %v9650_v6  ;;  %v3517_v38 = vld [vmem:[#allocation3 + $0x40] sm:$0xff] }
 0x326   : > { %3039 = vst.msk [vmem:[#allocation3 + $0x50] sm:$0xff] %vm423_vm5, %v2998_v39  ;;  %v11723_v25 = vpop.f32.mrb[220].mxu0  ;;  %v3558_v15 = vadd.f32 %v3517_v38, %v11267_v50  ;;  %v2960_v38 = vld [vmem:[#allocation3 + $0x68] sm:$0xff] }
 0x327   : > { %v2798_v43 = vpop.f32.mrb[144].mxu1  ;;  %v8920_v28 = vpop.f32.mrb[221].mxu0  ;;  %9217 = vmatmul.mubr.msk.f32.gmra.mrb[70].mxu0 %vm423_vm5, %v5336_v55  ;;  %v3657_v55 = vld [vmem:[#allocation2 + $0xe0] sm:$0xff] }
 0x328   : > { %v2999_v42 = vadd.f32 %v2958_v8, %v2798_v43  ;;  %v8542_v37 = vpop.f32.mrb[145].mxu1  ;;  %8839 = vmatmul.mubr.msk.f32.gmra.mrb[250].mxu1 %vm423_vm5, %v3655_v20  ;;  %9219 = vmatprep.mubr.msk.f32.mxu0 %vm9649_vm1, %v9650_v6  ;;  %3599 = vst.msk [vmem:[#allocation3 + $0x40] sm:$0xff] %vm423_vm5, %v3558_v15  ;;  %v5339_v28 = vld [vmem:[#allocation2 + $0xd2] sm:$0xff] }
 0x329   : > { %8841 = vmatprep.mubr.msk.f32.mxu1 %vm9649_vm1, %v9650_v6  ;;  %v3518_v32 = vld [vmem:[#allocation3 + $0x48] sm:$0xff] }
 0x32a   : > { %3040 = vst.msk [vmem:[#allocation3 + $0x58] sm:$0xff] %vm423_vm5, %v2999_v42  ;;  %v11734_v50 = vpop.f32.mrb[222].mxu0  ;;  %v3559_v9 = vadd.f32 %v3518_v32, %v11279_v45  ;;  %v2961_v32 = vld [vmem:[#allocation3 + $0x70] sm:$0xff] }
 0x32b   : > { %v2803_v19 = vpop.f32.mrb[146].mxu1  ;;  %v8923_v53 = vpop.f32.mrb[223].mxu0  ;;  %9220 = vmatmul.mubr.msk.f32.gmra.mrb[72].mxu0 %vm423_vm5, %v5337_v4  ;;  %v3658_v4 = vld [vmem:[#allocation2 + $0xe8] sm:$0xff] }
 0x32c   : > { %v3000_v48 = vadd.f32 %v2959_v26, %v2803_v19  ;;  %v8545_v16 = vpop.f32.mrb[147].mxu1  ;;  %8842 = vmatmul.mubr.msk.f32.gmra.mrb[252].mxu1 %vm423_vm5, %v3656_v2  ;;  %9222 = vmatprep.mubr.msk.f32.mxu0 %vm9649_vm1, %v9650_v6  ;;  %3600 = vst.msk [vmem:[#allocation3 + $0x48] sm:$0xff] %vm423_vm5, %v3559_v9  ;;  %v5340_v53 = vld [vmem:[#allocation2 + $0xda] sm:$0xff] }
 0x32d   : > { %8844 = vmatprep.mubr.msk.f32.mxu1 %vm9649_vm1, %v9650_v6  ;;  %v3519_v47 = vld [vmem:[#allocation3 + $0x50] sm:$0xff] }
 0x32e   : > { %3041 = vst.msk [vmem:[#allocation3 + $0x60] sm:$0xff] %vm423_vm5, %v3000_v48  ;;  %v11745_v45 = vpop.f32.mrb[224].mxu0  ;;  %v3560_v39 = vadd.f32 %v3519_v47, %v11291_v22  ;;  %v2962_v47 = vld [vmem:[#allocation3 + $0x78] sm:$0xff] }
 0x32f   : > { %v2808_v5 = vpop.f32.mrb[148].mxu1  ;;  %v8926_v15 = vpop.f32.mrb[225].mxu0  ;;  %9223 = vmatmul.mubr.msk.f32.gmra.mrb[74].mxu0 %vm423_vm5, %v5338_v61  ;;  %v3659_v61 = vld [vmem:[#allocation2 + $0xf0] sm:$0xff] }
 0x330   : > { %v3001_v43 = vadd.f32 %v2960_v38, %v2808_v5  ;;  %v8548_v8 = vpop.f32.mrb[149].mxu1  ;;  %8845 = vmatmul.mubr.msk.f32.gmra.mrb[254].mxu1 %vm423_vm5, %v3657_v55  ;;  %9225 = vmatprep.mubr.msk.f32.mxu0 %vm9649_vm1, %v9650_v6  ;;  %3601 = vst.msk [vmem:[#allocation3 + $0x50] sm:$0xff] %vm423_vm5, %v3560_v39  ;;  %v5341_v15 = vld [vmem:[#allocation2 + $0xe2] sm:$0xff] }
 0x331   : > { %8847 = vmatprep.mubr.msk.f32.mxu1 %vm9649_vm1, %v9650_v6  ;;  %v3520_v20 = vld [vmem:[#allocation3 + $0x58] sm:$0xff] }
 0x332   : > { %3042 = vst.msk [vmem:[#allocation3 + $0x68] sm:$0xff] %vm423_vm5, %v3001_v43  ;;  %v11756_v22 = vpop.f32.mrb[226].mxu0  ;;  %v3561_v42 = vadd.f32 %v3520_v20, %v11303_v12  ;;  %v2963_v20 = vld [vmem:[#allocation3 + $0x80] sm:$0xff] }
 0x333   : > { %v2813_v37 = vpop.f32.mrb[150].mxu1  ;;  %v8929_v9 = vpop.f32.mrb[227].mxu0  ;;  %9226 = vmatmul.mubr.msk.f32.gmra.mrb[76].mxu0 %vm423_vm5, %v5339_v28  ;;  %v3660_v28 = vld [vmem:[#allocation2 + $0xf8] sm:$0xff] }
 0x334   : > { %v3002_v19 = vadd.f32 %v2961_v32, %v2813_v37  ;;  %v8551_v26 = vpop.f32.mrb[151].mxu1  ;;  %8848 = vmatmul.mubr.msk.f32.gmra.mrb[0].mxu1 %vm423_vm5, %v3658_v4  ;;  %9228 = vmatprep.mubr.msk.f32.mxu0 %vm9649_vm1, %v9650_v6  ;;  %3602 = vst.msk [vmem:[#allocation3 + $0x58] sm:$0xff] %vm423_vm5, %v3561_v42  ;;  %v5342_v9 = vld [vmem:[#allocation2 + $0xea] sm:$0xff] }
 0x335   : > { %8850 = vmatprep.mubr.msk.f32.mxu1 %vm9649_vm1, %v9650_v6  ;;  %v3521_v2 = vld [vmem:[#allocation3 + $0x60] sm:$0xff] }
 0x336   : > { %3043 = vst.msk [vmem:[#allocation3 + $0x70] sm:$0xff] %vm423_vm5, %v3002_v19  ;;  %v11767_v12 = vpop.f32.mrb[228].mxu0  ;;  %v3562_v48 = vadd.f32 %v3521_v2, %v11315_v59  ;;  %v2964_v2 = vld [vmem:[#allocation3 + $0x88] sm:$0xff] }
 0x337   : > { %v2818_v16 = vpop.f32.mrb[152].mxu1  ;;  %v8932_v39 = vpop.f32.mrb[229].mxu0  ;;  %9229 = vmatmul.mubr.msk.f32.gmra.mrb[78].mxu0 %vm423_vm5, %v5340_v53  ;;  %v3661_v53 = vld [vmem:[#allocation2 + $0x100] sm:$0xff] }
 0x338   : > { %v3003_v5 = vadd.f32 %v2962_v47, %v2818_v16  ;;  %v8554_v38 = vpop.f32.mrb[153].mxu1  ;;  %8851 = vmatmul.mubr.msk.f32.gmra.mrb[2].mxu1 %vm423_vm5, %v3659_v61  ;;  %9231 = vmatprep.mubr.msk.f32.mxu0 %vm9649_vm1, %v9650_v6  ;;  %3603 = vst.msk [vmem:[#allocation3 + $0x60] sm:$0xff] %vm423_vm5, %v3562_v48  ;;  %v5343_v39 = vld [vmem:[#allocation2 + $0xf2] sm:$0xff] }
 0x339   : > { %8853 = vmatprep.mubr.msk.f32.mxu1 %vm9649_vm1, %v9650_v6  ;;  %v3522_v55 = vld [vmem:[#allocation3 + $0x68] sm:$0xff] }
 0x33a   : > { %3044 = vst.msk [vmem:[#allocation3 + $0x78] sm:$0xff] %vm423_vm5, %v3003_v5  ;;  %v11778_v59 = vpop.f32.mrb[230].mxu0  ;;  %v3563_v43 = vadd.f32 %v3522_v55, %v11327_v1  ;;  %v2965_v55 = vld [vmem:[#allocation3 + $0x90] sm:$0xff] }
 0x33b   : > { %v2823_v8 = vpop.f32.mrb[154].mxu1  ;;  %v8935_v42 = vpop.f32.mrb[231].mxu0  ;;  %9232 = vmatmul.mubr.msk.f32.gmra.mrb[80].mxu0 %vm423_vm5, %v5341_v15  ;;  %v3662_v15 = vld [vmem:[#allocation2 + $0x108] sm:$0xff] }
 0x33c   : > { %v3004_v37 = vadd.f32 %v2963_v20, %v2823_v8  ;;  %v8557_v32 = vpop.f32.mrb[155].mxu1  ;;  %8854 = vmatmul.mubr.msk.f32.gmra.mrb[4].mxu1 %vm423_vm5, %v3660_v28  ;;  %9234 = vmatprep.mubr.msk.f32.mxu0 %vm9649_vm1, %v9650_v6  ;;  %3604 = vst.msk [vmem:[#allocation3 + $0x68] sm:$0xff] %vm423_vm5, %v3563_v43  ;;  %v5344_v42 = vld [vmem:[#allocation2 + $0xfa] sm:$0xff] }
 0x33d   : > { %8856 = vmatprep.mubr.msk.f32.mxu1 %vm9649_vm1, %v9650_v6  ;;  %v3523_v4 = vld [vmem:[#allocation3 + $0x70] sm:$0xff] }
 0x33e   : > { %3045 = vst.msk [vmem:[#allocation3 + $0x80] sm:$0xff] %vm423_vm5, %v3004_v37  ;;  %v11789_v1 = vpop.f32.mrb[232].mxu0  ;;  %v3564_v19 = vadd.f32 %v3523_v4, %v11339_v27  ;;  %v2966_v4 = vld [vmem:[#allocation3 + $0x98] sm:$0xff] }
 0x33f   : > { %v2828_v26 = vpop.f32.mrb[156].mxu1  ;;  %v8938_v48 = vpop.f32.mrb[233].mxu0  ;;  %9235 = vmatmul.mubr.msk.f32.gmra.mrb[82].mxu0 %vm423_vm5, %v5342_v9  ;;  %v3663_v9 = vld [vmem:[#allocation2 + $0x110] sm:$0xff] }
 0x340   : > { %v3005_v16 = vadd.f32 %v2964_v2, %v2828_v26  ;;  %v8560_v47 = vpop.f32.mrb[157].mxu1  ;;  %8857 = vmatmul.mubr.msk.f32.gmra.mrb[6].mxu1 %vm423_vm5, %v3661_v53  ;;  %9237 = vmatprep.mubr.msk.f32.mxu0 %vm9649_vm1, %v9650_v6  ;;  %3605 = vst.msk [vmem:[#allocation3 + $0x70] sm:$0xff] %vm423_vm5, %v3564_v19  ;;  %v5345_v48 = vld [vmem:[#allocation2 + $0x102] sm:$0xff] }
 0x341   : > { %8859 = vmatprep.mubr.msk.f32.mxu1 %vm9649_vm1, %v9650_v6  ;;  %v3524_v61 = vld [vmem:[#allocation3 + $0x78] sm:$0xff] }
 0x342   : > { %3046 = vst.msk [vmem:[#allocation3 + $0x88] sm:$0xff] %vm423_vm5, %v3005_v16  ;;  %v11800_v27 = vpop.f32.mrb[234].mxu0  ;;  %v3565_v5 = vadd.f32 %v3524_v61, %v11351_v62  ;;  %v2967_v61 = vld [vmem:[#allocation3 + $0xa0] sm:$0xff] }
 0x343   : > { %v2833_v38 = vpop.f32.mrb[158].mxu1  ;;  %v8941_v43 = vpop.f32.mrb[235].mxu0  ;;  %9238 = vmatmul.mubr.msk.f32.gmra.mrb[84].mxu0 %vm423_vm5, %v5343_v39  ;;  %v3664_v39 = vld [vmem:[#allocation2 + $0x118] sm:$0xff] }
 0x344   : > { %v3006_v8 = vadd.f32 %v2965_v55, %v2833_v38  ;;  %v8563_v20 = vpop.f32.mrb[159].mxu1  ;;  %8860 = vmatmul.mubr.msk.f32.gmra.mrb[8].mxu1 %vm423_vm5, %v3662_v15  ;;  %9240 = vmatprep.mubr.msk.f32.mxu0 %vm9649_vm1, %v9650_v6  ;;  %3606 = vst.msk [vmem:[#allocation3 + $0x78] sm:$0xff] %vm423_vm5, %v3565_v5  ;;  %v5346_v43 = vld [vmem:[#allocation2 + $0x10a] sm:$0xff] }
 0x345   : > { %8862 = vmatprep.mubr.msk.f32.mxu1 %vm9649_vm1, %v9650_v6  ;;  %v3525_v28 = vld [vmem:[#allocation3 + $0x80] sm:$0xff] }
 0x346   : > { %3047 = vst.msk [vmem:[#allocation3 + $0x90] sm:$0xff] %vm423_vm5, %v3006_v8  ;;  %v11811_v62 = vpop.f32.mrb[236].mxu0  ;;  %v3566_v37 = vadd.f32 %v3525_v28, %v11363_v52  ;;  %v2968_v28 = vld [vmem:[#allocation3 + $0xa8] sm:$0xff] }
 0x347   : > { %v2838_v32 = vpop.f32.mrb[160].mxu1  ;;  %v8944_v19 = vpop.f32.mrb[237].mxu0  ;;  %9241 = vmatmul.mubr.msk.f32.gmra.mrb[86].mxu0 %vm423_vm5, %v5344_v42  ;;  %v3665_v42 = vld [vmem:[#allocation2 + $0x120] sm:$0xff] }
 0x348   : > { %v3007_v26 = vadd.f32 %v2966_v4, %v2838_v32  ;;  %v8566_v2 = vpop.f32.mrb[161].mxu1  ;;  %8863 = vmatmul.mubr.msk.f32.gmra.mrb[10].mxu1 %vm423_vm5, %v3663_v9  ;;  %9243 = vmatprep.mubr.msk.f32.mxu0 %vm9649_vm1, %v9650_v6  ;;  %3607 = vst.msk [vmem:[#allocation3 + $0x80] sm:$0xff] %vm423_vm5, %v3566_v37  ;;  %v5347_v19 = vld [vmem:[#allocation2 + $0x112] sm:$0xff] }
 0x349   : > { %8865 = vmatprep.mubr.msk.f32.mxu1 %vm9649_vm1, %v9650_v6  ;;  %v3526_v53 = vld [vmem:[#allocation3 + $0x88] sm:$0xff] }
 0x34a   : > { %3048 = vst.msk [vmem:[#allocation3 + $0x98] sm:$0xff] %vm423_vm5, %v3007_v26  ;;  %v11822_v52 = vpop.f32.mrb[238].mxu0  ;;  %v3567_v16 = vadd.f32 %v3526_v53, %v11375_v11  ;;  %v2969_v53 = vld [vmem:[#allocation3 + $0xb0] sm:$0xff] }
 0x34b   : > { %v2843_v47 = vpop.f32.mrb[162].mxu1  ;;  %v8947_v5 = vpop.f32.mrb[239].mxu0  ;;  %9244 = vmatmul.mubr.msk.f32.gmra.mrb[88].mxu0 %vm423_vm5, %v5345_v48  ;;  %v3666_v48 = vld [vmem:[#allocation2 + $0x128] sm:$0xff] }
 0x34c   : > { %v3008_v38 = vadd.f32 %v2967_v61, %v2843_v47  ;;  %v8569_v55 = vpop.f32.mrb[163].mxu1  ;;  %8866 = vmatmul.mubr.msk.f32.gmra.mrb[12].mxu1 %vm423_vm5, %v3664_v39  ;;  %9246 = vmatprep.mubr.msk.f32.mxu0 %vm9649_vm1, %v9650_v6  ;;  %3608 = vst.msk [vmem:[#allocation3 + $0x88] sm:$0xff] %vm423_vm5, %v3567_v16  ;;  %v5348_v5 = vld [vmem:[#allocation2 + $0x11a] sm:$0xff] }
 0x34d   : > { %8868 = vmatprep.mubr.msk.f32.mxu1 %vm9649_vm1, %v9650_v6  ;;  %v3527_v15 = vld [vmem:[#allocation3 + $0x90] sm:$0xff] }
 0x34e   : > { %3049 = vst.msk [vmem:[#allocation3 + $0xa0] sm:$0xff] %vm423_vm5, %v3008_v38  ;;  %v11833_v11 = vpop.f32.mrb[240].mxu0  ;;  %v3568_v8 = vadd.f32 %v3527_v15, %v11387_v14  ;;  %v2970_v15 = vld [vmem:[#allocation3 + $0xb8] sm:$0xff] }
 0x34f   : > { %v2848_v20 = vpop.f32.mrb[164].mxu1  ;;  %v8950_v37 = vpop.f32.mrb[241].mxu0  ;;  %9247 = vmatmul.mubr.msk.f32.gmra.mrb[90].mxu0 %vm423_vm5, %v5346_v43  ;;  %v3667_v43 = vld [vmem:[#allocation2 + $0x130] sm:$0xff] }
 0x350   : > { %v3009_v32 = vadd.f32 %v2968_v28, %v2848_v20  ;;  %v8572_v4 = vpop.f32.mrb[165].mxu1  ;;  %8869 = vmatmul.mubr.msk.f32.gmra.mrb[14].mxu1 %vm423_vm5, %v3665_v42  ;;  %9249 = vmatprep.mubr.msk.f32.mxu0 %vm9649_vm1, %v9650_v6  ;;  %3609 = vst.msk [vmem:[#allocation3 + $0x90] sm:$0xff] %vm423_vm5, %v3568_v8  ;;  %v5349_v37 = vld [vmem:[#allocation2 + $0x122] sm:$0xff] }
 0x351   : > { %8871 = vmatprep.mubr.msk.f32.mxu1 %vm9649_vm1, %v9650_v6  ;;  %v3528_v9 = vld [vmem:[#allocation3 + $0x98] sm:$0xff] }
 0x352   : > { %3050 = vst.msk [vmem:[#allocation3 + $0xa8] sm:$0xff] %vm423_vm5, %v3009_v32  ;;  %v11844_v14 = vpop.f32.mrb[242].mxu0  ;;  %v3569_v26 = vadd.f32 %v3528_v9, %v11399_v34  ;;  %v2971_v9 = vld [vmem:[#allocation3 + $0xc0] sm:$0xff] }
 0x353   : > { %v2853_v2 = vpop.f32.mrb[166].mxu1  ;;  %v8953_v16 = vpop.f32.mrb[243].mxu0  ;;  %9250 = vmatmul.mubr.msk.f32.gmra.mrb[92].mxu0 %vm423_vm5, %v5347_v19  ;;  %v3668_v19 = vld [vmem:[#allocation2 + $0x138] sm:$0xff] }
 0x354   : > { %v3010_v47 = vadd.f32 %v2969_v53, %v2853_v2  ;;  %v8575_v61 = vpop.f32.mrb[167].mxu1  ;;  %8872 = vmatmul.mubr.msk.f32.gmra.mrb[16].mxu1 %vm423_vm5, %v3666_v48  ;;  %9252 = vmatprep.mubr.msk.f32.mxu0 %vm9649_vm1, %v9650_v6  ;;  %3610 = vst.msk [vmem:[#allocation3 + $0x98] sm:$0xff] %vm423_vm5, %v3569_v26  ;;  %v5350_v16 = vld [vmem:[#allocation2 + $0x12a] sm:$0xff] }
 0x355   : > { %8874 = vmatprep.mubr.msk.f32.mxu1 %vm9649_vm1, %v9650_v6  ;;  %v3529_v39 = vld [vmem:[#allocation3 + $0xa0] sm:$0xff] }
 0x356   : > { %3051 = vst.msk [vmem:[#allocation3 + $0xb0] sm:$0xff] %vm423_vm5, %v3010_v47  ;;  %v11855_v34 = vpop.f32.mrb[244].mxu0  ;;  %v3570_v38 = vadd.f32 %v3529_v39, %v11411_v56  ;;  %v2972_v39 = vld [vmem:[#allocation3 + $0xc8] sm:$0xff] }
 0x357   : > { %v2858_v55 = vpop.f32.mrb[168].mxu1  ;;  %v8956_v8 = vpop.f32.mrb[245].mxu0  ;;  %9253 = vmatmul.mubr.msk.f32.gmra.mrb[94].mxu0 %vm423_vm5, %v5348_v5  ;;  %v3669_v5 = vld [vmem:[#allocation2 + $0x140] sm:$0xff] }
 0x358   : > { %v3011_v20 = vadd.f32 %v2970_v15, %v2858_v55  ;;  %v8578_v28 = vpop.f32.mrb[169].mxu1  ;;  %8875 = vmatmul.mubr.msk.f32.gmra.mrb[18].mxu1 %vm423_vm5, %v3667_v43  ;;  %9255 = vmatprep.mubr.msk.f32.mxu0 %vm9649_vm1, %v9650_v6  ;;  %3611 = vst.msk [vmem:[#allocation3 + $0xa0] sm:$0xff] %vm423_vm5, %v3570_v38  ;;  %v5351_v8 = vld [vmem:[#allocation2 + $0x132] sm:$0xff] }
 0x359   : > { %8877 = vmatprep.mubr.msk.f32.mxu1 %vm9649_vm1, %v9650_v6  ;;  %v3530_v42 = vld [vmem:[#allocation3 + $0xa8] sm:$0xff] }
 0x35a   : > { %3052 = vst.msk [vmem:[#allocation3 + $0xb8] sm:$0xff] %vm423_vm5, %v3011_v20  ;;  %v11866_v56 = vpop.f32.mrb[246].mxu0  ;;  %v3571_v32 = vadd.f32 %v3530_v42, %v11423_v54  ;;  %v2973_v42 = vld [vmem:[#allocation3 + $0xd0] sm:$0xff] }
 0x35b   : > { %v2863_v4 = vpop.f32.mrb[170].mxu1  ;;  %v8959_v26 = vpop.f32.mrb[247].mxu0  ;;  %9256 = vmatmul.mubr.msk.f32.gmra.mrb[96].mxu0 %vm423_vm5, %v5349_v37  ;;  %v3670_v37 = vld [vmem:[#allocation2 + $0x148] sm:$0xff] }
 0x35c   : > { %v3012_v2 = vadd.f32 %v2971_v9, %v2863_v4  ;;  %v8581_v53 = vpop.f32.mrb[171].mxu1  ;;  %8878 = vmatmul.mubr.msk.f32.gmra.mrb[20].mxu1 %vm423_vm5, %v3668_v19  ;;  %9258 = vmatprep.mubr.msk.f32.mxu0 %vm9649_vm1, %v9650_v6  ;;  %3612 = vst.msk [vmem:[#allocation3 + $0xa8] sm:$0xff] %vm423_vm5, %v3571_v32  ;;  %v5352_v26 = vld [vmem:[#allocation2 + $0x13a] sm:$0xff] }
 0x35d   : > { %8880 = vmatprep.mubr.msk.f32.mxu1 %vm9649_vm1, %v9650_v6  ;;  %v3531_v48 = vld [vmem:[#allocation3 + $0xb0] sm:$0xff] }
 0x35e   : > { %3053 = vst.msk [vmem:[#allocation3 + $0xc0] sm:$0xff] %vm423_vm5, %v3012_v2  ;;  %v11877_v54 = vpop.f32.mrb[248].mxu0  ;;  %v3572_v47 = vadd.f32 %v3531_v48, %v11435_v21  ;;  %v2974_v48 = vld [vmem:[#allocation3 + $0xd8] sm:$0xff] }
 0x35f   : > { %v2868_v61 = vpop.f32.mrb[172].mxu1  ;;  %v8962_v38 = vpop.f32.mrb[249].mxu0  ;;  %9259 = vmatmul.mubr.msk.f32.gmra.mrb[98].mxu0 %vm423_vm5, %v5350_v16  ;;  %v3671_v16 = vld [vmem:[#allocation2 + $0x150] sm:$0xff] }
 0x360   : > { %v3013_v55 = vadd.f32 %v2972_v39, %v2868_v61  ;;  %v8584_v15 = vpop.f32.mrb[173].mxu1  ;;  %8881 = vmatmul.mubr.msk.f32.gmra.mrb[22].mxu1 %vm423_vm5, %v3669_v5  ;;  %9261 = vmatprep.mubr.msk.f32.mxu0 %vm9649_vm1, %v9650_v6  ;;  %3613 = vst.msk [vmem:[#allocation3 + $0xb0] sm:$0xff] %vm423_vm5, %v3572_v47  ;;  %v5353_v38 = vld [vmem:[#allocation2 + $0x142] sm:$0xff] }
 0x361   : > { %8883 = vmatprep.mubr.msk.f32.mxu1 %vm9649_vm1, %v9650_v6  ;;  %v3532_v43 = vld [vmem:[#allocation3 + $0xb8] sm:$0xff]  ;;  %v7506_v15 = vld [vmem:[%s12919_s4 + $0x108] sm:$0xff] }
 0x362   : > { %3054 = vst.msk [vmem:[#allocation3 + $0xc8] sm:$0xff] %vm423_vm5, %v3013_v55  ;;  %v11888_v21 = vpop.f32.mrb[250].mxu0  ;;  %v3573_v20 = vadd.f32 %v3532_v43, %v11447_v33  ;;  %v7505_v55 = vld [vmem:[%s12919_s4 + $0x100] sm:$0xff] }
 0x363   : > { %v2873_v28 = vpop.f32.mrb[174].mxu1  ;;  %v8965_v32 = vpop.f32.mrb[251].mxu0  ;;  %9262 = vmatmul.mubr.msk.f32.gmra.mrb[100].mxu0 %vm423_vm5, %v5351_v8 }
 0x364   : > { %v3014_v4 = vadd.f32 %v2973_v42, %v2873_v28  ;;  %v8587_v9 = vpop.f32.mrb[175].mxu1  ;;  %8884 = vmatmul.mubr.msk.f32.gmra.mrb[24].mxu1 %vm423_vm5, %v3670_v37  ;;  %9264 = vmatprep.mubr.msk.f32.mxu0 %vm9649_vm1, %v9650_v6  ;;  %3614 = vst.msk [vmem:[#allocation3 + $0xb8] sm:$0xff] %vm423_vm5, %v3573_v20  ;;  %v2975_v20 = vld [vmem:[#allocation3 + $0xe0] sm:$0xff] }
 0x365   : > { %8886 = vmatprep.mubr.msk.f32.mxu1 %vm9649_vm1, %v9650_v6  ;;  %v3533_v19 = vld [vmem:[#allocation3 + $0xc0] sm:$0xff] }
 0x366   : > { %3055 = vst.msk [vmem:[#allocation3 + $0xd0] sm:$0xff] %vm423_vm5, %v3014_v4  ;;  %v11899_v33 = vpop.f32.mrb[252].mxu0  ;;  %v3574_v2 = vadd.f32 %v3533_v19, %v11464_v49  ;;  %v3672_v28 = vld [vmem:[#allocation2 + $0x158] sm:$0xf]  ;;  %v9609_v4 = vpack.c.bf16 %v7506_v15, %v7505_v55  ;;  %v5354_v19 = vld [vmem:[#allocation2 + $0x14a] sm:$0xff] }
 0x367   : > { %v2878_v53 = vpop.f32.mrb[176].mxu1  ;;  %v8968_v47 = vpop.f32.mrb[253].mxu0  ;;  %9265 = vmatmul.mubr.msk.f32.gmra.mrb[102].mxu0 %vm423_vm5, %v5352_v26  ;;  %v7507_v26 = vld [vmem:[%s12919_s4 + $0x110] sm:$0xff] }
 0x368   : > { %v3015_v61 = vadd.f32 %v2974_v48, %v2878_v53  ;;  %v8590_v39 = vpop.f32.mrb[177].mxu1  ;;  %8887 = vmatmul.mubr.msk.f32.gmra.mrb[26].mxu1 %vm423_vm5, %v3671_v16  ;;  %9267 = vmatprep.mubr.msk.f32.mxu0 %vm9649_vm1, %v9650_v6  ;;  %3615 = vst.msk [vmem:[#allocation3 + $0xc0] sm:$0xff] %vm423_vm5, %v3574_v2  ;;  %v7508_v2 = vld [vmem:[%s12919_s4 + $0x118] sm:$0xff]  ;;  %v2976_v16 = vld [vmem:[#allocation3 + $0xe8] sm:$0xff] }
 0x369   : > { %8889 = vmatprep.mubr.msk.f32.mxu1 %vm9649_vm1, %v9650_v6  ;;  %v3534_v5 = vld [vmem:[#allocation3 + $0xc8] sm:$0xff]  ;;  %v5355_v15 = vld [vmem:[#allocation2 + $0x152] sm:$0xff] }
 0x36a   : > { %3056 = vst.msk [vmem:[#allocation3 + $0xd8] sm:$0xff] %vm423_vm5, %v3015_v61  ;;  %v11910_v49 = vpop.f32.mrb[254].mxu0  ;;  %v3575_v43 = vadd.f32 %v3534_v5, %v11481_v35  ;;  %v4756_v61 = vld [vmem:[#allocation2 + $0x29] sm:$0xff] }
 0x36b   : > { %v2883_v8 = vpop.f32.mrb[178].mxu1  ;;  %v8971_v42 = vpop.f32.mrb[255].mxu0  ;;  %9268 = vmatmul.mubr.msk.f32.gmra.mrb[104].mxu0 %vm423_vm5, %v5353_v38 }
 0x36c   : > { %v3016_v37 = vadd.f32 %v2975_v20, %v2883_v8  ;;  %v8593_v32 = vpop.f32.mrb[179].mxu1  ;;  %8890 = vmatmul.mubr.msk.f32.gmra.mrb[28].mxu1 %vm423_vm5, %v3672_v28  ;;  %9270 = vmatprep.mubr.msk.f32.mxu0 %vm9649_vm1, %v9650_v6  ;;  %3616 = vst.msk [vmem:[#allocation3 + $0xc8] sm:$0xff] %vm423_vm5, %v3575_v43  ;;  %v2977_v20 = vld [vmem:[#allocation3 + $0xf0] sm:$0xff]  ;;  %v4757_v42 = vld [vmem:[#allocation2 + $0x31] sm:$0xff] }
 0x36d   : > { %9031 = vmatprep.mubr.msk.f32.mxu1 %vm9649_vm1, %v9650_v6  ;;  %v3535_v35 = vld [vmem:[#allocation3 + $0xd0] sm:$0xff] }
 0x36e   : > { %3057 = vst.msk [vmem:[#allocation3 + $0xe0] sm:$0xff] %vm423_vm5, %v3016_v37  ;;  %v11927_v9 = vpop.f32.mrb[0].mxu0  ;;  %v3576_v53 = vadd.f32 %v3535_v35, %v11493_v13  ;;  %v9612_v13 = vpack.c.bf16 %v7508_v2, %v7507_v26  ;;  %v5356_v35 = vld [vmem:[#allocation2 + $0x15a] sm:$0xff]  ;;  %v2978_v2 = vld [vmem:[#allocation3 + $0xf8] sm:$0xff] }
 0x36f   : > { %v2888_v48 = vpop.f32.mrb[180].mxu1  ;;  %v8974_v47 = vpop.f32.mrb[1].mxu0  ;;  %9271 = vmatmul.mubr.msk.f32.gmra.mrb[106].mxu0 %vm423_vm5, %v5354_v19 }
 0x370   : > { %v3017_v39 = vadd.f32 %v2976_v16, %v2888_v48  ;;  %v8596_v5 = vpop.f32.mrb[181].mxu1  ;;  %9032 = vmatmul.mubr.msk.f32.vlgmr.msra.gmra.mrb[30].mxu1 %vm423_vm5, %v4756_v61  ;;  %9273 = vmatprep.mubr.msk.f32.mxu0 %vm9649_vm1, %v9650_v6  ;;  %3617 = vst.msk [vmem:[#allocation3 + $0xd0] sm:$0xff] %vm423_vm5, %v3576_v53  ;;  %v4758_v48 = vld [vmem:[#allocation2 + $0x39] sm:$0xff] }
 0x371   : > { %9610 = vmatpush3.bf16.msra.mxu1 %v9609_v4  ;;  %9034 = vmatprep.mubr.msk.f32.mxu1 %vm9649_vm1, %v9650_v6  ;;  %v3536_v38 = vld [vmem:[#allocation3 + $0xd8] sm:$0xff] }
 0x372   : > { %3058 = vst.msk [vmem:[#allocation3 + $0xe8] sm:$0xff] %vm423_vm5, %v3017_v39  ;;  %v11944_v55 = vpop.f32.mrb[2].mxu0  ;;  %9611 = vmatprep.subr.bf16.mxu1 %v12943_v30  ;;  %v3577_v43 = vadd.f32 %v3536_v38, %v11505_v40 }
 0x373   : > { %v2893_v8 = vpop.f32.mrb[182].mxu1  ;;  %v8977_v28 = vpop.f32.mrb[3].mxu0  ;;  %9274 = vmatmul.mubr.msk.f32.gmra.mrb[108].mxu0 %vm423_vm5, %v5355_v15  ;;  %v4759_v15 = vld [vmem:[#allocation2 + $0x41] sm:$0xff] }
 0x374   : > { %v3018_v37 = vadd.f32 %v2977_v20, %v2893_v8  ;;  %v8599_v32 = vpop.f32.mrb[183].mxu1  ;;  %9035 = vmatmul.mubr.msk.f32.gmra.mrb[32].mxu1 %vm423_vm5, %v4757_v42  ;;  %9276 = vmatprep.mubr.msk.f32.mxu0 %vm9649_vm1, %v9650_v6  ;;  %3618 = vst.msk [vmem:[#allocation3 + $0xd8] sm:$0xff] %vm423_vm5, %v3577_v43 }
 0x375   : > { %9037 = vmatprep.mubr.msk.f32.mxu1 %vm9649_vm1, %v9650_v6  ;;  %9613 = vmatpush3.bf16.msra.mxu1 %v9612_v13  ;;  %v3537_v40 = vld [vmem:[#allocation3 + $0xe0] sm:$0xff] }
 0x376   : > { %3059 = vst.msk [vmem:[#allocation3 + $0xf0] sm:$0xff] %vm423_vm5, %v3018_v37  ;;  %v11956_v4 = vpop.f32.mrb[4].mxu0  ;;  %v3578_v19 = vadd.f32 %v3537_v40, %v11516_v0  ;;  %v2979_v13 = vld [vmem:[#allocation3 + $0x100] sm:$0xff]  ;;  %v2980_v37 = vld [vmem:[#allocation3 + $0x108] sm:$0xff]  ;;  %v4760_v40 = vld [vmem:[#allocation2 + $0x49] sm:$0xff] }
 0x377   : > { %v2898_v26 = vpop.f32.mrb[184].mxu1  ;;  %v8980_v53 = vpop.f32.mrb[5].mxu0  ;;  %9277 = vmatmul.mubr.msk.f32.gmra.mrb[110].mxu0 %vm423_vm5, %v5356_v35 }
 0x378   : > { %v3019_v16 = vadd.f32 %v2978_v2, %v2898_v26  ;;  %v8602_v47 = vpop.f32.mrb[185].mxu1  ;;  %9038 = vmatmul.mubr.msk.f32.gmra.mrb[34].mxu1 %vm423_vm5, %v4758_v48  ;;  %3619 = vst.msk [vmem:[#allocation3 + $0xe0] sm:$0xff] %vm423_vm5, %v3578_v19  ;;  %9279 = vmatprep.mubr.msk.f32.mxu0 %vm9649_vm1, %v9650_v6  ;;  %v2981_v48 = vld [vmem:[#allocation3 + $0x110] sm:$0xff] }
 0x379   : > { %9040 = vmatprep.mubr.msk.f32.mxu1 %vm9649_vm1, %v9650_v6  ;;  %v3538_v61 = vld [vmem:[#allocation3 + $0xe8] sm:$0xff]  ;;  %v4761_v47 = vld [vmem:[#allocation2 + $0x51] sm:$0xff] }
 0x37a   : > { %3060 = vst.msk [vmem:[#allocation3 + $0xf8] sm:$0xff] %vm423_vm5, %v3019_v16  ;;  %v11967_v0 = vpop.f32.mrb[6].mxu0  ;;  %v3579_v39 = vadd.f32 %v3538_v61, %v11527_v24 }
 0x37b   : > { %v2903_v5 = vpop.f32.mrb[186].mxu1  ;;  %v8983_v38 = vpop.f32.mrb[7].mxu0 }
 0x37c   : > { %v3020_v43 = vadd.f32 %v2979_v13, %v2903_v5  ;;  %v8605_v8 = vpop.f32.mrb[187].mxu1  ;;  %9041 = vmatmul.mubr.msk.f32.gmra.mrb[36].mxu1 %vm423_vm5, %v4759_v15  ;;  %3620 = vst.msk [vmem:[#allocation3 + $0xe8] sm:$0xff] %vm423_vm5, %v3579_v39  ;;  %v2982_v15 = vld [vmem:[#allocation3 + $0x118] sm:$0xff] }
 0x37d   : > { %9043 = vmatprep.mubr.msk.f32.mxu1 %vm9649_vm1, %v9650_v6  ;;  %v3539_v20 = vld [vmem:[#allocation3 + $0xf0] sm:$0xff]  ;;  %v4762_v8 = vld [vmem:[#allocation2 + $0x59] sm:$0xff] }
 0x37e   : > { %3061 = vst.msk [vmem:[#allocation3 + $0x100] sm:$0xff] %vm423_vm5, %v3020_v43  ;;  %v11975_v28 = vpop.f32.mrb[8].mxu0  ;;  %v3580_v24 = vadd.f32 %v3539_v20, %v11538_v23 }
 0x37f   : > { %v2908_v42 = vpop.f32.mrb[188].mxu1  ;;  %v8986_v32 = vpop.f32.mrb[9].mxu0 }
 0x380   : > { %v3021_v35 = vadd.f32 %v2980_v37, %v2908_v42  ;;  %v8608_v19 = vpop.f32.mrb[189].mxu1  ;;  %9044 = vmatmul.mubr.msk.f32.gmra.mrb[38].mxu1 %vm423_vm5, %v4760_v40  ;;  %3621 = vst.msk [vmem:[#allocation3 + $0xf0] sm:$0xff] %vm423_vm5, %v3580_v24  ;;  %v2983_v40 = vld [vmem:[#allocation3 + $0x120] sm:$0xff] }
 0x381   : > { %9046 = vmatprep.mubr.msk.f32.mxu1 %vm9649_vm1, %v9650_v6  ;;  %v3540_v26 = vld [vmem:[#allocation3 + $0xf8] sm:$0xff]  ;;  %v4763_v19 = vld [vmem:[#allocation2 + $0x61] sm:$0xff] }
 0x382   : > { %3062 = vst.msk [vmem:[#allocation3 + $0x108] sm:$0xff] %vm423_vm5, %v3021_v35  ;;  %v11983_v2 = vpop.f32.mrb[10].mxu0  ;;  %v3581_v23 = vadd.f32 %v3540_v26, %v11549_v58 }
 0x383   : > { %v2913_v53 = vpop.f32.mrb[190].mxu1  ;;  %v8989_v16 = vpop.f32.mrb[11].mxu0 }
 0x384   : > { %v3022_v61 = vadd.f32 %v2981_v48, %v2913_v53  ;;  %v8611_v39 = vpop.f32.mrb[191].mxu1  ;;  %9047 = vmatmul.mubr.msk.f32.gmra.mrb[40].mxu1 %vm423_vm5, %v4761_v47  ;;  %3622 = vst.msk [vmem:[#allocation3 + $0xf8] sm:$0xff] %vm423_vm5, %v3581_v23  ;;  %v2984_v47 = vld [vmem:[#allocation3 + $0x128] sm:$0xff] }
 0x385   : > { %9049 = vmatprep.mubr.msk.f32.mxu1 %vm9649_vm1, %v9650_v6  ;;  %v3541_v5 = vld [vmem:[#allocation3 + $0x100] sm:$0xff]  ;;  %v4764_v39 = vld [vmem:[#allocation2 + $0x69] sm:$0xff] }
 0x386   : > { %3063 = vst.msk [vmem:[#allocation3 + $0x110] sm:$0xff] %vm423_vm5, %v3022_v61  ;;  %v11991_v13 = vpop.f32.mrb[12].mxu0  ;;  %v3582_v58 = vadd.f32 %v3541_v5, %v11560_v46 }
 0x387   : > { %v2918_v38 = vpop.f32.mrb[192].mxu1  ;;  %v8992_v43 = vpop.f32.mrb[13].mxu0 }
 0x388   : > { %v3023_v20 = vadd.f32 %v2982_v15, %v2918_v38  ;;  %v8614_v24 = vpop.f32.mrb[193].mxu1  ;;  %9050 = vmatmul.mubr.msk.f32.gmra.mrb[42].mxu1 %vm423_vm5, %v4762_v8  ;;  %3623 = vst.msk [vmem:[#allocation3 + $0x100] sm:$0xff] %vm423_vm5, %v3582_v58  ;;  %v2985_v8 = vld [vmem:[#allocation3 + $0x130] sm:$0xff] }
 0x389   : > { %9052 = vmatprep.mubr.msk.f32.mxu1 %vm9649_vm1, %v9650_v6  ;;  %v3542_v42 = vld [vmem:[#allocation3 + $0x108] sm:$0xff]  ;;  %v4765_v24 = vld [vmem:[#allocation2 + $0x71] sm:$0xff] }
 0x38a   : > { %3064 = vst.msk [vmem:[#allocation3 + $0x118] sm:$0xff] %vm423_vm5, %v3023_v20  ;;  %v11999_v37 = vpop.f32.mrb[14].mxu0  ;;  %v3583_v46 = vadd.f32 %v3542_v42, %v11571_v18 }
 0x38b   : > { %v2923_v32 = vpop.f32.mrb[194].mxu1  ;;  %v8995_v35 = vpop.f32.mrb[15].mxu0 }
 0x38c   : > { %v3024_v26 = vadd.f32 %v2983_v40, %v2923_v32  ;;  %v8617_v23 = vpop.f32.mrb[195].mxu1  ;;  %9053 = vmatmul.mubr.msk.f32.gmra.mrb[44].mxu1 %vm423_vm5, %v4763_v19  ;;  %3624 = vst.msk [vmem:[#allocation3 + $0x108] sm:$0xff] %vm423_vm5, %v3583_v46  ;;  %v5357_v35 = vld [vmem:[#allocation2 + $0x162] sm:$0xff] }
 0x38d   : > { %9055 = vmatprep.mubr.msk.f32.mxu1 %vm9649_vm1, %v9650_v6  ;;  %v3543_v53 = vld [vmem:[#allocation3 + $0x110] sm:$0xff]  ;;  %9280 = vmatmul.mubr.msk.f32.gmra.mrb[112].mxu0 %vm423_vm5, %v5357_v35 }
 0x38e   : > { %3065 = vst.msk [vmem:[#allocation3 + $0x120] sm:$0xff] %vm423_vm5, %v3024_v26  ;;  %v12007_v48 = vpop.f32.mrb[16].mxu0  ;;  %v3584_v18 = vadd.f32 %v3543_v53, %v11582_v44  ;;  %v2986_v26 = vld [vmem:[#allocation3 + $0x138] sm:$0xff]  ;;  %v4766_v53 = vld [vmem:[#allocation2 + $0x79] sm:$0xff]  ;;  %9282 = vmatprep.mubr.msk.f32.mxu0 %vm9649_vm1, %v9650_v6 }
 0x38f   : > { %v2928_v16 = vpop.f32.mrb[196].mxu1  ;;  %v8998_v61 = vpop.f32.mrb[17].mxu0  ;;  %v4768_v35 = vld [vmem:[#allocation2 + $0x89] sm:$0xff] }
 0x390   : > { %v3025_v5 = vadd.f32 %v2984_v47, %v2928_v16  ;;  %v8620_v58 = vpop.f32.mrb[197].mxu1  ;;  %9056 = vmatmul.mubr.msk.f32.gmra.mrb[46].mxu1 %vm423_vm5, %v4764_v39  ;;  %3625 = vst.msk [vmem:[#allocation3 + $0x110] sm:$0xff] %vm423_vm5, %v3584_v18  ;;  %v5358_v61 = vld [vmem:[#allocation2 + $0x16a] sm:$0xf] }
 0x391   : > { %9058 = vmatprep.mubr.msk.f32.mxu1 %vm9649_vm1, %v9650_v6  ;;  %v3544_v38 = vld [vmem:[#allocation3 + $0x118] sm:$0xff]  ;;  %v2987_v58 = vld [vmem:[#allocation3 + $0x140] sm:$0xf]  ;;  %9283 = vmatmul.mubr.msk.f32.gmra.mrb[114].mxu0 %vm423_vm5, %v5358_v61 }
 0x392   : > { %3066 = vst.msk [vmem:[#allocation3 + $0x128] sm:$0xff] %vm423_vm5, %v3025_v5  ;;  %v12015_v15 = vpop.f32.mrb[18].mxu0  ;;  %v3585_v44 = vadd.f32 %v3544_v38, %v11593_v29  ;;  %9424 = vmatprep.mubr.msk.f32.mxu0 %vm9649_vm1, %v9650_v6 }
 0x393   : > { %v2933_v43 = vpop.f32.mrb[198].mxu1  ;;  %v9001_v20 = vpop.f32.mrb[19].mxu0 }
 0x394   : > { %v3026_v42 = vadd.f32 %v2985_v8, %v2933_v43  ;;  %v8623_v46 = vpop.f32.mrb[199].mxu1  ;;  %9059 = vmatmul.mubr.msk.f32.gmra.mrb[48].mxu1 %vm423_vm5, %v4765_v24  ;;  %3626 = vst.msk [vmem:[#allocation3 + $0x118] sm:$0xff] %vm423_vm5, %v3585_v44  ;;  %v4767_v44 = vld [vmem:[#allocation2 + $0x81] sm:$0xff] }
 0x395   : > { %9061 = vmatprep.mubr.msk.f32.mxu1 %vm9649_vm1, %v9650_v6  ;;  %v3545_v32 = vld [vmem:[#allocation3 + $0x120] sm:$0xff] }
 0x396   : > { %3067 = vst.msk [vmem:[#allocation3 + $0x130] sm:$0xff] %vm423_vm5, %v3026_v42  ;;  %v12023_v40 = vpop.f32.mrb[20].mxu0  ;;  %v3586_v29 = vadd.f32 %v3545_v32, %v11604_v41  ;;  %v4071_v46 = vld [vmem:[#allocation3] sm:$0xff] }
 0x397   : > { %v2938_v19 = vpop.f32.mrb[200].mxu1  ;;  %v9004_v23 = vpop.f32.mrb[21].mxu0 }
 0x398   : > { %v3027_v18 = vadd.f32 %v2986_v26, %v2938_v19  ;;  %v8626_v16 = vpop.f32.mrb[201].mxu1  ;;  %9062 = vmatmul.mubr.msk.f32.gmra.mrb[50].mxu1 %vm423_vm5, %v4766_v53  ;;  %3627 = vst.msk [vmem:[#allocation3 + $0x120] sm:$0xff] %vm423_vm5, %v3586_v29 }
 0x399   : > { %9064 = vmatprep.mubr.msk.f32.mxu1 %vm9649_vm1, %v9650_v6  ;;  %v3546_v47 = vld [vmem:[#allocation3 + $0x128] sm:$0xff] }
 0x39a   : > { %3068 = vst.msk [vmem:[#allocation3 + $0x138] sm:$0xff] %vm423_vm5, %v3027_v18  ;;  %v12034_v41 = vpop.f32.mrb[22].mxu0  ;;  %v3587_v39 = vadd.f32 %v3546_v47, %v11615_v57  ;;  %v4072_v18 = vld [vmem:[#allocation3 + $0x8] sm:$0xff]  ;;  %v4769_v47 = vld [vmem:[#allocation2 + $0x91] sm:$0xff] }
 0x39b   : > { %v2943_v5 = vpop.f32.mrb[202].mxu1  ;;  %v9007_v38 = vpop.f32.mrb[23].mxu0 }
 0x39c   : > { %v3028_v43 = vadd.f32 %v2987_v58, %v2943_v5  ;;  %v8629_v8 = vpop.f32.mrb[203].mxu1  ;;  %9065 = vmatmul.mubr.msk.f32.gmra.mrb[52].mxu1 %vm423_vm5, %v4767_v44  ;;  %3628 = vst.msk [vmem:[#allocation3 + $0x128] sm:$0xff] %vm423_vm5, %v3587_v39  ;;  %v4073_v44 = vld [vmem:[#allocation3 + $0x10] sm:$0xff] }
 0x39d   : > { %9067 = vmatprep.mubr.msk.f32.mxu1 %vm9649_vm1, %v9650_v6  ;;  %v3547_v20 = vld [vmem:[#allocation3 + $0x130] sm:$0xff]  ;;  %v4770_v8 = vld [vmem:[#allocation2 + $0x99] sm:$0xff] }
 0x39e   : > { %3069 = vst.msk [vmem:[#allocation3 + $0x140] sm:$0xf] %vm1335_vm6, %v3028_v43  ;;  %v12045_v57 = vpop.f32.mrb[24].mxu0  ;;  %v3588_v24 = vadd.f32 %v3547_v20, %v11626_v36 }
 0x39f   : > { %v3867_v42 = vpop.f32.mrb[204].mxu1  ;;  %v9010_v32 = vpop.f32.mrb[25].mxu0 }
 0x3a0   : > { %v4112_v29 = vadd.f32 %v4071_v46, %v3867_v42  ;;  %v8771_v19 = vpop.f32.mrb[205].mxu1  ;;  %9068 = vmatmul.mubr.msk.f32.gmra.mrb[54].mxu1 %vm423_vm5, %v4768_v35  ;;  %3629 = vst.msk [vmem:[#allocation3 + $0x130] sm:$0xff] %vm423_vm5, %v3588_v24  ;;  %v4074_v35 = vld [vmem:[#allocation3 + $0x18] sm:$0xff] }
 0x3a1   : > { %9070 = vmatprep.mubr.msk.f32.mxu1 %vm9649_vm1, %v9650_v6  ;;  %v3548_v26 = vld [vmem:[#allocation3 + $0x138] sm:$0xff]  ;;  %v4771_v19 = vld [vmem:[#allocation2 + $0xa1] sm:$0xff] }
 0x3a2   : > { %4153 = vst.msk [vmem:[#allocation3] sm:$0xff] %vm423_vm5, %v4112_v29  ;;  %v12053_v23 = vpop.f32.mrb[26].mxu0  ;;  %v3589_v36 = vadd.f32 %v3548_v26, %v11635_v10 }
 0x3a3   : > { %v3872_v53 = vpop.f32.mrb[206].mxu1  ;;  %v9013_v16 = vpop.f32.mrb[27].mxu0 }
 0x3a4   : > { %v4113_v61 = vadd.f32 %v4072_v18, %v3872_v53  ;;  %v8774_v39 = vpop.f32.mrb[207].mxu1  ;;  %9071 = vmatmul.mubr.msk.f32.gmra.mrb[56].mxu1 %vm423_vm5, %v4769_v47  ;;  %3630 = vst.msk [vmem:[#allocation3 + $0x138] sm:$0xff] %vm423_vm5, %v3589_v36  ;;  %v4075_v47 = vld [vmem:[#allocation3 + $0x20] sm:$0xff] }
 0x3a5   : > { %v3549_v5 = vld [vmem:[#allocation3 + $0x140] sm:$0xf]  ;;  %9073 = vmatprep.mubr.msk.f32.mxu1 %vm9649_vm1, %v9650_v6  ;;  %v4772_v39 = vld [vmem:[#allocation2 + $0xa9] sm:$0xff] }
 0x3a6   : > { %v3590_v58 = vadd.f32 %v3549_v5, %v11646_v17  ;;  %4154 = vst.msk [vmem:[#allocation3 + $0x8] sm:$0xff] %vm423_vm5, %v4113_v61  ;;  %v12062_v38 = vpop.f32.mrb[28].mxu0 }
 0x3a7   : > { %v3877_v10 = vpop.f32.mrb[208].mxu1  ;;  %v9016_v43 = vpop.f32.mrb[29].mxu0 }
 0x3a8   : > { %3631 = vst.msk [vmem:[#allocation3 + $0x140] sm:$0xf] %vm1335_vm6, %v3590_v58  ;;  %v4114_v20 = vadd.f32 %v4073_v44, %v3877_v10  ;;  %v8777_v24 = vpop.f32.mrb[209].mxu1  ;;  %9074 = vmatmul.mubr.msk.f32.gmra.mrb[58].mxu1 %vm423_vm5, %v4770_v8  ;;  %v4076_v8 = vld [vmem:[#allocation3 + $0x28] sm:$0xff] }
 0x3a9   : > { %9076 = vmatprep.mubr.msk.f32.mxu1 %vm9649_vm1, %v9650_v6  ;;  %v4633_v42 = vld [vmem:[#allocation3] sm:$0xff] }
 0x3aa   : > { %4155 = vst.msk [vmem:[#allocation3 + $0x10] sm:$0xff] %vm423_vm5, %v4114_v20  ;;  %v12069_v17 = vpop.f32.mrb[30].mxu0  ;;  %v4674_v46 = vadd.f32 %v4633_v42, %v11657_v3  ;;  %v4773_v20 = vld [vmem:[#allocation2 + $0xb1] sm:$0xff] }
 0x3ab   : > { %v3882_v32 = vpop.f32.mrb[210].mxu1  ;;  %v9019_v29 = vpop.f32.mrb[31].mxu0 }
 0x3ac   : > { %v4115_v26 = vadd.f32 %v4074_v35, %v3882_v32  ;;  %v8780_v36 = vpop.f32.mrb[211].mxu1  ;;  %9077 = vmatmul.mubr.msk.f32.gmra.mrb[60].mxu1 %vm423_vm5, %v4771_v19  ;;  %4715 = vst.msk [vmem:[#allocation3] sm:$0xff] %vm423_vm5, %v4674_v46  ;;  %v4077_v19 = vld [vmem:[#allocation3 + $0x30] sm:$0xff] }
 0x3ad   : > { %9079 = vmatprep.mubr.msk.f32.mxu1 %vm9649_vm1, %v9650_v6  ;;  %v4634_v53 = vld [vmem:[#allocation3 + $0x8] sm:$0xff] }
 0x3ae   : > { %4156 = vst.msk [vmem:[#allocation3 + $0x18] sm:$0xff] %vm423_vm5, %v4115_v26  ;;  %v12077_v18 = vpop.f32.mrb[32].mxu0  ;;  %v4675_v3 = vadd.f32 %v4634_v53, %v11668_v63  ;;  %v4774_v26 = vld [vmem:[#allocation2 + $0xb9] sm:$0xff] }
 0x3af   : > { %v3887_v16 = vpop.f32.mrb[212].mxu1  ;;  %v9022_v61 = vpop.f32.mrb[33].mxu0 }
 0x3b0   : > { %v4116_v5 = vadd.f32 %v4075_v47, %v3887_v16  ;;  %v8783_v58 = vpop.f32.mrb[213].mxu1  ;;  %9080 = vmatmul.mubr.msk.f32.gmra.mrb[62].mxu1 %vm423_vm5, %v4772_v39  ;;  %4716 = vst.msk [vmem:[#allocation3 + $0x8] sm:$0xff] %vm423_vm5, %v4675_v3  ;;  %v4078_v39 = vld [vmem:[#allocation3 + $0x38] sm:$0xff] }
 0x3b1   : > { %9082 = vmatprep.mubr.msk.f32.mxu1 %vm9649_vm1, %v9650_v6  ;;  %v4635_v10 = vld [vmem:[#allocation3 + $0x10] sm:$0xff] }
 0x3b2   : > { %4157 = vst.msk [vmem:[#allocation3 + $0x20] sm:$0xff] %vm423_vm5, %v4116_v5  ;;  %v12085_v44 = vpop.f32.mrb[34].mxu0  ;;  %v4676_v63 = vadd.f32 %v4635_v10, %v11679_v31  ;;  %v4775_v5 = vld [vmem:[#allocation2 + $0xc1] sm:$0xff] }
 0x3b3   : > { %v3892_v43 = vpop.f32.mrb[214].mxu1  ;;  %v9164_v24 = vpop.f32.mrb[35].mxu0 }
 0x3b4   : > { %v4117_v42 = vadd.f32 %v4076_v8, %v3892_v43  ;;  %v8786_v46 = vpop.f32.mrb[215].mxu1  ;;  %9083 = vmatmul.mubr.msk.f32.gmra.mrb[64].mxu1 %vm423_vm5, %v4773_v20  ;;  %4717 = vst.msk [vmem:[#allocation3 + $0x10] sm:$0xff] %vm423_vm5, %v4676_v63  ;;  %v4079_v24 = vld [vmem:[#allocation3 + $0x40] sm:$0xff] }
 0x3b5   : > { %9085 = vmatprep.mubr.msk.f32.mxu1 %vm9649_vm1, %v9650_v6  ;;  %v4636_v32 = vld [vmem:[#allocation3 + $0x18] sm:$0xff] }
 0x3b6   : > { %4158 = vst.msk [vmem:[#allocation3 + $0x28] sm:$0xff] %vm423_vm5, %v4117_v42  ;;  %v12093_v35 = vpop.f32.mrb[36].mxu0  ;;  %v4677_v31 = vadd.f32 %v4636_v32, %v11690_v7  ;;  %v4776_v42 = vld [vmem:[#allocation2 + $0xc9] sm:$0xff] }
 0x3b7   : > { %v3897_v29 = vpop.f32.mrb[216].mxu1  ;;  %v9167_v36 = vpop.f32.mrb[37].mxu0 }
 0x3b8   : > { %v4118_v53 = vadd.f32 %v4077_v19, %v3897_v29  ;;  %v8789_v3 = vpop.f32.mrb[217].mxu1  ;;  %9086 = vmatmul.mubr.msk.f32.gmra.mrb[66].mxu1 %vm423_vm5, %v4774_v26  ;;  %4718 = vst.msk [vmem:[#allocation3 + $0x18] sm:$0xff] %vm423_vm5, %v4677_v31  ;;  %v4080_v36 = vld [vmem:[#allocation3 + $0x48] sm:$0xff] }
 0x3b9   : > { %9088 = vmatprep.mubr.msk.f32.mxu1 %vm9649_vm1, %v9650_v6  ;;  %v4637_v16 = vld [vmem:[#allocation3 + $0x20] sm:$0xff] }
 0x3ba   : > { %4159 = vst.msk [vmem:[#allocation3 + $0x30] sm:$0xff] %vm423_vm5, %v4118_v53  ;;  %v12101_v47 = vpop.f32.mrb[38].mxu0  ;;  %v4678_v7 = vadd.f32 %v4637_v16, %v11701_v51  ;;  %v4777_v53 = vld [vmem:[#allocation2 + $0xd1] sm:$0xff] }
 0x3bb   : > { %v3902_v61 = vpop.f32.mrb[218].mxu1  ;;  %v9170_v58 = vpop.f32.mrb[39].mxu0 }
 0x3bc   : > { %v4119_v10 = vadd.f32 %v4078_v39, %v3902_v61  ;;  %v8792_v63 = vpop.f32.mrb[219].mxu1  ;;  %9089 = vmatmul.mubr.msk.f32.gmra.mrb[68].mxu1 %vm423_vm5, %v4775_v5  ;;  %4719 = vst.msk [vmem:[#allocation3 + $0x20] sm:$0xff] %vm423_vm5, %v4678_v7  ;;  %v4081_v58 = vld [vmem:[#allocation3 + $0x50] sm:$0xff] }
 0x3bd   : > { %9091 = vmatprep.mubr.msk.f32.mxu1 %vm9649_vm1, %v9650_v6  ;;  %v4638_v43 = vld [vmem:[#allocation3 + $0x28] sm:$0xff] }
 0x3be   : > { %4160 = vst.msk [vmem:[#allocation3 + $0x38] sm:$0xff] %vm423_vm5, %v4119_v10  ;;  %v12109_v8 = vpop.f32.mrb[40].mxu0  ;;  %v4679_v51 = vadd.f32 %v4638_v43, %v11712_v60  ;;  %v4778_v10 = vld [vmem:[#allocation2 + $0xd9] sm:$0xff] }
 0x3bf   : > { %v3907_v20 = vpop.f32.mrb[220].mxu1  ;;  %v9173_v46 = vpop.f32.mrb[41].mxu0 }
 0x3c0   : > { %v4120_v32 = vadd.f32 %v4079_v24, %v3907_v20  ;;  %v8795_v31 = vpop.f32.mrb[221].mxu1  ;;  %9092 = vmatmul.mubr.msk.f32.gmra.mrb[70].mxu1 %vm423_vm5, %v4776_v42  ;;  %4720 = vst.msk [vmem:[#allocation3 + $0x28] sm:$0xff] %vm423_vm5, %v4679_v51  ;;  %v4082_v46 = vld [vmem:[#allocation3 + $0x58] sm:$0xff] }
 0x3c1   : > { %9094 = vmatprep.mubr.msk.f32.mxu1 %vm9649_vm1, %v9650_v6  ;;  %v4639_v29 = vld [vmem:[#allocation3 + $0x30] sm:$0xff] }
 0x3c2   : > { %4161 = vst.msk [vmem:[#allocation3 + $0x40] sm:$0xff] %vm423_vm5, %v4120_v32  ;;  %v12117_v19 = vpop.f32.mrb[42].mxu0  ;;  %v4680_v60 = vadd.f32 %v4639_v29, %v11723_v25  ;;  %v4779_v32 = vld [vmem:[#allocation2 + $0xe1] sm:$0xff] }
 0x3c3   : > { %v3912_v26 = vpop.f32.mrb[222].mxu1  ;;  %v9176_v3 = vpop.f32.mrb[43].mxu0 }
 0x3c4   : > { %v4121_v16 = vadd.f32 %v4080_v36, %v3912_v26  ;;  %v8798_v7 = vpop.f32.mrb[223].mxu1  ;;  %9095 = vmatmul.mubr.msk.f32.gmra.mrb[72].mxu1 %vm423_vm5, %v4777_v53  ;;  %4721 = vst.msk [vmem:[#allocation3 + $0x30] sm:$0xff] %vm423_vm5, %v4680_v60  ;;  %v4083_v3 = vld [vmem:[#allocation3 + $0x60] sm:$0xff] }
 0x3c5   : > { %9097 = vmatprep.mubr.msk.f32.mxu1 %vm9649_vm1, %v9650_v6  ;;  %v4640_v61 = vld [vmem:[#allocation3 + $0x38] sm:$0xff] }
 0x3c6   : > { %4162 = vst.msk [vmem:[#allocation3 + $0x48] sm:$0xff] %vm423_vm5, %v4121_v16  ;;  %v12125_v39 = vpop.f32.mrb[44].mxu0  ;;  %v4681_v25 = vadd.f32 %v4640_v61, %v11734_v50  ;;  %v4780_v16 = vld [vmem:[#allocation2 + $0xe9] sm:$0xff] }
 0x3c7   : > { %v3917_v5 = vpop.f32.mrb[224].mxu1  ;;  %v9179_v63 = vpop.f32.mrb[45].mxu0 }
 0x3c8   : > { %v4122_v43 = vadd.f32 %v4081_v58, %v3917_v5  ;;  %v8801_v51 = vpop.f32.mrb[225].mxu1  ;;  %9098 = vmatmul.mubr.msk.f32.gmra.mrb[74].mxu1 %vm423_vm5, %v4778_v10  ;;  %4722 = vst.msk [vmem:[#allocation3 + $0x38] sm:$0xff] %vm423_vm5, %v4681_v25  ;;  %v4084_v63 = vld [vmem:[#allocation3 + $0x68] sm:$0xff] }
 0x3c9   : > { %9100 = vmatprep.mubr.msk.f32.mxu1 %vm9649_vm1, %v9650_v6  ;;  %v4641_v20 = vld [vmem:[#allocation3 + $0x40] sm:$0xff] }
 0x3ca   : > { %4163 = vst.msk [vmem:[#allocation3 + $0x50] sm:$0xff] %vm423_vm5, %v4122_v43  ;;  %v12133_v24 = vpop.f32.mrb[46].mxu0  ;;  %v4682_v50 = vadd.f32 %v4641_v20, %v11745_v45  ;;  %v4781_v43 = vld [vmem:[#allocation2 + $0xf1] sm:$0xff] }
 0x3cb   : > { %v3922_v42 = vpop.f32.mrb[226].mxu1  ;;  %v9182_v31 = vpop.f32.mrb[47].mxu0 }
 0x3cc   : > { %v4123_v29 = vadd.f32 %v4082_v46, %v3922_v42  ;;  %v8804_v60 = vpop.f32.mrb[227].mxu1  ;;  %9101 = vmatmul.mubr.msk.f32.gmra.mrb[76].mxu1 %vm423_vm5, %v4779_v32  ;;  %4723 = vst.msk [vmem:[#allocation3 + $0x40] sm:$0xff] %vm423_vm5, %v4682_v50  ;;  %v6573_v32 = vld [vmem:[%s12921_s6 + $0x8] sm:$0xff] }
 0x3cd   : > { %9103 = vmatprep.mubr.msk.f32.mxu1 %vm9649_vm1, %v9650_v6  ;;  %v4642_v26 = vld [vmem:[#allocation3 + $0x48] sm:$0xff]  ;;  %v4085_v60 = vld [vmem:[#allocation3 + $0x70] sm:$0xff] }
 0x3ce   : > { %4164 = vst.msk [vmem:[#allocation3 + $0x58] sm:$0xff] %vm423_vm5, %v4123_v29  ;;  %v12141_v36 = vpop.f32.mrb[48].mxu0  ;;  %v4683_v45 = vadd.f32 %v4642_v26, %v11756_v22  ;;  %v4782_v26 = vld [vmem:[#allocation2 + $0xf9] sm:$0xff] }
 0x3cf   : > { %v3927_v53 = vpop.f32.mrb[228].mxu1  ;;  %v9185_v7 = vpop.f32.mrb[49].mxu0 }
 0x3d0   : > { %v4124_v61 = vadd.f32 %v4083_v3, %v3927_v53  ;;  %v8807_v25 = vpop.f32.mrb[229].mxu1  ;;  %9104 = vmatmul.mubr.msk.f32.gmra.mrb[78].mxu1 %vm423_vm5, %v4780_v16  ;;  %4724 = vst.msk [vmem:[#allocation3 + $0x48] sm:$0xff] %vm423_vm5, %v4683_v45 }
 0x3d1   : > { %9106 = vmatprep.mubr.msk.f32.mxu1 %vm9649_vm1, %v9650_v6  ;;  %v4643_v5 = vld [vmem:[#allocation3 + $0x50] sm:$0xff] }
 0x3d2   : > { %4165 = vst.msk [vmem:[#allocation3 + $0x60] sm:$0xff] %vm423_vm5, %v4124_v61  ;;  %v12149_v58 = vpop.f32.mrb[50].mxu0  ;;  %v4684_v22 = vadd.f32 %v4643_v5, %v11767_v12  ;;  %v6572_v12 = vld [vmem:[%s12921_s6] sm:$0xff]  ;;  %v4086_v5 = vld [vmem:[#allocation3 + $0x78] sm:$0xff] }
 0x3d3   : > { %v3932_v10 = vpop.f32.mrb[230].mxu1  ;;  %v9188_v51 = vpop.f32.mrb[51].mxu0  ;;  %v9615_v53 = vpack.c.bf16 %v6573_v32, %v6572_v12 }
 0x3d4   : > { %v4125_v20 = vadd.f32 %v4084_v63, %v3932_v10  ;;  %v8810_v50 = vpop.f32.mrb[231].mxu1  ;;  %9107 = vmatmul.mubr.msk.f32.gmra.mrb[80].mxu1 %vm423_vm5, %v4781_v43  ;;  %4725 = vst.msk [vmem:[#allocation3 + $0x50] sm:$0xff] %vm423_vm5, %v4684_v22  ;;  %v4783_v22 = vld [vmem:[#allocation2 + $0x101] sm:$0xff] }
 0x3d5   : > { %9109 = vmatprep.mubr.msk.f32.mxu1 %vm9649_vm1, %v9650_v6  ;;  %v4644_v42 = vld [vmem:[#allocation3 + $0x58] sm:$0xff]  ;;  %9616 = vmatpush3.bf16.msra.mxu0 %v9615_v53  ;;  %v4087_v50 = vld [vmem:[#allocation3 + $0x80] sm:$0xff] }
 0x3d6   : > { %4166 = vst.msk [vmem:[#allocation3 + $0x68] sm:$0xff] %vm423_vm5, %v4125_v20  ;;  %v12157_v46 = vpop.f32.mrb[52].mxu0  ;;  %v4685_v31 = vadd.f32 %v4644_v42, %v11778_v59  ;;  %9617 = vmatprep.subr.bf16.mxu0 %v12943_v30  ;;  %v4784_v42 = vld [vmem:[#allocation2 + $0x109] sm:$0xff]  ;;  %v4785_v53 = vld [vmem:[#allocation2 + $0x111] sm:$0xff] }
 0x3d7   : > { %v3937_v29 = vpop.f32.mrb[232].mxu1  ;;  %v9191_v45 = vpop.f32.mrb[53].mxu0 }
 0x3d8   : > { %v4126_v3 = vadd.f32 %v4085_v60, %v3937_v29  ;;  %v8813_v16 = vpop.f32.mrb[233].mxu1  ;;  %9110 = vmatmul.mubr.msk.f32.gmra.mrb[82].mxu1 %vm423_vm5, %v4782_v26  ;;  %4726 = vst.msk [vmem:[#allocation3 + $0x58] sm:$0xff] %vm423_vm5, %v4685_v31  ;;  %v4088_v45 = vld [vmem:[#allocation3 + $0x88] sm:$0xff] }
 0x3d9   : > { %9112 = vmatprep.mubr.msk.f32.mxu1 %vm9649_vm1, %v9650_v6  ;;  %v4645_v7 = vld [vmem:[#allocation3 + $0x60] sm:$0xff] }
 0x3da   : > { %4167 = vst.msk [vmem:[#allocation3 + $0x70] sm:$0xff] %vm423_vm5, %v4126_v3  ;;  %v12171_v61 = vpop.f32.mrb[54].mxu0  ;;  %v4686_v59 = vadd.f32 %v4645_v7, %v11789_v1 }
 0x3db   : > { %v3942_v25 = vpop.f32.mrb[234].mxu1  ;;  %v9194_v10 = vpop.f32.mrb[55].mxu0 }
 0x3dc   : > { %v4127_v63 = vadd.f32 %v4086_v5, %v3942_v25  ;;  %v8816_v43 = vpop.f32.mrb[235].mxu1  ;;  %9113 = vmatmul.mubr.msk.f32.gmra.mrb[84].mxu1 %vm423_vm5, %v4783_v22  ;;  %4727 = vst.msk [vmem:[#allocation3 + $0x60] sm:$0xff] %vm423_vm5, %v4686_v59  ;;  %v4089_v22 = vld [vmem:[#allocation3 + $0x90] sm:$0xff]  ;;  %v4786_v10 = vld [vmem:[#allocation2 + $0x119] sm:$0xff] }
 0x3dd   : > { %9115 = vmatprep.mubr.msk.f32.mxu1 %vm9649_vm1, %v9650_v6  ;;  %v4646_v51 = vld [vmem:[#allocation3 + $0x68] sm:$0xff] }
 0x3de   : > { %4168 = vst.msk [vmem:[#allocation3 + $0x78] sm:$0xff] %vm423_vm5, %v4127_v63  ;;  %v12180_v20 = vpop.f32.mrb[56].mxu0  ;;  %v4687_v30 = vadd.f32 %v4646_v51, %v11800_v27 }
 0x3df   : > { %v3947_v1 = vpop.f32.mrb[236].mxu1  ;;  %v9197_v12 = vpop.f32.mrb[57].mxu0 }
 0x3e0   : > { %v4128_v32 = vadd.f32 %v4087_v50, %v3947_v1  ;;  %v8819_v31 = vpop.f32.mrb[237].mxu1  ;;  %9116 = vmatmul.mubr.msk.f32.gmra.mrb[86].mxu1 %vm423_vm5, %v4784_v42  ;;  %4728 = vst.msk [vmem:[#allocation3 + $0x68] sm:$0xff] %vm423_vm5, %v4687_v30  ;;  %v4090_v42 = vld [vmem:[#allocation3 + $0x98] sm:$0xff]  ;;  %v4787_v12 = vld [vmem:[#allocation2 + $0x121] sm:$0xff] }
 0x3e1   : > { %9118 = vmatprep.mubr.msk.f32.mxu1 %vm9649_vm1, %v9650_v6  ;;  %v4647_v29 = vld [vmem:[#allocation3 + $0x70] sm:$0xff] }
 0x3e2   : > { %4169 = vst.msk [vmem:[#allocation3 + $0x80] sm:$0xff] %vm423_vm5, %v4128_v32  ;;  %v12188_v60 = vpop.f32.mrb[58].mxu0  ;;  %v4688_v27 = vadd.f32 %v4647_v29, %v11811_v62 }
 0x3e3   : > { %v3952_v26 = vpop.f32.mrb[238].mxu1  ;;  %v9200_v3 = vpop.f32.mrb[59].mxu0 }
 0x3e4   : > { %v4129_v16 = vadd.f32 %v4088_v45, %v3952_v26  ;;  %v8822_v7 = vpop.f32.mrb[239].mxu1  ;;  %9119 = vmatmul.mubr.msk.f32.gmra.mrb[88].mxu1 %vm423_vm5, %v4785_v53  ;;  %4729 = vst.msk [vmem:[#allocation3 + $0x70] sm:$0xff] %vm423_vm5, %v4688_v27  ;;  %v4091_v53 = vld [vmem:[#allocation3 + $0xa0] sm:$0xff]  ;;  %v4788_v3 = vld [vmem:[#allocation2 + $0x129] sm:$0xff] }
 0x3e5   : > { %9121 = vmatprep.mubr.msk.f32.mxu1 %vm9649_vm1, %v9650_v6  ;;  %v4648_v59 = vld [vmem:[#allocation3 + $0x78] sm:$0xff] }
 0x3e6   : > { %4170 = vst.msk [vmem:[#allocation3 + $0x88] sm:$0xff] %vm423_vm5, %v4129_v16  ;;  %v12196_v25 = vpop.f32.mrb[60].mxu0  ;;  %v4689_v62 = vadd.f32 %v4648_v59, %v11822_v52 }
 0x3e7   : > { %v3957_v5 = vpop.f32.mrb[240].mxu1  ;;  %v9203_v63 = vpop.f32.mrb[61].mxu0 }
 0x3e8   : > { %v4130_v43 = vadd.f32 %v4089_v22, %v3957_v5  ;;  %v8825_v51 = vpop.f32.mrb[241].mxu1  ;;  %9122 = vmatmul.mubr.msk.f32.gmra.mrb[90].mxu1 %vm423_vm5, %v4786_v10  ;;  %4730 = vst.msk [vmem:[#allocation3 + $0x78] sm:$0xff] %vm423_vm5, %v4689_v62  ;;  %v4092_v10 = vld [vmem:[#allocation3 + $0xa8] sm:$0xff]  ;;  %v4789_v63 = vld [vmem:[#allocation2 + $0x131] sm:$0xff] }
 0x3e9   : > { %9124 = vmatprep.mubr.msk.f32.mxu1 %vm9649_vm1, %v9650_v6  ;;  %v4649_v30 = vld [vmem:[#allocation3 + $0x80] sm:$0xff] }
 0x3ea   : > { %4171 = vst.msk [vmem:[#allocation3 + $0x90] sm:$0xff] %vm423_vm5, %v4130_v43  ;;  %v12204_v1 = vpop.f32.mrb[62].mxu0  ;;  %v4690_v52 = vadd.f32 %v4649_v30, %v11833_v11 }
 0x3eb   : > { %v3962_v50 = vpop.f32.mrb[242].mxu1  ;;  %v9206_v32 = vpop.f32.mrb[63].mxu0 }
 0x3ec   : > { %v4131_v31 = vadd.f32 %v4090_v42, %v3962_v50  ;;  %v8828_v29 = vpop.f32.mrb[243].mxu1  ;;  %9125 = vmatmul.mubr.msk.f32.gmra.mrb[92].mxu1 %vm423_vm5, %v4787_v12  ;;  %4731 = vst.msk [vmem:[#allocation3 + $0x80] sm:$0xff] %vm423_vm5, %v4690_v52  ;;  %v4093_v12 = vld [vmem:[#allocation3 + $0xb0] sm:$0xff]  ;;  %v4790_v32 = vld [vmem:[#allocation2 + $0x139] sm:$0xff] }
 0x3ed   : > { %9127 = vmatprep.mubr.msk.f32.mxu1 %vm9649_vm1, %v9650_v6  ;;  %v4650_v27 = vld [vmem:[#allocation3 + $0x88] sm:$0xff] }
 0x3ee   : > { %4172 = vst.msk [vmem:[#allocation3 + $0x98] sm:$0xff] %vm423_vm5, %v4131_v31  ;;  %v12212_v26 = vpop.f32.mrb[64].mxu0  ;;  %v4691_v11 = vadd.f32 %v4650_v27, %v11844_v14 }
 0x3ef   : > { %v3967_v45 = vpop.f32.mrb[244].mxu1  ;;  %v9209_v16 = vpop.f32.mrb[65].mxu0 }
 0x3f0   : > { %v4132_v7 = vadd.f32 %v4091_v53, %v3967_v45  ;;  %v8831_v59 = vpop.f32.mrb[245].mxu1  ;;  %9128 = vmatmul.mubr.msk.f32.gmra.mrb[94].mxu1 %vm423_vm5, %v4788_v3  ;;  %4732 = vst.msk [vmem:[#allocation3 + $0x88] sm:$0xff] %vm423_vm5, %v4691_v11  ;;  %v4094_v3 = vld [vmem:[#allocation3 + $0xb8] sm:$0xff]  ;;  %v4791_v16 = vld [vmem:[#allocation2 + $0x141] sm:$0xff] }
 0x3f1   : > { %9130 = vmatprep.mubr.msk.f32.mxu1 %vm9649_vm1, %v9650_v6  ;;  %v4651_v62 = vld [vmem:[#allocation3 + $0x90] sm:$0xff] }
 0x3f2   : > { %4173 = vst.msk [vmem:[#allocation3 + $0xa0] sm:$0xff] %vm423_vm5, %v4132_v7  ;;  %v12220_v5 = vpop.f32.mrb[66].mxu0  ;;  %v4692_v14 = vadd.f32 %v4651_v62, %v11855_v34 }
 0x3f3   : > { %v3972_v22 = vpop.f32.mrb[246].mxu1  ;;  %v9212_v43 = vpop.f32.mrb[67].mxu0 }
 0x3f4   : > { %v4133_v51 = vadd.f32 %v4092_v10, %v3972_v22  ;;  %v8834_v30 = vpop.f32.mrb[247].mxu1  ;;  %9131 = vmatmul.mubr.msk.f32.gmra.mrb[96].mxu1 %vm423_vm5, %v4789_v63  ;;  %4733 = vst.msk [vmem:[#allocation3 + $0x90] sm:$0xff] %vm423_vm5, %v4692_v14  ;;  %v4095_v63 = vld [vmem:[#allocation3 + $0xc0] sm:$0xff]  ;;  %v4792_v43 = vld [vmem:[#allocation2 + $0x149] sm:$0xff] }
 0x3f5   : > { %9133 = vmatprep.mubr.msk.f32.mxu1 %vm9649_vm1, %v9650_v6  ;;  %v4652_v52 = vld [vmem:[#allocation3 + $0x98] sm:$0xff] }
 0x3f6   : > { %4174 = vst.msk [vmem:[#allocation3 + $0xa8] sm:$0xff] %vm423_vm5, %v4133_v51  ;;  %v12228_v50 = vpop.f32.mrb[68].mxu0  ;;  %v4693_v34 = vadd.f32 %v4652_v52, %v11866_v56 }
 0x3f7   : > { %v3977_v42 = vpop.f32.mrb[248].mxu1  ;;  %v9215_v31 = vpop.f32.mrb[69].mxu0 }
 0x3f8   : > { %v4134_v29 = vadd.f32 %v4093_v12, %v3977_v42  ;;  %v8837_v27 = vpop.f32.mrb[249].mxu1  ;;  %9134 = vmatmul.mubr.msk.f32.gmra.mrb[98].mxu1 %vm423_vm5, %v4790_v32  ;;  %4734 = vst.msk [vmem:[#allocation3 + $0x98] sm:$0xff] %vm423_vm5, %v4693_v34  ;;  %v4096_v32 = vld [vmem:[#allocation3 + $0xc8] sm:$0xff]  ;;  %v4793_v31 = vld [vmem:[#allocation2 + $0x151] sm:$0xff] }
 0x3f9   : > { %9136 = vmatprep.mubr.msk.f32.mxu1 %vm9649_vm1, %v9650_v6  ;;  %v4653_v11 = vld [vmem:[#allocation3 + $0xa0] sm:$0xff] }
 0x3fa   : > { %4175 = vst.msk [vmem:[#allocation3 + $0xb0] sm:$0xff] %vm423_vm5, %v4134_v29  ;;  %v12236_v45 = vpop.f32.mrb[70].mxu0  ;;  %v4694_v56 = vadd.f32 %v4653_v11, %v11877_v54 }
 0x3fb   : > { %v3982_v53 = vpop.f32.mrb[250].mxu1  ;;  %v9218_v7 = vpop.f32.mrb[71].mxu0 }
 0x3fc   : > { %v4135_v59 = vadd.f32 %v4094_v3, %v3982_v53  ;;  %v8840_v62 = vpop.f32.mrb[251].mxu1  ;;  %9137 = vmatmul.mubr.msk.f32.gmra.mrb[100].mxu1 %vm423_vm5, %v4791_v16  ;;  %4735 = vst.msk [vmem:[#allocation3 + $0xa0] sm:$0xff] %vm423_vm5, %v4694_v56  ;;  %v4097_v16 = vld [vmem:[#allocation3 + $0xd0] sm:$0xff]  ;;  %v4794_v7 = vld [vmem:[#allocation2 + $0x159] sm:$0xff] }
 0x3fd   : > { %9139 = vmatprep.mubr.msk.f32.mxu1 %vm9649_vm1, %v9650_v6  ;;  %v4654_v14 = vld [vmem:[#allocation3 + $0xa8] sm:$0xff] }
 0x3fe   : > { %4176 = vst.msk [vmem:[#allocation3 + $0xb8] sm:$0xff] %vm423_vm5, %v4135_v59  ;;  %v12244_v22 = vpop.f32.mrb[72].mxu0  ;;  %v4695_v54 = vadd.f32 %v4654_v14, %v11888_v21 }
 0x3ff   : > { %v3987_v10 = vpop.f32.mrb[252].mxu1  ;;  %v9221_v51 = vpop.f32.mrb[73].mxu0 }
 0x400   : > { %v4136_v30 = vadd.f32 %v4095_v63, %v3987_v10  ;;  %v8843_v52 = vpop.f32.mrb[253].mxu1  ;;  %9140 = vmatmul.mubr.msk.f32.gmra.mrb[102].mxu1 %vm423_vm5, %v4792_v43  ;;  %4736 = vst.msk [vmem:[#allocation3 + $0xa8] sm:$0xff] %vm423_vm5, %v4695_v54  ;;  %v4795_v54 = vld [vmem:[#allocation2 + $0x161] sm:$0xff]  ;;  %v4098_v51 = vld [vmem:[#allocation3 + $0xd8] sm:$0xff] }
 0x401   : > { %9142 = vmatprep.mubr.msk.f32.mxu1 %vm9649_vm1, %v9650_v6  ;;  %v4655_v34 = vld [vmem:[#allocation3 + $0xb0] sm:$0xff] }
 0x402   : > { %4177 = vst.msk [vmem:[#allocation3 + $0xc0] sm:$0xff] %vm423_vm5, %v4136_v30  ;;  %v12252_v42 = vpop.f32.mrb[74].mxu0  ;;  %v4696_v21 = vadd.f32 %v4655_v34, %v11899_v33 }
 0x403   : > { %v3992_v12 = vpop.f32.mrb[254].mxu1  ;;  %v9224_v29 = vpop.f32.mrb[75].mxu0 }
 0x404   : > { %v4137_v27 = vadd.f32 %v4096_v32, %v3992_v12  ;;  %v8846_v11 = vpop.f32.mrb[255].mxu1  ;;  %9143 = vmatmul.mubr.msk.f32.gmra.mrb[104].mxu1 %vm423_vm5, %v4793_v31  ;;  %4737 = vst.msk [vmem:[#allocation3 + $0xb0] sm:$0xff] %vm423_vm5, %v4696_v21  ;;  %v4796_v21 = vld [vmem:[#allocation2 + $0x169] sm:$0xf]  ;;  %v4099_v29 = vld [vmem:[#allocation3 + $0xe0] sm:$0xff] }
 0x405   : > { %9145 = vmatprep.mubr.msk.f32.mxu1 %vm9649_vm1, %v9650_v6  ;;  %v4656_v56 = vld [vmem:[#allocation3 + $0xb8] sm:$0xff] }
 0x406   : > { %4178 = vst.msk [vmem:[#allocation3 + $0xc8] sm:$0xff] %vm423_vm5, %v4137_v27  ;;  %v12260_v53 = vpop.f32.mrb[76].mxu0  ;;  %v4697_v33 = vadd.f32 %v4656_v56, %v11910_v49 }
 0x407   : > { %v3997_v3 = vpop.f32.mrb[0].mxu1  ;;  %v9227_v59 = vpop.f32.mrb[77].mxu0 }
 0x408   : > { %v4138_v62 = vadd.f32 %v4097_v16, %v3997_v3  ;;  %v8849_v14 = vpop.f32.mrb[1].mxu1  ;;  %9146 = vmatmul.mubr.msk.f32.gmra.mrb[106].mxu1 %vm423_vm5, %v4794_v7  ;;  %4738 = vst.msk [vmem:[#allocation3 + $0xb8] sm:$0xff] %vm423_vm5, %v4697_v33  ;;  %v4100_v7 = vld [vmem:[#allocation3 + $0xe8] sm:$0xff] }
 0x409   : > { %9148 = vmatprep.mubr.msk.f32.mxu1 %vm9649_vm1, %v9650_v6  ;;  %v4657_v10 = vld [vmem:[#allocation3 + $0xc0] sm:$0xff] }
 0x40a   : > { %4179 = vst.msk [vmem:[#allocation3 + $0xd0] sm:$0xff] %vm423_vm5, %v4138_v62  ;;  %v12268_v63 = vpop.f32.mrb[78].mxu0  ;;  %v4698_v49 = vadd.f32 %v4657_v10, %v11927_v9  ;;  %v5880_v62 = vld [vmem:[#allocation2 + $0x2b] sm:$0xff] }
 0x40b   : > { %v4002_v43 = vpop.f32.mrb[2].mxu1  ;;  %v9230_v30 = vpop.f32.mrb[79].mxu0 }
 0x40c   : > { %v4139_v52 = vadd.f32 %v4098_v51, %v4002_v43  ;;  %v8852_v34 = vpop.f32.mrb[3].mxu1  ;;  %9149 = vmatmul.mubr.msk.f32.gmra.mrb[108].mxu1 %vm423_vm5, %v4795_v54  ;;  %4739 = vst.msk [vmem:[#allocation3 + $0xc0] sm:$0xff] %vm423_vm5, %v4698_v49  ;;  %v4101_v51 = vld [vmem:[#allocation3 + $0xf0] sm:$0xff] }
 0x40d   : > { %9151 = vmatprep.mubr.msk.f32.mxu1 %vm9649_vm1, %v9650_v6  ;;  %v4658_v12 = vld [vmem:[#allocation3 + $0xc8] sm:$0xff] }
 0x40e   : > { %4180 = vst.msk [vmem:[#allocation3 + $0xd8] sm:$0xff] %vm423_vm5, %v4139_v52  ;;  %v12276_v32 = vpop.f32.mrb[80].mxu0  ;;  %v4699_v9 = vadd.f32 %v4658_v12, %v11944_v55  ;;  %v5881_v52 = vld [vmem:[#allocation2 + $0x33] sm:$0xff] }
 0x40f   : > { %v4007_v31 = vpop.f32.mrb[4].mxu1  ;;  %v9233_v27 = vpop.f32.mrb[81].mxu0 }
 0x410   : > { %v4140_v11 = vadd.f32 %v4099_v29, %v4007_v31  ;;  %v8855_v56 = vpop.f32.mrb[5].mxu1  ;;  %9152 = vmatmul.mubr.msk.f32.gmra.mrb[110].mxu1 %vm423_vm5, %v4796_v21  ;;  %4740 = vst.msk [vmem:[#allocation3 + $0xc8] sm:$0xff] %vm423_vm5, %v4699_v9  ;;  %v4102_v29 = vld [vmem:[#allocation3 + $0xf8] sm:$0xff] }
 0x411   : > { %9293 = vmatprep.mubr.msk.f32.mxu1 %vm9649_vm1, %v9650_v6  ;;  %v4659_v33 = vld [vmem:[#allocation3 + $0xd0] sm:$0xff] }
 0x412   : > { %4181 = vst.msk [vmem:[#allocation3 + $0xe0] sm:$0xff] %vm423_vm5, %v4140_v11  ;;  %v12284_v3 = vpop.f32.mrb[82].mxu0  ;;  %v4700_v16 = vadd.f32 %v4659_v33, %v11956_v4  ;;  %v5882_v11 = vld [vmem:[#allocation2 + $0x3b] sm:$0xff] }
 0x413   : > { %v4012_v55 = vpop.f32.mrb[6].mxu1  ;;  %v9236_v59 = vpop.f32.mrb[83].mxu0 }
 0x414   : > { %v4141_v14 = vadd.f32 %v4100_v7, %v4012_v55  ;;  %v8858_v54 = vpop.f32.mrb[7].mxu1  ;;  %9294 = vmatmul.mubr.msk.f32.vlgmr.msra.gmra.mrb[112].mxu1 %vm423_vm5, %v5880_v62  ;;  %4741 = vst.msk [vmem:[#allocation3 + $0xd0] sm:$0xff] %vm423_vm5, %v4700_v16  ;;  %v4103_v59 = vld [vmem:[#allocation3 + $0x100] sm:$0xff] }
 0x415   : > { %9296 = vmatprep.mubr.msk.f32.mxu1 %vm9649_vm1, %v9650_v6  ;;  %v4660_v10 = vld [vmem:[#allocation3 + $0xd8] sm:$0xff] }
 0x416   : > { %4182 = vst.msk [vmem:[#allocation3 + $0xe8] sm:$0xff] %vm423_vm5, %v4141_v14  ;;  %v12292_v49 = vpop.f32.mrb[84].mxu0  ;;  %v4701_v4 = vadd.f32 %v4660_v10, %v11967_v0  ;;  %v5883_v14 = vld [vmem:[#allocation2 + $0x43] sm:$0xff] }
 0x417   : > { %v4017_v43 = vpop.f32.mrb[8].mxu1  ;;  %v9239_v30 = vpop.f32.mrb[85].mxu0 }
 0x418   : > { %v4142_v34 = vadd.f32 %v4101_v51, %v4017_v43  ;;  %v8861_v21 = vpop.f32.mrb[9].mxu1  ;;  %9297 = vmatmul.mubr.msk.f32.gmra.mrb[114].mxu1 %vm423_vm5, %v5881_v52  ;;  %4742 = vst.msk [vmem:[#allocation3 + $0xd8] sm:$0xff] %vm423_vm5, %v4701_v4  ;;  %v4104_v30 = vld [vmem:[#allocation3 + $0x108] sm:$0xff] }
 0x419   : > { %9299 = vmatprep.mubr.msk.f32.mxu1 %vm9649_vm1, %v9650_v6  ;;  %v4661_v12 = vld [vmem:[#allocation3 + $0xe0] sm:$0xff] }
 0x41a   : > { %4183 = vst.msk [vmem:[#allocation3 + $0xf0] sm:$0xff] %vm423_vm5, %v4142_v34  ;;  %v12300_v9 = vpop.f32.mrb[86].mxu0  ;;  %v4702_v0 = vadd.f32 %v4661_v12, %v11975_v28  ;;  %v5884_v34 = vld [vmem:[#allocation2 + $0x4b] sm:$0xff] }
 0x41b   : > { %v4022_v31 = vpop.f32.mrb[10].mxu1  ;;  %v9242_v27 = vpop.f32.mrb[87].mxu0 }
 0x41c   : > { %v4143_v56 = vadd.f32 %v4102_v29, %v4022_v31  ;;  %v8864_v33 = vpop.f32.mrb[11].mxu1  ;;  %9300 = vmatmul.mubr.msk.f32.gmra.mrb[116].mxu1 %vm423_vm5, %v5882_v11  ;;  %4743 = vst.msk [vmem:[#allocation3 + $0xe0] sm:$0xff] %vm423_vm5, %v4702_v0  ;;  %v6575_v29 = vld [vmem:[%s12921_s6 + $0x18] sm:$0xff] }
 0x41d   : > { %9302 = vmatprep.mubr.msk.f32.mxu1 %vm9649_vm1, %v9650_v6  ;;  %v4662_v16 = vld [vmem:[#allocation3 + $0xe8] sm:$0xff] }
 0x41e   : > { %4184 = vst.msk [vmem:[#allocation3 + $0xf8] sm:$0xff] %vm423_vm5, %v4143_v56  ;;  %v12308_v55 = vpop.f32.mrb[88].mxu0  ;;  %v4703_v28 = vadd.f32 %v4662_v16, %v11983_v2  ;;  %v4105_v56 = vld [vmem:[#allocation3 + $0x110] sm:$0xff]  ;;  %v5885_v16 = vld [vmem:[#allocation2 + $0x53] sm:$0xff] }
 0x41f   : > { %v4027_v7 = vpop.f32.mrb[12].mxu1  ;;  %v9245_v62 = vpop.f32.mrb[89].mxu0 }
 0x420   : > { %v4144_v54 = vadd.f32 %v4103_v59, %v4027_v7  ;;  %v8867_v10 = vpop.f32.mrb[13].mxu1  ;;  %9303 = vmatmul.mubr.msk.f32.gmra.mrb[118].mxu1 %vm423_vm5, %v5883_v14  ;;  %4744 = vst.msk [vmem:[#allocation3 + $0xe8] sm:$0xff] %vm423_vm5, %v4703_v28 }
 0x421   : > { %9305 = vmatprep.mubr.msk.f32.mxu1 %vm9649_vm1, %v9650_v6  ;;  %v4663_v4 = vld [vmem:[#allocation3 + $0xf0] sm:$0xff]  ;;  %v4106_v10 = vld [vmem:[#allocation3 + $0x118] sm:$0xff] }
 0x422   : > { %4185 = vst.msk [vmem:[#allocation3 + $0x100] sm:$0xff] %vm423_vm5, %v4144_v54  ;;  %v12316_v43 = vpop.f32.mrb[90].mxu0  ;;  %v4704_v2 = vadd.f32 %v4663_v4, %v11991_v13  ;;  %v6574_v13 = vld [vmem:[%s12921_s6 + $0x10] sm:$0xff] }
 0x423   : > { %v4032_v51 = vpop.f32.mrb[14].mxu1  ;;  %v9248_v52 = vpop.f32.mrb[91].mxu0  ;;  %v9618_v28 = vpack.c.bf16 %v6575_v29, %v6574_v13  ;;  %v5887_v13 = vld [vmem:[#allocation2 + $0x63] sm:$0xff] }
 0x424   : > { %v4145_v21 = vadd.f32 %v4104_v30, %v4032_v51  ;;  %v8870_v12 = vpop.f32.mrb[15].mxu1  ;;  %9306 = vmatmul.mubr.msk.f32.gmra.mrb[120].mxu1 %vm423_vm5, %v5884_v34  ;;  %4745 = vst.msk [vmem:[#allocation3 + $0xf0] sm:$0xff] %vm423_vm5, %v4704_v2  ;;  %v5886_v2 = vld [vmem:[#allocation2 + $0x5b] sm:$0xff] }
 0x425   : > { %9308 = vmatprep.mubr.msk.f32.mxu1 %vm9649_vm1, %v9650_v6  ;;  %v4664_v0 = vld [vmem:[#allocation3 + $0xf8] sm:$0xff]  ;;  %9619 = vmatpush3.bf16.msra.mxu0 %v9618_v28  ;;  %v4107_v12 = vld [vmem:[#allocation3 + $0x120] sm:$0xff] }
 0x426   : > { %4186 = vst.msk [vmem:[#allocation3 + $0x108] sm:$0xff] %vm423_vm5, %v4145_v21  ;;  %v12324_v31 = vpop.f32.mrb[92].mxu0  ;;  %v4705_v27 = vadd.f32 %v4664_v0, %v11999_v37 }
 0x427   : > { %v4037_v11 = vpop.f32.mrb[16].mxu1  ;;  %v9251_v33 = vpop.f32.mrb[93].mxu0 }
 0x428   : > { %v4146_v7 = vadd.f32 %v4105_v56, %v4037_v11  ;;  %v8873_v59 = vpop.f32.mrb[17].mxu1  ;;  %9309 = vmatmul.mubr.msk.f32.gmra.mrb[122].mxu1 %vm423_vm5, %v5885_v16  ;;  %4746 = vst.msk [vmem:[#allocation3 + $0xf8] sm:$0xff] %vm423_vm5, %v4705_v27  ;;  %v4108_v16 = vld [vmem:[#allocation3 + $0x128] sm:$0xff] }
 0x429   : > { %9311 = vmatprep.mubr.msk.f32.mxu1 %vm9649_vm1, %v9650_v6  ;;  %v4665_v62 = vld [vmem:[#allocation3 + $0x100] sm:$0xff] }
 0x42a   : > { %4187 = vst.msk [vmem:[#allocation3 + $0x110] sm:$0xff] %vm423_vm5, %v4146_v7  ;;  %v12338_v14 = vpop.f32.mrb[94].mxu0  ;;  %v4706_v37 = vadd.f32 %v4665_v62, %v12007_v48  ;;  %v5888_v7 = vld [vmem:[#allocation2 + $0x6b] sm:$0xff] }
 0x42b   : > { %v4042_v54 = vpop.f32.mrb[18].mxu1  ;;  %v9254_v4 = vpop.f32.mrb[95].mxu0 }
 0x42c   : > { %v4147_v51 = vadd.f32 %v4106_v10, %v4042_v54  ;;  %v8876_v30 = vpop.f32.mrb[19].mxu1  ;;  %9312 = vmatmul.mubr.msk.f32.gmra.mrb[124].mxu1 %vm423_vm5, %v5886_v2  ;;  %4747 = vst.msk [vmem:[#allocation3 + $0x100] sm:$0xff] %vm423_vm5, %v4706_v37  ;;  %v4109_v4 = vld [vmem:[#allocation3 + $0x130] sm:$0xff] }
 0x42d   : > { %9314 = vmatprep.mubr.msk.f32.mxu1 %vm9649_vm1, %v9650_v6  ;;  %v4666_v52 = vld [vmem:[#allocation3 + $0x108] sm:$0xff] }
 0x42e   : > { %4188 = vst.msk [vmem:[#allocation3 + $0x118] sm:$0xff] %vm423_vm5, %v4147_v51  ;;  %v12346_v34 = vpop.f32.mrb[96].mxu0  ;;  %v4707_v48 = vadd.f32 %v4666_v52, %v12015_v15  ;;  %v5889_v51 = vld [vmem:[#allocation2 + $0x73] sm:$0xff] }
 0x42f   : > { %v4047_v21 = vpop.f32.mrb[20].mxu1  ;;  %v9257_v0 = vpop.f32.mrb[97].mxu0 }
 0x430   : > { %v4148_v29 = vadd.f32 %v4107_v12, %v4047_v21  ;;  %v8879_v27 = vpop.f32.mrb[21].mxu1  ;;  %9315 = vmatmul.mubr.msk.f32.gmra.mrb[126].mxu1 %vm423_vm5, %v5887_v13  ;;  %4748 = vst.msk [vmem:[#allocation3 + $0x108] sm:$0xff] %vm423_vm5, %v4707_v48  ;;  %v4110_v0 = vld [vmem:[#allocation3 + $0x138] sm:$0xff] }
 0x431   : > { %9317 = vmatprep.mubr.msk.f32.mxu1 %vm9649_vm1, %v9650_v6  ;;  %v4667_v11 = vld [vmem:[#allocation3 + $0x110] sm:$0xff] }
 0x432   : > { %4189 = vst.msk [vmem:[#allocation3 + $0x120] sm:$0xff] %vm423_vm5, %v4148_v29  ;;  %v12354_v56 = vpop.f32.mrb[98].mxu0  ;;  %v4708_v15 = vadd.f32 %v4667_v11, %v12023_v40  ;;  %v5890_v29 = vld [vmem:[#allocation2 + $0x7b] sm:$0xff] }
 0x433   : > { %v4052_v33 = vpop.f32.mrb[22].mxu1  ;;  %v9260_v28 = vpop.f32.mrb[99].mxu0 }
 0x434   : > { %v4149_v59 = vadd.f32 %v4108_v16, %v4052_v33  ;;  %v8882_v62 = vpop.f32.mrb[23].mxu1  ;;  %9318 = vmatmul.mubr.msk.f32.gmra.mrb[128].mxu1 %vm423_vm5, %v5888_v7  ;;  %4749 = vst.msk [vmem:[#allocation3 + $0x110] sm:$0xff] %vm423_vm5, %v4708_v15  ;;  %v4111_v28 = vld [vmem:[#allocation3 + $0x140] sm:$0xf] }
 0x435   : > { %9320 = vmatprep.mubr.msk.f32.mxu1 %vm9649_vm1, %v9650_v6  ;;  %v4668_v37 = vld [vmem:[#allocation3 + $0x118] sm:$0xff] }
 0x436   : > { %4190 = vst.msk [vmem:[#allocation3 + $0x128] sm:$0xff] %vm423_vm5, %v4149_v59  ;;  %v12362_v54 = vpop.f32.mrb[100].mxu0  ;;  %v4709_v40 = vadd.f32 %v4668_v37, %v12034_v41  ;;  %v5891_v59 = vld [vmem:[#allocation2 + $0x83] sm:$0xff] }
 0x437   : > { %v4057_v10 = vpop.f32.mrb[24].mxu1  ;;  %v9263_v2 = vpop.f32.mrb[101].mxu0 }
 0x438   : > { %v4150_v30 = vadd.f32 %v4109_v4, %v4057_v10  ;;  %v8885_v52 = vpop.f32.mrb[25].mxu1  ;;  %9321 = vmatmul.mubr.msk.f32.gmra.mrb[130].mxu1 %vm423_vm5, %v5889_v51  ;;  %4750 = vst.msk [vmem:[#allocation3 + $0x118] sm:$0xff] %vm423_vm5, %v4709_v40  ;;  %v5195_v2 = vld [vmem:[#allocation3] sm:$0xff] }
 0x439   : > { %9323 = vmatprep.mubr.msk.f32.mxu1 %vm9649_vm1, %v9650_v6  ;;  %v4669_v48 = vld [vmem:[#allocation3 + $0x120] sm:$0xff] }
 0x43a   : > { %4191 = vst.msk [vmem:[#allocation3 + $0x130] sm:$0xff] %vm423_vm5, %v4150_v30  ;;  %v12370_v21 = vpop.f32.mrb[102].mxu0  ;;  %v4710_v41 = vadd.f32 %v4669_v48, %v12045_v57  ;;  %v5892_v30 = vld [vmem:[#allocation2 + $0x8b] sm:$0xff] }
 0x43b   : > { %v4062_v12 = vpop.f32.mrb[26].mxu1  ;;  %v9266_v13 = vpop.f32.mrb[103].mxu0 }
 0x43c   : > { %v4151_v27 = vadd.f32 %v4110_v0, %v4062_v12  ;;  %v8888_v11 = vpop.f32.mrb[27].mxu1  ;;  %9324 = vmatmul.mubr.msk.f32.gmra.mrb[132].mxu1 %vm423_vm5, %v5890_v29  ;;  %4751 = vst.msk [vmem:[#allocation3 + $0x120] sm:$0xff] %vm423_vm5, %v4710_v41  ;;  %v5196_v13 = vld [vmem:[#allocation3 + $0x8] sm:$0xff] }
 0x43d   : > { %9326 = vmatprep.mubr.msk.f32.mxu1 %vm9649_vm1, %v9650_v6  ;;  %v4670_v15 = vld [vmem:[#allocation3 + $0x128] sm:$0xff] }
 0x43e   : > { %4192 = vst.msk [vmem:[#allocation3 + $0x138] sm:$0xff] %vm423_vm5, %v4151_v27  ;;  %v12378_v33 = vpop.f32.mrb[104].mxu0  ;;  %v4711_v57 = vadd.f32 %v4670_v15, %v12053_v23  ;;  %v5893_v27 = vld [vmem:[#allocation2 + $0x93] sm:$0xff] }
 0x43f   : > { %v4067_v16 = vpop.f32.mrb[28].mxu1  ;;  %v9269_v7 = vpop.f32.mrb[105].mxu0 }
 0x440   : > { %v4152_v62 = vadd.f32 %v4111_v28, %v4067_v16  ;;  %v8891_v37 = vpop.f32.mrb[29].mxu1  ;;  %9327 = vmatmul.mubr.msk.f32.gmra.mrb[134].mxu1 %vm423_vm5, %v5891_v59  ;;  %4752 = vst.msk [vmem:[#allocation3 + $0x128] sm:$0xff] %vm423_vm5, %v4711_v57  ;;  %v5197_v7 = vld [vmem:[#allocation3 + $0x10] sm:$0xff] }
 0x441   : > { %9329 = vmatprep.mubr.msk.f32.mxu1 %vm9649_vm1, %v9650_v6  ;;  %v4671_v40 = vld [vmem:[#allocation3 + $0x130] sm:$0xff] }
 0x442   : > { %4193 = vst.msk [vmem:[#allocation3 + $0x140] sm:$0xf] %vm1335_vm6, %v4152_v62  ;;  %v12386_v10 = vpop.f32.mrb[106].mxu0  ;;  %v4712_v23 = vadd.f32 %v4671_v40, %v12062_v38  ;;  %v5894_v62 = vld [vmem:[#allocation2 + $0x9b] sm:$0xff] }
 0x443   : > { %v4991_v4 = vpop.f32.mrb[30].mxu1  ;;  %v9272_v51 = vpop.f32.mrb[107].mxu0 }
 0x444   : > { %v5236_v52 = vadd.f32 %v5195_v2, %v4991_v4  ;;  %v9033_v48 = vpop.f32.mrb[31].mxu1  ;;  %9330 = vmatmul.mubr.msk.f32.gmra.mrb[136].mxu1 %vm423_vm5, %v5892_v30  ;;  %4753 = vst.msk [vmem:[#allocation3 + $0x130] sm:$0xff] %vm423_vm5, %v4712_v23  ;;  %v5198_v2 = vld [vmem:[#allocation3 + $0x18] sm:$0xff]  ;;  %v5895_v51 = vld [vmem:[#allocation2 + $0xa3] sm:$0xff] }
 0x445   : > { %9332 = vmatprep.mubr.msk.f32.mxu1 %vm9649_vm1, %v9650_v6  ;;  %v4672_v41 = vld [vmem:[#allocation3 + $0x138] sm:$0xff] }
 0x446   : > { %5277 = vst.msk [vmem:[#allocation3] sm:$0xff] %vm423_vm5, %v5236_v52  ;;  %v12394_v12 = vpop.f32.mrb[108].mxu0  ;;  %v4713_v38 = vadd.f32 %v4672_v41, %v12069_v17 }
 0x447   : > { %v4996_v0 = vpop.f32.mrb[32].mxu1  ;;  %v9275_v29 = vpop.f32.mrb[109].mxu0 }
 0x448   : > { %v5237_v11 = vadd.f32 %v5196_v13, %v4996_v0  ;;  %v9036_v15 = vpop.f32.mrb[33].mxu1  ;;  %9333 = vmatmul.mubr.msk.f32.gmra.mrb[138].mxu1 %vm423_vm5, %v5893_v27  ;;  %4754 = vst.msk [vmem:[#allocation3 + $0x138] sm:$0xff] %vm423_vm5, %v4713_v38  ;;  %v5199_v0 = vld [vmem:[#allocation3 + $0x20] sm:$0xff] }
 0x449   : > { %v4673_v57 = vld [vmem:[#allocation3 + $0x140] sm:$0xf]  ;;  %9335 = vmatprep.mubr.msk.f32.mxu1 %vm9649_vm1, %v9650_v6 }
 0x44a   : > { %v4714_v16 = vadd.f32 %v4673_v57, %v12077_v18  ;;  %5278 = vst.msk [vmem:[#allocation3 + $0x8] sm:$0xff] %vm423_vm5, %v5237_v11  ;;  %v12403_v28 = vpop.f32.mrb[110].mxu0  ;;  %v5200_v57 = vld [vmem:[#allocation3 + $0x28] sm:$0xff] }
 0x44b   : > { %v5001_v17 = vpop.f32.mrb[34].mxu1  ;;  %v9278_v59 = vpop.f32.mrb[111].mxu0 }
 0x44c   : > { %4755 = vst.msk [vmem:[#allocation3 + $0x140] sm:$0xf] %vm1335_vm6, %v4714_v16  ;;  %v5238_v37 = vadd.f32 %v5197_v7, %v5001_v17  ;;  %v9039_v40 = vpop.f32.mrb[35].mxu1  ;;  %9336 = vmatmul.mubr.msk.f32.gmra.mrb[140].mxu1 %vm423_vm5, %v5894_v62 }
 0x44d   : > { %9338 = vmatprep.mubr.msk.f32.mxu1 %vm9649_vm1, %v9650_v6  ;;  %v5757_v23 = vld [vmem:[#allocation3] sm:$0xff] }
 0x44e   : > { %5279 = vst.msk [vmem:[#allocation3 + $0x10] sm:$0xff] %vm423_vm5, %v5238_v37  ;;  %v5798_v18 = vadd.f32 %v5757_v23, %v12085_v44  ;;  %v5896_v44 = vld [vmem:[#allocation2 + $0xab] sm:$0xff] }
 0x44f   : > { %v5006_v4 = vpop.f32.mrb[36].mxu1  ;;  %v5201_v37 = vld [vmem:[#allocation3 + $0x30] sm:$0xff] }
 0x450   : > { %v5239_v30 = vadd.f32 %v5198_v2, %v5006_v4  ;;  %v9042_v52 = vpop.f32.mrb[37].mxu1  ;;  %9339 = vmatmul.mubr.msk.f32.gmra.mrb[142].mxu1 %vm423_vm5, %v5895_v51  ;;  %5839 = vst.msk [vmem:[#allocation3] sm:$0xff] %vm423_vm5, %v5798_v18  ;;  %v5202_v51 = vld [vmem:[#allocation3 + $0x38] sm:$0xff] }
 0x451   : > { %9341 = vmatprep.mubr.msk.f32.mxu1 %vm9649_vm1, %v9650_v6  ;;  %v5758_v48 = vld [vmem:[#allocation3 + $0x8] sm:$0xff] }
 0x452   : > { %5280 = vst.msk [vmem:[#allocation3 + $0x18] sm:$0xff] %vm423_vm5, %v5239_v30  ;;  %v5799_v41 = vadd.f32 %v5758_v48, %v12093_v35  ;;  %v5897_v35 = vld [vmem:[#allocation2 + $0xb3] sm:$0xff] }
 0x453   : > { %v5011_v38 = vpop.f32.mrb[38].mxu1 }
 0x454   : > { %v5240_v13 = vadd.f32 %v5199_v0, %v5011_v38  ;;  %v9045_v29 = vpop.f32.mrb[39].mxu1  ;;  %9342 = vmatmul.mubr.msk.f32.gmra.mrb[144].mxu1 %vm423_vm5, %v5896_v44  ;;  %5840 = vst.msk [vmem:[#allocation3 + $0x8] sm:$0xff] %vm423_vm5, %v5799_v41  ;;  %v5203_v0 = vld [vmem:[#allocation3 + $0x40] sm:$0xff] }
 0x455   : > { %9344 = vmatprep.mubr.msk.f32.mxu1 %vm9649_vm1, %v9650_v6  ;;  %v5759_v27 = vld [vmem:[#allocation3 + $0x10] sm:$0xff] }
 0x456   : > { %5281 = vst.msk [vmem:[#allocation3 + $0x20] sm:$0xff] %vm423_vm5, %v5240_v13  ;;  %v5800_v11 = vadd.f32 %v5759_v27, %v12101_v47  ;;  %v5898_v47 = vld [vmem:[#allocation2 + $0xbb] sm:$0xff] }
 0x457   : > { %v5016_v15 = vpop.f32.mrb[40].mxu1 }
 0x458   : > { %v5241_v16 = vadd.f32 %v5200_v57, %v5016_v15  ;;  %v9048_v17 = vpop.f32.mrb[41].mxu1  ;;  %9345 = vmatmul.mubr.msk.f32.gmra.mrb[146].mxu1 %vm423_vm5, %v5897_v35  ;;  %5841 = vst.msk [vmem:[#allocation3 + $0x10] sm:$0xff] %vm423_vm5, %v5800_v11  ;;  %v5204_v15 = vld [vmem:[#allocation3 + $0x48] sm:$0xff] }
 0x459   : > { %9347 = vmatprep.mubr.msk.f32.mxu1 %vm9649_vm1, %v9650_v6  ;;  %v5760_v7 = vld [vmem:[#allocation3 + $0x18] sm:$0xff] }
 0x45a   : > { %5282 = vst.msk [vmem:[#allocation3 + $0x28] sm:$0xff] %vm423_vm5, %v5241_v16  ;;  %v5801_v59 = vadd.f32 %v5760_v7, %v12109_v8  ;;  %v5899_v8 = vld [vmem:[#allocation2 + $0xc3] sm:$0xff] }
 0x45b   : > { %v5021_v62 = vpop.f32.mrb[42].mxu1 }
 0x45c   : > { %v5242_v40 = vadd.f32 %v5201_v37, %v5021_v62  ;;  %v9051_v23 = vpop.f32.mrb[43].mxu1  ;;  %9348 = vmatmul.mubr.msk.f32.gmra.mrb[148].mxu1 %vm423_vm5, %v5898_v47  ;;  %5842 = vst.msk [vmem:[#allocation3 + $0x18] sm:$0xff] %vm423_vm5, %v5801_v59  ;;  %v5205_v59 = vld [vmem:[#allocation3 + $0x50] sm:$0xff]  ;;  %v5902_v62 = vld [vmem:[#allocation2 + $0xdb] sm:$0xff] }
 0x45d   : > { %9350 = vmatprep.mubr.msk.f32.mxu1 %vm9649_vm1, %v9650_v6  ;;  %v5761_v18 = vld [vmem:[#allocation3 + $0x20] sm:$0xff] }
 0x45e   : > { %5283 = vst.msk [vmem:[#allocation3 + $0x30] sm:$0xff] %vm423_vm5, %v5242_v40  ;;  %v5802_v4 = vadd.f32 %v5761_v18, %v12117_v19  ;;  %v5900_v19 = vld [vmem:[#allocation2 + $0xcb] sm:$0xff] }
 0x45f   : > { %v5026_v2 = vpop.f32.mrb[44].mxu1 }
 0x460   : > { %v5243_v30 = vadd.f32 %v5202_v51, %v5026_v2  ;;  %v9054_v52 = vpop.f32.mrb[45].mxu1  ;;  %9351 = vmatmul.mubr.msk.f32.gmra.mrb[150].mxu1 %vm423_vm5, %v5899_v8  ;;  %5843 = vst.msk [vmem:[#allocation3 + $0x20] sm:$0xff] %vm423_vm5, %v5802_v4  ;;  %v12452_v17 = vpop.f32.mrb[112].mxu0  ;;  %v5206_v2 = vld [vmem:[#allocation3 + $0x58] sm:$0xff]  ;;  %v5903_v51 = vld [vmem:[#allocation2 + $0xe3] sm:$0xff] }
 0x461   : > { %9353 = vmatprep.mubr.msk.f32.mxu1 %vm9649_vm1, %v9650_v6  ;;  %v5762_v48 = vld [vmem:[#allocation3 + $0x28] sm:$0xff]  ;;  %v9281_v37 = vpop.f32.mrb[113].mxu0 }
 0x462   : > { %5284 = vst.msk [vmem:[#allocation3 + $0x38] sm:$0xff] %vm423_vm5, %v5243_v30  ;;  %v5803_v41 = vadd.f32 %v5762_v48, %v12125_v39  ;;  %v5901_v39 = vld [vmem:[#allocation2 + $0xd3] sm:$0xff] }
 0x463   : > { %v5031_v38 = vpop.f32.mrb[46].mxu1 }
 0x464   : > { %v5244_v44 = vadd.f32 %v5203_v0, %v5031_v38  ;;  %v9057_v13 = vpop.f32.mrb[47].mxu1  ;;  %9354 = vmatmul.mubr.msk.f32.gmra.mrb[152].mxu1 %vm423_vm5, %v5900_v19  ;;  %5844 = vst.msk [vmem:[#allocation3 + $0x28] sm:$0xff] %vm423_vm5, %v5803_v41  ;;  %v12460_v18 = vpop.f32.mrb[114].mxu0  ;;  %v5904_v0 = vld [vmem:[#allocation2 + $0xeb] sm:$0xff] }
 0x465   : > { %9356 = vmatprep.mubr.msk.f32.mxu1 %vm9649_vm1, %v9650_v6  ;;  %v5763_v29 = vld [vmem:[#allocation3 + $0x30] sm:$0xff]  ;;  %v9284_v8 = vpop.f32.mrb[115].mxu0 }
 0x466   : > { %5285 = vst.msk [vmem:[#allocation3 + $0x40] sm:$0xff] %vm423_vm5, %v5244_v44  ;;  %v5804_v27 = vadd.f32 %v5763_v29, %v12133_v24  ;;  %v5211_v8 = vld [vmem:[#allocation3 + $0x80] sm:$0xff] }
 0x467   : > { %v5036_v11 = vpop.f32.mrb[48].mxu1 }
 0x468   : > { %v5245_v57 = vadd.f32 %v5204_v15, %v5036_v11  ;;  %v9060_v35 = vpop.f32.mrb[49].mxu1  ;;  %9357 = vmatmul.mubr.msk.f32.gmra.mrb[154].mxu1 %vm423_vm5, %v5901_v39  ;;  %5845 = vst.msk [vmem:[#allocation3 + $0x30] sm:$0xff] %vm423_vm5, %v5804_v27  ;;  %v5208_v11 = vld [vmem:[#allocation3 + $0x68] sm:$0xff] }
 0x469   : > { %9359 = vmatprep.mubr.msk.f32.mxu1 %vm9649_vm1, %v9650_v6  ;;  %v5764_v16 = vld [vmem:[#allocation3 + $0x38] sm:$0xff] }
 0x46a   : > { %5286 = vst.msk [vmem:[#allocation3 + $0x48] sm:$0xff] %vm423_vm5, %v5245_v57  ;;  %v5805_v7 = vadd.f32 %v5764_v16, %v12141_v36 }
 0x46b   : > { %v5041_v24 = vpop.f32.mrb[50].mxu1 }
 0x46c   : > { %v5246_v47 = vadd.f32 %v5205_v59, %v5041_v24  ;;  %v9063_v40 = vpop.f32.mrb[51].mxu1  ;;  %9360 = vmatmul.mubr.msk.f32.gmra.mrb[156].mxu1 %vm423_vm5, %v5902_v62  ;;  %5846 = vst.msk [vmem:[#allocation3 + $0x38] sm:$0xff] %vm423_vm5, %v5805_v7  ;;  %v5209_v7 = vld [vmem:[#allocation3 + $0x70] sm:$0xff] }
 0x46d   : > { %9362 = vmatprep.mubr.msk.f32.mxu1 %vm9649_vm1, %v9650_v6  ;;  %v5765_v23 = vld [vmem:[#allocation3 + $0x40] sm:$0xff]  ;;  %v5210_v40 = vld [vmem:[#allocation3 + $0x78] sm:$0xff] }
 0x46e   : > { %5287 = vst.msk [vmem:[#allocation3 + $0x50] sm:$0xff] %vm423_vm5, %v5246_v47  ;;  %v5806_v36 = vadd.f32 %v5765_v23, %v12149_v58  ;;  %v5207_v58 = vld [vmem:[#allocation3 + $0x60] sm:$0xff] }
 0x46f   : > { %v5046_v4 = vpop.f32.mrb[52].mxu1 }
 0x470   : > { %v5247_v30 = vadd.f32 %v5206_v2, %v5046_v4  ;;  %v9066_v52 = vpop.f32.mrb[53].mxu1  ;;  %9363 = vmatmul.mubr.msk.f32.gmra.mrb[158].mxu1 %vm423_vm5, %v5903_v51  ;;  %5847 = vst.msk [vmem:[#allocation3 + $0x40] sm:$0xff] %vm423_vm5, %v5806_v36 }
 0x471   : > { %9365 = vmatprep.mubr.msk.f32.mxu1 %vm9649_vm1, %v9650_v6  ;;  %v5766_v48 = vld [vmem:[#allocation3 + $0x48] sm:$0xff] }
 0x472   : > { %5288 = vst.msk [vmem:[#allocation3 + $0x58] sm:$0xff] %vm423_vm5, %v5247_v30  ;;  %v5807_v41 = vadd.f32 %v5766_v48, %v12157_v46  ;;  %v5905_v46 = vld [vmem:[#allocation2 + $0xf3] sm:$0xff] }
 0x473   : > { %v5051_v38 = vpop.f32.mrb[54].mxu1 }
 0x474   : > { %v5248_v19 = vadd.f32 %v5207_v58, %v5051_v38  ;;  %v9069_v44 = vpop.f32.mrb[55].mxu1  ;;  %9366 = vmatmul.mubr.msk.f32.gmra.mrb[160].mxu1 %vm423_vm5, %v5904_v0  ;;  %5848 = vst.msk [vmem:[#allocation3 + $0x48] sm:$0xff] %vm423_vm5, %v5807_v41  ;;  %v5212_v58 = vld [vmem:[#allocation3 + $0x88] sm:$0xff] }
 0x475   : > { %9368 = vmatprep.mubr.msk.f32.mxu1 %vm9649_vm1, %v9650_v6  ;;  %v5767_v13 = vld [vmem:[#allocation3 + $0x50] sm:$0xff] }
 0x476   : > { %5289 = vst.msk [vmem:[#allocation3 + $0x60] sm:$0xff] %vm423_vm5, %v5248_v19  ;;  %v5808_v29 = vadd.f32 %v5767_v13, %v12171_v61  ;;  %v5906_v61 = vld [vmem:[#allocation2 + $0xfb] sm:$0xff] }
 0x477   : > { %v5056_v27 = vpop.f32.mrb[56].mxu1 }
 0x478   : > { %v5249_v15 = vadd.f32 %v5208_v11, %v5056_v27  ;;  %v9072_v39 = vpop.f32.mrb[57].mxu1  ;;  %9369 = vmatmul.mubr.msk.f32.gmra.mrb[162].mxu1 %vm423_vm5, %v5905_v46  ;;  %5849 = vst.msk [vmem:[#allocation3 + $0x50] sm:$0xff] %vm423_vm5, %v5808_v29  ;;  %v5213_v27 = vld [vmem:[#allocation3 + $0x90] sm:$0xff] }
 0x479   : > { %9371 = vmatprep.mubr.msk.f32.mxu1 %vm9649_vm1, %v9650_v6  ;;  %v5768_v57 = vld [vmem:[#allocation3 + $0x58] sm:$0xff] }
 0x47a   : > { %5290 = vst.msk [vmem:[#allocation3 + $0x68] sm:$0xff] %vm423_vm5, %v5249_v15  ;;  %v5809_v35 = vadd.f32 %v5768_v57, %v12180_v20  ;;  %v5907_v20 = vld [vmem:[#allocation2 + $0x103] sm:$0xff] }
 0x47b   : > { %v5061_v16 = vpop.f32.mrb[58].mxu1 }
 0x47c   : > { %v5250_v24 = vadd.f32 %v5209_v7, %v5061_v16  ;;  %v9075_v59 = vpop.f32.mrb[59].mxu1  ;;  %9372 = vmatmul.mubr.msk.f32.gmra.mrb[164].mxu1 %vm423_vm5, %v5906_v61  ;;  %5850 = vst.msk [vmem:[#allocation3 + $0x58] sm:$0xff] %vm423_vm5, %v5809_v35  ;;  %v5214_v35 = vld [vmem:[#allocation3 + $0x98] sm:$0xff] }
 0x47d   : > { %9374 = vmatprep.mubr.msk.f32.mxu1 %vm9649_vm1, %v9650_v6  ;;  %v5769_v62 = vld [vmem:[#allocation3 + $0x60] sm:$0xff] }
 0x47e   : > { %5291 = vst.msk [vmem:[#allocation3 + $0x70] sm:$0xff] %vm423_vm5, %v5250_v24  ;;  %v5810_v37 = vadd.f32 %v5769_v62, %v12188_v60  ;;  %v5908_v60 = vld [vmem:[#allocation2 + $0x10b] sm:$0xff]  ;;  %v5215_v62 = vld [vmem:[#allocation3 + $0xa0] sm:$0xff] }
 0x47f   : > { %v5066_v47 = vpop.f32.mrb[60].mxu1 }
 0x480   : > { %v5251_v23 = vadd.f32 %v5210_v40, %v5066_v47  ;;  %v9078_v36 = vpop.f32.mrb[61].mxu1  ;;  %9375 = vmatmul.mubr.msk.f32.gmra.mrb[166].mxu1 %vm423_vm5, %v5907_v20  ;;  %5851 = vst.msk [vmem:[#allocation3 + $0x60] sm:$0xff] %vm423_vm5, %v5810_v37 }
 0x481   : > { %9377 = vmatprep.mubr.msk.f32.mxu1 %vm9649_vm1, %v9650_v6  ;;  %v5770_v4 = vld [vmem:[#allocation3 + $0x68] sm:$0xff] }
 0x482   : > { %5292 = vst.msk [vmem:[#allocation3 + $0x78] sm:$0xff] %vm423_vm5, %v5251_v23  ;;  %v5811_v2 = vadd.f32 %v5770_v4, %v12196_v25  ;;  %v5909_v25 = vld [vmem:[#allocation2 + $0x113] sm:$0xff]  ;;  %v5216_v36 = vld [vmem:[#allocation3 + $0xa8] sm:$0xff] }
 0x483   : > { %v5071_v51 = vpop.f32.mrb[62].mxu1 }
 0x484   : > { %v5252_v30 = vadd.f32 %v5211_v8, %v5071_v51  ;;  %v9081_v52 = vpop.f32.mrb[63].mxu1  ;;  %9378 = vmatmul.mubr.msk.f32.gmra.mrb[168].mxu1 %vm423_vm5, %v5908_v60  ;;  %5852 = vst.msk [vmem:[#allocation3 + $0x68] sm:$0xff] %vm423_vm5, %v5811_v2 }
 0x485   : > { %9380 = vmatprep.mubr.msk.f32.mxu1 %vm9649_vm1, %v9650_v6  ;;  %v5771_v48 = vld [vmem:[#allocation3 + $0x70] sm:$0xff] }
 0x486   : > { %5293 = vst.msk [vmem:[#allocation3 + $0x80] sm:$0xff] %vm423_vm5, %v5252_v30  ;;  %v5812_v41 = vadd.f32 %v5771_v48, %v12204_v1  ;;  %v5910_v1 = vld [vmem:[#allocation2 + $0x11b] sm:$0xff]  ;;  %v5217_v30 = vld [vmem:[#allocation3 + $0xb0] sm:$0xff] }
 0x487   : > { %v5076_v38 = vpop.f32.mrb[64].mxu1 }
 0x488   : > { %v5253_v0 = vadd.f32 %v5212_v58, %v5076_v38  ;;  %v9084_v19 = vpop.f32.mrb[65].mxu1  ;;  %9381 = vmatmul.mubr.msk.f32.gmra.mrb[170].mxu1 %vm423_vm5, %v5909_v25  ;;  %5853 = vst.msk [vmem:[#allocation3 + $0x70] sm:$0xff] %vm423_vm5, %v5812_v41  ;;  %v5218_v25 = vld [vmem:[#allocation3 + $0xb8] sm:$0xff] }
 0x489   : > { %9383 = vmatprep.mubr.msk.f32.mxu1 %vm9649_vm1, %v9650_v6  ;;  %v5772_v44 = vld [vmem:[#allocation3 + $0x78] sm:$0xff] }
 0x48a   : > { %5294 = vst.msk [vmem:[#allocation3 + $0x88] sm:$0xff] %vm423_vm5, %v5253_v0  ;;  %v5813_v13 = vadd.f32 %v5772_v44, %v12212_v26  ;;  %v5911_v26 = vld [vmem:[#allocation2 + $0x123] sm:$0xff] }
 0x48b   : > { %v5081_v29 = vpop.f32.mrb[66].mxu1 }
 0x48c   : > { %v5254_v11 = vadd.f32 %v5213_v27, %v5081_v29  ;;  %v9087_v46 = vpop.f32.mrb[67].mxu1  ;;  %9384 = vmatmul.mubr.msk.f32.gmra.mrb[172].mxu1 %vm423_vm5, %v5910_v1  ;;  %5854 = vst.msk [vmem:[#allocation3 + $0x78] sm:$0xff] %vm423_vm5, %v5813_v13  ;;  %v5219_v27 = vld [vmem:[#allocation3 + $0xc0] sm:$0xff] }
 0x48d   : > { %9386 = vmatprep.mubr.msk.f32.mxu1 %vm9649_vm1, %v9650_v6  ;;  %v5773_v15 = vld [vmem:[#allocation3 + $0x80] sm:$0xff] }
 0x48e   : > { %5295 = vst.msk [vmem:[#allocation3 + $0x90] sm:$0xff] %vm423_vm5, %v5254_v11  ;;  %v5814_v39 = vadd.f32 %v5773_v15, %v12220_v5  ;;  %v5912_v5 = vld [vmem:[#allocation2 + $0x12b] sm:$0xff] }
 0x48f   : > { %v5086_v57 = vpop.f32.mrb[68].mxu1 }
 0x490   : > { %v5255_v16 = vadd.f32 %v5214_v35, %v5086_v57  ;;  %v9090_v7 = vpop.f32.mrb[69].mxu1  ;;  %9387 = vmatmul.mubr.msk.f32.gmra.mrb[174].mxu1 %vm423_vm5, %v5911_v26  ;;  %5855 = vst.msk [vmem:[#allocation3 + $0x80] sm:$0xff] %vm423_vm5, %v5814_v39  ;;  %v5220_v57 = vld [vmem:[#allocation3 + $0xc8] sm:$0xff] }
 0x491   : > { %9389 = vmatprep.mubr.msk.f32.mxu1 %vm9649_vm1, %v9650_v6  ;;  %v5774_v61 = vld [vmem:[#allocation3 + $0x88] sm:$0xff] }
 0x492   : > { %5296 = vst.msk [vmem:[#allocation3 + $0x98] sm:$0xff] %vm423_vm5, %v5255_v16  ;;  %v5815_v24 = vadd.f32 %v5774_v61, %v12228_v50  ;;  %v5913_v50 = vld [vmem:[#allocation2 + $0x133] sm:$0xff] }
 0x493   : > { %v5091_v59 = vpop.f32.mrb[70].mxu1 }
 0x494   : > { %v5256_v37 = vadd.f32 %v5215_v62, %v5091_v59  ;;  %v9093_v47 = vpop.f32.mrb[71].mxu1  ;;  %9390 = vmatmul.mubr.msk.f32.gmra.mrb[176].mxu1 %vm423_vm5, %v5912_v5  ;;  %5856 = vst.msk [vmem:[#allocation3 + $0x88] sm:$0xff] %vm423_vm5, %v5815_v24  ;;  %v5221_v24 = vld [vmem:[#allocation3 + $0xd0] sm:$0xff] }
 0x495   : > { %9392 = vmatprep.mubr.msk.f32.mxu1 %vm9649_vm1, %v9650_v6  ;;  %v5775_v40 = vld [vmem:[#allocation3 + $0x90] sm:$0xff] }
 0x496   : > { %5297 = vst.msk [vmem:[#allocation3 + $0xa0] sm:$0xff] %vm423_vm5, %v5256_v37  ;;  %v5816_v20 = vadd.f32 %v5775_v40, %v12236_v45  ;;  %v5914_v45 = vld [vmem:[#allocation2 + $0x13b] sm:$0xff]  ;;  %v5919_v5 = vld [vmem:[#allocation2 + $0x163] sm:$0xff] }
 0x497   : > { %v5096_v23 = vpop.f32.mrb[72].mxu1 }
 0x498   : > { %v5257_v4 = vadd.f32 %v5216_v36, %v5096_v23  ;;  %v9096_v2 = vpop.f32.mrb[73].mxu1  ;;  %9393 = vmatmul.mubr.msk.f32.gmra.mrb[178].mxu1 %vm423_vm5, %v5913_v50  ;;  %5857 = vst.msk [vmem:[#allocation3 + $0x90] sm:$0xff] %vm423_vm5, %v5816_v20  ;;  %v5920_v36 = vld [vmem:[#allocation2 + $0x16b] sm:$0xf] }
 0x499   : > { %9395 = vmatprep.mubr.msk.f32.mxu1 %vm9649_vm1, %v9650_v6  ;;  %v5776_v51 = vld [vmem:[#allocation3 + $0x98] sm:$0xff] }
 0x49a   : > { %5298 = vst.msk [vmem:[#allocation3 + $0xa8] sm:$0xff] %vm423_vm5, %v5257_v4  ;;  %v5817_v8 = vadd.f32 %v5776_v51, %v12244_v22  ;;  %v5915_v22 = vld [vmem:[#allocation2 + $0x143] sm:$0xff]  ;;  %v5223_v51 = vld [vmem:[#allocation3 + $0xe0] sm:$0xff] }
 0x49b   : > { %v5101_v60 = vpop.f32.mrb[74].mxu1 }
 0x49c   : > { %v5258_v52 = vadd.f32 %v5217_v30, %v5101_v60  ;;  %v9099_v48 = vpop.f32.mrb[75].mxu1  ;;  %9396 = vmatmul.mubr.msk.f32.gmra.mrb[180].mxu1 %vm423_vm5, %v5914_v45  ;;  %5858 = vst.msk [vmem:[#allocation3 + $0x98] sm:$0xff] %vm423_vm5, %v5817_v8 }
 0x49d   : > { %9398 = vmatprep.mubr.msk.f32.mxu1 %vm9649_vm1, %v9650_v6  ;;  %v5777_v41 = vld [vmem:[#allocation3 + $0xa0] sm:$0xff] }
 0x49e   : > { %5299 = vst.msk [vmem:[#allocation3 + $0xb0] sm:$0xff] %vm423_vm5, %v5258_v52  ;;  %v5818_v38 = vadd.f32 %v5777_v41, %v12252_v42  ;;  %v5916_v42 = vld [vmem:[#allocation2 + $0x14b] sm:$0xff]  ;;  %v5224_v52 = vld [vmem:[#allocation3 + $0xe8] sm:$0xff] }
 0x49f   : > { %v5106_v58 = vpop.f32.mrb[76].mxu1 }
 0x4a0   : > { %v5259_v0 = vadd.f32 %v5218_v25, %v5106_v58  ;;  %v9102_v19 = vpop.f32.mrb[77].mxu1  ;;  %9399 = vmatmul.mubr.msk.f32.gmra.mrb[182].mxu1 %vm423_vm5, %v5915_v22  ;;  %5859 = vst.msk [vmem:[#allocation3 + $0xa0] sm:$0xff] %vm423_vm5, %v5818_v38  ;;  %v5225_v25 = vld [vmem:[#allocation3 + $0xf0] sm:$0xff] }
 0x4a1   : > { %9401 = vmatprep.mubr.msk.f32.mxu1 %vm9649_vm1, %v9650_v6  ;;  %v5778_v44 = vld [vmem:[#allocation3 + $0xa8] sm:$0xff] }
 0x4a2   : > { %5300 = vst.msk [vmem:[#allocation3 + $0xb8] sm:$0xff] %vm423_vm5, %v5259_v0  ;;  %v5819_v13 = vadd.f32 %v5778_v44, %v12260_v53  ;;  %v5917_v53 = vld [vmem:[#allocation2 + $0x153] sm:$0xff] }
 0x4a3   : > { %v5111_v29 = vpop.f32.mrb[78].mxu1 }
 0x4a4   : > { %v5260_v1 = vadd.f32 %v5219_v27, %v5111_v29  ;;  %v9105_v11 = vpop.f32.mrb[79].mxu1  ;;  %9402 = vmatmul.mubr.msk.f32.gmra.mrb[184].mxu1 %vm423_vm5, %v5916_v42  ;;  %5860 = vst.msk [vmem:[#allocation3 + $0xa8] sm:$0xff] %vm423_vm5, %v5819_v13  ;;  %v5226_v13 = vld [vmem:[#allocation3 + $0xf8] sm:$0xff] }
 0x4a5   : > { %9404 = vmatprep.mubr.msk.f32.mxu1 %vm9649_vm1, %v9650_v6  ;;  %v5779_v46 = vld [vmem:[#allocation3 + $0xb0] sm:$0xff]  ;;  %v5227_v11 = vld [vmem:[#allocation3 + $0x100] sm:$0xff] }
 0x4a6   : > { %5301 = vst.msk [vmem:[#allocation3 + $0xc0] sm:$0xff] %vm423_vm5, %v5260_v1  ;;  %v5820_v15 = vadd.f32 %v5779_v46, %v12268_v63  ;;  %v5918_v63 = vld [vmem:[#allocation2 + $0x15b] sm:$0xff] }
 0x4a7   : > { %v5116_v39 = vpop.f32.mrb[80].mxu1 }
 0x4a8   : > { %v5261_v35 = vadd.f32 %v5220_v57, %v5116_v39  ;;  %v9108_v26 = vpop.f32.mrb[81].mxu1  ;;  %9405 = vmatmul.mubr.msk.f32.gmra.mrb[186].mxu1 %vm423_vm5, %v5917_v53  ;;  %5861 = vst.msk [vmem:[#allocation3 + $0xb0] sm:$0xff] %vm423_vm5, %v5820_v15  ;;  %v5228_v53 = vld [vmem:[#allocation3 + $0x108] sm:$0xff] }
 0x4a9   : > { %9407 = vmatprep.mubr.msk.f32.mxu1 %vm9649_vm1, %v9650_v6  ;;  %v5780_v16 = vld [vmem:[#allocation3 + $0xb8] sm:$0xff] }
 0x4aa   : > { %5302 = vst.msk [vmem:[#allocation3 + $0xc8] sm:$0xff] %vm423_vm5, %v5261_v35  ;;  %v5821_v7 = vadd.f32 %v5780_v16, %v12276_v32  ;;  %v5222_v32 = vld [vmem:[#allocation3 + $0xd8] sm:$0xff] }
 0x4ab   : > { %v5121_v61 = vpop.f32.mrb[82].mxu1 }
 0x4ac   : > { %v5262_v59 = vadd.f32 %v5221_v24, %v5121_v61  ;;  %v9111_v62 = vpop.f32.mrb[83].mxu1  ;;  %9408 = vmatmul.mubr.msk.f32.gmra.mrb[188].mxu1 %vm423_vm5, %v5918_v63  ;;  %5862 = vst.msk [vmem:[#allocation3 + $0xb8] sm:$0xff] %vm423_vm5, %v5821_v7  ;;  %v5229_v61 = vld [vmem:[#allocation3 + $0x110] sm:$0xff] }
 0x4ad   : > { %9410 = vmatprep.mubr.msk.f32.mxu1 %vm9649_vm1, %v9650_v6  ;;  %v5781_v37 = vld [vmem:[#allocation3 + $0xc0] sm:$0xff] }
 0x4ae   : > { %5303 = vst.msk [vmem:[#allocation3 + $0xd0] sm:$0xff] %vm423_vm5, %v5262_v59  ;;  %v5822_v47 = vadd.f32 %v5781_v37, %v12284_v3 }
 0x4af   : > { %v5126_v40 = vpop.f32.mrb[84].mxu1 }
 0x4b0   : > { %v5263_v20 = vadd.f32 %v5222_v32, %v5126_v40  ;;  %v9114_v23 = vpop.f32.mrb[85].mxu1  ;;  %9411 = vmatmul.mubr.msk.f32.gmra.mrb[190].mxu1 %vm423_vm5, %v5919_v5  ;;  %5863 = vst.msk [vmem:[#allocation3 + $0xc0] sm:$0xff] %vm423_vm5, %v5822_v47  ;;  %v5230_v5 = vld [vmem:[#allocation3 + $0x118] sm:$0xff] }
 0x4b1   : > { %9413 = vmatprep.mubr.msk.f32.mxu1 %vm9649_vm1, %v9650_v6  ;;  %v5782_v50 = vld [vmem:[#allocation3 + $0xc8] sm:$0xff] }
 0x4b2   : > { %5304 = vst.msk [vmem:[#allocation3 + $0xd8] sm:$0xff] %vm423_vm5, %v5263_v20  ;;  %v5823_v4 = vadd.f32 %v5782_v50, %v12292_v49  ;;  %v5231_v20 = vld [vmem:[#allocation3 + $0x120] sm:$0xff] }
 0x4b3   : > { %v5131_v2 = vpop.f32.mrb[86].mxu1 }
 0x4b4   : > { %v5264_v3 = vadd.f32 %v5223_v51, %v5131_v2  ;;  %v9117_v8 = vpop.f32.mrb[87].mxu1  ;;  %9414 = vmatmul.mubr.msk.f32.gmra.mrb[192].mxu1 %vm423_vm5, %v5920_v36  ;;  %5864 = vst.msk [vmem:[#allocation3 + $0xc8] sm:$0xff] %vm423_vm5, %v5823_v4  ;;  %v5232_v2 = vld [vmem:[#allocation3 + $0x128] sm:$0xff] }
 0x4b5   : > { %v5783_v60 = vld [vmem:[#allocation3 + $0xd0] sm:$0xff] }
 0x4b6   : > { %5305 = vst.msk [vmem:[#allocation3 + $0xe0] sm:$0xff] %vm423_vm5, %v5264_v3  ;;  %v5824_v30 = vadd.f32 %v5783_v60, %v12300_v9 }
 0x4b7   : > { %v5136_v45 = vpop.f32.mrb[88].mxu1 }
 0x4b8   : > { %v5265_v48 = vadd.f32 %v5224_v52, %v5136_v45  ;;  %v9120_v41 = vpop.f32.mrb[89].mxu1  ;;  %5865 = vst.msk [vmem:[#allocation3 + $0xd0] sm:$0xff] %vm423_vm5, %v5824_v30  ;;  %v5233_v30 = vld [vmem:[#allocation3 + $0x130] sm:$0xff] }
 0x4b9   : > { %v5784_v49 = vld [vmem:[#allocation3 + $0xd8] sm:$0xff] }
 0x4ba   : > { %5306 = vst.msk [vmem:[#allocation3 + $0xe8] sm:$0xff] %vm423_vm5, %v5265_v48  ;;  %v5825_v38 = vadd.f32 %v5784_v49, %v12308_v55  ;;  %v5234_v49 = vld [vmem:[#allocation3 + $0x138] sm:$0xff] }
 0x4bb   : > { %v5141_v58 = vpop.f32.mrb[90].mxu1 }
 0x4bc   : > { %v5266_v22 = vadd.f32 %v5225_v25, %v5141_v58  ;;  %v9123_v0 = vpop.f32.mrb[91].mxu1  ;;  %5866 = vst.msk [vmem:[#allocation3 + $0xd8] sm:$0xff] %vm423_vm5, %v5825_v38 }
 0x4bd   : > { %v5785_v19 = vld [vmem:[#allocation3 + $0xe0] sm:$0xff] }
 0x4be   : > { %5307 = vst.msk [vmem:[#allocation3 + $0xf0] sm:$0xff] %vm423_vm5, %v5266_v22  ;;  %v5826_v9 = vadd.f32 %v5785_v19, %v12316_v43  ;;  %v5235_v0 = vld [vmem:[#allocation3 + $0x140] sm:$0xf] }
 0x4bf   : > { %v5146_v44 = vpop.f32.mrb[92].mxu1 }
 0x4c0   : > { %v5267_v29 = vadd.f32 %v5226_v13, %v5146_v44  ;;  %v9126_v27 = vpop.f32.mrb[93].mxu1  ;;  %5867 = vst.msk [vmem:[#allocation3 + $0xe0] sm:$0xff] %vm423_vm5, %v5826_v9 }
 0x4c1   : > { %v5786_v42 = vld [vmem:[#allocation3 + $0xe8] sm:$0xff] }
 0x4c2   : > { %5308 = vst.msk [vmem:[#allocation3 + $0xf8] sm:$0xff] %vm423_vm5, %v5267_v29  ;;  %v5827_v55 = vadd.f32 %v5786_v42, %v12324_v31  ;;  %v6319_v29 = vld [vmem:[#allocation3] sm:$0xff] }
 0x4c3   : > { %v5151_v1 = vpop.f32.mrb[94].mxu1 }
 0x4c4   : > { %v5268_v46 = vadd.f32 %v5227_v11, %v5151_v1  ;;  %v9129_v15 = vpop.f32.mrb[95].mxu1  ;;  %5868 = vst.msk [vmem:[#allocation3 + $0xe8] sm:$0xff] %vm423_vm5, %v5827_v55  ;;  %v6320_v11 = vld [vmem:[#allocation3 + $0x8] sm:$0xff] }
 0x4c5   : > { %v5787_v39 = vld [vmem:[#allocation3 + $0xf0] sm:$0xff] }
 0x4c6   : > { %5309 = vst.msk [vmem:[#allocation3 + $0x100] sm:$0xff] %vm423_vm5, %v5268_v46  ;;  %v5828_v43 = vadd.f32 %v5787_v39, %v12338_v14 }
 0x4c7   : > { %v5156_v57 = vpop.f32.mrb[96].mxu1 }
 0x4c8   : > { %v5269_v35 = vadd.f32 %v5228_v53, %v5156_v57  ;;  %v9132_v26 = vpop.f32.mrb[97].mxu1  ;;  %5869 = vst.msk [vmem:[#allocation3 + $0xf0] sm:$0xff] %vm423_vm5, %v5828_v43  ;;  %v6321_v57 = vld [vmem:[#allocation3 + $0x10] sm:$0xff]  ;;  %v12614_v53 = vld [vmem:[%s12920_s5] ss:$0 sm:$0xff] }
 0x4c9   : > { %v5788_v16 = vld [vmem:[#allocation3 + $0xf8] sm:$0xff] }
 0x4ca   : > { %5310 = vst.msk [vmem:[#allocation3 + $0x108] sm:$0xff] %vm423_vm5, %v5269_v35  ;;  %v5829_v31 = vadd.f32 %v5788_v16, %v12346_v34 }
 0x4cb   : > { %v5161_v7 = vpop.f32.mrb[98].mxu1 }
 0x4cc   : > { %v5270_v24 = vadd.f32 %v5229_v61, %v5161_v7  ;;  %v9135_v63 = vpop.f32.mrb[99].mxu1  ;;  %5870 = vst.msk [vmem:[#allocation3 + $0xf8] sm:$0xff] %vm423_vm5, %v5829_v31  ;;  %v6322_v7 = vld [vmem:[#allocation3 + $0x18] sm:$0xff] }
 0x4cd   : > { %v5789_v59 = vld [vmem:[#allocation3 + $0x100] sm:$0xff] }
 0x4ce   : > { %5311 = vst.msk [vmem:[#allocation3 + $0x110] sm:$0xff] %vm423_vm5, %v5270_v24  ;;  %v5830_v14 = vadd.f32 %v5789_v59, %v12354_v56 }
 0x4cf   : > { %v5166_v62 = vpop.f32.mrb[100].mxu1 }
 0x4d0   : > { %v5271_v37 = vadd.f32 %v5230_v5, %v5166_v62  ;;  %v9138_v47 = vpop.f32.mrb[101].mxu1  ;;  %5871 = vst.msk [vmem:[#allocation3 + $0x100] sm:$0xff] %vm423_vm5, %v5830_v14  ;;  %v6323_v62 = vld [vmem:[#allocation3 + $0x20] sm:$0xff] }
 0x4d1   : > { %v5790_v40 = vld [vmem:[#allocation3 + $0x108] sm:$0xff] }
 0x4d2   : > { %5312 = vst.msk [vmem:[#allocation3 + $0x118] sm:$0xff] %vm423_vm5, %v5271_v37  ;;  %v5831_v34 = vadd.f32 %v5790_v40, %v12362_v54 }
 0x4d3   : > { %v5171_v32 = vpop.f32.mrb[102].mxu1 }
 0x4d4   : > { %v5272_v23 = vadd.f32 %v5231_v20, %v5171_v32  ;;  %v9141_v36 = vpop.f32.mrb[103].mxu1  ;;  %5872 = vst.msk [vmem:[#allocation3 + $0x108] sm:$0xff] %vm423_vm5, %v5831_v34  ;;  %v6324_v20 = vld [vmem:[#allocation3 + $0x28] sm:$0xff] }
 0x4d5   : > { %v5791_v50 = vld [vmem:[#allocation3 + $0x110] sm:$0xff] }
 0x4d6   : > { %5313 = vst.msk [vmem:[#allocation3 + $0x120] sm:$0xff] %vm423_vm5, %v5272_v23  ;;  %v5832_v56 = vadd.f32 %v5791_v50, %v12370_v21 }
 0x4d7   : > { %v5176_v4 = vpop.f32.mrb[104].mxu1 }
 0x4d8   : > { %v5273_v51 = vadd.f32 %v5232_v2, %v5176_v4  ;;  %v9144_v3 = vpop.f32.mrb[105].mxu1  ;;  %5873 = vst.msk [vmem:[#allocation3 + $0x110] sm:$0xff] %vm423_vm5, %v5832_v56 }
 0x4d9   : > { %v5792_v8 = vld [vmem:[#allocation3 + $0x118] sm:$0xff] }
 0x4da   : > { %5314 = vst.msk [vmem:[#allocation3 + $0x128] sm:$0xff] %vm423_vm5, %v5273_v51  ;;  %v5833_v54 = vadd.f32 %v5792_v8, %v12378_v33  ;;  %v6325_v51 = vld [vmem:[#allocation3 + $0x30] sm:$0xff] }
 0x4db   : > { %v5181_v60 = vpop.f32.mrb[106].mxu1 }
 0x4dc   : > { %v5274_v45 = vadd.f32 %v5233_v30, %v5181_v60  ;;  %v9147_v52 = vpop.f32.mrb[107].mxu1  ;;  %5874 = vst.msk [vmem:[#allocation3 + $0x118] sm:$0xff] %vm423_vm5, %v5833_v54 }
 0x4dd   : > { %v5793_v48 = vld [vmem:[#allocation3 + $0x120] sm:$0xff]  ;;  %v6326_v52 = vld [vmem:[#allocation3 + $0x38] sm:$0xff] }
 0x4de   : > { %5315 = vst.msk [vmem:[#allocation3 + $0x130] sm:$0xff] %vm423_vm5, %v5274_v45  ;;  %v5834_v21 = vadd.f32 %v5793_v48, %v12386_v10 }
 0x4df   : > { %v5186_v41 = vpop.f32.mrb[108].mxu1 }
 0x4e0   : > { %v5275_v38 = vadd.f32 %v5234_v49, %v5186_v41  ;;  %v9150_v58 = vpop.f32.mrb[109].mxu1  ;;  %5875 = vst.msk [vmem:[#allocation3 + $0x120] sm:$0xff] %vm423_vm5, %v5834_v21 }
 0x4e1   : > { %v5794_v25 = vld [vmem:[#allocation3 + $0x128] sm:$0xff] }
 0x4e2   : > { %5316 = vst.msk [vmem:[#allocation3 + $0x138] sm:$0xff] %vm423_vm5, %v5275_v38  ;;  %v5835_v33 = vadd.f32 %v5794_v25, %v12394_v12  ;;  %v6327_v25 = vld [vmem:[#allocation3 + $0x40] sm:$0xff] }
 0x4e3   : > { %v5191_v22 = vpop.f32.mrb[110].mxu1 }
 0x4e4   : > { %v5276_v19 = vadd.f32 %v5235_v0, %v5191_v22  ;;  %v9153_v9 = vpop.f32.mrb[111].mxu1  ;;  %5876 = vst.msk [vmem:[#allocation3 + $0x128] sm:$0xff] %vm423_vm5, %v5835_v33 }
 0x4e5   : > { %v5795_v44 = vld [vmem:[#allocation3 + $0x130] sm:$0xff] }
 0x4e6   : > { %5317 = vst.msk [vmem:[#allocation3 + $0x140] sm:$0xf] %vm1335_vm6, %v5276_v19  ;;  %v5836_v10 = vadd.f32 %v5795_v44, %v12403_v28 }
 0x4e7   : > { %v6115_v13 = vpop.f32.mrb[112].mxu1 }
 0x4e8   : > { %v6360_v27 = vadd.f32 %v6319_v29, %v6115_v13  ;;  %v9295_v42 = vpop.f32.mrb[113].mxu1  ;;  %5877 = vst.msk [vmem:[#allocation3 + $0x130] sm:$0xff] %vm423_vm5, %v5836_v10  ;;  %v6328_v10 = vld [vmem:[#allocation3 + $0x48] sm:$0xff] }
 0x4e9   : > { %v5796_v55 = vld [vmem:[#allocation3 + $0x138] sm:$0xff] }
 0x4ea   : > { %6401 = vst.msk [vmem:[#allocation3] sm:$0xff] %vm423_vm5, %v6360_v27  ;;  %v5837_v12 = vadd.f32 %v5796_v55, %v12452_v17 }
 0x4eb   : > { %v6120_v1 = vpop.f32.mrb[114].mxu1 }
 0x4ec   : > { %5878 = vst.msk [vmem:[#allocation3 + $0x138] sm:$0xff] %vm423_vm5, %v5837_v12  ;;  %v6361_v46 = vadd.f32 %v6320_v11, %v6120_v1  ;;  %v9298_v15 = vpop.f32.mrb[115].mxu1  ;;  %v6329_v1 = vld [vmem:[#allocation3 + $0x50] sm:$0xff] }
 0x4ed   : > { %v5797_v39 = vld [vmem:[#allocation3 + $0x140] sm:$0xf] }
 0x4ee   : > { %6402 = vst.msk [vmem:[#allocation3 + $0x8] sm:$0xff] %vm423_vm5, %v6361_v46  ;;  %v5838_v28 = vadd.f32 %v5797_v39, %v12460_v18 }
 0x4ef   : > { %v6125_v43 = vpop.f32.mrb[116].mxu1 }
 0x4f0   : > { %5879 = vst.msk [vmem:[#allocation3 + $0x140] sm:$0xf] %vm1335_vm6, %v5838_v28  ;;  %v6362_v17 = vadd.f32 %v6321_v57, %v6125_v43  ;;  %v9301_v35 = vpop.f32.mrb[117].mxu1  ;;  %v6330_v57 = vld [vmem:[#allocation3 + $0x58] sm:$0xff] }
 0x4f1   : > { %v6442_v26 = vld [vmem:[#allocation3] sm:$0xff] }
 0x4f2   : > { %6403 = vst.msk [vmem:[#allocation3 + $0x10] sm:$0xff] %vm423_vm5, %v6362_v17  ;;  %v6490_v16 = vadd.f32 %v12614_v53, %v6442_v26 }
 0x4f3   : > { %v6130_v31 = vpop.f32.mrb[118].mxu1 }
 0x4f4   : > { %v6363_v61 = vadd.f32 %v6322_v7, %v6130_v31  ;;  %v9304_v18 = vpop.f32.mrb[119].mxu1  ;;  %v6531_v24 = vmax.f32 %v6490_v16, 0.0 }
 0x4f5   : > { %v6443_v63 = vld [vmem:[#allocation3 + $0x8] sm:$0xff] }
 0x4f6   : > { %6404 = vst.msk [vmem:[#allocation3 + $0x18] sm:$0xff] %vm423_vm5, %v6363_v61  ;;  %9425 = vmatmul.mubr.msk.f32.vlgmr.msra.gmra.mrb[116].mxu0 %vm423_vm5, %v6531_v24  ;;  %v6491_v59 = vadd.f32 %v12614_v53, %v6443_v63  ;;  %v6331_v61 = vld [vmem:[#allocation3 + $0x60] sm:$0xff] }
 0x4f7   : > { %v6135_v14 = vpop.f32.mrb[120].mxu1  ;;  %9427 = vmatprep.mubr.msk.f32.mxu0 %vm9649_vm1, %v9650_v6 }
 0x4f8   : > { %v6364_v5 = vadd.f32 %v6323_v62, %v6135_v14  ;;  %v9307_v37 = vpop.f32.mrb[121].mxu1  ;;  %v6532_v47 = vmax.f32 %v6491_v59, 0.0 }
 0x4f9   : > { %v6444_v40 = vld [vmem:[#allocation3 + $0x10] sm:$0xff] }
 0x4fa   : > { %6405 = vst.msk [vmem:[#allocation3 + $0x20] sm:$0xff] %vm423_vm5, %v6364_v5  ;;  %9428 = vmatmul.mubr.msk.f32.gmra.mrb[118].mxu0 %vm423_vm5, %v6532_v47  ;;  %v6492_v34 = vadd.f32 %v12614_v53, %v6444_v40  ;;  %v6332_v5 = vld [vmem:[#allocation3 + $0x68] sm:$0xff] }
 0x4fb   : > { %v6140_v32 = vpop.f32.mrb[122].mxu1  ;;  %9430 = vmatprep.mubr.msk.f32.mxu0 %vm9649_vm1, %v9650_v6 }
 0x4fc   : > { %v6365_v23 = vadd.f32 %v6324_v20, %v6140_v32  ;;  %v9310_v36 = vpop.f32.mrb[123].mxu1  ;;  %v6533_v50 = vmax.f32 %v6492_v34, 0.0 }
 0x4fd   : > { %v6445_v56 = vld [vmem:[#allocation3 + $0x18] sm:$0xff] }
 0x4fe   : > { %6406 = vst.msk [vmem:[#allocation3 + $0x28] sm:$0xff] %vm423_vm5, %v6365_v23  ;;  %9431 = vmatmul.mubr.msk.f32.gmra.mrb[120].mxu0 %vm423_vm5, %v6533_v50  ;;  %v6493_v4 = vadd.f32 %v12614_v53, %v6445_v56  ;;  %v6333_v23 = vld [vmem:[#allocation3 + $0x70] sm:$0xff] }
 0x4ff   : > { %v6145_v2 = vpop.f32.mrb[124].mxu1  ;;  %9433 = vmatprep.mubr.msk.f32.mxu0 %vm9649_vm1, %v9650_v6 }
 0x500   : > { %v6366_v3 = vadd.f32 %v6325_v51, %v6145_v2  ;;  %v9313_v8 = vpop.f32.mrb[125].mxu1  ;;  %v6534_v54 = vmax.f32 %v6493_v4, 0.0 }
 0x501   : > { %v6446_v60 = vld [vmem:[#allocation3 + $0x20] sm:$0xff] }
 0x502   : > { %6407 = vst.msk [vmem:[#allocation3 + $0x30] sm:$0xff] %vm423_vm5, %v6366_v3  ;;  %9434 = vmatmul.mubr.msk.f32.gmra.mrb[122].mxu0 %vm423_vm5, %v6534_v54  ;;  %v6494_v30 = vadd.f32 %v12614_v53, %v6446_v60  ;;  %v6334_v3 = vld [vmem:[#allocation3 + $0x78] sm:$0xff] }
 0x503   : > { %v6150_v45 = vpop.f32.mrb[126].mxu1  ;;  %9436 = vmatprep.mubr.msk.f32.mxu0 %vm9649_vm1, %v9650_v6 }
 0x504   : > { %v6367_v48 = vadd.f32 %v6326_v52, %v6150_v45  ;;  %v9316_v21 = vpop.f32.mrb[127].mxu1  ;;  %v6535_v41 = vmax.f32 %v6494_v30, 0.0 }
 0x505   : > { %v6447_v49 = vld [vmem:[#allocation3 + $0x28] sm:$0xff] }
 0x506   : > { %6408 = vst.msk [vmem:[#allocation3 + $0x38] sm:$0xff] %vm423_vm5, %v6367_v48  ;;  %9437 = vmatmul.mubr.msk.f32.gmra.mrb[124].mxu0 %vm423_vm5, %v6535_v41  ;;  %v6495_v38 = vadd.f32 %v12614_v53, %v6447_v49  ;;  %v6335_v48 = vld [vmem:[#allocation3 + $0x80] sm:$0xff] }
 0x507   : > { %v6155_v58 = vpop.f32.mrb[128].mxu1  ;;  %9439 = vmatprep.mubr.msk.f32.mxu0 %vm9649_vm1, %v9650_v6 }
 0x508   : > { %v6368_v33 = vadd.f32 %v6327_v25, %v6155_v58  ;;  %v9319_v22 = vpop.f32.mrb[129].mxu1  ;;  %v6536_v0 = vmax.f32 %v6495_v38, 0.0 }
 0x509   : > { %v6448_v19 = vld [vmem:[#allocation3 + $0x30] sm:$0xff] }
 0x50a   : > { %6409 = vst.msk [vmem:[#allocation3 + $0x40] sm:$0xff] %vm423_vm5, %v6368_v33  ;;  %9440 = vmatmul.mubr.msk.f32.gmra.mrb[126].mxu0 %vm423_vm5, %v6536_v0  ;;  %v6496_v9 = vadd.f32 %v12614_v53, %v6448_v19  ;;  %v6336_v33 = vld [vmem:[#allocation3 + $0x88] sm:$0xff] }
 0x50b   : > { %v6160_v44 = vpop.f32.mrb[130].mxu1  ;;  %9442 = vmatprep.mubr.msk.f32.mxu0 %vm9649_vm1, %v9650_v6 }
 0x50c   : > { %v6369_v13 = vadd.f32 %v6328_v10, %v6160_v44  ;;  %v9322_v29 = vpop.f32.mrb[131].mxu1  ;;  %v6537_v27 = vmax.f32 %v6496_v9, 0.0 }
 0x50d   : > { %v6449_v42 = vld [vmem:[#allocation3 + $0x38] sm:$0xff] }
 0x50e   : > { %6410 = vst.msk [vmem:[#allocation3 + $0x48] sm:$0xff] %vm423_vm5, %v6369_v13  ;;  %9443 = vmatmul.mubr.msk.f32.gmra.mrb[128].mxu0 %vm423_vm5, %v6537_v27  ;;  %v6497_v55 = vadd.f32 %v12614_v53, %v6449_v42  ;;  %v6337_v13 = vld [vmem:[#allocation3 + $0x90] sm:$0xff] }
 0x50f   : > { %v6165_v12 = vpop.f32.mrb[132].mxu1  ;;  %9445 = vmatprep.mubr.msk.f32.mxu0 %vm9649_vm1, %v9650_v6 }
 0x510   : > { %v6370_v11 = vadd.f32 %v6329_v1, %v6165_v12  ;;  %v9325_v46 = vpop.f32.mrb[133].mxu1  ;;  %v6538_v15 = vmax.f32 %v6497_v55, 0.0 }
 0x511   : > { %v6450_v39 = vld [vmem:[#allocation3 + $0x40] sm:$0xff] }
 0x512   : > { %6411 = vst.msk [vmem:[#allocation3 + $0x50] sm:$0xff] %vm423_vm5, %v6370_v11  ;;  %9446 = vmatmul.mubr.msk.f32.gmra.mrb[130].mxu0 %vm423_vm5, %v6538_v15  ;;  %v6498_v28 = vadd.f32 %v12614_v53, %v6450_v39  ;;  %v6338_v11 = vld [vmem:[#allocation3 + $0x98] sm:$0xff] }
 0x513   : > { %v6170_v43 = vpop.f32.mrb[134].mxu1  ;;  %9448 = vmatprep.mubr.msk.f32.mxu0 %vm9649_vm1, %v9650_v6 }
 0x514   : > { %v6371_v17 = vadd.f32 %v6330_v57, %v6170_v43  ;;  %v9328_v35 = vpop.f32.mrb[135].mxu1  ;;  %v6539_v26 = vmax.f32 %v6498_v28, 0.0 }
 0x515   : > { %v6451_v16 = vld [vmem:[#allocation3 + $0x48] sm:$0xff] }
 0x516   : > { %6412 = vst.msk [vmem:[#allocation3 + $0x58] sm:$0xff] %vm423_vm5, %v6371_v17  ;;  %9449 = vmatmul.mubr.msk.f32.gmra.mrb[132].mxu0 %vm423_vm5, %v6539_v26  ;;  %v6499_v31 = vadd.f32 %v12614_v53, %v6451_v16  ;;  %v6339_v17 = vld [vmem:[#allocation3 + $0xa0] sm:$0xff] }
 0x517   : > { %v6175_v7 = vpop.f32.mrb[136].mxu1  ;;  %9451 = vmatprep.mubr.msk.f32.mxu0 %vm9649_vm1, %v9650_v6 }
 0x518   : > { %v6372_v18 = vadd.f32 %v6331_v61, %v6175_v7  ;;  %v9331_v24 = vpop.f32.mrb[137].mxu1  ;;  %v6540_v63 = vmax.f32 %v6499_v31, 0.0 }
 0x519   : > { %v6452_v59 = vld [vmem:[#allocation3 + $0x50] sm:$0xff] }
 0x51a   : > { %6413 = vst.msk [vmem:[#allocation3 + $0x60] sm:$0xff] %vm423_vm5, %v6372_v18  ;;  %9452 = vmatmul.mubr.msk.f32.gmra.mrb[134].mxu0 %vm423_vm5, %v6540_v63  ;;  %v6500_v14 = vadd.f32 %v12614_v53, %v6452_v59  ;;  %v6340_v18 = vld [vmem:[#allocation3 + $0xa8] sm:$0xff] }
 0x51b   : > { %v6180_v62 = vpop.f32.mrb[138].mxu1  ;;  %9454 = vmatprep.mubr.msk.f32.mxu0 %vm9649_vm1, %v9650_v6 }
 0x51c   : > { %v6373_v37 = vadd.f32 %v6332_v5, %v6180_v62  ;;  %v9334_v47 = vpop.f32.mrb[139].mxu1  ;;  %v6541_v40 = vmax.f32 %v6500_v14, 0.0 }
 0x51d   : > { %v6453_v34 = vld [vmem:[#allocation3 + $0x58] sm:$0xff] }
 0x51e   : > { %6414 = vst.msk [vmem:[#allocation3 + $0x68] sm:$0xff] %vm423_vm5, %v6373_v37  ;;  %9455 = vmatmul.mubr.msk.f32.gmra.mrb[136].mxu0 %vm423_vm5, %v6541_v40  ;;  %v6501_v32 = vadd.f32 %v12614_v53, %v6453_v34  ;;  %v6341_v37 = vld [vmem:[#allocation3 + $0xb0] sm:$0xff] }
 0x51f   : > { %v6185_v20 = vpop.f32.mrb[140].mxu1  ;;  %9457 = vmatprep.mubr.msk.f32.mxu0 %vm9649_vm1, %v9650_v6 }
 0x520   : > { %v6374_v36 = vadd.f32 %v6333_v23, %v6185_v20  ;;  %v9337_v50 = vpop.f32.mrb[141].mxu1  ;;  %v6542_v56 = vmax.f32 %v6501_v32, 0.0 }
 0x521   : > { %v6454_v4 = vld [vmem:[#allocation3 + $0x60] sm:$0xff] }
 0x522   : > { %6415 = vst.msk [vmem:[#allocation3 + $0x70] sm:$0xff] %vm423_vm5, %v6374_v36  ;;  %9458 = vmatmul.mubr.msk.f32.gmra.mrb[138].mxu0 %vm423_vm5, %v6542_v56  ;;  %v6502_v2 = vadd.f32 %v12614_v53, %v6454_v4  ;;  %v6342_v36 = vld [vmem:[#allocation3 + $0xb8] sm:$0xff] }
 0x523   : > { %v6190_v51 = vpop.f32.mrb[142].mxu1  ;;  %9460 = vmatprep.mubr.msk.f32.mxu0 %vm9649_vm1, %v9650_v6 }
 0x524   : > { %v6375_v8 = vadd.f32 %v6334_v3, %v6190_v51  ;;  %v9340_v54 = vpop.f32.mrb[143].mxu1  ;;  %v6543_v60 = vmax.f32 %v6502_v2, 0.0 }
 0x525   : > { %v6455_v30 = vld [vmem:[#allocation3 + $0x68] sm:$0xff] }
 0x526   : > { %6416 = vst.msk [vmem:[#allocation3 + $0x78] sm:$0xff] %vm423_vm5, %v6375_v8  ;;  %9461 = vmatmul.mubr.msk.f32.gmra.mrb[140].mxu0 %vm423_vm5, %v6543_v60  ;;  %v6503_v45 = vadd.f32 %v12614_v53, %v6455_v30  ;;  %v6343_v8 = vld [vmem:[#allocation3 + $0xc0] sm:$0xff] }
 0x527   : > { %v6195_v52 = vpop.f32.mrb[144].mxu1  ;;  %9463 = vmatprep.mubr.msk.f32.mxu0 %vm9649_vm1, %v9650_v6 }
 0x528   : > { %v6376_v21 = vadd.f32 %v6335_v48, %v6195_v52  ;;  %v9343_v41 = vpop.f32.mrb[145].mxu1  ;;  %v6544_v49 = vmax.f32 %v6503_v45, 0.0 }
 0x529   : > { %v6456_v38 = vld [vmem:[#allocation3 + $0x70] sm:$0xff] }
 0x52a   : > { %6417 = vst.msk [vmem:[#allocation3 + $0x80] sm:$0xff] %vm423_vm5, %v6376_v21  ;;  %9464 = vmatmul.mubr.msk.f32.gmra.mrb[142].mxu0 %vm423_vm5, %v6544_v49  ;;  %v6504_v58 = vadd.f32 %v12614_v53, %v6456_v38  ;;  %v6344_v21 = vld [vmem:[#allocation3 + $0xc8] sm:$0xff] }
 0x52b   : > { %v6200_v25 = vpop.f32.mrb[146].mxu1  ;;  %9466 = vmatprep.mubr.msk.f32.mxu0 %vm9649_vm1, %v9650_v6 }
 0x52c   : > { %v6377_v22 = vadd.f32 %v6336_v33, %v6200_v25  ;;  %v9346_v0 = vpop.f32.mrb[147].mxu1  ;;  %v6545_v19 = vmax.f32 %v6504_v58, 0.0 }
 0x52d   : > { %v6457_v9 = vld [vmem:[#allocation3 + $0x78] sm:$0xff] }
 0x52e   : > { %6418 = vst.msk [vmem:[#allocation3 + $0x88] sm:$0xff] %vm423_vm5, %v6377_v22  ;;  %9467 = vmatmul.mubr.msk.f32.gmra.mrb[144].mxu0 %vm423_vm5, %v6545_v19  ;;  %v6505_v44 = vadd.f32 %v12614_v53, %v6457_v9  ;;  %v6345_v22 = vld [vmem:[#allocation3 + $0xd0] sm:$0xff] }
 0x52f   : > { %v6205_v10 = vpop.f32.mrb[148].mxu1  ;;  %9469 = vmatprep.mubr.msk.f32.mxu0 %vm9649_vm1, %v9650_v6 }
 0x530   : > { %v6378_v29 = vadd.f32 %v6337_v13, %v6205_v10  ;;  %v9349_v27 = vpop.f32.mrb[149].mxu1  ;;  %v6546_v42 = vmax.f32 %v6505_v44, 0.0 }
 0x531   : > { %v6458_v55 = vld [vmem:[#allocation3 + $0x80] sm:$0xff] }
 0x532   : > { %6419 = vst.msk [vmem:[#allocation3 + $0x90] sm:$0xff] %vm423_vm5, %v6378_v29  ;;  %9470 = vmatmul.mubr.msk.f32.gmra.mrb[146].mxu0 %vm423_vm5, %v6546_v42  ;;  %v6506_v12 = vadd.f32 %v12614_v53, %v6458_v55  ;;  %v6346_v29 = vld [vmem:[#allocation3 + $0xd8] sm:$0xff] }
 0x533   : > { %v6210_v1 = vpop.f32.mrb[150].mxu1  ;;  %9472 = vmatprep.mubr.msk.f32.mxu0 %vm9649_vm1, %v9650_v6 }
 0x534   : > { %v6379_v46 = vadd.f32 %v6338_v11, %v6210_v1  ;;  %v9352_v15 = vpop.f32.mrb[151].mxu1  ;;  %v6547_v39 = vmax.f32 %v6506_v12, 0.0 }
 0x535   : > { %v6459_v28 = vld [vmem:[#allocation3 + $0x88] sm:$0xff] }
 0x536   : > { %6420 = vst.msk [vmem:[#allocation3 + $0x98] sm:$0xff] %vm423_vm5, %v6379_v46  ;;  %9473 = vmatmul.mubr.msk.f32.gmra.mrb[148].mxu0 %vm423_vm5, %v6547_v39  ;;  %v6507_v43 = vadd.f32 %v12614_v53, %v6459_v28  ;;  %v6347_v46 = vld [vmem:[#allocation3 + $0xe0] sm:$0xff] }
 0x537   : > { %v6215_v57 = vpop.f32.mrb[152].mxu1  ;;  %9475 = vmatprep.mubr.msk.f32.mxu0 %vm9649_vm1, %v9650_v6 }
 0x538   : > { %v6380_v35 = vadd.f32 %v6339_v17, %v6215_v57  ;;  %v9355_v26 = vpop.f32.mrb[153].mxu1  ;;  %v6548_v16 = vmax.f32 %v6507_v43, 0.0 }
 0x539   : > { %v6460_v31 = vld [vmem:[#allocation3 + $0x90] sm:$0xff] }
 0x53a   : > { %6421 = vst.msk [vmem:[#allocation3 + $0xa0] sm:$0xff] %vm423_vm5, %v6380_v35  ;;  %9476 = vmatmul.mubr.msk.f32.gmra.mrb[150].mxu0 %vm423_vm5, %v6548_v16  ;;  %v6508_v7 = vadd.f32 %v12614_v53, %v6460_v31  ;;  %v6348_v35 = vld [vmem:[#allocation3 + $0xe8] sm:$0xff] }
 0x53b   : > { %v6220_v61 = vpop.f32.mrb[154].mxu1  ;;  %9478 = vmatprep.mubr.msk.f32.mxu0 %vm9649_vm1, %v9650_v6 }
 0x53c   : > { %v6381_v24 = vadd.f32 %v6340_v18, %v6220_v61  ;;  %v9358_v63 = vpop.f32.mrb[155].mxu1  ;;  %v6549_v59 = vmax.f32 %v6508_v7, 0.0 }
 0x53d   : > { %v6461_v14 = vld [vmem:[#allocation3 + $0x98] sm:$0xff] }
 0x53e   : > { %6422 = vst.msk [vmem:[#allocation3 + $0xa8] sm:$0xff] %vm423_vm5, %v6381_v24  ;;  %9479 = vmatmul.mubr.msk.f32.gmra.mrb[152].mxu0 %vm423_vm5, %v6549_v59  ;;  %v6509_v62 = vadd.f32 %v12614_v53, %v6461_v14  ;;  %v6349_v24 = vld [vmem:[#allocation3 + $0xf0] sm:$0xff] }
 0x53f   : > { %v6225_v5 = vpop.f32.mrb[156].mxu1  ;;  %9481 = vmatprep.mubr.msk.f32.mxu0 %vm9649_vm1, %v9650_v6 }
 0x540   : > { %v6382_v47 = vadd.f32 %v6341_v37, %v6225_v5  ;;  %v9361_v40 = vpop.f32.mrb[157].mxu1  ;;  %v6550_v34 = vmax.f32 %v6509_v62, 0.0 }
 0x541   : > { %v6462_v32 = vld [vmem:[#allocation3 + $0xa0] sm:$0xff] }
 0x542   : > { %6423 = vst.msk [vmem:[#allocation3 + $0xb0] sm:$0xff] %vm423_vm5, %v6382_v47  ;;  %9482 = vmatmul.mubr.msk.f32.gmra.mrb[154].mxu0 %vm423_vm5, %v6550_v34  ;;  %v6510_v20 = vadd.f32 %v12614_v53, %v6462_v32  ;;  %v6350_v47 = vld [vmem:[#allocation3 + $0xf8] sm:$0xff] }
 0x543   : > { %v6230_v23 = vpop.f32.mrb[158].mxu1  ;;  %9484 = vmatprep.mubr.msk.f32.mxu0 %vm9649_vm1, %v9650_v6 }
 0x544   : > { %v6383_v50 = vadd.f32 %v6342_v36, %v6230_v23  ;;  %v9364_v56 = vpop.f32.mrb[159].mxu1  ;;  %v6551_v4 = vmax.f32 %v6510_v20, 0.0 }
 0x545   : > { %v6463_v2 = vld [vmem:[#allocation3 + $0xa8] sm:$0xff] }
 0x546   : > { %6424 = vst.msk [vmem:[#allocation3 + $0xb8] sm:$0xff] %vm423_vm5, %v6383_v50  ;;  %9485 = vmatmul.mubr.msk.f32.gmra.mrb[156].mxu0 %vm423_vm5, %v6551_v4  ;;  %v6511_v51 = vadd.f32 %v12614_v53, %v6463_v2  ;;  %v6351_v50 = vld [vmem:[#allocation3 + $0x100] sm:$0xff] }
 0x547   : > { %v6235_v3 = vpop.f32.mrb[160].mxu1  ;;  %9487 = vmatprep.mubr.msk.f32.mxu0 %vm9649_vm1, %v9650_v6 }
 0x548   : > { %v6384_v54 = vadd.f32 %v6343_v8, %v6235_v3  ;;  %v9367_v60 = vpop.f32.mrb[161].mxu1  ;;  %v6552_v30 = vmax.f32 %v6511_v51, 0.0 }
 0x549   : > { %v6464_v45 = vld [vmem:[#allocation3 + $0xb0] sm:$0xff] }
 0x54a   : > { %6425 = vst.msk [vmem:[#allocation3 + $0xc0] sm:$0xff] %vm423_vm5, %v6384_v54  ;;  %9488 = vmatmul.mubr.msk.f32.gmra.mrb[158].mxu0 %vm423_vm5, %v6552_v30  ;;  %v6512_v52 = vadd.f32 %v12614_v53, %v6464_v45  ;;  %v6352_v54 = vld [vmem:[#allocation3 + $0x108] sm:$0xff] }
 0x54b   : > { %v6240_v48 = vpop.f32.mrb[162].mxu1  ;;  %9490 = vmatprep.mubr.msk.f32.mxu0 %vm9649_vm1, %v9650_v6 }
 0x54c   : > { %v6385_v41 = vadd.f32 %v6344_v21, %v6240_v48  ;;  %v9370_v49 = vpop.f32.mrb[163].mxu1  ;;  %v6553_v38 = vmax.f32 %v6512_v52, 0.0 }
 0x54d   : > { %v6465_v58 = vld [vmem:[#allocation3 + $0xb8] sm:$0xff] }
 0x54e   : > { %6426 = vst.msk [vmem:[#allocation3 + $0xc8] sm:$0xff] %vm423_vm5, %v6385_v41  ;;  %9491 = vmatmul.mubr.msk.f32.gmra.mrb[160].mxu0 %vm423_vm5, %v6553_v38  ;;  %v6513_v25 = vadd.f32 %v12614_v53, %v6465_v58  ;;  %v6353_v41 = vld [vmem:[#allocation3 + $0x110] sm:$0xff] }
 0x54f   : > { %v6245_v33 = vpop.f32.mrb[164].mxu1  ;;  %9493 = vmatprep.mubr.msk.f32.mxu0 %vm9649_vm1, %v9650_v6 }
 0x550   : > { %v6386_v0 = vadd.f32 %v6345_v22, %v6245_v33  ;;  %v9373_v19 = vpop.f32.mrb[165].mxu1  ;;  %v6554_v9 = vmax.f32 %v6513_v25, 0.0 }
 0x551   : > { %v6466_v44 = vld [vmem:[#allocation3 + $0xc0] sm:$0xff] }
 0x552   : > { %6427 = vst.msk [vmem:[#allocation3 + $0xd0] sm:$0xff] %vm423_vm5, %v6386_v0  ;;  %9494 = vmatmul.mubr.msk.f32.gmra.mrb[162].mxu0 %vm423_vm5, %v6554_v9  ;;  %v6514_v10 = vadd.f32 %v12614_v53, %v6466_v44  ;;  %v6354_v0 = vld [vmem:[#allocation3 + $0x118] sm:$0xff] }
 0x553   : > { %v6250_v13 = vpop.f32.mrb[166].mxu1  ;;  %9496 = vmatprep.mubr.msk.f32.mxu0 %vm9649_vm1, %v9650_v6 }
 0x554   : > { %v6387_v27 = vadd.f32 %v6346_v29, %v6250_v13  ;;  %v9376_v42 = vpop.f32.mrb[167].mxu1  ;;  %v6555_v55 = vmax.f32 %v6514_v10, 0.0 }
 0x555   : > { %v6467_v12 = vld [vmem:[#allocation3 + $0xc8] sm:$0xff] }
 0x556   : > { %6428 = vst.msk [vmem:[#allocation3 + $0xd8] sm:$0xff] %vm423_vm5, %v6387_v27  ;;  %9497 = vmatmul.mubr.msk.f32.gmra.mrb[164].mxu0 %vm423_vm5, %v6555_v55  ;;  %v6515_v1 = vadd.f32 %v12614_v53, %v6467_v12  ;;  %v6355_v27 = vld [vmem:[#allocation3 + $0x120] sm:$0xff] }
 0x557   : > { %v6255_v11 = vpop.f32.mrb[168].mxu1  ;;  %9499 = vmatprep.mubr.msk.f32.mxu0 %vm9649_vm1, %v9650_v6 }
 0x558   : > { %v6388_v15 = vadd.f32 %v6347_v46, %v6255_v11  ;;  %v9379_v39 = vpop.f32.mrb[169].mxu1  ;;  %v6556_v28 = vmax.f32 %v6515_v1, 0.0 }
 0x559   : > { %v6468_v43 = vld [vmem:[#allocation3 + $0xd0] sm:$0xff] }
 0x55a   : > { %6429 = vst.msk [vmem:[#allocation3 + $0xe0] sm:$0xff] %vm423_vm5, %v6388_v15  ;;  %9500 = vmatmul.mubr.msk.f32.gmra.mrb[166].mxu0 %vm423_vm5, %v6556_v28  ;;  %v6516_v57 = vadd.f32 %v12614_v53, %v6468_v43  ;;  %v6356_v15 = vld [vmem:[#allocation3 + $0x128] sm:$0xff] }
 0x55b   : > { %v6260_v17 = vpop.f32.mrb[170].mxu1  ;;  %9502 = vmatprep.mubr.msk.f32.mxu0 %vm9649_vm1, %v9650_v6 }
 0x55c   : > { %v6389_v26 = vadd.f32 %v6348_v35, %v6260_v17  ;;  %v9382_v16 = vpop.f32.mrb[171].mxu1  ;;  %v6557_v31 = vmax.f32 %v6516_v57, 0.0 }
 0x55d   : > { %v6469_v7 = vld [vmem:[#allocation3 + $0xd8] sm:$0xff] }
 0x55e   : > { %6430 = vst.msk [vmem:[#allocation3 + $0xe8] sm:$0xff] %vm423_vm5, %v6389_v26  ;;  %9503 = vmatmul.mubr.msk.f32.gmra.mrb[168].mxu0 %vm423_vm5, %v6557_v31  ;;  %v6517_v61 = vadd.f32 %v12614_v53, %v6469_v7  ;;  %v6357_v26 = vld [vmem:[#allocation3 + $0x130] sm:$0xff] }
 0x55f   : > { %v6265_v18 = vpop.f32.mrb[172].mxu1  ;;  %9505 = vmatprep.mubr.msk.f32.mxu0 %vm9649_vm1, %v9650_v6 }
 0x560   : > { %v6390_v63 = vadd.f32 %v6349_v24, %v6265_v18  ;;  %v9385_v59 = vpop.f32.mrb[173].mxu1  ;;  %v6558_v14 = vmax.f32 %v6517_v61, 0.0 }
 0x561   : > { %v6470_v62 = vld [vmem:[#allocation3 + $0xe0] sm:$0xff] }
 0x562   : > { %6431 = vst.msk [vmem:[#allocation3 + $0xf0] sm:$0xff] %vm423_vm5, %v6390_v63  ;;  %9506 = vmatmul.mubr.msk.f32.gmra.mrb[170].mxu0 %vm423_vm5, %v6558_v14  ;;  %v6518_v5 = vadd.f32 %v12614_v53, %v6470_v62  ;;  %v6358_v63 = vld [vmem:[#allocation3 + $0x138] sm:$0xff] }
 0x563   : > { %v6270_v37 = vpop.f32.mrb[174].mxu1  ;;  %9508 = vmatprep.mubr.msk.f32.mxu0 %vm9649_vm1, %v9650_v6 }
 0x564   : > { %v6391_v40 = vadd.f32 %v6350_v47, %v6270_v37  ;;  %v9388_v34 = vpop.f32.mrb[175].mxu1  ;;  %v6559_v32 = vmax.f32 %v6518_v5, 0.0 }
 0x565   : > { %v6471_v20 = vld [vmem:[#allocation3 + $0xe8] sm:$0xff] }
 0x566   : > { %6432 = vst.msk [vmem:[#allocation3 + $0xf8] sm:$0xff] %vm423_vm5, %v6391_v40  ;;  %9509 = vmatmul.mubr.msk.f32.gmra.mrb[172].mxu0 %vm423_vm5, %v6559_v32  ;;  %v6519_v23 = vadd.f32 %v12614_v53, %v6471_v20  ;;  %v6359_v40 = vld [vmem:[#allocation3 + $0x140] sm:$0xf] }
 0x567   : > { %v6275_v36 = vpop.f32.mrb[176].mxu1  ;;  %9511 = vmatprep.mubr.msk.f32.mxu0 %vm9649_vm1, %v9650_v6 }
 0x568   : > { %v6392_v56 = vadd.f32 %v6351_v50, %v6275_v36  ;;  %v9391_v4 = vpop.f32.mrb[177].mxu1  ;;  %v6560_v2 = vmax.f32 %v6519_v23, 0.0 }
 0x569   : > { %v6472_v51 = vld [vmem:[#allocation3 + $0xf0] sm:$0xff] }
 0x56a   : > { %6433 = vst.msk [vmem:[#allocation3 + $0x100] sm:$0xff] %vm423_vm5, %v6392_v56  ;;  %9512 = vmatmul.mubr.msk.f32.gmra.mrb[174].mxu0 %vm423_vm5, %v6560_v2  ;;  %v6520_v3 = vadd.f32 %v12614_v53, %v6472_v51 }
 0x56b   : > { %v6280_v8 = vpop.f32.mrb[178].mxu1  ;;  %9514 = vmatprep.mubr.msk.f32.mxu0 %vm9649_vm1, %v9650_v6 }
 0x56c   : > { %v6393_v60 = vadd.f32 %v6352_v54, %v6280_v8  ;;  %v9394_v30 = vpop.f32.mrb[179].mxu1  ;;  %v6561_v45 = vmax.f32 %v6520_v3, 0.0  ;;  %v12821_v54 = vld [vmem:[%s12922_s7] ss:$0 sm:$0xff] }
 0x56d   : > { %v6473_v52 = vld [vmem:[#allocation3 + $0xf8] sm:$0xff] }
 0x56e   : > { %6434 = vst.msk [vmem:[#allocation3 + $0x108] sm:$0xff] %vm423_vm5, %v6393_v60  ;;  %9515 = vmatmul.mubr.msk.f32.gmra.mrb[176].mxu0 %vm423_vm5, %v6561_v45  ;;  %v6521_v48 = vadd.f32 %v12614_v53, %v6473_v52 }
 0x56f   : > { %v6285_v21 = vpop.f32.mrb[180].mxu1  ;;  %9517 = vmatprep.mubr.msk.f32.mxu0 %vm9649_vm1, %v9650_v6 }
 0x570   : > { %v6394_v49 = vadd.f32 %v6353_v41, %v6285_v21  ;;  %v9397_v38 = vpop.f32.mrb[181].mxu1  ;;  %v6562_v58 = vmax.f32 %v6521_v48, 0.0 }
 0x571   : > { %v6474_v25 = vld [vmem:[#allocation3 + $0x100] sm:$0xff] }
 0x572   : > { %6435 = vst.msk [vmem:[#allocation3 + $0x110] sm:$0xff] %vm423_vm5, %v6394_v49  ;;  %9518 = vmatmul.mubr.msk.f32.gmra.mrb[178].mxu0 %vm423_vm5, %v6562_v58  ;;  %v6522_v33 = vadd.f32 %v12614_v53, %v6474_v25 }
 0x573   : > { %v6290_v22 = vpop.f32.mrb[182].mxu1  ;;  %9520 = vmatprep.mubr.msk.f32.mxu0 %vm9649_vm1, %v9650_v6 }
 0x574   : > { %v6395_v19 = vadd.f32 %v6354_v0, %v6290_v22  ;;  %v9400_v9 = vpop.f32.mrb[183].mxu1  ;;  %v6563_v44 = vmax.f32 %v6522_v33, 0.0 }
 0x575   : > { %v6475_v10 = vld [vmem:[#allocation3 + $0x108] sm:$0xff] }
 0x576   : > { %6436 = vst.msk [vmem:[#allocation3 + $0x118] sm:$0xff] %vm423_vm5, %v6395_v19  ;;  %9521 = vmatmul.mubr.msk.f32.gmra.mrb[180].mxu0 %vm423_vm5, %v6563_v44  ;;  %v6523_v13 = vadd.f32 %v12614_v53, %v6475_v10 }
 0x577   : > { %v6295_v29 = vpop.f32.mrb[184].mxu1  ;;  %9523 = vmatprep.mubr.msk.f32.mxu0 %vm9649_vm1, %v9650_v6 }
 0x578   : > { %v6396_v42 = vadd.f32 %v6355_v27, %v6295_v29  ;;  %v9403_v55 = vpop.f32.mrb[185].mxu1  ;;  %v6564_v12 = vmax.f32 %v6523_v13, 0.0 }
 0x579   : > { %v6476_v1 = vld [vmem:[#allocation3 + $0x110] sm:$0xff] }
 0x57a   : > { %6437 = vst.msk [vmem:[#allocation3 + $0x120] sm:$0xff] %vm423_vm5, %v6396_v42  ;;  %9524 = vmatmul.mubr.msk.f32.gmra.mrb[182].mxu0 %vm423_vm5, %v6564_v12  ;;  %v6524_v11 = vadd.f32 %v12614_v53, %v6476_v1 }
 0x57b   : > { %v6300_v46 = vpop.f32.mrb[186].mxu1  ;;  %9526 = vmatprep.mubr.msk.f32.mxu0 %vm9649_vm1, %v9650_v6 }
 0x57c   : > { %v6397_v39 = vadd.f32 %v6356_v15, %v6300_v46  ;;  %v9406_v28 = vpop.f32.mrb[187].mxu1  ;;  %v6565_v43 = vmax.f32 %v6524_v11, 0.0 }
 0x57d   : > { %v6477_v57 = vld [vmem:[#allocation3 + $0x118] sm:$0xff] }
 0x57e   : > { %6438 = vst.msk [vmem:[#allocation3 + $0x128] sm:$0xff] %vm423_vm5, %v6397_v39  ;;  %9527 = vmatmul.mubr.msk.f32.gmra.mrb[184].mxu0 %vm423_vm5, %v6565_v43  ;;  %v6525_v17 = vadd.f32 %v12614_v53, %v6477_v57 }
 0x57f   : > { %v6305_v35 = vpop.f32.mrb[188].mxu1  ;;  %9529 = vmatprep.mubr.msk.f32.mxu0 %vm9649_vm1, %v9650_v6 }
 0x580   : > { %v6398_v16 = vadd.f32 %v6357_v26, %v6305_v35  ;;  %v9409_v31 = vpop.f32.mrb[189].mxu1  ;;  %v6566_v7 = vmax.f32 %v6525_v17, 0.0 }
 0x581   : > { %v6478_v61 = vld [vmem:[#allocation3 + $0x120] sm:$0xff] }
 0x582   : > { %6439 = vst.msk [vmem:[#allocation3 + $0x130] sm:$0xff] %vm423_vm5, %v6398_v16  ;;  %9530 = vmatmul.mubr.msk.f32.gmra.mrb[186].mxu0 %vm423_vm5, %v6566_v7  ;;  %v6526_v18 = vadd.f32 %v12614_v53, %v6478_v61 }
 0x583   : > { %v6310_v24 = vpop.f32.mrb[190].mxu1  ;;  %9532 = vmatprep.mubr.msk.f32.mxu0 %vm9649_vm1, %v9650_v6 }
 0x584   : > { %v6399_v59 = vadd.f32 %v6358_v63, %v6310_v24  ;;  %v9412_v14 = vpop.f32.mrb[191].mxu1  ;;  %v6567_v62 = vmax.f32 %v6526_v18, 0.0 }
 0x585   : > { %v6479_v5 = vld [vmem:[#allocation3 + $0x128] sm:$0xff] }
 0x586   : > { %6440 = vst.msk [vmem:[#allocation3 + $0x138] sm:$0xff] %vm423_vm5, %v6399_v59  ;;  %9533 = vmatmul.mubr.msk.f32.gmra.mrb[188].mxu0 %vm423_vm5, %v6567_v62  ;;  %v6527_v37 = vadd.f32 %v12614_v53, %v6479_v5 }
 0x587   : > { %v6315_v47 = vpop.f32.mrb[192].mxu1  ;;  %9535 = vmatprep.mubr.msk.f32.mxu0 %vm9649_vm1, %v9650_v6 }
 0x588   : > { %v6400_v34 = vadd.f32 %v6359_v40, %v6315_v47  ;;  %v9415_v32 = vpop.f32.mrb[193].mxu1  ;;  %v6568_v20 = vmax.f32 %v6527_v37, 0.0 }
 0x589   : > { %v6480_v23 = vld [vmem:[#allocation3 + $0x130] sm:$0xff] }
 0x58a   : > { %6441 = vst.msk [vmem:[#allocation3 + $0x140] sm:$0xf] %vm1335_vm6, %v6400_v34  ;;  %9536 = vmatmul.mubr.msk.f32.gmra.mrb[190].mxu0 %vm423_vm5, %v6568_v20  ;;  %v6528_v36 = vadd.f32 %v12614_v53, %v6480_v23 }
 0x58b   : > { %9538 = vmatprep.mubr.msk.f32.mxu0 %vm9649_vm1, %v9650_v6 }
 0x58c   : > { %v6569_v50 = vmax.f32 %v6528_v36, 0.0 }
 0x58d   : > { %v6481_v56 = vld [vmem:[#allocation3 + $0x138] sm:$0xff] }
 0x58e   : > { %9539 = vmatmul.mubr.msk.f32.gmra.mrb[192].mxu0 %vm423_vm5, %v6569_v50  ;;  %v6529_v4 = vadd.f32 %v12614_v53, %v6481_v56 }
 0x58f   : > { %9541 = vmatprep.mubr.msk.f32.mxu0 %vm9649_vm1, %v9650_v6 }
 0x590   : > { %v6570_v2 = vmax.f32 %v6529_v4, 0.0 }
 0x591   : > { %v6482_v51 = vld [vmem:[#allocation3 + $0x140] sm:$0xf] }
 0x592   : > { %9542 = vmatmul.mubr.msk.f32.gmra.mrb[194].mxu0 %vm423_vm5, %v6570_v2  ;;  %v6530_v3 = vadd.f32 %v12614_v53, %v6482_v51 }
 0x593   : > { %9544 = vmatprep.mubr.msk.f32.mxu0 %vm9649_vm1, %v9650_v6 }
 0x594   : > { %v6571_v8 = vmax.f32 %v6530_v3, 0.0 }
 0x596   : > { %9545 = vmatmul.mubr.msk.f32.gmra.mrb[196].mxu0 %vm423_vm5, %v6571_v8 }
 0x5c9   : > { %v6772_v53 = vpop.f32.mrb[116].mxu0 }
 0x5ca   : > { %v6773_v6 = vadd.f32 %v12821_v54, %v6772_v53  ;;  %v9426_v60 = vpop.f32.mrb[117].mxu0 }
 0x5cc   : > { %6976 = vst [vmem:[%s12828_s29] sm:$0xff] %v6773_v6 }
 0x5cd   : > { %v6777_v30 = vpop.f32.mrb[118].mxu0 }
 0x5ce   : > { %v6778_v45 = vadd.f32 %v12821_v54, %v6777_v30  ;;  %v9429_v52 = vpop.f32.mrb[119].mxu0 }
 0x5d0   : > { %6977 = vst [vmem:[%s12828_s29 + $0x8] sm:$0xff] %v6778_v45 }
 0x5d1   : > { %v6782_v48 = vpop.f32.mrb[120].mxu0 }
 0x5d2   : > { %v6783_v21 = vadd.f32 %v12821_v54, %v6782_v48  ;;  %v9432_v41 = vpop.f32.mrb[121].mxu0 }
 0x5d4   : > { %6978 = vst [vmem:[%s12828_s29 + $0x10] sm:$0xff] %v6783_v21 }
 0x5d5   : > { %v6787_v49 = vpop.f32.mrb[122].mxu0 }
 0x5d6   : > { %v6788_v38 = vadd.f32 %v12821_v54, %v6787_v49  ;;  %v9435_v58 = vpop.f32.mrb[123].mxu0 }
 0x5d8   : > { %6979 = vst [vmem:[%s12828_s29 + $0x18] sm:$0xff] %v6788_v38 }
 0x5d9   : > { %v6792_v25 = vpop.f32.mrb[124].mxu0 }
 0x5da   : > { %v6793_v33 = vadd.f32 %v12821_v54, %v6792_v25  ;;  %v9438_v22 = vpop.f32.mrb[125].mxu0 }
 0x5dc   : > { %6980 = vst [vmem:[%s12828_s29 + $0x20] sm:$0xff] %v6793_v33 }
 0x5dd   : > { %v6797_v0 = vpop.f32.mrb[126].mxu0 }
 0x5de   : > { %v6798_v19 = vadd.f32 %v12821_v54, %v6797_v0  ;;  %v9441_v9 = vpop.f32.mrb[127].mxu0 }
 0x5e0   : > { %6981 = vst [vmem:[%s12828_s29 + $0x28] sm:$0xff] %v6798_v19 }
 0x5e1   : > { %v6802_v44 = vpop.f32.mrb[128].mxu0 }
 0x5e2   : > { %v6803_v10 = vadd.f32 %v12821_v54, %v6802_v44  ;;  %v9444_v13 = vpop.f32.mrb[129].mxu0 }
 0x5e4   : > { %6982 = vst [vmem:[%s12828_s29 + $0x30] sm:$0xff] %v6803_v10 }
 0x5e5   : > { %v6807_v29 = vpop.f32.mrb[130].mxu0 }
 0x5e6   : > { %v6808_v27 = vadd.f32 %v12821_v54, %v6807_v29  ;;  %v9447_v42 = vpop.f32.mrb[131].mxu0 }
 0x5e8   : > { %6983 = vst [vmem:[%s12828_s29 + $0x38] sm:$0xff] %v6808_v27 }
 0x5e9   : > { %v6812_v55 = vpop.f32.mrb[132].mxu0 }
 0x5ea   : > { %v6813_v12 = vadd.f32 %v12821_v54, %v6812_v55  ;;  %v9450_v1 = vpop.f32.mrb[133].mxu0 }
 0x5ec   : > { %6984 = vst [vmem:[%s12828_s29 + $0x40] sm:$0xff] %v6813_v12 }
 0x5ed   : > { %v6817_v11 = vpop.f32.mrb[134].mxu0 }
 0x5ee   : > { %v6818_v46 = vadd.f32 %v12821_v54, %v6817_v11  ;;  %v9453_v15 = vpop.f32.mrb[135].mxu0 }
 0x5f0   : > { %6985 = vst [vmem:[%s12828_s29 + $0x48] sm:$0xff] %v6818_v46 }
 0x5f1   : > { %v6822_v39 = vpop.f32.mrb[136].mxu0 }
 0x5f2   : > { %v6823_v28 = vadd.f32 %v12821_v54, %v6822_v39  ;;  %v9456_v43 = vpop.f32.mrb[137].mxu0 }
 0x5f4   : > { %6986 = vst [vmem:[%s12828_s29 + $0x50] sm:$0xff] %v6823_v28 }
 0x5f5   : > { %v6827_v57 = vpop.f32.mrb[138].mxu0 }
 0x5f6   : > { %v6828_v17 = vadd.f32 %v12821_v54, %v6827_v57  ;;  %v9459_v35 = vpop.f32.mrb[139].mxu0 }
 0x5f8   : > { %6987 = vst [vmem:[%s12828_s29 + $0x58] sm:$0xff] %v6828_v17 }
 0x5f9   : > { %v6832_v26 = vpop.f32.mrb[140].mxu0 }
 0x5fa   : > { %v6833_v16 = vadd.f32 %v12821_v54, %v6832_v26  ;;  %v9462_v31 = vpop.f32.mrb[141].mxu0 }
 0x5fc   : > { %6988 = vst [vmem:[%s12828_s29 + $0x60] sm:$0xff] %v6833_v16 }
 0x5fd   : > { %v6837_v7 = vpop.f32.mrb[142].mxu0 }
 0x5fe   : > { %v6838_v61 = vadd.f32 %v12821_v54, %v6837_v7  ;;  %v9465_v18 = vpop.f32.mrb[143].mxu0 }
 0x600   : > { %6989 = vst [vmem:[%s12828_s29 + $0x68] sm:$0xff] %v6838_v61 }
 0x601   : > { %v6842_v24 = vpop.f32.mrb[144].mxu0 }
 0x602   : > { %v6843_v63 = vadd.f32 %v12821_v54, %v6842_v24  ;;  %v9468_v59 = vpop.f32.mrb[145].mxu0 }
 0x604   : > { %6990 = vst [vmem:[%s12828_s29 + $0x70] sm:$0xff] %v6843_v63 }
 0x605   : > { %v6847_v14 = vpop.f32.mrb[146].mxu0 }
 0x606   : > { %v6848_v62 = vadd.f32 %v12821_v54, %v6847_v14  ;;  %v9471_v5 = vpop.f32.mrb[147].mxu0 }
 0x608   : > { %6991 = vst [vmem:[%s12828_s29 + $0x78] sm:$0xff] %v6848_v62 }
 0x609   : > { %v6852_v37 = vpop.f32.mrb[148].mxu0 }
 0x60a   : > { %v6853_v47 = vadd.f32 %v12821_v54, %v6852_v37  ;;  %v9474_v40 = vpop.f32.mrb[149].mxu0 }
 0x60c   : > { %6992 = vst [vmem:[%s12828_s29 + $0x80] sm:$0xff] %v6853_v47 }
 0x60d   : > { %v6857_v34 = vpop.f32.mrb[150].mxu0 }
 0x60e   : > { %v6858_v32 = vadd.f32 %v12821_v54, %v6857_v34  ;;  %v9477_v20 = vpop.f32.mrb[151].mxu0 }
 0x610   : > { %6993 = vst [vmem:[%s12828_s29 + $0x88] sm:$0xff] %v6858_v32 }
 0x611   : > { %v6862_v23 = vpop.f32.mrb[152].mxu0 }
 0x612   : > { %v6863_v36 = vadd.f32 %v12821_v54, %v6862_v23  ;;  %v9480_v50 = vpop.f32.mrb[153].mxu0 }
 0x614   : > { %6994 = vst [vmem:[%s12828_s29 + $0x90] sm:$0xff] %v6863_v36 }
 0x615   : > { %v6867_v56 = vpop.f32.mrb[154].mxu0 }
 0x616   : > { %v6868_v4 = vadd.f32 %v12821_v54, %v6867_v56  ;;  %v9483_v2 = vpop.f32.mrb[155].mxu0 }
 0x618   : > { %6995 = vst [vmem:[%s12828_s29 + $0x98] sm:$0xff] %v6868_v4 }
 0x619   : > { %v6872_v51 = vpop.f32.mrb[156].mxu0 }
 0x61a   : > { %v6873_v3 = vadd.f32 %v12821_v54, %v6872_v51  ;;  %v9486_v8 = vpop.f32.mrb[157].mxu0 }
 0x61c   : > { %6996 = vst [vmem:[%s12828_s29 + $0xa0] sm:$0xff] %v6873_v3 }
 0x61d   : > { %v6877_v53 = vpop.f32.mrb[158].mxu0 }
 0x61e   : > { %v6878_v6 = vadd.f32 %v12821_v54, %v6877_v53  ;;  %v9489_v60 = vpop.f32.mrb[159].mxu0 }
 0x620   : > { %6997 = vst [vmem:[%s12828_s29 + $0xa8] sm:$0xff] %v6878_v6 }
 0x621   : > { %v6882_v30 = vpop.f32.mrb[160].mxu0 }
 0x622   : > { %v6883_v45 = vadd.f32 %v12821_v54, %v6882_v30  ;;  %v9492_v52 = vpop.f32.mrb[161].mxu0 }
 0x624   : > { %6998 = vst [vmem:[%s12828_s29 + $0xb0] sm:$0xff] %v6883_v45 }
 0x625   : > { %v6887_v48 = vpop.f32.mrb[162].mxu0 }
 0x626   : > { %v6888_v21 = vadd.f32 %v12821_v54, %v6887_v48  ;;  %v9495_v41 = vpop.f32.mrb[163].mxu0 }
 0x628   : > { %6999 = vst [vmem:[%s12828_s29 + $0xb8] sm:$0xff] %v6888_v21 }
 0x629   : > { %v6892_v49 = vpop.f32.mrb[164].mxu0 }
 0x62a   : > { %v6893_v38 = vadd.f32 %v12821_v54, %v6892_v49  ;;  %v9498_v58 = vpop.f32.mrb[165].mxu0 }
 0x62c   : > { %7000 = vst [vmem:[%s12828_s29 + $0xc0] sm:$0xff] %v6893_v38 }
 0x62d   : > { %v6897_v25 = vpop.f32.mrb[166].mxu0 }
 0x62e   : > { %v6898_v33 = vadd.f32 %v12821_v54, %v6897_v25  ;;  %v9501_v22 = vpop.f32.mrb[167].mxu0 }
 0x630   : > { %7001 = vst [vmem:[%s12828_s29 + $0xc8] sm:$0xff] %v6898_v33 }
 0x631   : > { %v6902_v0 = vpop.f32.mrb[168].mxu0 }
 0x632   : > { %v6903_v19 = vadd.f32 %v12821_v54, %v6902_v0  ;;  %v9504_v9 = vpop.f32.mrb[169].mxu0 }
 0x634   : > { %7002 = vst [vmem:[%s12828_s29 + $0xd0] sm:$0xff] %v6903_v19 }
 0x635   : > { %v6907_v44 = vpop.f32.mrb[170].mxu0 }
 0x636   : > { %v6908_v10 = vadd.f32 %v12821_v54, %v6907_v44  ;;  %v9507_v13 = vpop.f32.mrb[171].mxu0 }
 0x638   : > { %7003 = vst [vmem:[%s12828_s29 + $0xd8] sm:$0xff] %v6908_v10 }
 0x639   : > { %v6912_v29 = vpop.f32.mrb[172].mxu0 }
 0x63a   : > { %v6913_v27 = vadd.f32 %v12821_v54, %v6912_v29  ;;  %v9510_v42 = vpop.f32.mrb[173].mxu0 }
 0x63c   : > { %7004 = vst [vmem:[%s12828_s29 + $0xe0] sm:$0xff] %v6913_v27 }
 0x63d   : > { %v6917_v55 = vpop.f32.mrb[174].mxu0 }
 0x63e   : > { %v6918_v12 = vadd.f32 %v12821_v54, %v6917_v55  ;;  %v9513_v1 = vpop.f32.mrb[175].mxu0 }
 0x640   : > { %7005 = vst [vmem:[%s12828_s29 + $0xe8] sm:$0xff] %v6918_v12 }
 0x641   : > { %v6922_v11 = vpop.f32.mrb[176].mxu0 }
 0x642   : > { %v6923_v46 = vadd.f32 %v12821_v54, %v6922_v11  ;;  %v9516_v15 = vpop.f32.mrb[177].mxu0 }
 0x644   : > { %7006 = vst [vmem:[%s12828_s29 + $0xf0] sm:$0xff] %v6923_v46 }
 0x645   : > { %v6927_v39 = vpop.f32.mrb[178].mxu0 }
 0x646   : > { %v6928_v28 = vadd.f32 %v12821_v54, %v6927_v39  ;;  %v9519_v43 = vpop.f32.mrb[179].mxu0 }
 0x648   : > { %7007 = vst [vmem:[%s12828_s29 + $0xf8] sm:$0xff] %v6928_v28 }
 0x649   : > { %v6932_v57 = vpop.f32.mrb[180].mxu0 }
 0x64a   : > { %v6933_v17 = vadd.f32 %v12821_v54, %v6932_v57  ;;  %v9522_v35 = vpop.f32.mrb[181].mxu0 }
 0x64c   : > { %7008 = vst [vmem:[%s12828_s29 + $0x100] sm:$0xff] %v6933_v17 }
 0x64d   : > { %v6937_v26 = vpop.f32.mrb[182].mxu0 }
 0x64e   : > { %v6938_v16 = vadd.f32 %v12821_v54, %v6937_v26  ;;  %v9525_v31 = vpop.f32.mrb[183].mxu0 }
 0x650   : > { %7009 = vst [vmem:[%s12828_s29 + $0x108] sm:$0xff] %v6938_v16 }
 0x651   : > { %v6942_v7 = vpop.f32.mrb[184].mxu0 }
 0x652   : > { %v6943_v61 = vadd.f32 %v12821_v54, %v6942_v7  ;;  %v9528_v18 = vpop.f32.mrb[185].mxu0 }
 0x654   : > { %7010 = vst [vmem:[%s12828_s29 + $0x110] sm:$0xff] %v6943_v61 }
 0x655   : > { %v6947_v24 = vpop.f32.mrb[186].mxu0 }
 0x656   : > { %v6948_v63 = vadd.f32 %v12821_v54, %v6947_v24  ;;  %v9531_v59 = vpop.f32.mrb[187].mxu0 }
 0x658   : > { %7011 = vst [vmem:[%s12828_s29 + $0x118] sm:$0xff] %v6948_v63 }
 0x659   : > { %v6952_v14 = vpop.f32.mrb[188].mxu0 }
 0x65a   : > { %v6953_v62 = vadd.f32 %v12821_v54, %v6952_v14  ;;  %v9534_v5 = vpop.f32.mrb[189].mxu0 }
 0x65c   : > { %7012 = vst [vmem:[%s12828_s29 + $0x120] sm:$0xff] %v6953_v62 }
 0x65d   : > { %v6957_v37 = vpop.f32.mrb[190].mxu0 }
 0x65e   : > { %v6958_v47 = vadd.f32 %v12821_v54, %v6957_v37  ;;  %v9537_v40 = vpop.f32.mrb[191].mxu0 }
 0x660   : > { %7013 = vst [vmem:[%s12828_s29 + $0x128] sm:$0xff] %v6958_v47 }
 0x661   : > { %v6962_v34 = vpop.f32.mrb[192].mxu0 }
 0x662   : > { %v6963_v32 = vadd.f32 %v12821_v54, %v6962_v34  ;;  %v9540_v20 = vpop.f32.mrb[193].mxu0 }
 0x664   : > { %7014 = vst [vmem:[%s12828_s29 + $0x130] sm:$0xff] %v6963_v32 }
 0x665   : > { %v6967_v23 = vpop.f32.mrb[194].mxu0 }
 0x666   : > { %v6968_v36 = vadd.f32 %v12821_v54, %v6967_v23  ;;  %v9543_v50 = vpop.f32.mrb[195].mxu0 }
 0x668   : > { %7015 = vst [vmem:[%s12828_s29 + $0x138] sm:$0xff] %v6968_v36 }
 0x669   : > { %v6972_v56 = vpop.f32.mrb[196].mxu0 }
 0x66a   : > { %v6973_v4 = vadd.f32 %v12821_v54, %v6972_v56  ;;  %v9546_v2 = vpop.f32.mrb[197].mxu0 }
 0x66c   : > { %7016 = vst [vmem:[%s12828_s29 + $0x140] sm:$0xf] %v6973_v4 }
 0x66d PF: > { %s23_s21 = sadd.s32 1, %s9646_s21  }
 0x66e   : > { %p20_p4 = scmp.ge.s32.totalorder %s23_s21, 4  }
 0x670   :  { %22 = sbr.rel (!%p20_p4) target bundleno = 1 (0x1), region = 114 }

</bundles_post_ra>
